<compile_context>
chip_gen: v6e
topology: v6e:2x2x1
jax: 0.10.0
libtpu: 0.0.40
codegen_flags: <defaults>
</compile_context>

<pallas_src>
import math

import jax
import jax.numpy as jnp
from jax.experimental import pallas as pl
from jax.experimental.pallas import tpu as pltpu

# ---- module-consistent (scaled-down) sizes ----
B = 2
N = 8                  # graph nodes
NODE_DIM = 32
EDGE_DIM = 32
NUM_HEADS = 4
HEAD_DIM = NODE_DIM // NUM_HEADS
NODE_HIDDEN = 64
EDGE_HIDDEN1 = 64
EDGE_HIDDEN2 = 64
NUM_LAYERS = 3
N2 = N * N
BN = B * N             # 16 stacked node rows
BN2 = B * N2           # 128 stacked edge rows (pair p = i*N + j within batch)

# ---- w32 slab column layout: every sub-block starts on a 128-lane boundary --
W32_NPROJ = (0, 224)       # [W1_src(64) | W1_tgt(64) | Wqkv_n(96)]
W32_QKVN = (128, 224)      # Wqkv_n alone (aligned view inside the nproj block)
W32_EPROJR = (256, 416)    # [Wqkv_e(96) | W1_rev(64)]
W32_EDGE1 = (512, 576)     # W1_edge
W32_WO = (640, 672)        # W_o
W32_FW1 = (768, 832)       # fw1
W32_EW3 = (896, 960)       # ew3
W32_HMASK = (1024, 1028)   # per-head reduction mask (32, 4)
W32_WIDTH = 1152

W64_FW2 = (0, 32)
W64_EW2 = (128, 160)
W64_EW4 = (256, 288)
W64_WIDTH = 384

MISC_ROWS = 24             # f32 misc slab, 128 lanes wide


def _layer_norm(x, g, b, eps=1e-5):
    mu = jnp.mean(x, axis=-1, keepdims=True)
    var = jnp.mean((x - mu) ** 2, axis=-1, keepdims=True)
    return (x - mu) * jax.lax.rsqrt(var + eps) * g + b


# -----------------------------------------------------------------------------
# Pallas kernel: full 3-layer RTNoEdgeInit forward, batch folded into rows.
# -----------------------------------------------------------------------------
def rt3_kernel(node_ref, edge_ref, w32_ref, w64_ref, perm_ref, misc_ref,
               node_out_ref, edge_out_ref):
    D = NODE_DIM
    H1 = EDGE_HIDDEN1
    scale = 1.0 / math.sqrt(HEAD_DIM)

    node = node_ref[...]            # (BN, D)   f32
    edge = edge_ref[...]            # (BN2, E)  f32, i-major pairs per batch
    perm = perm_ref[...]            # (BN2, BN2) bf16 block-diag pair reversal

    # ---- 128-lane-aligned static slab slices (loaded once per call) ----
    w_nproj = w32_ref[:, W32_NPROJ[0]:W32_NPROJ[1]]       # (32, 224)
    w_qkvn = w32_ref[:, W32_QKVN[0]:W32_QKVN[1]]          # (32, 96)
    w_eproj_r = w32_ref[:, W32_EPROJR[0]:W32_EPROJR[1]]   # (32, 160)
    w_edge1 = w32_ref[:, W32_EDGE1[0]:W32_EDGE1[1]]       # (32, 64)
    w_o = w32_ref[:, W32_WO[0]:W32_WO[1]]                 # (32, 32)
    w_fw1 = w32_ref[:, W32_FW1[0]:W32_FW1[1]]             # (32, 64)
    w_ew3 = w32_ref[:, W32_EW3[0]:W32_EW3[1]]             # (32, 64)
    hmask = w32_ref[:, W32_HMASK[0]:W32_HMASK[1]]         # (32, 4)
    w_fw2 = w64_ref[:, W64_FW2[0]:W64_FW2[1]]             # (64, 32)
    w_ew2 = w64_ref[:, W64_EW2[0]:W64_EW2[1]]             # (64, 32)
    w_ew4 = w64_ref[:, W64_EW4[0]:W64_EW4[1]]             # (64, 32)

    # ---- misc slab: biases / LN params / head-expansion mask ----
    hmask_t = misc_ref[0:4, 0:D]                          # (4, 32)
    # Node-path broadcasts hoisted out of the unrolled layer loop.
    b_qkvn = jnp.broadcast_to(misc_ref[4:5, 0:96], (BN, 96))
    b_o = jnp.broadcast_to(misc_ref[6:7, 0:D], (BN, D))
    fb1 = jnp.broadcast_to(misc_ref[7:8, 0:NODE_HIDDEN], (BN, NODE_HIDDEN))
    fb2 = jnp.broadcast_to(misc_ref[8:9, 0:D], (BN, D))
    ln1n_g = jnp.broadcast_to(misc_ref[13:14, 0:D], (BN, D))
    ln1n_b = jnp.broadcast_to(misc_ref[14:15, 0:D], (BN, D))
    ln2n_g = jnp.broadcast_to(misc_ref[15:16, 0:D], (BN, D))
    ln2n_b = jnp.broadcast_to(misc_ref[16:17, 0:D], (BN, D))
    # Edge-path (128-row targets) biases kept as (1, .) rows (broadcast at use).
    b_qkve = misc_ref[5:6, 0:96]
    eb1 = misc_ref[9:10, 0:H1]
    eb2 = misc_ref[10:11, 0:D]
    eb3 = misc_ref[11:12, 0:EDGE_HIDDEN2]
    eb4 = misc_ref[12:13, 0:D]
    ln1e_g = misc_ref[17:18, 0:D]
    ln1e_b = misc_ref[18:19, 0:D]
    ln2e_g = misc_ref[19:20, 0:D]
    ln2e_b = misc_ref[20:21, 0:D]

    def mmb(a, b):
        # bf16 MXU operands, f32 accumulation.
        return jnp.dot(a.astype(jnp.bfloat16), b.astype(jnp.bfloat16),
                       preferred_element_type=jnp.float32)

    # Layer-0 node QKV projection (aligned Wqkv_n view of the fused block).
    qkv_n = mmb(node, w_qkvn) + b_qkvn                       # (BN, 96)

    for layer in range(NUM_LAYERS):   # unrolled; node/edge stay in VMEM
        # ---------------- relational attention (j-major pair order) --------
        q_n = qkv_n[:, 0:D].reshape(B, N, D)
        k_n = qkv_n[:, D:2 * D].reshape(B, N, D)
        v_n = qkv_n[:, 2 * D:3 * D].reshape(B, N, D)

        # Reversed edges in i-major order == original edges in j-major order.
        edge_rev = mmb(perm, edge)                           # (BN2, E)
        eproj_r = mmb(edge_rev, w_eproj_r)                   # (BN2, 160)
        qkv_e = eproj_r[:, 0:96] + b_qkve                    # j-major QKV_e
        h_rev = eproj_r[:, 96:160]                           # rev_edge @ W1_rev

        q_e = qkv_e[:, 0:D].reshape(B, N, N, D)              # [b, j, i, :]
        k_e = qkv_e[:, D:2 * D].reshape(B, N, N, D)
        v_e = qkv_e[:, 2 * D:3 * D].reshape(B, N, N, D)

        qf = q_n[:, None, :, :] + q_e        # q_n[b,i] bcast over j (axis 1)
        kf = k_n[:, :, None, :] + k_e        # k_n[b,j] bcast over i (axis 2)
        # Per-head dot product via block-diagonal reduction matmul (MXU).
        s = mmb((qf * kf).reshape(BN2, D), hmask) * scale    # (BN2, H)
        s4 = s.reshape(B, N, N, NUM_HEADS)                   # [b, j, i, h]
        # Softmax over j == leading (axis 1) reductions -> cross-vreg VPU ops.
        m = jnp.max(s4, axis=1, keepdims=True)
        p = jnp.exp(s4 - m)
        denom = jnp.sum(p, axis=1, keepdims=True)
        att = p * pl.reciprocal(denom, approx=True)
        att_full = mmb(att.reshape(BN2, NUM_HEADS), hmask_t).reshape(B, N, N, D)
        vf = v_n[:, :, None, :] + v_e        # v_n[b,j] bcast over i
        attn = jnp.sum(att_full * vf, axis=1).reshape(BN, D)  # sum over j
        attn_out = mmb(attn, w_o) + b_o

        # ---------------- node residual / LN / FFN --------------------------
        node1 = _layer_norm(node + attn_out, ln1n_g, ln1n_b)
        ffn = mmb(jnp.maximum(mmb(node1, w_fw1) + fb1, 0.0), w_fw2) + fb2
        node = _layer_norm(node1 + ffn, ln2n_g, ln2n_b)

        # ------- fused end-of-layer node projection: [src | tgt | qkv_n] ----
        nproj = mmb(node, w_nproj)                           # (BN, 224)
        src = nproj[:, 0:H1].reshape(B, N, H1)               # node @ W1_src
        tgt = nproj[:, H1:2 * H1].reshape(B, N, H1)          # node @ W1_tgt
        if layer + 1 < NUM_LAYERS:
            qkv_n = nproj[:, 2 * H1:2 * H1 + 96] + b_qkvn    # next layer's QKV

        # ---------------- edge update (i-major pair order) ------------------
        h_edge = mmb(edge, w_edge1)                          # edge @ W1_edge
        h = ((h_edge + h_rev + eb1).reshape(B, N, N, H1)
             + src[:, None, :, :]     # source = node[b, j]  (bcast over i)
             + tgt[:, :, None, :])    # target = node[b, i]  (bcast over j)
        e1 = mmb(jnp.maximum(h.reshape(BN2, H1), 0.0), w_ew2) + eb2
        edge1 = _layer_norm(edge + e1, ln1e_g, ln1e_b)
        e2 = mmb(jnp.maximum(mmb(edge1, w_ew3) + eb3, 0.0), w_ew4) + eb4
        edge = _layer_norm(edge1 + e2, ln2e_g, ln2e_b)

    node_out_ref[...] = node
    edge_out_ref[...] = edge


def rt_layers_pallas(node_s, edge_s, packed):
    w32, w64, perm, misc = packed
    out_shape = [
        jax.ShapeDtypeStruct((BN, NODE_DIM), jnp.float32),
        jax.ShapeDtypeStruct((BN2, EDGE_DIM), jnp.float32),
    ]
    in_specs = [
        pl.BlockSpec((BN, NODE_DIM), lambda i: (0, 0)),
        pl.BlockSpec((BN2, EDGE_DIM), lambda i: (0, 0)),
        pl.BlockSpec(w32.shape, lambda i: (0, 0)),
        pl.BlockSpec(w64.shape, lambda i: (0, 0)),
        pl.BlockSpec(perm.shape, lambda i: (0, 0)),
        pl.BlockSpec(misc.shape, lambda i: (0, 0)),
    ]
    out_specs = [
        pl.BlockSpec((BN, NODE_DIM), lambda i: (0, 0)),
        pl.BlockSpec((BN2, EDGE_DIM), lambda i: (0, 0)),
    ]
    node_o, edge_o = pl.pallas_call(
        rt3_kernel,
        out_shape=out_shape,
        grid=(1,),                      # single step: batch folded into rows
        in_specs=in_specs,
        out_specs=out_specs,
        compiler_params=pltpu.CompilerParams(
            dimension_semantics=("arbitrary",)),
    )(node_s, edge_s, w32, w64, perm, misc)
    return node_o, edge_o


def rt_no_edge_init_forward(node, edge, packed, return_edge=False):
    Bv, Nv, Dv = node.shape
    node_s = node.reshape(Bv * Nv, Dv)
    edge_s = edge.reshape(Bv * Nv * Nv, EDGE_DIM)
    node_o, edge_o = rt_layers_pallas(node_s, edge_s, packed)
    node_o = node_o.reshape(Bv, Nv, Dv)
    if return_edge:
        return node_o, edge_o.reshape(Bv, Nv, Nv, EDGE_DIM)
    return node_o


# -----------------------------------------------------------------------------
# Deterministic parameter init (torch.nn.Linear-style uniform; LN = (1, 0)).
# -----------------------------------------------------------------------------
def init_params(key):
    def linear(k, fin, fout):
        k1, k2 = jax.random.split(k)
        bound = 1.0 / math.sqrt(fin)
        w = jax.random.uniform(k1, (fin, fout), jnp.float32, -bound, bound)
        b = jax.random.uniform(k2, (1, fout), jnp.float32, -bound, bound)
        return w, b

    keys = jax.random.split(key, 9)
    P = {}
    P['W_qkv_n'], P['b_qkv_n'] = linear(keys[0], NODE_DIM, 3 * NODE_DIM)
    P['W_qkv_e'], P['b_qkv_e'] = linear(keys[1], EDGE_DIM, 3 * NODE_DIM)
    P['W_o'], P['b_o'] = linear(keys[2], NODE_DIM, NODE_DIM)
    P['fw1'], P['fb1'] = linear(keys[3], NODE_DIM, NODE_HIDDEN)
    P['fw2'], P['fb2'] = linear(keys[4], NODE_HIDDEN, NODE_DIM)
    P['W1_e'], P['eb1'] = linear(keys[5], 2 * NODE_DIM + 2 * EDGE_DIM, EDGE_HIDDEN1)
    P['ew2'], P['eb2'] = linear(keys[6], EDGE_HIDDEN1, EDGE_DIM)
    P['ew3'], P['eb3'] = linear(keys[7], EDGE_DIM, EDGE_HIDDEN2)
    P['ew4'], P['eb4'] = linear(keys[8], EDGE_HIDDEN2, EDGE_DIM)
    for nm, dim in [('ln1n', NODE_DIM), ('ln2n', NODE_DIM),
                    ('ln1e', EDGE_DIM), ('ln2e', EDGE_DIM)]:
        P[nm + '_g'] = jnp.ones((1, dim), jnp.float32)
        P[nm + '_b'] = jnp.zeros((1, dim), jnp.float32)
    return P


def kernel_params(P):
    """Pack parameters into 128-lane-aligned slabs (bf16 weights, f32 misc)."""
    D, E, H, hd = NODE_DIM, EDGE_DIM, NUM_HEADS, HEAD_DIM

    def split_qkv(W, b):
        # Fused columns are laid out [head][q(hd) k(hd) v(hd)] (matches the
        # reshape(B,N,H,3*hd).chunk(3,-1) in the PyTorch module); rearrange to
        # [q(all heads) | k(all heads) | v(all heads)], heads contiguous.
        Wr = W.reshape(W.shape[0], H, 3, hd)
        br = b.reshape(H, 3, hd)
        ws = [Wr[:, :, i, :].reshape(W.shape[0], D) for i in range(3)]
        bs = [br[:, i, :].reshape(1, D) for i in range(3)]
        return jnp.concatenate(ws, axis=1), jnp.concatenate(bs, axis=1)

    wqkv_n, b_qkvn = split_qkv(P['W_qkv_n'], P['b_qkv_n'])   # (32,96),(1,96)
    wqkv_e, b_qkve = split_qkv(P['W_qkv_e'], P['b_qkv_e'])

    W1 = P['W1_e']   # rows: [edge | reversed_edge | source_node | target_node]
    ew1e = W1[0:E]
    ew1r = W1[E:2 * E]
    ew1s = W1[2 * E:2 * E + D]
    ew1t = W1[2 * E + D:2 * E + 2 * D]

    head_ids = jnp.arange(D) // hd
    hmask = (head_ids[:, None] == jnp.arange(H)[None, :]).astype(jnp.float32)
    hmask_t = hmask.T                                        # (4, 32)

    def block(mats, width):
        blk = jnp.concatenate(mats, axis=1)
        return jnp.pad(blk, ((0, 0), (0, width - blk.shape[1])))

    w32 = jnp.concatenate([
        block([ew1s, ew1t, wqkv_n], 256),   # [   0: 224) node proj (fused)
        block([wqkv_e, ew1r], 256),         # [ 256: 416) rev-edge proj (fused)
        block([ew1e], 128),                 # [ 512: 576) W1_edge
        block([P['W_o']], 128),             # [ 640: 672) W_o
        block([P['fw1']], 128),             # [ 768: 832) fw1
        block([P['ew3']], 128),             # [ 896: 960) ew3
        block([hmask], 128),                # [1024:1028) head mask
    ], axis=1).astype(jnp.bfloat16)
    assert w32.shape == (32, W32_WIDTH)

    w64 = jnp.concatenate([
        block([P['fw2']], 128),             # [  0: 32)
        block([P['ew2']], 128),             # [128:160)
        block([P['ew4']], 128),             # [256:288)
    ], axis=1).astype(jnp.bfloat16)
    assert w64.shape == (64, W64_WIDTH)

    # Block-diagonal pair-reversal permutation over the stacked (B*N2) rows:
    # (perm @ edge)[b*N2 + i*N + j] == edge[b*N2 + j*N + i].
    idx = jnp.arange(BN2)
    b_idx, p_idx = idx // N2, idx % N2
    rev = b_idx * N2 + (p_idx % N) * N + (p_idx // N)
    perm = (jnp.arange(BN2)[None, :] == rev[:, None]).astype(jnp.bfloat16)

    def row(x):
        x = jnp.asarray(x, jnp.float32).reshape(1, -1)
        return jnp.pad(x, ((0, 0), (0, 128 - x.shape[1])))

    rows = [row(hmask_t[i]) for i in range(H)]               # rows 0-3
    rows += [row(b_qkvn), row(b_qkve), row(P['b_o']),        # rows 4-6
             row(P['fb1']), row(P['fb2']),                   # rows 7-8
             row(P['eb1']), row(P['eb2']), row(P['eb3']), row(P['eb4']),  # 9-12
             row(P['ln1n_g']), row(P['ln1n_b']), row(P['ln2n_g']), row(P['ln2n_b']),  # 13-16
             row(P['ln1e_g']), row(P['ln1e_b']), row(P['ln2e_g']), row(P['ln2e_b'])]  # 17-20
    rows += [jnp.zeros((1, 128), jnp.float32)] * (MISC_ROWS - len(rows))
    misc = jnp.concatenate(rows, axis=0)                     # (24, 128) f32

    return w32, w64, perm, misc


# -----------------------------------------------------------------------------
# Pure-JAX f32 reference (mirrors the PyTorch code path) for correctness.
# -----------------------------------------------------------------------------
def ref_attention(node, edge, P):
    Bv, Nv, D = node.shape
    H, hd = NUM_HEADS, HEAD_DIM
    scale = 1.0 / math.sqrt(hd)
    qkv_n = node @ P['W_qkv_n'] + P['b_qkv_n']
    qkv_e = edge @ P['W_qkv_e'] + P['b_qkv_e']
    qkv_n = qkv_n.reshape(Bv, Nv, H, 3 * hd).transpose(0, 2, 1, 3)
    q_n, k_n, v_n = jnp.split(qkv_n, 3, axis=-1)
    qkv_e = qkv_e.reshape(Bv, Nv, Nv, H, 3 * hd).transpose(0, 3, 1, 2, 4)
    q_e, k_e, v_e = jnp.split(qkv_e, 3, axis=-1)
    q = q_n[:, :, :, None, :] + q_e
    k = k_n[:, :, None, :, :] + k_e
    qk = jnp.sum(q * k, axis=-1) * scale
    att = jax.nn.softmax(qk, axis=-1)
    v = v_n[:, :, None, :, :] + v_e
    new = jnp.einsum('bhij,bhijd->bhid', att, v)
    new = new.transpose(0, 2, 1, 3).reshape(Bv, Nv, D)
    return new @ P['W_o'] + P['b_o']


def ref_layer(node, edge, P):
    Bv, Nv, D = node.shape
    attn = ref_attention(node, edge, P)
    node = _layer_norm(node + attn, P['ln1n_g'], P['ln1n_b'])
    ffn = jnp.maximum(node @ P['fw1'] + P['fb1'], 0.0) @ P['fw2'] + P['fb2']
    node = _layer_norm(node + ffn, P['ln2n_g'], P['ln2n_b'])
    src = jnp.broadcast_to(node[:, None, :, :], (Bv, Nv, Nv, D))
    tgt = jnp.broadcast_to(node[:, :, None, :], (Bv, Nv, Nv, D))
    rev = jnp.transpose(edge, (0, 2, 1, 3))
    cat = jnp.concatenate([edge, rev, src, tgt], axis=-1)
    e1 = jnp.maximum(cat @ P['W1_e'] + P['eb1'], 0.0) @ P['ew2'] + P['eb2']
    edge = _layer_norm(edge + e1, P['ln1e_g'], P['ln1e_b'])
    e2 = jnp.maximum(edge @ P['ew3'] + P['eb3'], 0.0) @ P['ew4'] + P['eb4']
    edge = _layer_norm(edge + e2, P['ln2e_g'], P['ln2e_b'])
    return node, edge


def ref_forward(node, edge, P, num_layers=NUM_LAYERS, return_edge=False):
    for _ in range(num_layers):
        node, edge = ref_layer(node, edge, P)
    if return_edge:
        return node, edge
    return node


if __name__ == "__main__":
    key = jax.random.PRNGKey(0)
    kp, kn, ke = jax.random.split(key, 3)
    P = init_params(kp)
    packed = kernel_params(P)

    node = jax.random.normal(kn, (B, N, NODE_DIM), jnp.float32)
    edge = jax.random.normal(ke, (B, N, N, EDGE_DIM), jnp.float32)

    node_out, edge_out = rt_no_edge_init_forward(node, edge, packed,
                                                 return_edge=True)
    node_out = jax.block_until_ready(node_out)
    edge_out = jax.block_until_ready(edge_out)

    ref_n, ref_e = ref_forward(node, edge, P, return_edge=True)
    ref_n = jax.block_until_ready(ref_n)
    ref_e = jax.block_until_ready(ref_e)

    err_n = float(jnp.max(jnp.abs(node_out - ref_n)))
    err_e = float(jnp.max(jnp.abs(edge_out - ref_e)))
    assert node_out.shape == (B, N, NODE_DIM)
    assert edge_out.shape == (B, N, N, EDGE_DIM)
    # All-f32 variant matches to ~1e-5; bf16 MXU operands compound to a few
    # e-2 over 3 residual/LN layers, so allow 1.5e-1 headroom.
    assert err_n < 1.5e-1, f"node max abs err {err_n}"
    assert err_e < 1.5e-1, f"edge max abs err {err_e}"
    print("KERNEL_OK")
</pallas_src>

<mosaic_0001>
module attributes {stable_mosaic.version = 11 : i64} {
  func.func @rt3_kernel(%arg0: i32, %arg1: memref<16x32xf32, #tpu.memory_space<vmem>>, %arg2: memref<128x32xf32, #tpu.memory_space<vmem>>, %arg3: memref<32x1152xbf16, #tpu.memory_space<vmem>>, %arg4: memref<64x384xbf16, #tpu.memory_space<vmem>>, %arg5: memref<128x128xbf16, #tpu.memory_space<vmem>>, %arg6: memref<24x128xf32, #tpu.memory_space<vmem>>, %arg7: memref<16x32xf32, #tpu.memory_space<vmem>>, %arg8: memref<128x32xf32, #tpu.memory_space<vmem>>) attributes {dimension_semantics = [#tpu.dimension_semantics<arbitrary>], iteration_bounds = array<i64: 1>, scalar_prefetch = 0 : i64, scratch_operands = 0 : i64, tpu.core_type = #tpu.core_type<tc>, window_params = [{pipeline_mode = #tpu.pipeline_mode<synchronous>, transform_indices = @transform_0, window_bounds = array<i64: 16, 32>}, {pipeline_mode = #tpu.pipeline_mode<synchronous>, transform_indices = @transform_1, window_bounds = array<i64: 128, 32>}, {pipeline_mode = #tpu.pipeline_mode<synchronous>, transform_indices = @transform_2, window_bounds = array<i64: 32, 1152>}, {pipeline_mode = #tpu.pipeline_mode<synchronous>, transform_indices = @transform_3, window_bounds = array<i64: 64, 384>}, {pipeline_mode = #tpu.pipeline_mode<synchronous>, transform_indices = @transform_4, window_bounds = array<i64: 128, 128>}, {pipeline_mode = #tpu.pipeline_mode<synchronous>, transform_indices = @transform_5, window_bounds = array<i64: 24, 128>}, {pipeline_mode = #tpu.pipeline_mode<synchronous>, transform_indices = @transform_6, window_bounds = array<i64: 16, 32>}, {pipeline_mode = #tpu.pipeline_mode<synchronous>, transform_indices = @transform_7, window_bounds = array<i64: 128, 32>}]} {
    %c0 = arith.constant 0 : index
    %c0_0 = arith.constant 0 : index
    %0 = vector.load %arg1[%c0, %c0_0] : memref<16x32xf32, #tpu.memory_space<vmem>>, vector<16x32xf32>
    %c0_1 = arith.constant 0 : index
    %c0_2 = arith.constant 0 : index
    %1 = vector.load %arg2[%c0_1, %c0_2] : memref<128x32xf32, #tpu.memory_space<vmem>>, vector<128x32xf32>
    %c0_3 = arith.constant 0 : index
    %c0_4 = arith.constant 0 : index
    %2 = vector.load %arg5[%c0_3, %c0_4] : memref<128x128xbf16, #tpu.memory_space<vmem>>, vector<128x128xbf16>
    %c0_5 = arith.constant 0 : index
    %c0_6 = arith.constant 0 : index
    %3 = vector.load %arg3[%c0_5, %c0_6] : memref<32x1152xbf16, #tpu.memory_space<vmem>>, vector<32x224xbf16>
    %c0_7 = arith.constant 0 : index
    %c128 = arith.constant 128 : index
    %4 = vector.load %arg3[%c0_7, %c128] : memref<32x1152xbf16, #tpu.memory_space<vmem>>, vector<32x96xbf16>
    %c0_8 = arith.constant 0 : index
    %c256 = arith.constant 256 : index
    %5 = vector.load %arg3[%c0_8, %c256] : memref<32x1152xbf16, #tpu.memory_space<vmem>>, vector<32x160xbf16>
    %c0_9 = arith.constant 0 : index
    %c512 = arith.constant 512 : index
    %6 = vector.load %arg3[%c0_9, %c512] : memref<32x1152xbf16, #tpu.memory_space<vmem>>, vector<32x64xbf16>
    %c0_10 = arith.constant 0 : index
    %c640 = arith.constant 640 : index
    %7 = vector.load %arg3[%c0_10, %c640] : memref<32x1152xbf16, #tpu.memory_space<vmem>>, vector<32x32xbf16>
    %c0_11 = arith.constant 0 : index
    %c768 = arith.constant 768 : index
    %8 = vector.load %arg3[%c0_11, %c768] : memref<32x1152xbf16, #tpu.memory_space<vmem>>, vector<32x64xbf16>
    %c0_12 = arith.constant 0 : index
    %c896 = arith.constant 896 : index
    %9 = vector.load %arg3[%c0_12, %c896] : memref<32x1152xbf16, #tpu.memory_space<vmem>>, vector<32x64xbf16>
    %c0_13 = arith.constant 0 : index
    %c1024 = arith.constant 1024 : index
    %10 = vector.load %arg3[%c0_13, %c1024] : memref<32x1152xbf16, #tpu.memory_space<vmem>>, vector<32x4xbf16>
    %c0_14 = arith.constant 0 : index
    %c0_15 = arith.constant 0 : index
    %11 = vector.load %arg4[%c0_14, %c0_15] : memref<64x384xbf16, #tpu.memory_space<vmem>>, vector<64x32xbf16>
    %c0_16 = arith.constant 0 : index
    %c128_17 = arith.constant 128 : index
    %12 = vector.load %arg4[%c0_16, %c128_17] : memref<64x384xbf16, #tpu.memory_space<vmem>>, vector<64x32xbf16>
    %c0_18 = arith.constant 0 : index
    %c256_19 = arith.constant 256 : index
    %13 = vector.load %arg4[%c0_18, %c256_19] : memref<64x384xbf16, #tpu.memory_space<vmem>>, vector<64x32xbf16>
    %c0_20 = arith.constant 0 : index
    %c0_21 = arith.constant 0 : index
    %14 = vector.load %arg6[%c0_20, %c0_21] : memref<24x128xf32, #tpu.memory_space<vmem>>, vector<4x32xf32>
    %c4 = arith.constant 4 : index
    %c0_22 = arith.constant 0 : index
    %15 = vector.load %arg6[%c4, %c0_22] : memref<24x128xf32, #tpu.memory_space<vmem>>, vector<1x96xf32>
    %16 = vector.shape_cast %15 : vector<1x96xf32> to vector<1x96xf32>
    %17 = vector.broadcast %16 : vector<1x96xf32> to vector<16x96xf32>
    %c6 = arith.constant 6 : index
    %c0_23 = arith.constant 0 : index
    %18 = vector.load %arg6[%c6, %c0_23] : memref<24x128xf32, #tpu.memory_space<vmem>>, vector<1x32xf32>
    %19 = vector.shape_cast %18 : vector<1x32xf32> to vector<1x32xf32>
    %20 = vector.broadcast %19 : vector<1x32xf32> to vector<16x32xf32>
    %c7 = arith.constant 7 : index
    %c0_24 = arith.constant 0 : index
    %21 = vector.load %arg6[%c7, %c0_24] : memref<24x128xf32, #tpu.memory_space<vmem>>, vector<1x64xf32>
    %22 = vector.shape_cast %21 : vector<1x64xf32> to vector<1x64xf32>
    %23 = vector.broadcast %22 : vector<1x64xf32> to vector<16x64xf32>
    %c8 = arith.constant 8 : index
    %c0_25 = arith.constant 0 : index
    %24 = vector.load %arg6[%c8, %c0_25] : memref<24x128xf32, #tpu.memory_space<vmem>>, vector<1x32xf32>
    %25 = vector.shape_cast %24 : vector<1x32xf32> to vector<1x32xf32>
    %26 = vector.broadcast %25 : vector<1x32xf32> to vector<16x32xf32>
    %c13 = arith.constant 13 : index
    %c0_26 = arith.constant 0 : index
    %27 = vector.load %arg6[%c13, %c0_26] : memref<24x128xf32, #tpu.memory_space<vmem>>, vector<1x32xf32>
    %28 = vector.shape_cast %27 : vector<1x32xf32> to vector<1x32xf32>
    %29 = vector.broadcast %28 : vector<1x32xf32> to vector<16x32xf32>
    %c14 = arith.constant 14 : index
    %c0_27 = arith.constant 0 : index
    %30 = vector.load %arg6[%c14, %c0_27] : memref<24x128xf32, #tpu.memory_space<vmem>>, vector<1x32xf32>
    %31 = vector.shape_cast %30 : vector<1x32xf32> to vector<1x32xf32>
    %32 = vector.broadcast %31 : vector<1x32xf32> to vector<16x32xf32>
    %c15 = arith.constant 15 : index
    %c0_28 = arith.constant 0 : index
    %33 = vector.load %arg6[%c15, %c0_28] : memref<24x128xf32, #tpu.memory_space<vmem>>, vector<1x32xf32>
    %34 = vector.shape_cast %33 : vector<1x32xf32> to vector<1x32xf32>
    %35 = vector.broadcast %34 : vector<1x32xf32> to vector<16x32xf32>
    %c16 = arith.constant 16 : index
    %c0_29 = arith.constant 0 : index
    %36 = vector.load %arg6[%c16, %c0_29] : memref<24x128xf32, #tpu.memory_space<vmem>>, vector<1x32xf32>
    %37 = vector.shape_cast %36 : vector<1x32xf32> to vector<1x32xf32>
    %38 = vector.broadcast %37 : vector<1x32xf32> to vector<16x32xf32>
    %c5 = arith.constant 5 : index
    %c0_30 = arith.constant 0 : index
    %39 = vector.load %arg6[%c5, %c0_30] : memref<24x128xf32, #tpu.memory_space<vmem>>, vector<1x96xf32>
    %c9 = arith.constant 9 : index
    %c0_31 = arith.constant 0 : index
    %40 = vector.load %arg6[%c9, %c0_31] : memref<24x128xf32, #tpu.memory_space<vmem>>, vector<1x64xf32>
    %c10 = arith.constant 10 : index
    %c0_32 = arith.constant 0 : index
    %41 = vector.load %arg6[%c10, %c0_32] : memref<24x128xf32, #tpu.memory_space<vmem>>, vector<1x32xf32>
    %c11 = arith.constant 11 : index
    %c0_33 = arith.constant 0 : index
    %42 = vector.load %arg6[%c11, %c0_33] : memref<24x128xf32, #tpu.memory_space<vmem>>, vector<1x64xf32>
    %c12 = arith.constant 12 : index
    %c0_34 = arith.constant 0 : index
    %43 = vector.load %arg6[%c12, %c0_34] : memref<24x128xf32, #tpu.memory_space<vmem>>, vector<1x32xf32>
    %c17 = arith.constant 17 : index
    %c0_35 = arith.constant 0 : index
    %44 = vector.load %arg6[%c17, %c0_35] : memref<24x128xf32, #tpu.memory_space<vmem>>, vector<1x32xf32>
    %c18 = arith.constant 18 : index
    %c0_36 = arith.constant 0 : index
    %45 = vector.load %arg6[%c18, %c0_36] : memref<24x128xf32, #tpu.memory_space<vmem>>, vector<1x32xf32>
    %c19 = arith.constant 19 : index
    %c0_37 = arith.constant 0 : index
    %46 = vector.load %arg6[%c19, %c0_37] : memref<24x128xf32, #tpu.memory_space<vmem>>, vector<1x32xf32>
    %c20 = arith.constant 20 : index
    %c0_38 = arith.constant 0 : index
    %47 = vector.load %arg6[%c20, %c0_38] : memref<24x128xf32, #tpu.memory_space<vmem>>, vector<1x32xf32>
    %48 = arith.truncf %0 : vector<16x32xf32> to vector<16x32xbf16>
    %cst = arith.constant dense<0.000000e+00> : vector<16x96xf32>
    %49 = tpu.matmul %48, %4, %cst {dimension_numbers = #tpu.dot_dimension_numbers<[1], [0], [0], [1], [0, 0, 1, 1], [], []>} : vector<16x32xbf16>, vector<32x96xbf16>, vector<16x96xf32> -> vector<16x96xf32>
    %50 = arith.addf %49, %17 : vector<16x96xf32>
    %51 = vector.extract_strided_slice %50 {offsets = [0, 0], sizes = [16, 32], strides = [1, 1]} : vector<16x96xf32> to vector<16x32xf32>
    %52 = vector.shape_cast %51 : vector<16x32xf32> to vector<2x8x32xf32>
    %53 = vector.extract_strided_slice %50 {offsets = [0, 32], sizes = [16, 32], strides = [1, 1]} : vector<16x96xf32> to vector<16x32xf32>
    %54 = vector.shape_cast %53 : vector<16x32xf32> to vector<2x8x32xf32>
    %55 = vector.extract_strided_slice %50 {offsets = [0, 64], sizes = [16, 32], strides = [1, 1]} : vector<16x96xf32> to vector<16x32xf32>
    %56 = vector.shape_cast %55 : vector<16x32xf32> to vector<2x8x32xf32>
    %57 = arith.truncf %1 : vector<128x32xf32> to vector<128x32xbf16>
    %cst_39 = arith.constant dense<0.000000e+00> : vector<128x32xf32>
    %58 = tpu.matmul %2, %57, %cst_39 {dimension_numbers = #tpu.dot_dimension_numbers<[1], [0], [0], [1], [0, 0, 1, 1], [], []>} : vector<128x128xbf16>, vector<128x32xbf16>, vector<128x32xf32> -> vector<128x32xf32>
    %59 = arith.truncf %58 : vector<128x32xf32> to vector<128x32xbf16>
    %cst_40 = arith.constant dense<0.000000e+00> : vector<128x160xf32>
    %60 = tpu.matmul %59, %5, %cst_40 {dimension_numbers = #tpu.dot_dimension_numbers<[1], [0], [0], [1], [0, 0, 1, 1], [], []>} : vector<128x32xbf16>, vector<32x160xbf16>, vector<128x160xf32> -> vector<128x160xf32>
    %61 = vector.extract_strided_slice %60 {offsets = [0, 0], sizes = [128, 96], strides = [1, 1]} : vector<128x160xf32> to vector<128x96xf32>
    %62 = vector.broadcast %39 : vector<1x96xf32> to vector<128x96xf32>
    %63 = arith.addf %61, %62 : vector<128x96xf32>
    %64 = vector.extract_strided_slice %60 {offsets = [0, 96], sizes = [128, 64], strides = [1, 1]} : vector<128x160xf32> to vector<128x64xf32>
    %65 = vector.extract_strided_slice %63 {offsets = [0, 0], sizes = [128, 32], strides = [1, 1]} : vector<128x96xf32> to vector<128x32xf32>
    %66 = vector.shape_cast %65 : vector<128x32xf32> to vector<2x8x8x32xf32>
    %67 = vector.extract_strided_slice %63 {offsets = [0, 32], sizes = [128, 32], strides = [1, 1]} : vector<128x96xf32> to vector<128x32xf32>
    %68 = vector.shape_cast %67 : vector<128x32xf32> to vector<2x8x8x32xf32>
    %69 = vector.extract_strided_slice %63 {offsets = [0, 64], sizes = [128, 32], strides = [1, 1]} : vector<128x96xf32> to vector<128x32xf32>
    %70 = vector.shape_cast %69 : vector<128x32xf32> to vector<2x8x8x32xf32>
    %71 = vector.shape_cast %52 : vector<2x8x32xf32> to vector<2x1x8x32xf32>
    %72 = vector.broadcast %71 : vector<2x1x8x32xf32> to vector<2x8x8x32xf32>
    %73 = arith.addf %72, %66 : vector<2x8x8x32xf32>
    %74 = vector.shape_cast %54 : vector<2x8x32xf32> to vector<2x8x1x32xf32>
    %75 = vector.broadcast %74 : vector<2x8x1x32xf32> to vector<2x8x8x32xf32>
    %76 = arith.addf %75, %68 : vector<2x8x8x32xf32>
    %77 = arith.mulf %73, %76 : vector<2x8x8x32xf32>
    %78 = vector.shape_cast %77 : vector<2x8x8x32xf32> to vector<128x32xf32>
    %79 = arith.truncf %78 : vector<128x32xf32> to vector<128x32xbf16>
    %cst_41 = arith.constant dense<0.000000e+00> : vector<128x4xf32>
    %80 = tpu.matmul %79, %10, %cst_41 {dimension_numbers = #tpu.dot_dimension_numbers<[1], [0], [0], [1], [0, 0, 1, 1], [], []>} : vector<128x32xbf16>, vector<32x4xbf16>, vector<128x4xf32> -> vector<128x4xf32>
    %cst_42 = arith.constant 0.353553385 : f32
    %81 = vector.broadcast %cst_42 : f32 to vector<128x4xf32>
    %82 = arith.mulf %80, %81 : vector<128x4xf32>
    %83 = vector.shape_cast %82 : vector<128x4xf32> to vector<2x8x8x4xf32>
    %cst_43 = arith.constant dense<0xFF800000> : vector<2x8x4xf32>
    %84 = vector.multi_reduction <maximumf>, %83, %cst_43 [1] : vector<2x8x8x4xf32> to vector<2x8x4xf32>
    %85 = vector.shape_cast %84 : vector<2x8x4xf32> to vector<2x1x8x4xf32>
    %86 = vector.broadcast %85 : vector<2x1x8x4xf32> to vector<2x8x8x4xf32>
    %87 = arith.subf %83, %86 : vector<2x8x8x4xf32>
    %88 = math.exp %87 : vector<2x8x8x4xf32>
    %cst_44 = arith.constant dense<0.000000e+00> : vector<2x8x4xf32>
    %89 = vector.multi_reduction <add>, %88, %cst_44 [1] : vector<2x8x8x4xf32> to vector<2x8x4xf32>
    %90 = vector.shape_cast %89 : vector<2x8x4xf32> to vector<2x1x8x4xf32>
    %91 = tpu.reciprocal %90 {approx = true} : vector<2x1x8x4xf32> -> vector<2x1x8x4xf32>
    %92 = vector.broadcast %91 : vector<2x1x8x4xf32> to vector<2x8x8x4xf32>
    %93 = arith.mulf %88, %92 : vector<2x8x8x4xf32>
    %94 = vector.shape_cast %93 : vector<2x8x8x4xf32> to vector<128x4xf32>
    %95 = arith.truncf %94 : vector<128x4xf32> to vector<128x4xbf16>
    %96 = arith.truncf %14 : vector<4x32xf32> to vector<4x32xbf16>
    %cst_45 = arith.constant dense<0.000000e+00> : vector<128x32xf32>
    %97 = tpu.matmul %95, %96, %cst_45 {dimension_numbers = #tpu.dot_dimension_numbers<[1], [0], [0], [1], [0, 0, 1, 1], [], []>} : vector<128x4xbf16>, vector<4x32xbf16>, vector<128x32xf32> -> vector<128x32xf32>
    %98 = vector.shape_cast %97 : vector<128x32xf32> to vector<2x8x8x32xf32>
    %99 = vector.shape_cast %56 : vector<2x8x32xf32> to vector<2x8x1x32xf32>
    %100 = vector.broadcast %99 : vector<2x8x1x32xf32> to vector<2x8x8x32xf32>
    %101 = arith.addf %100, %70 : vector<2x8x8x32xf32>
    %102 = arith.mulf %98, %101 : vector<2x8x8x32xf32>
    %cst_46 = arith.constant dense<0.000000e+00> : vector<2x8x32xf32>
    %103 = vector.multi_reduction <add>, %102, %cst_46 [1] : vector<2x8x8x32xf32> to vector<2x8x32xf32>
    %104 = vector.shape_cast %103 : vector<2x8x32xf32> to vector<16x32xf32>
    %105 = arith.truncf %104 : vector<16x32xf32> to vector<16x32xbf16>
    %cst_47 = arith.constant dense<0.000000e+00> : vector<16x32xf32>
    %106 = tpu.matmul %105, %7, %cst_47 {dimension_numbers = #tpu.dot_dimension_numbers<[1], [0], [0], [1], [0, 0, 1, 1], [], []>} : vector<16x32xbf16>, vector<32x32xbf16>, vector<16x32xf32> -> vector<16x32xf32>
    %107 = arith.addf %106, %20 : vector<16x32xf32>
    %108 = arith.addf %0, %107 : vector<16x32xf32>
    %cst_48 = arith.constant dense<0.000000e+00> : vector<16xf32>
    %109 = vector.multi_reduction <add>, %108, %cst_48 [1] : vector<16x32xf32> to vector<16xf32>
    %110 = vector.shape_cast %109 : vector<16xf32> to vector<16x1xf32>
    %cst_49 = arith.constant 3.200000e+01 : f32
    %111 = vector.broadcast %cst_49 : f32 to vector<16x1xf32>
    %112 = arith.divf %110, %111 : vector<16x1xf32>
    %113 = vector.broadcast %112 : vector<16x1xf32> to vector<16x32xf32>
    %114 = arith.subf %108, %113 : vector<16x32xf32>
    %115 = arith.mulf %114, %114 : vector<16x32xf32>
    %cst_50 = arith.constant dense<0.000000e+00> : vector<16xf32>
    %116 = vector.multi_reduction <add>, %115, %cst_50 [1] : vector<16x32xf32> to vector<16xf32>
    %117 = vector.shape_cast %116 : vector<16xf32> to vector<16x1xf32>
    %cst_51 = arith.constant 3.200000e+01 : f32
    %118 = vector.broadcast %cst_51 : f32 to vector<16x1xf32>
    %119 = arith.divf %117, %118 : vector<16x1xf32>
    %120 = vector.broadcast %112 : vector<16x1xf32> to vector<16x32xf32>
    %121 = arith.subf %108, %120 : vector<16x32xf32>
    %cst_52 = arith.constant 9.99999974E-6 : f32
    %122 = vector.broadcast %cst_52 : f32 to vector<16x1xf32>
    %123 = arith.addf %119, %122 : vector<16x1xf32>
    %124 = math.rsqrt %123 : vector<16x1xf32>
    %125 = vector.broadcast %124 : vector<16x1xf32> to vector<16x32xf32>
    %126 = arith.mulf %121, %125 : vector<16x32xf32>
    %127 = arith.mulf %126, %29 : vector<16x32xf32>
    %128 = arith.addf %127, %32 : vector<16x32xf32>
    %129 = arith.truncf %128 : vector<16x32xf32> to vector<16x32xbf16>
    %cst_53 = arith.constant dense<0.000000e+00> : vector<16x64xf32>
    %130 = tpu.matmul %129, %8, %cst_53 {dimension_numbers = #tpu.dot_dimension_numbers<[1], [0], [0], [1], [0, 0, 1, 1], [], []>} : vector<16x32xbf16>, vector<32x64xbf16>, vector<16x64xf32> -> vector<16x64xf32>
    %131 = arith.addf %130, %23 : vector<16x64xf32>
    %cst_54 = arith.constant 0.000000e+00 : f32
    %132 = vector.broadcast %cst_54 : f32 to vector<16x64xf32>
    %133 = arith.maximumf %131, %132 : vector<16x64xf32>
    %134 = arith.truncf %133 : vector<16x64xf32> to vector<16x64xbf16>
    %cst_55 = arith.constant dense<0.000000e+00> : vector<16x32xf32>
    %135 = tpu.matmul %134, %11, %cst_55 {dimension_numbers = #tpu.dot_dimension_numbers<[1], [0], [0], [1], [0, 0, 1, 1], [], []>} : vector<16x64xbf16>, vector<64x32xbf16>, vector<16x32xf32> -> vector<16x32xf32>
    %136 = arith.addf %135, %26 : vector<16x32xf32>
    %137 = arith.addf %128, %136 : vector<16x32xf32>
    %cst_56 = arith.constant dense<0.000000e+00> : vector<16xf32>
    %138 = vector.multi_reduction <add>, %137, %cst_56 [1] : vector<16x32xf32> to vector<16xf32>
    %139 = vector.shape_cast %138 : vector<16xf32> to vector<16x1xf32>
    %cst_57 = arith.constant 3.200000e+01 : f32
    %140 = vector.broadcast %cst_57 : f32 to vector<16x1xf32>
    %141 = arith.divf %139, %140 : vector<16x1xf32>
    %142 = vector.broadcast %141 : vector<16x1xf32> to vector<16x32xf32>
    %143 = arith.subf %137, %142 : vector<16x32xf32>
    %144 = arith.mulf %143, %143 : vector<16x32xf32>
    %cst_58 = arith.constant dense<0.000000e+00> : vector<16xf32>
    %145 = vector.multi_reduction <add>, %144, %cst_58 [1] : vector<16x32xf32> to vector<16xf32>
    %146 = vector.shape_cast %145 : vector<16xf32> to vector<16x1xf32>
    %cst_59 = arith.constant 3.200000e+01 : f32
    %147 = vector.broadcast %cst_59 : f32 to vector<16x1xf32>
    %148 = arith.divf %146, %147 : vector<16x1xf32>
    %149 = vector.broadcast %141 : vector<16x1xf32> to vector<16x32xf32>
    %150 = arith.subf %137, %149 : vector<16x32xf32>
    %cst_60 = arith.constant 9.99999974E-6 : f32
    %151 = vector.broadcast %cst_60 : f32 to vector<16x1xf32>
    %152 = arith.addf %148, %151 : vector<16x1xf32>
    %153 = math.rsqrt %152 : vector<16x1xf32>
    %154 = vector.broadcast %153 : vector<16x1xf32> to vector<16x32xf32>
    %155 = arith.mulf %150, %154 : vector<16x32xf32>
    %156 = arith.mulf %155, %35 : vector<16x32xf32>
    %157 = arith.addf %156, %38 : vector<16x32xf32>
    %158 = arith.truncf %157 : vector<16x32xf32> to vector<16x32xbf16>
    %cst_61 = arith.constant dense<0.000000e+00> : vector<16x224xf32>
    %159 = tpu.matmul %158, %3, %cst_61 {dimension_numbers = #tpu.dot_dimension_numbers<[1], [0], [0], [1], [0, 0, 1, 1], [], []>} : vector<16x32xbf16>, vector<32x224xbf16>, vector<16x224xf32> -> vector<16x224xf32>
    %160 = vector.extract_strided_slice %159 {offsets = [0, 0], sizes = [16, 64], strides = [1, 1]} : vector<16x224xf32> to vector<16x64xf32>
    %161 = vector.shape_cast %160 : vector<16x64xf32> to vector<2x8x64xf32>
    %162 = vector.extract_strided_slice %159 {offsets = [0, 64], sizes = [16, 64], strides = [1, 1]} : vector<16x224xf32> to vector<16x64xf32>
    %163 = vector.shape_cast %162 : vector<16x64xf32> to vector<2x8x64xf32>
    %164 = vector.extract_strided_slice %159 {offsets = [0, 128], sizes = [16, 96], strides = [1, 1]} : vector<16x224xf32> to vector<16x96xf32>
    %165 = arith.addf %164, %17 : vector<16x96xf32>
    %166 = arith.truncf %1 : vector<128x32xf32> to vector<128x32xbf16>
    %cst_62 = arith.constant dense<0.000000e+00> : vector<128x64xf32>
    %167 = tpu.matmul %166, %6, %cst_62 {dimension_numbers = #tpu.dot_dimension_numbers<[1], [0], [0], [1], [0, 0, 1, 1], [], []>} : vector<128x32xbf16>, vector<32x64xbf16>, vector<128x64xf32> -> vector<128x64xf32>
    %168 = arith.addf %167, %64 : vector<128x64xf32>
    %169 = vector.broadcast %40 : vector<1x64xf32> to vector<128x64xf32>
    %170 = arith.addf %168, %169 : vector<128x64xf32>
    %171 = vector.shape_cast %170 : vector<128x64xf32> to vector<2x8x8x64xf32>
    %172 = vector.shape_cast %161 : vector<2x8x64xf32> to vector<2x1x8x64xf32>
    %173 = vector.broadcast %172 : vector<2x1x8x64xf32> to vector<2x8x8x64xf32>
    %174 = arith.addf %171, %173 : vector<2x8x8x64xf32>
    %175 = vector.shape_cast %163 : vector<2x8x64xf32> to vector<2x8x1x64xf32>
    %176 = vector.broadcast %175 : vector<2x8x1x64xf32> to vector<2x8x8x64xf32>
    %177 = arith.addf %174, %176 : vector<2x8x8x64xf32>
    %178 = vector.shape_cast %177 : vector<2x8x8x64xf32> to vector<128x64xf32>
    %cst_63 = arith.constant 0.000000e+00 : f32
    %179 = vector.broadcast %cst_63 : f32 to vector<128x64xf32>
    %180 = arith.maximumf %178, %179 : vector<128x64xf32>
    %181 = arith.truncf %180 : vector<128x64xf32> to vector<128x64xbf16>
    %cst_64 = arith.constant dense<0.000000e+00> : vector<128x32xf32>
    %182 = tpu.matmul %181, %12, %cst_64 {dimension_numbers = #tpu.dot_dimension_numbers<[1], [0], [0], [1], [0, 0, 1, 1], [], []>} : vector<128x64xbf16>, vector<64x32xbf16>, vector<128x32xf32> -> vector<128x32xf32>
    %183 = vector.broadcast %41 : vector<1x32xf32> to vector<128x32xf32>
    %184 = arith.addf %182, %183 : vector<128x32xf32>
    %185 = arith.addf %1, %184 : vector<128x32xf32>
    %cst_65 = arith.constant dense<0.000000e+00> : vector<128xf32>
    %186 = vector.multi_reduction <add>, %185, %cst_65 [1] : vector<128x32xf32> to vector<128xf32>
    %187 = vector.shape_cast %186 : vector<128xf32> to vector<128x1xf32>
    %cst_66 = arith.constant 3.200000e+01 : f32
    %188 = vector.broadcast %cst_66 : f32 to vector<128x1xf32>
    %189 = arith.divf %187, %188 : vector<128x1xf32>
    %190 = vector.broadcast %189 : vector<128x1xf32> to vector<128x32xf32>
    %191 = arith.subf %185, %190 : vector<128x32xf32>
    %192 = arith.mulf %191, %191 : vector<128x32xf32>
    %cst_67 = arith.constant dense<0.000000e+00> : vector<128xf32>
    %193 = vector.multi_reduction <add>, %192, %cst_67 [1] : vector<128x32xf32> to vector<128xf32>
    %194 = vector.shape_cast %193 : vector<128xf32> to vector<128x1xf32>
    %cst_68 = arith.constant 3.200000e+01 : f32
    %195 = vector.broadcast %cst_68 : f32 to vector<128x1xf32>
    %196 = arith.divf %194, %195 : vector<128x1xf32>
    %197 = vector.broadcast %189 : vector<128x1xf32> to vector<128x32xf32>
    %198 = arith.subf %185, %197 : vector<128x32xf32>
    %cst_69 = arith.constant 9.99999974E-6 : f32
    %199 = vector.broadcast %cst_69 : f32 to vector<128x1xf32>
    %200 = arith.addf %196, %199 : vector<128x1xf32>
    %201 = math.rsqrt %200 : vector<128x1xf32>
    %202 = vector.broadcast %201 : vector<128x1xf32> to vector<128x32xf32>
    %203 = arith.mulf %198, %202 : vector<128x32xf32>
    %204 = vector.broadcast %44 : vector<1x32xf32> to vector<128x32xf32>
    %205 = arith.mulf %203, %204 : vector<128x32xf32>
    %206 = vector.broadcast %45 : vector<1x32xf32> to vector<128x32xf32>
    %207 = arith.addf %205, %206 : vector<128x32xf32>
    %208 = arith.truncf %207 : vector<128x32xf32> to vector<128x32xbf16>
    %cst_70 = arith.constant dense<0.000000e+00> : vector<128x64xf32>
    %209 = tpu.matmul %208, %9, %cst_70 {dimension_numbers = #tpu.dot_dimension_numbers<[1], [0], [0], [1], [0, 0, 1, 1], [], []>} : vector<128x32xbf16>, vector<32x64xbf16>, vector<128x64xf32> -> vector<128x64xf32>
    %210 = vector.broadcast %42 : vector<1x64xf32> to vector<128x64xf32>
    %211 = arith.addf %209, %210 : vector<128x64xf32>
    %cst_71 = arith.constant 0.000000e+00 : f32
    %212 = vector.broadcast %cst_71 : f32 to vector<128x64xf32>
    %213 = arith.maximumf %211, %212 : vector<128x64xf32>
    %214 = arith.truncf %213 : vector<128x64xf32> to vector<128x64xbf16>
    %cst_72 = arith.constant dense<0.000000e+00> : vector<128x32xf32>
    %215 = tpu.matmul %214, %13, %cst_72 {dimension_numbers = #tpu.dot_dimension_numbers<[1], [0], [0], [1], [0, 0, 1, 1], [], []>} : vector<128x64xbf16>, vector<64x32xbf16>, vector<128x32xf32> -> vector<128x32xf32>
    %216 = vector.broadcast %43 : vector<1x32xf32> to vector<128x32xf32>
    %217 = arith.addf %215, %216 : vector<128x32xf32>
    %218 = arith.addf %207, %217 : vector<128x32xf32>
    %cst_73 = arith.constant dense<0.000000e+00> : vector<128xf32>
    %219 = vector.multi_reduction <add>, %218, %cst_73 [1] : vector<128x32xf32> to vector<128xf32>
    %220 = vector.shape_cast %219 : vector<128xf32> to vector<128x1xf32>
    %cst_74 = arith.constant 3.200000e+01 : f32
    %221 = vector.broadcast %cst_74 : f32 to vector<128x1xf32>
    %222 = arith.divf %220, %221 : vector<128x1xf32>
    %223 = vector.broadcast %222 : vector<128x1xf32> to vector<128x32xf32>
    %224 = arith.subf %218, %223 : vector<128x32xf32>
    %225 = arith.mulf %224, %224 : vector<128x32xf32>
    %cst_75 = arith.constant dense<0.000000e+00> : vector<128xf32>
    %226 = vector.multi_reduction <add>, %225, %cst_75 [1] : vector<128x32xf32> to vector<128xf32>
    %227 = vector.shape_cast %226 : vector<128xf32> to vector<128x1xf32>
    %cst_76 = arith.constant 3.200000e+01 : f32
    %228 = vector.broadcast %cst_76 : f32 to vector<128x1xf32>
    %229 = arith.divf %227, %228 : vector<128x1xf32>
    %230 = vector.broadcast %222 : vector<128x1xf32> to vector<128x32xf32>
    %231 = arith.subf %218, %230 : vector<128x32xf32>
    %cst_77 = arith.constant 9.99999974E-6 : f32
    %232 = vector.broadcast %cst_77 : f32 to vector<128x1xf32>
    %233 = arith.addf %229, %232 : vector<128x1xf32>
    %234 = math.rsqrt %233 : vector<128x1xf32>
    %235 = vector.broadcast %234 : vector<128x1xf32> to vector<128x32xf32>
    %236 = arith.mulf %231, %235 : vector<128x32xf32>
    %237 = vector.broadcast %46 : vector<1x32xf32> to vector<128x32xf32>
    %238 = arith.mulf %236, %237 : vector<128x32xf32>
    %239 = vector.broadcast %47 : vector<1x32xf32> to vector<128x32xf32>
    %240 = arith.addf %238, %239 : vector<128x32xf32>
    %241 = vector.extract_strided_slice %165 {offsets = [0, 0], sizes = [16, 32], strides = [1, 1]} : vector<16x96xf32> to vector<16x32xf32>
    %242 = vector.shape_cast %241 : vector<16x32xf32> to vector<2x8x32xf32>
    %243 = vector.extract_strided_slice %165 {offsets = [0, 32], sizes = [16, 32], strides = [1, 1]} : vector<16x96xf32> to vector<16x32xf32>
    %244 = vector.shape_cast %243 : vector<16x32xf32> to vector<2x8x32xf32>
    %245 = vector.extract_strided_slice %165 {offsets = [0, 64], sizes = [16, 32], strides = [1, 1]} : vector<16x96xf32> to vector<16x32xf32>
    %246 = vector.shape_cast %245 : vector<16x32xf32> to vector<2x8x32xf32>
    %247 = arith.truncf %240 : vector<128x32xf32> to vector<128x32xbf16>
    %cst_78 = arith.constant dense<0.000000e+00> : vector<128x32xf32>
    %248 = tpu.matmul %2, %247, %cst_78 {dimension_numbers = #tpu.dot_dimension_numbers<[1], [0], [0], [1], [0, 0, 1, 1], [], []>} : vector<128x128xbf16>, vector<128x32xbf16>, vector<128x32xf32> -> vector<128x32xf32>
    %249 = arith.truncf %248 : vector<128x32xf32> to vector<128x32xbf16>
    %cst_79 = arith.constant dense<0.000000e+00> : vector<128x160xf32>
    %250 = tpu.matmul %249, %5, %cst_79 {dimension_numbers = #tpu.dot_dimension_numbers<[1], [0], [0], [1], [0, 0, 1, 1], [], []>} : vector<128x32xbf16>, vector<32x160xbf16>, vector<128x160xf32> -> vector<128x160xf32>
    %251 = vector.extract_strided_slice %250 {offsets = [0, 0], sizes = [128, 96], strides = [1, 1]} : vector<128x160xf32> to vector<128x96xf32>
    %252 = vector.broadcast %39 : vector<1x96xf32> to vector<128x96xf32>
    %253 = arith.addf %251, %252 : vector<128x96xf32>
    %254 = vector.extract_strided_slice %250 {offsets = [0, 96], sizes = [128, 64], strides = [1, 1]} : vector<128x160xf32> to vector<128x64xf32>
    %255 = vector.extract_strided_slice %253 {offsets = [0, 0], sizes = [128, 32], strides = [1, 1]} : vector<128x96xf32> to vector<128x32xf32>
    %256 = vector.shape_cast %255 : vector<128x32xf32> to vector<2x8x8x32xf32>
    %257 = vector.extract_strided_slice %253 {offsets = [0, 32], sizes = [128, 32], strides = [1, 1]} : vector<128x96xf32> to vector<128x32xf32>
    %258 = vector.shape_cast %257 : vector<128x32xf32> to vector<2x8x8x32xf32>
    %259 = vector.extract_strided_slice %253 {offsets = [0, 64], sizes = [128, 32], strides = [1, 1]} : vector<128x96xf32> to vector<128x32xf32>
    %260 = vector.shape_cast %259 : vector<128x32xf32> to vector<2x8x8x32xf32>
    %261 = vector.shape_cast %242 : vector<2x8x32xf32> to vector<2x1x8x32xf32>
    %262 = vector.broadcast %261 : vector<2x1x8x32xf32> to vector<2x8x8x32xf32>
    %263 = arith.addf %262, %256 : vector<2x8x8x32xf32>
    %264 = vector.shape_cast %244 : vector<2x8x32xf32> to vector<2x8x1x32xf32>
    %265 = vector.broadcast %264 : vector<2x8x1x32xf32> to vector<2x8x8x32xf32>
    %266 = arith.addf %265, %258 : vector<2x8x8x32xf32>
    %267 = arith.mulf %263, %266 : vector<2x8x8x32xf32>
    %268 = vector.shape_cast %267 : vector<2x8x8x32xf32> to vector<128x32xf32>
    %269 = arith.truncf %268 : vector<128x32xf32> to vector<128x32xbf16>
    %cst_80 = arith.constant dense<0.000000e+00> : vector<128x4xf32>
    %270 = tpu.matmul %269, %10, %cst_80 {dimension_numbers = #tpu.dot_dimension_numbers<[1], [0], [0], [1], [0, 0, 1, 1], [], []>} : vector<128x32xbf16>, vector<32x4xbf16>, vector<128x4xf32> -> vector<128x4xf32>
    %cst_81 = arith.constant 0.353553385 : f32
    %271 = vector.broadcast %cst_81 : f32 to vector<128x4xf32>
    %272 = arith.mulf %270, %271 : vector<128x4xf32>
    %273 = vector.shape_cast %272 : vector<128x4xf32> to vector<2x8x8x4xf32>
    %cst_82 = arith.constant dense<0xFF800000> : vector<2x8x4xf32>
    %274 = vector.multi_reduction <maximumf>, %273, %cst_82 [1] : vector<2x8x8x4xf32> to vector<2x8x4xf32>
    %275 = vector.shape_cast %274 : vector<2x8x4xf32> to vector<2x1x8x4xf32>
    %276 = vector.broadcast %275 : vector<2x1x8x4xf32> to vector<2x8x8x4xf32>
    %277 = arith.subf %273, %276 : vector<2x8x8x4xf32>
    %278 = math.exp %277 : vector<2x8x8x4xf32>
    %cst_83 = arith.constant dense<0.000000e+00> : vector<2x8x4xf32>
    %279 = vector.multi_reduction <add>, %278, %cst_83 [1] : vector<2x8x8x4xf32> to vector<2x8x4xf32>
    %280 = vector.shape_cast %279 : vector<2x8x4xf32> to vector<2x1x8x4xf32>
    %281 = tpu.reciprocal %280 {approx = true} : vector<2x1x8x4xf32> -> vector<2x1x8x4xf32>
    %282 = vector.broadcast %281 : vector<2x1x8x4xf32> to vector<2x8x8x4xf32>
    %283 = arith.mulf %278, %282 : vector<2x8x8x4xf32>
    %284 = vector.shape_cast %283 : vector<2x8x8x4xf32> to vector<128x4xf32>
    %285 = arith.truncf %284 : vector<128x4xf32> to vector<128x4xbf16>
    %286 = arith.truncf %14 : vector<4x32xf32> to vector<4x32xbf16>
    %cst_84 = arith.constant dense<0.000000e+00> : vector<128x32xf32>
    %287 = tpu.matmul %285, %286, %cst_84 {dimension_numbers = #tpu.dot_dimension_numbers<[1], [0], [0], [1], [0, 0, 1, 1], [], []>} : vector<128x4xbf16>, vector<4x32xbf16>, vector<128x32xf32> -> vector<128x32xf32>
    %288 = vector.shape_cast %287 : vector<128x32xf32> to vector<2x8x8x32xf32>
    %289 = vector.shape_cast %246 : vector<2x8x32xf32> to vector<2x8x1x32xf32>
    %290 = vector.broadcast %289 : vector<2x8x1x32xf32> to vector<2x8x8x32xf32>
    %291 = arith.addf %290, %260 : vector<2x8x8x32xf32>
    %292 = arith.mulf %288, %291 : vector<2x8x8x32xf32>
    %cst_85 = arith.constant dense<0.000000e+00> : vector<2x8x32xf32>
    %293 = vector.multi_reduction <add>, %292, %cst_85 [1] : vector<2x8x8x32xf32> to vector<2x8x32xf32>
    %294 = vector.shape_cast %293 : vector<2x8x32xf32> to vector<16x32xf32>
    %295 = arith.truncf %294 : vector<16x32xf32> to vector<16x32xbf16>
    %cst_86 = arith.constant dense<0.000000e+00> : vector<16x32xf32>
    %296 = tpu.matmul %295, %7, %cst_86 {dimension_numbers = #tpu.dot_dimension_numbers<[1], [0], [0], [1], [0, 0, 1, 1], [], []>} : vector<16x32xbf16>, vector<32x32xbf16>, vector<16x32xf32> -> vector<16x32xf32>
    %297 = arith.addf %296, %20 : vector<16x32xf32>
    %298 = arith.addf %157, %297 : vector<16x32xf32>
    %cst_87 = arith.constant dense<0.000000e+00> : vector<16xf32>
    %299 = vector.multi_reduction <add>, %298, %cst_87 [1] : vector<16x32xf32> to vector<16xf32>
    %300 = vector.shape_cast %299 : vector<16xf32> to vector<16x1xf32>
    %cst_88 = arith.constant 3.200000e+01 : f32
    %301 = vector.broadcast %cst_88 : f32 to vector<16x1xf32>
    %302 = arith.divf %300, %301 : vector<16x1xf32>
    %303 = vector.broadcast %302 : vector<16x1xf32> to vector<16x32xf32>
    %304 = arith.subf %298, %303 : vector<16x32xf32>
    %305 = arith.mulf %304, %304 : vector<16x32xf32>
    %cst_89 = arith.constant dense<0.000000e+00> : vector<16xf32>
    %306 = vector.multi_reduction <add>, %305, %cst_89 [1] : vector<16x32xf32> to vector<16xf32>
    %307 = vector.shape_cast %306 : vector<16xf32> to vector<16x1xf32>
    %cst_90 = arith.constant 3.200000e+01 : f32
    %308 = vector.broadcast %cst_90 : f32 to vector<16x1xf32>
    %309 = arith.divf %307, %308 : vector<16x1xf32>
    %310 = vector.broadcast %302 : vector<16x1xf32> to vector<16x32xf32>
    %311 = arith.subf %298, %310 : vector<16x32xf32>
    %cst_91 = arith.constant 9.99999974E-6 : f32
    %312 = vector.broadcast %cst_91 : f32 to vector<16x1xf32>
    %313 = arith.addf %309, %312 : vector<16x1xf32>
    %314 = math.rsqrt %313 : vector<16x1xf32>
    %315 = vector.broadcast %314 : vector<16x1xf32> to vector<16x32xf32>
    %316 = arith.mulf %311, %315 : vector<16x32xf32>
    %317 = arith.mulf %316, %29 : vector<16x32xf32>
    %318 = arith.addf %317, %32 : vector<16x32xf32>
    %319 = arith.truncf %318 : vector<16x32xf32> to vector<16x32xbf16>
    %cst_92 = arith.constant dense<0.000000e+00> : vector<16x64xf32>
    %320 = tpu.matmul %319, %8, %cst_92 {dimension_numbers = #tpu.dot_dimension_numbers<[1], [0], [0], [1], [0, 0, 1, 1], [], []>} : vector<16x32xbf16>, vector<32x64xbf16>, vector<16x64xf32> -> vector<16x64xf32>
    %321 = arith.addf %320, %23 : vector<16x64xf32>
    %cst_93 = arith.constant 0.000000e+00 : f32
    %322 = vector.broadcast %cst_93 : f32 to vector<16x64xf32>
    %323 = arith.maximumf %321, %322 : vector<16x64xf32>
    %324 = arith.truncf %323 : vector<16x64xf32> to vector<16x64xbf16>
    %cst_94 = arith.constant dense<0.000000e+00> : vector<16x32xf32>
    %325 = tpu.matmul %324, %11, %cst_94 {dimension_numbers = #tpu.dot_dimension_numbers<[1], [0], [0], [1], [0, 0, 1, 1], [], []>} : vector<16x64xbf16>, vector<64x32xbf16>, vector<16x32xf32> -> vector<16x32xf32>
    %326 = arith.addf %325, %26 : vector<16x32xf32>
    %327 = arith.addf %318, %326 : vector<16x32xf32>
    %cst_95 = arith.constant dense<0.000000e+00> : vector<16xf32>
    %328 = vector.multi_reduction <add>, %327, %cst_95 [1] : vector<16x32xf32> to vector<16xf32>
    %329 = vector.shape_cast %328 : vector<16xf32> to vector<16x1xf32>
    %cst_96 = arith.constant 3.200000e+01 : f32
    %330 = vector.broadcast %cst_96 : f32 to vector<16x1xf32>
    %331 = arith.divf %329, %330 : vector<16x1xf32>
    %332 = vector.broadcast %331 : vector<16x1xf32> to vector<16x32xf32>
    %333 = arith.subf %327, %332 : vector<16x32xf32>
    %334 = arith.mulf %333, %333 : vector<16x32xf32>
    %cst_97 = arith.constant dense<0.000000e+00> : vector<16xf32>
    %335 = vector.multi_reduction <add>, %334, %cst_97 [1] : vector<16x32xf32> to vector<16xf32>
    %336 = vector.shape_cast %335 : vector<16xf32> to vector<16x1xf32>
    %cst_98 = arith.constant 3.200000e+01 : f32
    %337 = vector.broadcast %cst_98 : f32 to vector<16x1xf32>
    %338 = arith.divf %336, %337 : vector<16x1xf32>
    %339 = vector.broadcast %331 : vector<16x1xf32> to vector<16x32xf32>
    %340 = arith.subf %327, %339 : vector<16x32xf32>
    %cst_99 = arith.constant 9.99999974E-6 : f32
    %341 = vector.broadcast %cst_99 : f32 to vector<16x1xf32>
    %342 = arith.addf %338, %341 : vector<16x1xf32>
    %343 = math.rsqrt %342 : vector<16x1xf32>
    %344 = vector.broadcast %343 : vector<16x1xf32> to vector<16x32xf32>
    %345 = arith.mulf %340, %344 : vector<16x32xf32>
    %346 = arith.mulf %345, %35 : vector<16x32xf32>
    %347 = arith.addf %346, %38 : vector<16x32xf32>
    %348 = arith.truncf %347 : vector<16x32xf32> to vector<16x32xbf16>
    %cst_100 = arith.constant dense<0.000000e+00> : vector<16x224xf32>
    %349 = tpu.matmul %348, %3, %cst_100 {dimension_numbers = #tpu.dot_dimension_numbers<[1], [0], [0], [1], [0, 0, 1, 1], [], []>} : vector<16x32xbf16>, vector<32x224xbf16>, vector<16x224xf32> -> vector<16x224xf32>
    %350 = vector.extract_strided_slice %349 {offsets = [0, 0], sizes = [16, 64], strides = [1, 1]} : vector<16x224xf32> to vector<16x64xf32>
    %351 = vector.shape_cast %350 : vector<16x64xf32> to vector<2x8x64xf32>
    %352 = vector.extract_strided_slice %349 {offsets = [0, 64], sizes = [16, 64], strides = [1, 1]} : vector<16x224xf32> to vector<16x64xf32>
    %353 = vector.shape_cast %352 : vector<16x64xf32> to vector<2x8x64xf32>
    %354 = vector.extract_strided_slice %349 {offsets = [0, 128], sizes = [16, 96], strides = [1, 1]} : vector<16x224xf32> to vector<16x96xf32>
    %355 = arith.addf %354, %17 : vector<16x96xf32>
    %356 = arith.truncf %240 : vector<128x32xf32> to vector<128x32xbf16>
    %cst_101 = arith.constant dense<0.000000e+00> : vector<128x64xf32>
    %357 = tpu.matmul %356, %6, %cst_101 {dimension_numbers = #tpu.dot_dimension_numbers<[1], [0], [0], [1], [0, 0, 1, 1], [], []>} : vector<128x32xbf16>, vector<32x64xbf16>, vector<128x64xf32> -> vector<128x64xf32>
    %358 = arith.addf %357, %254 : vector<128x64xf32>
    %359 = vector.broadcast %40 : vector<1x64xf32> to vector<128x64xf32>
    %360 = arith.addf %358, %359 : vector<128x64xf32>
    %361 = vector.shape_cast %360 : vector<128x64xf32> to vector<2x8x8x64xf32>
    %362 = vector.shape_cast %351 : vector<2x8x64xf32> to vector<2x1x8x64xf32>
    %363 = vector.broadcast %362 : vector<2x1x8x64xf32> to vector<2x8x8x64xf32>
    %364 = arith.addf %361, %363 : vector<2x8x8x64xf32>
    %365 = vector.shape_cast %353 : vector<2x8x64xf32> to vector<2x8x1x64xf32>
    %366 = vector.broadcast %365 : vector<2x8x1x64xf32> to vector<2x8x8x64xf32>
    %367 = arith.addf %364, %366 : vector<2x8x8x64xf32>
    %368 = vector.shape_cast %367 : vector<2x8x8x64xf32> to vector<128x64xf32>
    %cst_102 = arith.constant 0.000000e+00 : f32
    %369 = vector.broadcast %cst_102 : f32 to vector<128x64xf32>
    %370 = arith.maximumf %368, %369 : vector<128x64xf32>
    %371 = arith.truncf %370 : vector<128x64xf32> to vector<128x64xbf16>
    %cst_103 = arith.constant dense<0.000000e+00> : vector<128x32xf32>
    %372 = tpu.matmul %371, %12, %cst_103 {dimension_numbers = #tpu.dot_dimension_numbers<[1], [0], [0], [1], [0, 0, 1, 1], [], []>} : vector<128x64xbf16>, vector<64x32xbf16>, vector<128x32xf32> -> vector<128x32xf32>
    %373 = vector.broadcast %41 : vector<1x32xf32> to vector<128x32xf32>
    %374 = arith.addf %372, %373 : vector<128x32xf32>
    %375 = arith.addf %240, %374 : vector<128x32xf32>
    %cst_104 = arith.constant dense<0.000000e+00> : vector<128xf32>
    %376 = vector.multi_reduction <add>, %375, %cst_104 [1] : vector<128x32xf32> to vector<128xf32>
    %377 = vector.shape_cast %376 : vector<128xf32> to vector<128x1xf32>
    %cst_105 = arith.constant 3.200000e+01 : f32
    %378 = vector.broadcast %cst_105 : f32 to vector<128x1xf32>
    %379 = arith.divf %377, %378 : vector<128x1xf32>
    %380 = vector.broadcast %379 : vector<128x1xf32> to vector<128x32xf32>
    %381 = arith.subf %375, %380 : vector<128x32xf32>
    %382 = arith.mulf %381, %381 : vector<128x32xf32>
    %cst_106 = arith.constant dense<0.000000e+00> : vector<128xf32>
    %383 = vector.multi_reduction <add>, %382, %cst_106 [1] : vector<128x32xf32> to vector<128xf32>
    %384 = vector.shape_cast %383 : vector<128xf32> to vector<128x1xf32>
    %cst_107 = arith.constant 3.200000e+01 : f32
    %385 = vector.broadcast %cst_107 : f32 to vector<128x1xf32>
    %386 = arith.divf %384, %385 : vector<128x1xf32>
    %387 = vector.broadcast %379 : vector<128x1xf32> to vector<128x32xf32>
    %388 = arith.subf %375, %387 : vector<128x32xf32>
    %cst_108 = arith.constant 9.99999974E-6 : f32
    %389 = vector.broadcast %cst_108 : f32 to vector<128x1xf32>
    %390 = arith.addf %386, %389 : vector<128x1xf32>
    %391 = math.rsqrt %390 : vector<128x1xf32>
    %392 = vector.broadcast %391 : vector<128x1xf32> to vector<128x32xf32>
    %393 = arith.mulf %388, %392 : vector<128x32xf32>
    %394 = vector.broadcast %44 : vector<1x32xf32> to vector<128x32xf32>
    %395 = arith.mulf %393, %394 : vector<128x32xf32>
    %396 = vector.broadcast %45 : vector<1x32xf32> to vector<128x32xf32>
    %397 = arith.addf %395, %396 : vector<128x32xf32>
    %398 = arith.truncf %397 : vector<128x32xf32> to vector<128x32xbf16>
    %cst_109 = arith.constant dense<0.000000e+00> : vector<128x64xf32>
    %399 = tpu.matmul %398, %9, %cst_109 {dimension_numbers = #tpu.dot_dimension_numbers<[1], [0], [0], [1], [0, 0, 1, 1], [], []>} : vector<128x32xbf16>, vector<32x64xbf16>, vector<128x64xf32> -> vector<128x64xf32>
    %400 = vector.broadcast %42 : vector<1x64xf32> to vector<128x64xf32>
    %401 = arith.addf %399, %400 : vector<128x64xf32>
    %cst_110 = arith.constant 0.000000e+00 : f32
    %402 = vector.broadcast %cst_110 : f32 to vector<128x64xf32>
    %403 = arith.maximumf %401, %402 : vector<128x64xf32>
    %404 = arith.truncf %403 : vector<128x64xf32> to vector<128x64xbf16>
    %cst_111 = arith.constant dense<0.000000e+00> : vector<128x32xf32>
    %405 = tpu.matmul %404, %13, %cst_111 {dimension_numbers = #tpu.dot_dimension_numbers<[1], [0], [0], [1], [0, 0, 1, 1], [], []>} : vector<128x64xbf16>, vector<64x32xbf16>, vector<128x32xf32> -> vector<128x32xf32>
    %406 = vector.broadcast %43 : vector<1x32xf32> to vector<128x32xf32>
    %407 = arith.addf %405, %406 : vector<128x32xf32>
    %408 = arith.addf %397, %407 : vector<128x32xf32>
    %cst_112 = arith.constant dense<0.000000e+00> : vector<128xf32>
    %409 = vector.multi_reduction <add>, %408, %cst_112 [1] : vector<128x32xf32> to vector<128xf32>
    %410 = vector.shape_cast %409 : vector<128xf32> to vector<128x1xf32>
    %cst_113 = arith.constant 3.200000e+01 : f32
    %411 = vector.broadcast %cst_113 : f32 to vector<128x1xf32>
    %412 = arith.divf %410, %411 : vector<128x1xf32>
    %413 = vector.broadcast %412 : vector<128x1xf32> to vector<128x32xf32>
    %414 = arith.subf %408, %413 : vector<128x32xf32>
    %415 = arith.mulf %414, %414 : vector<128x32xf32>
    %cst_114 = arith.constant dense<0.000000e+00> : vector<128xf32>
    %416 = vector.multi_reduction <add>, %415, %cst_114 [1] : vector<128x32xf32> to vector<128xf32>
    %417 = vector.shape_cast %416 : vector<128xf32> to vector<128x1xf32>
    %cst_115 = arith.constant 3.200000e+01 : f32
    %418 = vector.broadcast %cst_115 : f32 to vector<128x1xf32>
    %419 = arith.divf %417, %418 : vector<128x1xf32>
    %420 = vector.broadcast %412 : vector<128x1xf32> to vector<128x32xf32>
    %421 = arith.subf %408, %420 : vector<128x32xf32>
    %cst_116 = arith.constant 9.99999974E-6 : f32
    %422 = vector.broadcast %cst_116 : f32 to vector<128x1xf32>
    %423 = arith.addf %419, %422 : vector<128x1xf32>
    %424 = math.rsqrt %423 : vector<128x1xf32>
    %425 = vector.broadcast %424 : vector<128x1xf32> to vector<128x32xf32>
    %426 = arith.mulf %421, %425 : vector<128x32xf32>
    %427 = vector.broadcast %46 : vector<1x32xf32> to vector<128x32xf32>
    %428 = arith.mulf %426, %427 : vector<128x32xf32>
    %429 = vector.broadcast %47 : vector<1x32xf32> to vector<128x32xf32>
    %430 = arith.addf %428, %429 : vector<128x32xf32>
    %431 = vector.extract_strided_slice %355 {offsets = [0, 0], sizes = [16, 32], strides = [1, 1]} : vector<16x96xf32> to vector<16x32xf32>
    %432 = vector.shape_cast %431 : vector<16x32xf32> to vector<2x8x32xf32>
    %433 = vector.extract_strided_slice %355 {offsets = [0, 32], sizes = [16, 32], strides = [1, 1]} : vector<16x96xf32> to vector<16x32xf32>
    %434 = vector.shape_cast %433 : vector<16x32xf32> to vector<2x8x32xf32>
    %435 = vector.extract_strided_slice %355 {offsets = [0, 64], sizes = [16, 32], strides = [1, 1]} : vector<16x96xf32> to vector<16x32xf32>
    %436 = vector.shape_cast %435 : vector<16x32xf32> to vector<2x8x32xf32>
    %437 = arith.truncf %430 : vector<128x32xf32> to vector<128x32xbf16>
    %cst_117 = arith.constant dense<0.000000e+00> : vector<128x32xf32>
    %438 = tpu.matmul %2, %437, %cst_117 {dimension_numbers = #tpu.dot_dimension_numbers<[1], [0], [0], [1], [0, 0, 1, 1], [], []>} : vector<128x128xbf16>, vector<128x32xbf16>, vector<128x32xf32> -> vector<128x32xf32>
    %439 = arith.truncf %438 : vector<128x32xf32> to vector<128x32xbf16>
    %cst_118 = arith.constant dense<0.000000e+00> : vector<128x160xf32>
    %440 = tpu.matmul %439, %5, %cst_118 {dimension_numbers = #tpu.dot_dimension_numbers<[1], [0], [0], [1], [0, 0, 1, 1], [], []>} : vector<128x32xbf16>, vector<32x160xbf16>, vector<128x160xf32> -> vector<128x160xf32>
    %441 = vector.extract_strided_slice %440 {offsets = [0, 0], sizes = [128, 96], strides = [1, 1]} : vector<128x160xf32> to vector<128x96xf32>
    %442 = vector.broadcast %39 : vector<1x96xf32> to vector<128x96xf32>
    %443 = arith.addf %441, %442 : vector<128x96xf32>
    %444 = vector.extract_strided_slice %440 {offsets = [0, 96], sizes = [128, 64], strides = [1, 1]} : vector<128x160xf32> to vector<128x64xf32>
    %445 = vector.extract_strided_slice %443 {offsets = [0, 0], sizes = [128, 32], strides = [1, 1]} : vector<128x96xf32> to vector<128x32xf32>
    %446 = vector.shape_cast %445 : vector<128x32xf32> to vector<2x8x8x32xf32>
    %447 = vector.extract_strided_slice %443 {offsets = [0, 32], sizes = [128, 32], strides = [1, 1]} : vector<128x96xf32> to vector<128x32xf32>
    %448 = vector.shape_cast %447 : vector<128x32xf32> to vector<2x8x8x32xf32>
    %449 = vector.extract_strided_slice %443 {offsets = [0, 64], sizes = [128, 32], strides = [1, 1]} : vector<128x96xf32> to vector<128x32xf32>
    %450 = vector.shape_cast %449 : vector<128x32xf32> to vector<2x8x8x32xf32>
    %451 = vector.shape_cast %432 : vector<2x8x32xf32> to vector<2x1x8x32xf32>
    %452 = vector.broadcast %451 : vector<2x1x8x32xf32> to vector<2x8x8x32xf32>
    %453 = arith.addf %452, %446 : vector<2x8x8x32xf32>
    %454 = vector.shape_cast %434 : vector<2x8x32xf32> to vector<2x8x1x32xf32>
    %455 = vector.broadcast %454 : vector<2x8x1x32xf32> to vector<2x8x8x32xf32>
    %456 = arith.addf %455, %448 : vector<2x8x8x32xf32>
    %457 = arith.mulf %453, %456 : vector<2x8x8x32xf32>
    %458 = vector.shape_cast %457 : vector<2x8x8x32xf32> to vector<128x32xf32>
    %459 = arith.truncf %458 : vector<128x32xf32> to vector<128x32xbf16>
    %cst_119 = arith.constant dense<0.000000e+00> : vector<128x4xf32>
    %460 = tpu.matmul %459, %10, %cst_119 {dimension_numbers = #tpu.dot_dimension_numbers<[1], [0], [0], [1], [0, 0, 1, 1], [], []>} : vector<128x32xbf16>, vector<32x4xbf16>, vector<128x4xf32> -> vector<128x4xf32>
    %cst_120 = arith.constant 0.353553385 : f32
    %461 = vector.broadcast %cst_120 : f32 to vector<128x4xf32>
    %462 = arith.mulf %460, %461 : vector<128x4xf32>
    %463 = vector.shape_cast %462 : vector<128x4xf32> to vector<2x8x8x4xf32>
    %cst_121 = arith.constant dense<0xFF800000> : vector<2x8x4xf32>
    %464 = vector.multi_reduction <maximumf>, %463, %cst_121 [1] : vector<2x8x8x4xf32> to vector<2x8x4xf32>
    %465 = vector.shape_cast %464 : vector<2x8x4xf32> to vector<2x1x8x4xf32>
    %466 = vector.broadcast %465 : vector<2x1x8x4xf32> to vector<2x8x8x4xf32>
    %467 = arith.subf %463, %466 : vector<2x8x8x4xf32>
    %468 = math.exp %467 : vector<2x8x8x4xf32>
    %cst_122 = arith.constant dense<0.000000e+00> : vector<2x8x4xf32>
    %469 = vector.multi_reduction <add>, %468, %cst_122 [1] : vector<2x8x8x4xf32> to vector<2x8x4xf32>
    %470 = vector.shape_cast %469 : vector<2x8x4xf32> to vector<2x1x8x4xf32>
    %471 = tpu.reciprocal %470 {approx = true} : vector<2x1x8x4xf32> -> vector<2x1x8x4xf32>
    %472 = vector.broadcast %471 : vector<2x1x8x4xf32> to vector<2x8x8x4xf32>
    %473 = arith.mulf %468, %472 : vector<2x8x8x4xf32>
    %474 = vector.shape_cast %473 : vector<2x8x8x4xf32> to vector<128x4xf32>
    %475 = arith.truncf %474 : vector<128x4xf32> to vector<128x4xbf16>
    %476 = arith.truncf %14 : vector<4x32xf32> to vector<4x32xbf16>
    %cst_123 = arith.constant dense<0.000000e+00> : vector<128x32xf32>
    %477 = tpu.matmul %475, %476, %cst_123 {dimension_numbers = #tpu.dot_dimension_numbers<[1], [0], [0], [1], [0, 0, 1, 1], [], []>} : vector<128x4xbf16>, vector<4x32xbf16>, vector<128x32xf32> -> vector<128x32xf32>
    %478 = vector.shape_cast %477 : vector<128x32xf32> to vector<2x8x8x32xf32>
    %479 = vector.shape_cast %436 : vector<2x8x32xf32> to vector<2x8x1x32xf32>
    %480 = vector.broadcast %479 : vector<2x8x1x32xf32> to vector<2x8x8x32xf32>
    %481 = arith.addf %480, %450 : vector<2x8x8x32xf32>
    %482 = arith.mulf %478, %481 : vector<2x8x8x32xf32>
    %cst_124 = arith.constant dense<0.000000e+00> : vector<2x8x32xf32>
    %483 = vector.multi_reduction <add>, %482, %cst_124 [1] : vector<2x8x8x32xf32> to vector<2x8x32xf32>
    %484 = vector.shape_cast %483 : vector<2x8x32xf32> to vector<16x32xf32>
    %485 = arith.truncf %484 : vector<16x32xf32> to vector<16x32xbf16>
    %cst_125 = arith.constant dense<0.000000e+00> : vector<16x32xf32>
    %486 = tpu.matmul %485, %7, %cst_125 {dimension_numbers = #tpu.dot_dimension_numbers<[1], [0], [0], [1], [0, 0, 1, 1], [], []>} : vector<16x32xbf16>, vector<32x32xbf16>, vector<16x32xf32> -> vector<16x32xf32>
    %487 = arith.addf %486, %20 : vector<16x32xf32>
    %488 = arith.addf %347, %487 : vector<16x32xf32>
    %cst_126 = arith.constant dense<0.000000e+00> : vector<16xf32>
    %489 = vector.multi_reduction <add>, %488, %cst_126 [1] : vector<16x32xf32> to vector<16xf32>
    %490 = vector.shape_cast %489 : vector<16xf32> to vector<16x1xf32>
    %cst_127 = arith.constant 3.200000e+01 : f32
    %491 = vector.broadcast %cst_127 : f32 to vector<16x1xf32>
    %492 = arith.divf %490, %491 : vector<16x1xf32>
    %493 = vector.broadcast %492 : vector<16x1xf32> to vector<16x32xf32>
    %494 = arith.subf %488, %493 : vector<16x32xf32>
    %495 = arith.mulf %494, %494 : vector<16x32xf32>
    %cst_128 = arith.constant dense<0.000000e+00> : vector<16xf32>
    %496 = vector.multi_reduction <add>, %495, %cst_128 [1] : vector<16x32xf32> to vector<16xf32>
    %497 = vector.shape_cast %496 : vector<16xf32> to vector<16x1xf32>
    %cst_129 = arith.constant 3.200000e+01 : f32
    %498 = vector.broadcast %cst_129 : f32 to vector<16x1xf32>
    %499 = arith.divf %497, %498 : vector<16x1xf32>
    %500 = vector.broadcast %492 : vector<16x1xf32> to vector<16x32xf32>
    %501 = arith.subf %488, %500 : vector<16x32xf32>
    %cst_130 = arith.constant 9.99999974E-6 : f32
    %502 = vector.broadcast %cst_130 : f32 to vector<16x1xf32>
    %503 = arith.addf %499, %502 : vector<16x1xf32>
    %504 = math.rsqrt %503 : vector<16x1xf32>
    %505 = vector.broadcast %504 : vector<16x1xf32> to vector<16x32xf32>
    %506 = arith.mulf %501, %505 : vector<16x32xf32>
    %507 = arith.mulf %506, %29 : vector<16x32xf32>
    %508 = arith.addf %507, %32 : vector<16x32xf32>
    %509 = arith.truncf %508 : vector<16x32xf32> to vector<16x32xbf16>
    %cst_131 = arith.constant dense<0.000000e+00> : vector<16x64xf32>
    %510 = tpu.matmul %509, %8, %cst_131 {dimension_numbers = #tpu.dot_dimension_numbers<[1], [0], [0], [1], [0, 0, 1, 1], [], []>} : vector<16x32xbf16>, vector<32x64xbf16>, vector<16x64xf32> -> vector<16x64xf32>
    %511 = arith.addf %510, %23 : vector<16x64xf32>
    %cst_132 = arith.constant 0.000000e+00 : f32
    %512 = vector.broadcast %cst_132 : f32 to vector<16x64xf32>
    %513 = arith.maximumf %511, %512 : vector<16x64xf32>
    %514 = arith.truncf %513 : vector<16x64xf32> to vector<16x64xbf16>
    %cst_133 = arith.constant dense<0.000000e+00> : vector<16x32xf32>
    %515 = tpu.matmul %514, %11, %cst_133 {dimension_numbers = #tpu.dot_dimension_numbers<[1], [0], [0], [1], [0, 0, 1, 1], [], []>} : vector<16x64xbf16>, vector<64x32xbf16>, vector<16x32xf32> -> vector<16x32xf32>
    %516 = arith.addf %515, %26 : vector<16x32xf32>
    %517 = arith.addf %508, %516 : vector<16x32xf32>
    %cst_134 = arith.constant dense<0.000000e+00> : vector<16xf32>
    %518 = vector.multi_reduction <add>, %517, %cst_134 [1] : vector<16x32xf32> to vector<16xf32>
    %519 = vector.shape_cast %518 : vector<16xf32> to vector<16x1xf32>
    %cst_135 = arith.constant 3.200000e+01 : f32
    %520 = vector.broadcast %cst_135 : f32 to vector<16x1xf32>
    %521 = arith.divf %519, %520 : vector<16x1xf32>
    %522 = vector.broadcast %521 : vector<16x1xf32> to vector<16x32xf32>
    %523 = arith.subf %517, %522 : vector<16x32xf32>
    %524 = arith.mulf %523, %523 : vector<16x32xf32>
    %cst_136 = arith.constant dense<0.000000e+00> : vector<16xf32>
    %525 = vector.multi_reduction <add>, %524, %cst_136 [1] : vector<16x32xf32> to vector<16xf32>
    %526 = vector.shape_cast %525 : vector<16xf32> to vector<16x1xf32>
    %cst_137 = arith.constant 3.200000e+01 : f32
    %527 = vector.broadcast %cst_137 : f32 to vector<16x1xf32>
    %528 = arith.divf %526, %527 : vector<16x1xf32>
    %529 = vector.broadcast %521 : vector<16x1xf32> to vector<16x32xf32>
    %530 = arith.subf %517, %529 : vector<16x32xf32>
    %cst_138 = arith.constant 9.99999974E-6 : f32
    %531 = vector.broadcast %cst_138 : f32 to vector<16x1xf32>
    %532 = arith.addf %528, %531 : vector<16x1xf32>
    %533 = math.rsqrt %532 : vector<16x1xf32>
    %534 = vector.broadcast %533 : vector<16x1xf32> to vector<16x32xf32>
    %535 = arith.mulf %530, %534 : vector<16x32xf32>
    %536 = arith.mulf %535, %35 : vector<16x32xf32>
    %537 = arith.addf %536, %38 : vector<16x32xf32>
    %538 = arith.truncf %537 : vector<16x32xf32> to vector<16x32xbf16>
    %cst_139 = arith.constant dense<0.000000e+00> : vector<16x224xf32>
    %539 = tpu.matmul %538, %3, %cst_139 {dimension_numbers = #tpu.dot_dimension_numbers<[1], [0], [0], [1], [0, 0, 1, 1], [], []>} : vector<16x32xbf16>, vector<32x224xbf16>, vector<16x224xf32> -> vector<16x224xf32>
    %540 = vector.extract_strided_slice %539 {offsets = [0, 0], sizes = [16, 64], strides = [1, 1]} : vector<16x224xf32> to vector<16x64xf32>
    %541 = vector.shape_cast %540 : vector<16x64xf32> to vector<2x8x64xf32>
    %542 = vector.extract_strided_slice %539 {offsets = [0, 64], sizes = [16, 64], strides = [1, 1]} : vector<16x224xf32> to vector<16x64xf32>
    %543 = vector.shape_cast %542 : vector<16x64xf32> to vector<2x8x64xf32>
    %544 = arith.truncf %430 : vector<128x32xf32> to vector<128x32xbf16>
    %cst_140 = arith.constant dense<0.000000e+00> : vector<128x64xf32>
    %545 = tpu.matmul %544, %6, %cst_140 {dimension_numbers = #tpu.dot_dimension_numbers<[1], [0], [0], [1], [0, 0, 1, 1], [], []>} : vector<128x32xbf16>, vector<32x64xbf16>, vector<128x64xf32> -> vector<128x64xf32>
    %546 = arith.addf %545, %444 : vector<128x64xf32>
    %547 = vector.broadcast %40 : vector<1x64xf32> to vector<128x64xf32>
    %548 = arith.addf %546, %547 : vector<128x64xf32>
    %549 = vector.shape_cast %548 : vector<128x64xf32> to vector<2x8x8x64xf32>
    %550 = vector.shape_cast %541 : vector<2x8x64xf32> to vector<2x1x8x64xf32>
    %551 = vector.broadcast %550 : vector<2x1x8x64xf32> to vector<2x8x8x64xf32>
    %552 = arith.addf %549, %551 : vector<2x8x8x64xf32>
    %553 = vector.shape_cast %543 : vector<2x8x64xf32> to vector<2x8x1x64xf32>
    %554 = vector.broadcast %553 : vector<2x8x1x64xf32> to vector<2x8x8x64xf32>
    %555 = arith.addf %552, %554 : vector<2x8x8x64xf32>
    %556 = vector.shape_cast %555 : vector<2x8x8x64xf32> to vector<128x64xf32>
    %cst_141 = arith.constant 0.000000e+00 : f32
    %557 = vector.broadcast %cst_141 : f32 to vector<128x64xf32>
    %558 = arith.maximumf %556, %557 : vector<128x64xf32>
    %559 = arith.truncf %558 : vector<128x64xf32> to vector<128x64xbf16>
    %cst_142 = arith.constant dense<0.000000e+00> : vector<128x32xf32>
    %560 = tpu.matmul %559, %12, %cst_142 {dimension_numbers = #tpu.dot_dimension_numbers<[1], [0], [0], [1], [0, 0, 1, 1], [], []>} : vector<128x64xbf16>, vector<64x32xbf16>, vector<128x32xf32> -> vector<128x32xf32>
    %561 = vector.broadcast %41 : vector<1x32xf32> to vector<128x32xf32>
    %562 = arith.addf %560, %561 : vector<128x32xf32>
    %563 = arith.addf %430, %562 : vector<128x32xf32>
    %cst_143 = arith.constant dense<0.000000e+00> : vector<128xf32>
    %564 = vector.multi_reduction <add>, %563, %cst_143 [1] : vector<128x32xf32> to vector<128xf32>
    %565 = vector.shape_cast %564 : vector<128xf32> to vector<128x1xf32>
    %cst_144 = arith.constant 3.200000e+01 : f32
    %566 = vector.broadcast %cst_144 : f32 to vector<128x1xf32>
    %567 = arith.divf %565, %566 : vector<128x1xf32>
    %568 = vector.broadcast %567 : vector<128x1xf32> to vector<128x32xf32>
    %569 = arith.subf %563, %568 : vector<128x32xf32>
    %570 = arith.mulf %569, %569 : vector<128x32xf32>
    %cst_145 = arith.constant dense<0.000000e+00> : vector<128xf32>
    %571 = vector.multi_reduction <add>, %570, %cst_145 [1] : vector<128x32xf32> to vector<128xf32>
    %572 = vector.shape_cast %571 : vector<128xf32> to vector<128x1xf32>
    %cst_146 = arith.constant 3.200000e+01 : f32
    %573 = vector.broadcast %cst_146 : f32 to vector<128x1xf32>
    %574 = arith.divf %572, %573 : vector<128x1xf32>
    %575 = vector.broadcast %567 : vector<128x1xf32> to vector<128x32xf32>
    %576 = arith.subf %563, %575 : vector<128x32xf32>
    %cst_147 = arith.constant 9.99999974E-6 : f32
    %577 = vector.broadcast %cst_147 : f32 to vector<128x1xf32>
    %578 = arith.addf %574, %577 : vector<128x1xf32>
    %579 = math.rsqrt %578 : vector<128x1xf32>
    %580 = vector.broadcast %579 : vector<128x1xf32> to vector<128x32xf32>
    %581 = arith.mulf %576, %580 : vector<128x32xf32>
    %582 = vector.broadcast %44 : vector<1x32xf32> to vector<128x32xf32>
    %583 = arith.mulf %581, %582 : vector<128x32xf32>
    %584 = vector.broadcast %45 : vector<1x32xf32> to vector<128x32xf32>
    %585 = arith.addf %583, %584 : vector<128x32xf32>
    %586 = arith.truncf %585 : vector<128x32xf32> to vector<128x32xbf16>
    %cst_148 = arith.constant dense<0.000000e+00> : vector<128x64xf32>
    %587 = tpu.matmul %586, %9, %cst_148 {dimension_numbers = #tpu.dot_dimension_numbers<[1], [0], [0], [1], [0, 0, 1, 1], [], []>} : vector<128x32xbf16>, vector<32x64xbf16>, vector<128x64xf32> -> vector<128x64xf32>
    %588 = vector.broadcast %42 : vector<1x64xf32> to vector<128x64xf32>
    %589 = arith.addf %587, %588 : vector<128x64xf32>
    %cst_149 = arith.constant 0.000000e+00 : f32
    %590 = vector.broadcast %cst_149 : f32 to vector<128x64xf32>
    %591 = arith.maximumf %589, %590 : vector<128x64xf32>
    %592 = arith.truncf %591 : vector<128x64xf32> to vector<128x64xbf16>
    %cst_150 = arith.constant dense<0.000000e+00> : vector<128x32xf32>
    %593 = tpu.matmul %592, %13, %cst_150 {dimension_numbers = #tpu.dot_dimension_numbers<[1], [0], [0], [1], [0, 0, 1, 1], [], []>} : vector<128x64xbf16>, vector<64x32xbf16>, vector<128x32xf32> -> vector<128x32xf32>
    %594 = vector.broadcast %43 : vector<1x32xf32> to vector<128x32xf32>
    %595 = arith.addf %593, %594 : vector<128x32xf32>
    %596 = arith.addf %585, %595 : vector<128x32xf32>
    %cst_151 = arith.constant dense<0.000000e+00> : vector<128xf32>
    %597 = vector.multi_reduction <add>, %596, %cst_151 [1] : vector<128x32xf32> to vector<128xf32>
    %598 = vector.shape_cast %597 : vector<128xf32> to vector<128x1xf32>
    %cst_152 = arith.constant 3.200000e+01 : f32
    %599 = vector.broadcast %cst_152 : f32 to vector<128x1xf32>
    %600 = arith.divf %598, %599 : vector<128x1xf32>
    %601 = vector.broadcast %600 : vector<128x1xf32> to vector<128x32xf32>
    %602 = arith.subf %596, %601 : vector<128x32xf32>
    %603 = arith.mulf %602, %602 : vector<128x32xf32>
    %cst_153 = arith.constant dense<0.000000e+00> : vector<128xf32>
    %604 = vector.multi_reduction <add>, %603, %cst_153 [1] : vector<128x32xf32> to vector<128xf32>
    %605 = vector.shape_cast %604 : vector<128xf32> to vector<128x1xf32>
    %cst_154 = arith.constant 3.200000e+01 : f32
    %606 = vector.broadcast %cst_154 : f32 to vector<128x1xf32>
    %607 = arith.divf %605, %606 : vector<128x1xf32>
    %608 = vector.broadcast %600 : vector<128x1xf32> to vector<128x32xf32>
    %609 = arith.subf %596, %608 : vector<128x32xf32>
    %cst_155 = arith.constant 9.99999974E-6 : f32
    %610 = vector.broadcast %cst_155 : f32 to vector<128x1xf32>
    %611 = arith.addf %607, %610 : vector<128x1xf32>
    %612 = math.rsqrt %611 : vector<128x1xf32>
    %613 = vector.broadcast %612 : vector<128x1xf32> to vector<128x32xf32>
    %614 = arith.mulf %609, %613 : vector<128x32xf32>
    %615 = vector.broadcast %46 : vector<1x32xf32> to vector<128x32xf32>
    %616 = arith.mulf %614, %615 : vector<128x32xf32>
    %617 = vector.broadcast %47 : vector<1x32xf32> to vector<128x32xf32>
    %618 = arith.addf %616, %617 : vector<128x32xf32>
    %c0_156 = arith.constant 0 : index
    %c0_157 = arith.constant 0 : index
    %619 = vector.load %arg7[%c0_156, %c0_157] : memref<16x32xf32, #tpu.memory_space<vmem>>, vector<16x32xf32>
    tpu.vector_store %arg7[%c0_156, %c0_157], %537 {strides = array<i32>} : memref<16x32xf32, #tpu.memory_space<vmem>>, vector<16x32xf32>,
    %c0_158 = arith.constant 0 : index
    %c0_159 = arith.constant 0 : index
    %620 = vector.load %arg8[%c0_158, %c0_159] : memref<128x32xf32, #tpu.memory_space<vmem>>, vector<128x32xf32>
    tpu.vector_store %arg8[%c0_158, %c0_159], %618 {strides = array<i32>} : memref<128x32xf32, #tpu.memory_space<vmem>>, vector<128x32xf32>,
    return
  }
  func.func @transform_0(%arg0: i32) -> (i32, i32) {
    %c0_i32 = arith.constant 0 : i32
    %c0_i32_0 = arith.constant 0 : i32
    %c0_i32_1 = arith.constant 0 : i32
    return %c0_i32, %c0_i32_0 : i32, i32
  }
  func.func @transform_1(%arg0: i32) -> (i32, i32) {
    %c0_i32 = arith.constant 0 : i32
    %c0_i32_0 = arith.constant 0 : i32
    %c0_i32_1 = arith.constant 0 : i32
    return %c0_i32, %c0_i32_0 : i32, i32
  }
  func.func @transform_2(%arg0: i32) -> (i32, i32) {
    %c0_i32 = arith.constant 0 : i32
    %c0_i32_0 = arith.constant 0 : i32
    %c0_i32_1 = arith.constant 0 : i32
    return %c0_i32, %c0_i32_0 : i32, i32
  }
  func.func @transform_3(%arg0: i32) -> (i32, i32) {
    %c0_i32 = arith.constant 0 : i32
    %c0_i32_0 = arith.constant 0 : i32
    %c0_i32_1 = arith.constant 0 : i32
    return %c0_i32, %c0_i32_0 : i32, i32
  }
  func.func @transform_4(%arg0: i32) -> (i32, i32) {
    %c0_i32 = arith.constant 0 : i32
    %c0_i32_0 = arith.constant 0 : i32
    %c0_i32_1 = arith.constant 0 : i32
    return %c0_i32, %c0_i32_0 : i32, i32
  }
  func.func @transform_5(%arg0: i32) -> (i32, i32) {
    %c0_i32 = arith.constant 0 : i32
    %c0_i32_0 = arith.constant 0 : i32
    %c0_i32_1 = arith.constant 0 : i32
    return %c0_i32, %c0_i32_0 : i32, i32
  }
  func.func @transform_6(%arg0: i32) -> (i32, i32) {
    %c0_i32 = arith.constant 0 : i32
    %c0_i32_0 = arith.constant 0 : i32
    %c0_i32_1 = arith.constant 0 : i32
    return %c0_i32, %c0_i32_0 : i32, i32
  }
  func.func @transform_7(%arg0: i32) -> (i32, i32) {
    %c0_i32 = arith.constant 0 : i32
    %c0_i32_0 = arith.constant 0 : i32
    %c0_i32_1 = arith.constant 0 : i32
    return %c0_i32, %c0_i32_0 : i32, i32
  }
}

</mosaic_0001>

<bundles_post_ra>
// kernel: tpu_custom_call.1
= control target key start
LH: loop header
LB: loop body
LE: loop exit
PB: predicated region body
PF: predicated region fallthrough
CT: control target
= control target key end

     0   :  { %13 = vsyncpa [#allocation3], 0  ;;  %s14869_s0 = inlined_call_operand.hbm [shape: f32[16,32], index: 0, kind: input, shape index: {}]   ;;  %s14870_s1 = inlined_call_operand.vmem [shape: f32[128,32], index: 1, kind: input, shape index: {}]   ;;  %s14871_s2 = inlined_call_operand.vmem [shape: bf16[32,1152], index: 2, kind: input, shape index: {}]   ;;  %s14872_s3 = inlined_call_operand.hbm [shape: bf16[64,384], index: 3, kind: input, shape index: {}]   ;;  %s14873_s4 = inlined_call_operand.hbm [shape: bf16[128,128], index: 4, kind: input, shape index: {}]   ;;  %s14874_s5 = inlined_call_operand.vmem [shape: f32[24,128], index: 5, kind: input, shape index: {}]   ;;  %s14875_s6 = inlined_call_operand.hbm [shape: f32[16,32], index: 6, kind: output, shape index: {0}]   ;;  %s14876_s7 = inlined_call_operand.vmem [shape: f32[128,32], index: 7, kind: output, shape index: {1}]  }
   0x1   :  { %14 = vsyncpa [#allocation6], 0 }
   0x2   :  { %15 = vsyncpa [#allocation4], 0  ;;  %s10470_s24 = smov [#allocation5]  }
   0x3   :  { %s37_s25 = sshll.u32 %s10470_s24, 4  ;;  %s38_s25 = int_to_ptr.vmem [resolvable:$true] %s37_s25 }
   0x4   :  { %s10392_s26 = scalar_lea.vmem %s38_s25, 1536  ;;  %p10397_p1 = scmp.lt.s32.totalorder %s38_s25, %s38_s25 }
   0x5   :  { %p10393_p0 = scmp.ne.s32.totalorder %s38_s25, %s10392_s26  ;;  %p10398_p2 = scmp.lt.s32.totalorder %s10392_s26, %s10392_s26 }
   0x7   :  { %p10399_p3 = por %p10398_p2, %p10397_p1 }
   0x9   :  { %p10400_p4 = pnand %p10399_p3, %p10393_p0 }
   0xb   :  { %10403 = shalt.err (!%p10400_p4)
}
   0xc   :  { %s10471_s27 = smov 192   ;;  %s10472_s28 = smov 12  }
   0xd   :  { %43 = dma.hbm_to_vmem [thread:$0]  %s14872_s3, 1536, %s38_s25, [#allocation6], %s10471_s27, %s10471_s27, %s10472_s28  }
   0xe   :  { %s10473_s8 = smov [#allocation2]  }
   0xf   :  { %s21_s9 = sshll.u32 %s10473_s8, 4  ;;  %s22_s9 = int_to_ptr.vmem [resolvable:$true] %s21_s9 }
  0x10   :  { %s10412_s10 = scalar_lea.vmem %s22_s9, 256  ;;  %p10417_p6 = scmp.lt.s32.totalorder %s22_s9, %s22_s9 }
  0x11   :  { %p10413_p5 = scmp.ne.s32.totalorder %s22_s9, %s10412_s10  ;;  %p10418_p7 = scmp.lt.s32.totalorder %s10412_s10, %s10412_s10 }
  0x13   :  { %p10419_p8 = por %p10418_p7, %p10417_p6 }
  0x15   :  { %p10420_p9 = pnand %p10419_p8, %p10413_p5 }
  0x17   :  { %10423 = shalt.err (!%p10420_p9)
}
  0x18   :  { %s10474_s11 = smov 128   ;;  %s10475_s12 = smov 8  }
  0x19   :  { %27 = dma.hbm_to_vmem [thread:$0]  %s14869_s0, 256, %s22_s9, [#allocation3], %s10474_s11, %s10474_s11, %s10475_s12  }
  0x1a   :  { %s10476_s3 = smov [#allocation7]  }
  0x1b   :  { %s49_s15 = sshll.u32 %s10476_s3, 4  ;;  %s50_s15 = int_to_ptr.vmem [resolvable:$true] %s49_s15 }
  0x1c   :  { %s10432_s16 = scalar_lea.vmem %s50_s15, 1024  ;;  %p10437_p11 = scmp.lt.s32.totalorder %s50_s15, %s50_s15 }
  0x1d   :  { %p10433_p10 = scmp.ne.s32.totalorder %s50_s15, %s10432_s16  ;;  %p10438_p12 = scmp.lt.s32.totalorder %s10432_s16, %s10432_s16 }
  0x1f   :  { %p10439_p13 = por %p10438_p12, %p10437_p11 }
  0x21   :  { %p10440_p0 = pnand %p10439_p13, %p10433_p10 }
  0x23   :  { %10443 = shalt.err (!%p10440_p0)
}
  0x24   :  { %s10477_s17 = smov 64   ;;  %s10478_s18 = smov 4  }
  0x25   :  { %55 = dma.hbm_to_vmem [thread:$0]  %s14873_s4, 1024, %s50_s15, [#allocation6], %s10477_s17, %s10477_s17, %s10478_s18  }
  0x26   :  { %10464 = dma.done.wait [#allocation3], 256  }
  0x27   :  { %10465 = vsyncadd [#allocation3], 4294967040 }
  0x28   :  { %10466 = dma.done.wait [#allocation6], 2560  }
  0x29   :  { %10467 = vsyncadd [#allocation6], 4294964736  ;;  %v14879_v0 = vmov 0.0   ;;  %vm10480_vm0 = vmmov 0   ;;  %v84_v1 = vld [vmem:[%s14870_s1 + $0x70] sm:$0xff]  ;;  %v85_v2 = vld [vmem:[%s14870_s1 + $0x78] sm:$0xff] }
  0x2a   :  { %9303 = vmatprep.subr.bf16.mxu0 %v14879_v0  ;;  %9307 = vmatprep.mubr.msk.bf16.mxu0 %vm10480_vm0, %v14879_v0  ;;  %v82_v3 = vld [vmem:[%s14870_s1 + $0x60] sm:$0xff]  ;;  %v10552_v4 = vpack.c.bf16 %v85_v2, %v84_v1  ;;  %v83_v5 = vld [vmem:[%s14870_s1 + $0x68] sm:$0xff]  ;;  %v80_v7 = vld [vmem:[%s14870_s1 + $0x50] sm:$0xff]  ;;  %vm221_vm1 = vcmask 261120   ;;  %v14877_v42 = vmov 0   ;;  %s10483_s25 = smov 96  }
  0x2b   :  { %v10557_v6 = vpack.c.bf16 %v83_v5, %v82_v3  ;;  %v81_v8 = vld [vmem:[%s14870_s1 + $0x58] sm:$0xff]  ;;  %v78_v9 = vld [vmem:[%s14870_s1 + $0x40] sm:$0xff]  ;;  %v79_v11 = vld [vmem:[%s14870_s1 + $0x48] sm:$0xff]  ;;  %vm1213_vm2 = vcmask 1041408   ;;  %vm1053_vm3 = vcmask 31744   ;;  %vm1582_vm4 = vcmask 523264  }
  0x2c   :  { %9311 = vmatprep.subr.bf16.mxu1 %v10552_v4  ;;  %v10571_v10 = vpack.c.bf16 %v81_v8, %v80_v7  ;;  %v9888_v12 = vld [vmem:[#allocation7] sm:$0xff]   ;;  %v10578_v13 = vpack.c.bf16 %v79_v11, %v78_v9  ;;  %v77_v15 = vld [vmem:[%s14870_s1 + $0x38] sm:$0xff]  ;;  %v74_v16 = vld [vmem:[%s14870_s1 + $0x20] sm:$0xff]  ;;  %v10482_v11 = vmov 1966171168   ;;  %s10484_s28 = smov 32  }
  0x2d   :  { %9312 = vmatpush3.bf16.msra.mxu1 %v10552_v4  ;;  %9327 = vmatprep.mubr.bf16.mxu1 %v9888_v12  ;;  %v76_v14 = vld [vmem:[%s14870_s1 + $0x30] sm:$0xff]  ;;  %v75_v18 = vld [vmem:[%s14870_s1 + $0x28] sm:$0xff]  ;;  %v68_v21 = vld [vmem:[#allocation2] sm:$0xff]  ;;  %v624_v12 = vunpack.c.l.s4 %v10482_v11  ;;  %s10485_s27 = smov [#allocation8]  }
  0x2e   :  { %9313 = vmatprep.subr.bf16.mxu1 %v10557_v6  ;;  %v10591_v17 = vpack.c.bf16 %v77_v15, %v76_v14  ;;  %v9896_v19 = vld [vmem:[%s14871_s2 + $0x4c] ss:$36 sps:$4 sm:$0xff]   ;;  %v9897_v20 = vld [vmem:[%s14871_s2 + $0x4] ss:$36 sps:$4 sm:$0xff]   ;;  %v73_v24 = vld [vmem:[%s14870_s1 + $0x18] sm:$0xff]  ;;  %v10610_v25 = vpack.c.bf16 %v75_v18, %v74_v16  ;;  %v626_v14 = vlaneseq  ;;  %s8775_s29 = sshll.u32 %s10485_s27, 4  ;;  %s8776_s29 = int_to_ptr.vmem [resolvable:$true] %s8775_s29 }
  0x2f   :  { %v69_v22 = vld [vmem:[#allocation2 + $0x8] sm:$0xff]  ;;  %v72_v23 = vld [vmem:[%s14870_s1 + $0x10] sm:$0xff]  ;;  %9304 = vmatpush3.bf16.msra.mxu0 %v9896_v19  ;;  %v70_v27 = vld [vmem:[%s14870_s1] sm:$0xff]  ;;  %v625_v15 = vunpack.c.0.s8 %v624_v12  ;;  %s10444_s30 = scalar_lea.vmem %s8776_s29, 256  ;;  %p10449_p2 = scmp.lt.s32.totalorder %s8776_s29, %s8776_s29 }
  0x30   :  { %9305 = vmatprep.subr.bf16.mxu0 %v14879_v0  ;;  %v208_v26 = vpack.c.bf16 %v69_v22, %v68_v21  ;;  %v71_v28 = vld [vmem:[%s14870_s1 + $0x8] sm:$0xff]  ;;  %v10621_v29 = vpack.c.bf16 %v73_v24, %v72_v23  ;;  %v9889_v31 = vld [vmem:[#allocation7 + $0x8] sm:$0xff]   ;;  %v9890_v32 = vld [vmem:[#allocation7 + $0x10] sm:$0xff]   ;;  %v627_v16 = vshrl.u32 %v626_v14, 7  ;;  %p10445_p1 = scmp.ne.s32.totalorder %s8776_s29, %s10444_s30  ;;  %p10450_p3 = scmp.lt.s32.totalorder %s10444_s30, %s10444_s30 }
  0x31   :  { %9314 = vmatpush3.bf16.msra.mxu1 %v10557_v6  ;;  %v10626_v30 = vpack.c.bf16 %v71_v28, %v70_v27  ;;  %v9891_v33 = vld [vmem:[#allocation7 + $0x18] sm:$0xff]   ;;  %v9892_v34 = vld [vmem:[#allocation7 + $0x20] sm:$0xff]   ;;  %v9893_v35 = vld [vmem:[#allocation7 + $0x28] sm:$0xff]  }
  0x32   :  { %9315 = vmatprep.subr.bf16.mxu1 %v10571_v10  ;;  %v9894_v36 = vld [vmem:[#allocation7 + $0x30] sm:$0xff]   ;;  %v9895_v37 = vld [vmem:[#allocation7 + $0x38] sm:$0xff]   ;;  %v9900_v38 = vld [vmem:[%s14871_s2 + $0x54] ss:$36 sps:$4 sm:$0xff]   ;;  %v10670_v23 = vsub.s32 0, %v627_v16  ;;  %p10451_p4 = por %p10450_p3, %p10449_p2 }
  0x33   :  { %9306 = vmatpush3.bf16.msra.mxu0 %v9897_v20  ;;  %v9898_v39 = vld [vmem:[%s14871_s2 + $0x50] ss:$36 sps:$4 sm:$0xff]   ;;  %v9901_v41 = vld [vmem:[%s14871_s2 + $0x8] ss:$36 sps:$4 sm:$0xff]   ;;  %v8792_v18 = vld [vmem:[%s14874_s5 + $0x4] ss:$0 sm:$0xff]  ;;  %v10666_v20 = vsub.s32 %v625_v15, %v627_v16 }
  0x34   :  { %483 = vmatprep.subr.bf16.mxu0 %v9900_v38  ;;  %v9903_v40 = vld [vmem:[%s14871_s2 + $0xc] ss:$36 sps:$4 sm:$0xff]   ;;  %p10452_p5 = pnand %p10451_p4, %p10445_p1 }
  0x35   :  { %9316 = vmatpush3.bf16.msra.mxu1 %v10571_v10  ;;  %14959 = vst [vmem:[#allocation12_spill] sm:$0xff] %v10666_v20  ;;  %v9904_v27 = vld [vmem:[%s14871_s2 + $0x68] ss:$36 sps:$4 sm:$0xff]  }
  0x36   :  { %9317 = vmatprep.subr.bf16.mxu1 %v10578_v13  ;;  %9308 = vmatmul.mubr.msk.bf16.vlgmr.msra.gmra.mxu0 %vm221_vm1, %v208_v26  ;;  %v10676_v26 = vld [vmem:[%s14874_s5 + $0x5] ss:$0 sm:$0xff] }
  0x37   :  { %484 = vmatpush1.bf16.msra.mxu0 %v9898_v39  ;;  %503 = vmatprep.mubr.bf16.mxu0 %v14877_v42 }
  0x38   :  { %485 = vmatprep.subr.bf16.mxu0 %v9903_v40 }
  0x39   :  { %9318 = vmatpush3.bf16.msra.mxu1 %v10578_v13 }
  0x3a   :  { %9319 = vmatprep.subr.bf16.mxu1 %v10591_v17 }
  0x3b   :  { %486 = vmatpush1.bf16.msra.mxu0 %v9901_v41 }
  0x3d   :  { %9320 = vmatpush3.bf16.msra.mxu1 %v10591_v17 }
  0x3e   :  { %9321 = vmatprep.subr.bf16.mxu1 %v10610_v25 }
  0x41   :  { %9322 = vmatpush3.bf16.msra.mxu1 %v10610_v25 }
  0x42   :  { %9323 = vmatprep.subr.bf16.mxu1 %v10621_v29 }
  0x45   :  { %9324 = vmatpush3.bf16.msra.mxu1 %v10621_v29 }
  0x46   :  { %9325 = vmatprep.subr.bf16.mxu1 %v10626_v30 }
  0x49   :  { %9326 = vmatpush3.bf16.msra.mxu1 %v10626_v30 }
  0x4a   :  { %9343 = vmatprep.subr.bf16.mxu1 %v9904_v27 }
  0x4c   :  { %9328 = vmatmul.mubr.bf16.vlgmr.msra.gmra.mxu1 %v9889_v31 }
  0x4d   :  { %9331 = vmatprep.mubr.bf16.mxu1 %v9890_v32  ;;  %9344 = vmatpush3.bf16.msra.mxu1 %v9904_v27 }
  0x54   :  { %9332 = vmatmul.mubr.bf16.gmra.mxu1 %v9891_v33 }
  0x55   :  { %9335 = vmatprep.mubr.bf16.mxu1 %v9892_v34 }
  0x5c   :  { %9336 = vmatmul.mubr.bf16.gmra.mxu1 %v9893_v35  ;;  %v9905_v35 = vld [vmem:[%s14871_s2 + $0x20] ss:$36 sps:$4 sm:$0xff]  }
  0x5d   :  { %9339 = vmatprep.mubr.bf16.mxu1 %v9894_v36  ;;  %9345 = vmatprep.subr.bf16.mxu1 %v9905_v35 }
  0x5e   :  { %9346 = vmatpush3.bf16.msra.mxu1 %v9905_v35 }
  0x5f   :  { %9381 = vmatprep.subr.bf16.mxu1 %v14879_v0 }
  0x64   :  { %9340 = vmatmul.mubr.bf16.gmra.mxu1 %v9895_v37 }
  0xf6   :  { %v259_v43 = vpop.f32.mrf.mxu0 }
  0xf7   :  { %v10664_v19 = vadd.f32 %v8792_v18, %v259_v43 }
  0xf8   :  { %v9309_v44 = vpop.f32.mrf.mxu0 }
  0xf9   :  { %v629_v21 = vrot.slane %v10664_v19, %v10666_v20  ;;  %v622_v38 = vcombine.high %v10664_v19, %v10664_v19 }
  0xfa   :  { %v10644_v45 = vpop.f32.mrf.mxu0 }
  0xfb   :  { %v637_v22 = vcombine.high %v629_v21, %v629_v21  ;;  %v645_v24 = vrot.slane %v629_v21, %v10666_v20 }
  0xfc   :  { %v9310_v46 = vpop.f32.mrf.mxu0 }
  0xfd   :  { %v659_v32 = vrot.slane %v637_v22, %v10666_v20  ;;  %v723_v33 = vrot.slane %v645_v24, %v10670_v23  ;;  %v667_v41 = vcombine.high %v645_v24, %v645_v24 }
  0xff   :  { %v727_v40 = vrot.slane %v659_v32, %v10670_v23 }
 0x10c   :  { %v9329_v47 = vpop.f32.mrf.mxu1 }
 0x10e   :  { %v356_v48 = vpop.f32.mrf.mxu1 }
 0x110   :  { %v9330_v49 = vpop.f32.mrf.mxu1 }
 0x111   :  { %v420_v54 = vpack.c.bf16 %v9330_v49, %v9329_v47  ;;  %v731_v49 = vrot.slane %v667_v41, %v10670_v23 }
 0x112   :  { %v359_v50 = vpop.f32.mrf.mxu1 }
 0x113   :  { %v419_v51 = vpack.c.bf16 %v359_v50, %v356_v48  ;;  %v669_v48 = vcombine.high %v659_v32, %v659_v32  ;;  %v636_v50 = vrot.slane %v622_v38, %v10666_v20 }
 0x114   :  { %v9333_v52 = vpop.f32.mrf.mxu1 }
 0x115   :  { %8815 = vmatmul.mubr.msk.bf16.vlgmr.msra.gmra.mxu0 %vm221_vm1, %v419_v51 }
 0x116   :  { %513 = vmatprep.mubr.bf16.mxu0 %v14877_v42  ;;  %v372_v53 = vpop.f32.mrf.mxu1 }
 0x118   :  { %v9334_v55 = vpop.f32.mrf.mxu1 }
 0x119   :  { %v422_v60 = vpack.c.bf16 %v9334_v55, %v9333_v52  ;;  %v735_v55 = vrot.slane %v669_v48, %v10670_v23 }
 0x11a   :  { %v375_v56 = vpop.f32.mrf.mxu1 }
 0x11b   :  { %v421_v57 = vpack.c.bf16 %v375_v56, %v372_v53  ;;  %v652_v56 = vrot.slane %v636_v50, %v10666_v20 }
 0x11c   :  { %v9337_v58 = vpop.f32.mrf.mxu1 }
 0x11d   :  { %8816 = vmatmul.mubr.msk.bf16.gmra.mxu0 %vm221_vm1, %v420_v54 }
 0x11e   :  { %523 = vmatprep.mubr.bf16.mxu0 %v14877_v42  ;;  %v388_v59 = vpop.f32.mrf.mxu1 }
 0x120   :  { %v9338_v61 = vpop.f32.mrf.mxu1 }
 0x121   :  { %v424_v3 = vpack.c.bf16 %v9338_v61, %v9337_v58 }
 0x122   :  { %v391_v62 = vpop.f32.mrf.mxu1 }
 0x123   :  { %v423_v63 = vpack.c.bf16 %v391_v62, %v388_v59  ;;  %v739_v62 = vrot.slane %v652_v56, %v10670_v23 }
 0x124   :  { %v9341_v1 = vpop.f32.mrf.mxu1 }
 0x125   :  { %8817 = vmatmul.mubr.msk.bf16.gmra.mxu0 %vm221_vm1, %v421_v57  ;;  %v638_v57 = vcombine.high %v636_v50, %v636_v50 }
 0x126   :  { %533 = vmatprep.mubr.bf16.mxu0 %v14877_v42  ;;  %v404_v2 = vpop.f32.mrf.mxu1 }
 0x128   :  { %v9342_v5 = vpop.f32.mrf.mxu1 }
 0x129   :  { %v426_v9 = vpack.c.bf16 %v9342_v5, %v9341_v1  ;;  %v10762_v5 = vadd.f32 %v8792_v18, %v10644_v45 }
 0x12a   :  { %v407_v7 = vpop.f32.mrf.mxu1 }
 0x12b   :  { %v425_v8 = vpack.c.bf16 %v407_v7, %v404_v2  ;;  %v678_v18 = vrot.slane %v10762_v5, %v10666_v20 }
 0x12d   :  { %8818 = vmatmul.mubr.msk.bf16.gmra.mxu0 %vm221_vm1, %v422_v60  ;;  %v686_v35 = vcombine.high %v678_v18, %v678_v18 }
 0x12e   :  { %543 = vmatprep.mubr.bf16.mxu0 %v14877_v42 }
 0x12f   :  { %v708_v50 = vrot.slane %v686_v35, %v10666_v20 }
 0x135   :  { %8819 = vmatmul.mubr.msk.bf16.gmra.mxu0 %vm221_vm1, %v423_v63  ;;  %v666_v63 = vrot.slane %v638_v57, %v10666_v20 }
 0x136   :  { %553 = vmatprep.mubr.bf16.mxu0 %v14877_v42 }
 0x137   :  { %v670_v16 = vcombine.high %v666_v63, %v666_v63 }
 0x139   :  { %v751_v32 = vrot.slane %v670_v16, %v10670_v23 }
 0x13d   :  { %8820 = vmatmul.mubr.msk.bf16.gmra.mxu0 %vm221_vm1, %v424_v3 }
 0x13e   :  { %563 = vmatprep.mubr.bf16.mxu0 %v14877_v42 }
 0x145   :  { %8821 = vmatmul.mubr.msk.bf16.gmra.mxu0 %vm221_vm1, %v425_v8  ;;  %v743_v8 = vrot.slane %v666_v63, %v10670_v23  ;;  %v759_v63 = vrot.slane %v708_v50, %v10670_v23 }
 0x146   :  { %573 = vmatprep.mubr.bf16.mxu0 %v14877_v42 }
 0x14d   :  { %8822 = vmatmul.mubr.msk.bf16.gmra.mxu0 %vm221_vm1, %v426_v9  ;;  %v668_v9 = vcombine.high %v652_v56, %v652_v56 }
 0x14f   :  { %v747_v15 = vrot.slane %v668_v9, %v10670_v23  ;;  %v671_v9 = vcombine.high %v10762_v5, %v10762_v5 }
 0x1d5   :  { %v10681_v28 = vpop.f32.mrf.mxu0 }
 0x1d6   :  { %v10685_v31 = vadd.f32 %v10676_v26, %v10681_v28 }
 0x1d7   :  { %v10689_v34 = vpop.f32.mrf.mxu0 }
 0x1d8   :  { %v10695_v36 = vadd.f32 %v723_v33, %v10685_v31  ;;  %v694_v33 = vrot.slane %v678_v18, %v10666_v20 }
 0x1d9   :  { %v10697_v37 = vpop.f32.mrf.mxu0 }
 0x1da   :  { %v10703_v39 = vadd.f32 %v10676_v26, %v10697_v37  ;;  %832 = vrot.lane.b32.xlu0 %v10695_v36, %s10483_s25 }
 0x1db   :  { %v10708_v43 = vpop.f32.mrf.mxu0 }
 0x1dc   :  { %v10712_v44 = vadd.f32 %v727_v40, %v10703_v39 }
 0x1dd   :  { %v10714_v46 = vpop.f32.mrf.mxu0 }
 0x1de   :  { %v10718_v47 = vadd.f32 %v10676_v26, %v10714_v46  ;;  %834 = vrot.lane.b32.xlu0 %v10712_v44, %s10483_s25 }
 0x1df   :  { %v10724_v51 = vpop.f32.mrf.mxu0 }
 0x1e0   :  { %v10727_v52 = vadd.f32 %v731_v49, %v10718_v47  ;;  %v755_v49 = vrot.slane %v694_v33, %v10670_v23 }
 0x1e1   :  { %v10729_v53 = vpop.f32.mrf.mxu0 }
 0x1e2   :  { %v10733_v54 = vadd.f32 %v10676_v26, %v10729_v53  ;;  %836 = vrot.lane.b32.xlu1 %v10727_v52, %s10483_s25 }
 0x1e3   :  { %v10739_v58 = vpop.f32.mrf.mxu0 }
 0x1e4   :  { %v10742_v59 = vadd.f32 %v735_v55, %v10733_v54 }
 0x1e5   :  { %v10744_v60 = vpop.f32.mrf.mxu0 }
 0x1e6   :  { %v10748_v61 = vadd.f32 %v10676_v26, %v10744_v60  ;;  %838 = vrot.lane.b32.xlu1 %v10742_v59, %s10483_s25 }
 0x1e7   :  { %v10754_v1 = vpop.f32.mrf.mxu0 }
 0x1e8   :  { %v10757_v2 = vadd.f32 %v739_v62, %v10748_v61 }
 0x1e9   :  { %v10759_v3 = vpop.f32.mrf.mxu0 }
 0x1ea   :  { %v10766_v7 = vadd.f32 %v10676_v26, %v10759_v3  ;;  %840 = vrot.lane.b32.xlu0 %v10757_v2, %s10483_s25 }
 0x1eb   :  { %v10771_v11 = vpop.f32.mrf.mxu0 }
 0x1ec   :  { %v10774_v12 = vadd.f32 %v743_v8, %v10766_v7  ;;  %v716_v8 = vcombine.high %v694_v33, %v694_v33  ;;  %v685_v33 = vrot.slane %v671_v9, %v10666_v20 }
 0x1ed   :  { %v10776_v14 = vpop.f32.mrf.mxu0 }
 0x1ee   :  { %14960 = vst [vmem:[#allocation13_spill] sm:$0xff] %v10776_v14  ;;  %v10780_v45 = vadd.f32 %v10676_v26, %v10776_v14  ;;  %842 = vrot.lane.b32.xlu1 %v10774_v12, %s10483_s25  ;;  %v763_v35 = vrot.slane %v716_v8, %v10670_v23  ;;  %v701_v8 = vrot.slane %v685_v33, %v10666_v20 }
 0x1ef   :  { %v10787_v21 = vpop.f32.mrf.mxu0 }
 0x1f0   :  { %v10790_v22 = vadd.f32 %v747_v15, %v10780_v45 }
 0x1f1   :  { %v10792_v24 = vpop.f32.mrf.mxu0 }
 0x1f2   :  { %14961 = vst [vmem:[#allocation14_spill] sm:$0xff] %v10792_v24  ;;  %v10796_v27 = vadd.f32 %v10676_v26, %v10792_v24  ;;  %844 = vrot.lane.b32.xlu0 %v10790_v22, %s10483_s25 }
 0x1f3   :  { %v10802_v38 = vpop.f32.mrf.mxu0 }
 0x1f4   :  { %14962 = vst [vmem:[#allocation15_spill] sm:$0xff] %v10802_v38  ;;  %v10805_v40 = vadd.f32 %v751_v32, %v10796_v27 }
 0x1f5   :  { %v10807_v41 = vpop.f32.mrf.mxu0 }
 0x1f6   :  { %14963 = vst [vmem:[#allocation16_spill] sm:$0xff] %v10807_v41  ;;  %v10811_v48 = vadd.f32 %v10676_v26, %v10807_v41  ;;  %846 = vrot.lane.b32.xlu1 %v10805_v40, %s10483_s25 }
 0x1f7   :  { %v10817_v55 = vpop.f32.mrf.mxu0 }
 0x1f8   :  { %14964 = vst [vmem:[#allocation17_spill] sm:$0xff] %v10817_v55  ;;  %v808_v56 = vadd.f32 %v755_v49, %v10811_v48  ;;  %v718_v49 = vcombine.high %v708_v50, %v708_v50 }
 0x1f9   :  { %v10820_v57 = vpop.f32.mrf.mxu0 }
 0x1fa   :  { %14965 = vst [vmem:[#allocation18_spill] sm:$0xff] %v10820_v57  ;;  %v10824_v62 = vadd.f32 %v10676_v26, %v10820_v57  ;;  %848 = vrot.lane.b32.xlu0 %v808_v56, %s10483_s25 }
 0x1fb   :  { %v10830_v15 = vpop.f32.mrf.mxu0 }
 0x1fc   :  { %14966 = vst [vmem:[#allocation19_spill] sm:$0xff] %v10830_v15  ;;  %v809_v16 = vadd.f32 %v759_v63, %v10824_v62  ;;  %v687_v15 = vcombine.high %v685_v33, %v685_v33 }
 0x1fd   :  { %v10833_v18 = vpop.f32.mrf.mxu0 }
 0x1fe   :  { %14967 = vst [vmem:[#allocation20_spill] sm:$0xff] %v10833_v18  ;;  %v10837_v32 = vadd.f32 %v10676_v26, %v10833_v18  ;;  %850 = vrot.lane.b32.xlu1 %v809_v16, %s10483_s25  ;;  %v767_v18 = vrot.slane %v718_v49, %v10670_v23  ;;  %v715_v49 = vrot.slane %v687_v15, %v10666_v20 }
 0x1ff   :  { %v10842_v42 = vpop.f32.mrf.mxu0 }
 0x200   :  { %14968 = vst [vmem:[#allocation21_spill] sm:$0xff] %v10842_v42  ;;  %v810_v0 = vadd.f32 %v763_v35, %v10837_v32 }
 0x201   :  { %v10845_v57 = vpop.f32.mrf.mxu0 }
 0x202   :  { %14969 = vst [vmem:[#allocation22_spill] sm:$0xff] %v10845_v57  ;;  %v10849_v63 = vadd.f32 %v10676_v26, %v10845_v57  ;;  %852 = vrot.lane.b32.xlu0 %v810_v0, %s10483_s25  ;;  %v771_v57 = vrot.slane %v701_v8, %v10670_v23 }
 0x203   :  { %v10854_v50 = vpop.f32.mrf.mxu0 }
 0x204   :  { %14970 = vst [vmem:[#allocation23_spill] sm:$0xff] %v10854_v50  ;;  %v811_v9 = vadd.f32 %v767_v18, %v10849_v63  ;;  %v775_v50 = vrot.slane %v715_v49, %v10670_v23 }
 0x205   :  { %v10857_v42 = vpop.f32.mrf.mxu0 }
 0x206   :  { %14971 = vst [vmem:[#allocation24_spill] sm:$0xff] %v10857_v42  ;;  %v10861_v35 = vadd.f32 %v10676_v26, %v10857_v42  ;;  %854 = vrot.lane.b32.xlu1 %v811_v9, %s10483_s25  ;;  %v717_v42 = vcombine.high %v701_v8, %v701_v8 }
 0x207   :  { %v10866_v41 = vpop.f32.mrf.mxu0 }
 0x208   :  { %14972 = vst [vmem:[#allocation25_spill] sm:$0xff] %v10866_v41  ;;  %v812_v33 = vadd.f32 %v771_v57, %v10861_v35  ;;  %v779_v20 = vrot.slane %v717_v42, %v10670_v23  ;;  %v604_v42 = vadd.f32 %v10685_v31, %v10664_v19 }
 0x209   :  { %v10869_v55 = vpop.f32.mrf.mxu0 }
 0x20a   :  { %14973 = vst [vmem:[#allocation26_spill] sm:$0xff] %v10869_v55  ;;  %v10873_v18 = vadd.f32 %v10676_v26, %v10869_v55  ;;  %856 = vrot.lane.b32.xlu0 %v812_v33, %s10483_s25  ;;  %v719_v55 = vcombine.high %v715_v49, %v715_v49  ;;  %v611_v49 = vadd.f32 %v10796_v27, %v10664_v19 }
 0x20b   :  { %v10877_v24 = vpop.f32.mrf.mxu0  ;;  %v614_v27 = vadd.f32 %v10837_v32, %v10762_v5 }
 0x20c   :  { %14974 = vst [vmem:[#allocation27_spill] sm:$0xff] %v10877_v24  ;;  %v813_v38 = vadd.f32 %v775_v50, %v10873_v18  ;;  %v783_v24 = vrot.slane %v719_v55, %v10670_v23 }
 0x20d   :  { %v10880_v15 = vpop.f32.mrf.mxu0 }
 0x20e   :  { %14975 = vst [vmem:[#allocation28_spill] sm:$0xff] %v10880_v15  ;;  %v10884_v57 = vadd.f32 %v10676_v26, %v10880_v15  ;;  %858 = vrot.lane.b32.xlu1 %v813_v38, %s10483_s25 }
 0x20f   :  { %v10888_v41 = vpop.f32.mrf.mxu0 }
 0x210   :  { %v814_v14 = vadd.f32 %v779_v20, %v10884_v57  ;;  %v605_v20 = vadd.f32 %v10703_v39, %v10664_v19 }
 0x211   :  { %v10891_v8 = vpop.f32.mrf.mxu0 }
 0x212   :  { %v10895_v50 = vadd.f32 %v10676_v26, %v10891_v8  ;;  %860 = vrot.lane.b32.xlu0 %v814_v14, %s10483_s25 }
 0x214   :  { %v815_v15 = vadd.f32 %v783_v24, %v10895_v50 }
 0x216   :  { %1314 = vrot.lane.b32.xlu0 %v10695_v36, %s10477_s17  ;;  %862 = vrot.lane.b32.xlu1 %v815_v15, %s10483_s25 }
 0x21a   :  { %1330 = vrot.lane.b32.xlu0 %v808_v56, %s10477_s17  ;;  %1316 = vrot.lane.b32.xlu1 %v10712_v44, %s10477_s17 }
 0x21e   :  { %1318 = vrot.lane.b32.xlu0 %v10727_v52, %s10477_s17  ;;  %1332 = vrot.lane.b32.xlu1 %v809_v16, %s10477_s17 }
 0x222   :  { %1320 = vrot.lane.b32.xlu0 %v10742_v59, %s10477_s17  ;;  %1334 = vrot.lane.b32.xlu1 %v810_v0, %s10477_s17 }
 0x226   :  { %1322 = vrot.lane.b32.xlu0 %v10757_v2, %s10477_s17  ;;  %1336 = vrot.lane.b32.xlu1 %v811_v9, %s10477_s17  ;;  %v606_v2 = vadd.f32 %v10718_v47, %v10664_v19  ;;  %v610_v9 = vadd.f32 %v10780_v45, %v10664_v19 }
 0x22a   :  { %1324 = vrot.lane.b32.xlu0 %v10774_v12, %s10477_s17  ;;  %1338 = vrot.lane.b32.xlu1 %v812_v33, %s10477_s17  ;;  %v607_v12 = vadd.f32 %v10733_v54, %v10664_v19 }
 0x22e   :  { %1326 = vrot.lane.b32.xlu0 %v10790_v22, %s10477_s17  ;;  %1340 = vrot.lane.b32.xlu1 %v813_v38, %s10477_s17  ;;  %v608_v38 = vadd.f32 %v10748_v61, %v10664_v19 }
 0x232   :  { %1328 = vrot.lane.b32.xlu0 %v10805_v40, %s10477_s17  ;;  %1342 = vrot.lane.b32.xlu1 %v814_v14, %s10477_s17  ;;  %v609_v40 = vadd.f32 %v10766_v7, %v10664_v19 }
 0x236   :  { %1344 = vrot.lane.b32.xlu1 %v815_v15, %s10477_s17 }
 0x24c   :  { %v833_v0 = vpop.permute.xlu0 %832 }
 0x24d   :  { %v880_v36 = vmul.f32 %v833_v0, %v604_v42  ;;  %v612_v42 = vadd.f32 %v10811_v48, %v10762_v5 }
 0x250   :  { %v835_v26 = vpop.permute.xlu0 %834 }
 0x251   :  { %v881_v44 = vmul.f32 %v835_v26, %v605_v20  ;;  %v613_v20 = vadd.f32 %v10824_v62, %v10762_v5 }
 0x253   :  { %v896_v52 = vpack.c.bf16 %v881_v44, %v880_v36 }
 0x254   :  { %v837_v59 = vpop.permute.xlu1 %836 }
 0x255   :  { %9347 = vmatprep.mubr.msk.bf16.mxu1 %vm221_vm1, %v896_v52  ;;  %v882_v22 = vmul.f32 %v837_v59, %v606_v2  ;;  %v615_v52 = vadd.f32 %v10849_v63, %v10762_v5 }
 0x258   :  { %v839_v14 = vpop.permute.xlu1 %838 }
 0x259   :  { %v883_v24 = vmul.f32 %v839_v14, %v607_v12  ;;  %v616_v14 = vadd.f32 %v10861_v35, %v10762_v5 }
 0x25b   :  { %v897_v31 = vpack.c.bf16 %v883_v24, %v882_v22  ;;  %v617_v22 = vadd.f32 %v10873_v18, %v10762_v5  ;;  %v14976_v18 = vmov 0.0  }
 0x25c   :  { %v841_v39 = vpop.permute.xlu0 %840 }
 0x25d   :  { %9348 = vmatmul.mubr.msk.bf16.vlgmr.msra.gmra.mxu1 %vm221_vm1, %v897_v31  ;;  %v884_v56 = vmul.f32 %v841_v39, %v608_v38  ;;  %v618_v38 = vadd.f32 %v10884_v57, %v10762_v5 }
 0x260   :  { %v843_v55 = vpop.permute.xlu1 %842 }
 0x261   :  { %v885_v16 = vmul.f32 %v843_v55, %v609_v40  ;;  %v619_v40 = vadd.f32 %v10895_v50, %v10762_v5 }
 0x263   :  { %v898_v47 = vpack.c.bf16 %v885_v16, %v884_v56 }
 0x264   :  { %v845_v54 = vpop.permute.xlu0 %844 }
 0x265   :  { %9351 = vmatprep.mubr.msk.bf16.mxu1 %vm221_vm1, %v898_v47  ;;  %v886_v15 = vmul.f32 %v845_v54, %v610_v9  ;;  %v158_v47 = vld [vmem:[%s14874_s5] sm:$0xf] }
 0x266   :  { %v10970_v54 = vpack.c.bf16 %v158_v47, %v158_v47 }
 0x268   :  { %v847_v33 = vpop.permute.xlu1 %846  ;;  %14977 = vst [vmem:[#allocation29_spill] sm:$0xff] %v10970_v54  ;;  %9869 = vmatprep.subr.msk.bf16.mxu0 %vm1213_vm2, %v10970_v54  ;;  %v10976_v5 = vsel %vm1213_vm2, %v10970_v54, 0 }
 0x269   :  { %v887_v0 = vmul.f32 %v847_v33, %v611_v49  ;;  %14978 = vst [vmem:[#allocation30_spill] sm:$0xff] %v10976_v5  ;;  %9364 = vmatpush3.bf16.msra.mxu0 %v10976_v5 }
 0x26a   :  { %9397 = vmatprep.subr.bf16.mxu0 %v14976_v18 }
 0x26b   :  { %v899_v61 = vpack.c.bf16 %v887_v0, %v886_v15 }
 0x26c   :  { %v849_v7 = vpop.permute.xlu0 %848 }
 0x26d   :  { %9352 = vmatmul.mubr.msk.bf16.gmra.mxu1 %vm221_vm1, %v899_v61  ;;  %v888_v36 = vmul.f32 %v849_v7, %v612_v42 }
 0x270   :  { %v851_v26 = vpop.permute.xlu1 %850 }
 0x271   :  { %v889_v44 = vmul.f32 %v851_v26, %v613_v20 }
 0x273   :  { %v900_v45 = vpack.c.bf16 %v889_v44, %v888_v36 }
 0x274   :  { %v853_v19 = vpop.permute.xlu0 %852 }
 0x275   :  { %9355 = vmatprep.mubr.msk.bf16.mxu1 %vm221_vm1, %v900_v45  ;;  %v890_v2 = vmul.f32 %v853_v19, %v614_v27 }
 0x278   :  { %v855_v59 = vpop.permute.xlu1 %854 }
 0x279   :  { %v891_v12 = vmul.f32 %v855_v59, %v615_v52 }
 0x27b   :  { %v901_v48 = vpack.c.bf16 %v891_v12, %v890_v2 }
 0x27c   :  { %v857_v62 = vpop.permute.xlu0 %856 }
 0x27d   :  { %9356 = vmatmul.mubr.msk.bf16.gmra.mxu1 %vm221_vm1, %v901_v48  ;;  %v892_v31 = vmul.f32 %v857_v62, %v616_v14 }
 0x280   :  { %v859_v24 = vpop.permute.xlu1 %858 }
 0x281   :  { %v893_v39 = vmul.f32 %v859_v24, %v617_v22 }
 0x283   :  { %v902_v32 = vpack.c.bf16 %v893_v39, %v892_v31 }
 0x284   :  { %v861_v63 = vpop.permute.xlu0 %860 }
 0x285   :  { %9359 = vmatprep.mubr.msk.bf16.mxu1 %vm221_vm1, %v902_v32  ;;  %v894_v56 = vmul.f32 %v861_v63, %v618_v38 }
 0x288   :  { %v863_v55 = vpop.permute.xlu1 %862 }
 0x289   :  { %v895_v16 = vmul.f32 %v863_v55, %v619_v40 }
 0x28b   :  { %v903_v35 = vpack.c.bf16 %v895_v16, %v894_v56 }
 0x28d   :  { %9360 = vmatmul.mubr.msk.bf16.gmra.mxu1 %vm221_vm1, %v903_v35 }
 0x28e   :  { %9385 = vmatprep.mubr.msk.bf16.mxu1 %vm10480_vm0, %v14976_v18 }
 0x31d   :  { %v9349_v57 = vpop.f32.mrf.mxu1 }
 0x31e   :  { %v1039_v0 = vmul.f32 0.35355338, %v9349_v57 }
 0x31f   :  { %v974_v50 = vpop.f32.mrf.mxu1 }
 0x320   :  { %v1037_v33 = vmul.f32 0.35355338, %v974_v50  ;;  %v1056_v44 = vsel %vm1053_vm3, %v1039_v0, -inf }
 0x321   :  { %v9350_v9 = vpop.f32.mrf.mxu1 }
 0x322   :  { %v1040_v7 = vmul.f32 0.35355338, %v9350_v9  ;;  %v1054_v20 = vsel %vm1053_vm3, %v1037_v33, -inf }
 0x323   :  { %v977_v49 = vpop.f32.mrf.mxu1  ;;  %v1057_v27 = vmax.f32 %v1054_v20, %v1056_v44 }
 0x324   :  { %v1038_v61 = vmul.f32 0.35355338, %v977_v49  ;;  %v1058_v52 = vsel %vm1053_vm3, %v1040_v7, -inf }
 0x326   :  { %v1055_v45 = vsel %vm1053_vm3, %v1038_v61, -inf }
 0x327   :  { %v1059_v62 = vmax.f32 %v1055_v45, %v1058_v52 }
 0x32d   :  { %v9353_v15 = vpop.f32.mrf.mxu1 }
 0x32e   :  { %v1043_v2 = vmul.f32 0.35355338, %v9353_v15 }
 0x32f   :  { %v990_v42 = vpop.f32.mrf.mxu1 }
 0x330   :  { %v1041_v26 = vmul.f32 0.35355338, %v990_v42  ;;  %v1064_v31 = vsel %vm1053_vm3, %v1043_v2, -inf }
 0x331   :  { %v9354_v36 = vpop.f32.mrf.mxu1 }
 0x332   :  { %v1060_v19 = vsel %vm1053_vm3, %v1041_v26, -inf  ;;  %v1044_v12 = vmul.f32 0.35355338, %v9354_v36 }
 0x333   :  { %v993_v59 = vpop.f32.mrf.mxu1  ;;  %v1061_v14 = vmax.f32 %v1057_v27, %v1060_v19 }
 0x334   :  { %v1042_v48 = vmul.f32 0.35355338, %v993_v59  ;;  %v1066_v39 = vsel %vm1053_vm3, %v1044_v12, -inf }
 0x335   :  { %v1065_v32 = vmax.f32 %v1061_v14, %v1064_v31 }
 0x336   :  { %v1062_v22 = vsel %vm1053_vm3, %v1042_v48, -inf }
 0x337   :  { %v1063_v24 = vmax.f32 %v1059_v62, %v1062_v22 }
 0x339   :  { %v1067_v63 = vmax.f32 %v1063_v24, %v1066_v39 }
 0x33b   :  { %v1068_v38 = vmax.f32 %v1065_v32, %v1067_v63 }
 0x33d   :  { %v1084_v40 = vsub.f32 %v1037_v33, %v1068_v38  ;;  %v1085_v55 = vsub.f32 %v1038_v61, %v1068_v38  ;;  %v1086_v56 = vsub.f32 %v1039_v0, %v1068_v38  ;;  %v1087_v16 = vsub.f32 %v1040_v7, %v1068_v38  ;;  %v9357_v9 = vpop.f32.mrf.mxu1 }
 0x33e   :  { %v1088_v35 = vsub.f32 %v1041_v26, %v1068_v38  ;;  %v1089_v49 = vsub.f32 %v1042_v48, %v1068_v38  ;;  %v1090_v42 = vsub.f32 %v1043_v2, %v1068_v38  ;;  %v1091_v44 = vsub.f32 %v1044_v12, %v1068_v38 }
 0x33f   :  { %v1100_v47 = vmul.f32 1.442695, %v1084_v40  ;;  %v1102_v57 = vmul.f32 1.442695, %v1085_v55  ;;  %v1104_v50 = vmul.f32 1.442695, %v1086_v56  ;;  %v1006_v36 = vpop.f32.mrf.mxu1 }
 0x340   :  { %v1106_v15 = vmul.f32 1.442695, %v1087_v16  ;;  %v1108_v20 = vmul.f32 1.442695, %v1088_v35  ;;  %v1110_v45 = vmul.f32 1.442695, %v1089_v49 }
 0x341   :  { %9932 = vpow2.f32 %v1100_v47  ;;  %v1112_v33 = vmul.f32 1.442695, %v1090_v42  ;;  %v9358_v0 = vpop.f32.mrf.mxu1  ;;  %v1114_v61 = vmul.f32 1.442695, %v1091_v44  ;;  %v1045_v26 = vmul.f32 0.35355338, %v1006_v36 }
 0x342   :  { %9934 = vpow2.f32 %v1102_v57  ;;  %v1047_v52 = vmul.f32 0.35355338, %v9357_v9  ;;  %v1048_v24 = vmul.f32 0.35355338, %v9358_v0 }
 0x343   :  { %9936 = vpow2.f32 %v1104_v50  ;;  %v1009_v7 = vpop.f32.mrf.mxu1  ;;  %v1069_v22 = vsel %vm1053_vm3, %v1045_v26, -inf }
 0x344   :  { %9938 = vpow2.f32 %v1106_v15  ;;  %v1046_v59 = vmul.f32 0.35355338, %v1009_v7  ;;  %v1071_v40 = vsel %vm1053_vm3, %v1047_v52, -inf  ;;  %v1073_v49 = vsel %vm1053_vm3, %v1048_v24, -inf }
 0x345   :  { %9940 = vpow2.f32 %v1108_v20  ;;  %v1072_v47 = vmax.f32 %v1069_v22, %v1071_v40 }
 0x346   :  { %9942 = vpow2.f32 %v1110_v45  ;;  %v1070_v55 = vsel %vm1053_vm3, %v1046_v59, -inf }
 0x347   :  { %9944 = vpow2.f32 %v1112_v33  ;;  %v1074_v44 = vmax.f32 %v1070_v55, %v1073_v49 }
 0x348   :  { %9946 = vpow2.f32 %v1114_v61 }
 0x34d   :  { %v9361_v19 = vpop.f32.mrf.mxu1 }
 0x34e   :  { %v10988_v27 = vpop.eup %9932  ;;  %v1051_v57 = vmul.f32 0.35355338, %v9361_v19 }
 0x34f   :  { %v10990_v2 = vpop.eup %9934  ;;  %v1132_v12 = vsel %vm1053_vm3, %v10988_v27, 0.0  ;;  %v1022_v48 = vpop.f32.mrf.mxu1 }
 0x350   :  { %v10994_v62 = vpop.eup %9936  ;;  %v1133_v14 = vsel %vm1053_vm3, %v10990_v2, 0.0  ;;  %v1049_v31 = vmul.f32 0.35355338, %v1022_v48  ;;  %v1079_v48 = vsel %vm1053_vm3, %v1051_v57, -inf }
 0x351   :  { %v10999_v39 = vpop.eup %9938  ;;  %v1134_v32 = vadd.f32 %v1133_v14, %v1132_v12  ;;  %v9362_v63 = vpop.f32.mrf.mxu1  ;;  %v1135_v38 = vsel %vm1053_vm3, %v10994_v62, 0.0 }
 0x352   :  { %v1075_v56 = vsel %vm1053_vm3, %v1049_v31, -inf  ;;  %v9941_v16 = vpop.eup %9940  ;;  %v1137_v9 = vsel %vm1053_vm3, %v10999_v39, 0.0  ;;  %v1052_v15 = vmul.f32 0.35355338, %v9362_v63 }
 0x353   :  { %v1136_v35 = vadd.f32 %v1135_v38, %v1134_v32  ;;  %v1025_v50 = vpop.f32.mrf.mxu1  ;;  %v9943_v20 = vpop.eup %9942  ;;  %v1076_v45 = vmax.f32 %v1072_v47, %v1075_v56  ;;  %v1139_v33 = vsel %vm1053_vm3, %v9941_v16, 0.0 }
 0x354   :  { %v1050_v42 = vmul.f32 0.35355338, %v1025_v50  ;;  %v11011_v61 = vpop.eup %9944  ;;  %v1141_v12 = vsel %vm1053_vm3, %v9943_v20, 0.0  ;;  %v1081_v14 = vsel %vm1053_vm3, %v1052_v15, -inf }
 0x355   :  { %v1138_v36 = vadd.f32 %v1137_v9, %v1136_v35  ;;  %v9947_v22 = vpop.eup %9946  ;;  %v1080_v63 = vmax.f32 %v1076_v45, %v1079_v48  ;;  %v1143_v40 = vsel %vm1053_vm3, %v11011_v61, 0.0 }
 0x356   :  { %v1077_v0 = vsel %vm1053_vm3, %v1050_v42, -inf  ;;  %v1145_v35 = vsel %vm1053_vm3, %v9947_v22, 0.0 }
 0x357   :  { %v1140_v7 = vadd.f32 %v1139_v33, %v1138_v36  ;;  %v1078_v19 = vmax.f32 %v1074_v44, %v1077_v0 }
 0x359   :  { %v1142_v32 = vadd.f32 %v1141_v12, %v1140_v7  ;;  %v1082_v38 = vmax.f32 %v1078_v19, %v1081_v14 }
 0x35b   :  { %v1144_v55 = vadd.f32 %v1143_v40, %v1142_v32  ;;  %v1083_v56 = vmax.f32 %v1080_v63, %v1082_v38 }
 0x35d   :  { %v1146_v47 = vadd.f32 %v1145_v35, %v1144_v55  ;;  %v1092_v50 = vsub.f32 %v1045_v26, %v1083_v56  ;;  %v1093_v9 = vsub.f32 %v1046_v59, %v1083_v56  ;;  %v1094_v49 = vsub.f32 %v1047_v52, %v1083_v56 }
 0x35e   :  { %v1095_v36 = vsub.f32 %v1048_v24, %v1083_v56  ;;  %v1096_v44 = vsub.f32 %v1049_v31, %v1083_v56  ;;  %v1097_v5 = vsub.f32 %v1050_v42, %v1083_v56  ;;  %v1098_v19 = vsub.f32 %v1051_v57, %v1083_v56 }
 0x35f   :  { %9948 = vrcp.f32 %v1146_v47  ;;  %v1116_v33 = vmul.f32 1.442695, %v1092_v50  ;;  %v1118_v0 = vmul.f32 1.442695, %v1093_v9  ;;  %v1120_v7 = vmul.f32 1.442695, %v1094_v49 }
 0x360   :  { %v1122_v45 = vmul.f32 1.442695, %v1095_v36  ;;  %v1124_v12 = vmul.f32 1.442695, %v1096_v44  ;;  %v1099_v48 = vsub.f32 %v1052_v15, %v1083_v56  ;;  %v1126_v14 = vmul.f32 1.442695, %v1097_v5 }
 0x361   :  { %9950 = vpow2.f32 %v1116_v33  ;;  %v1128_v26 = vmul.f32 1.442695, %v1098_v19 }
 0x362   :  { %9952 = vpow2.f32 %v1118_v0  ;;  %v1130_v52 = vmul.f32 1.442695, %v1099_v48 }
 0x363   :  { %9954 = vpow2.f32 %v1120_v7 }
 0x364   :  { %9956 = vpow2.f32 %v1122_v45 }
 0x365   :  { %9958 = vpow2.f32 %v1124_v12 }
 0x366   :  { %9960 = vpow2.f32 %v1126_v14 }
 0x367   :  { %9962 = vpow2.f32 %v1128_v26 }
 0x368   :  { %9964 = vpow2.f32 %v1130_v52 }
 0x36c   :  { %v9949_v59 = vpop.eup %9948 }
 0x36d   :  { %v1164_v24 = vmul.f32 %v9949_v59, %v10988_v27  ;;  %v1165_v31 = vmul.f32 %v9949_v59, %v10990_v2  ;;  %v1166_v42 = vmul.f32 %v9949_v59, %v10994_v62  ;;  %v1167_v57 = vmul.f32 %v9949_v59, %v10999_v39 }
 0x36e   :  { %v9951_v32 = vpop.eup %9950  ;;  %v1168_v63 = vmul.f32 %v9949_v59, %v9941_v16  ;;  %v1169_v15 = vmul.f32 %v9949_v59, %v9943_v20  ;;  %v1170_v20 = vmul.f32 %v9949_v59, %v11011_v61  ;;  %v1171_v9 = vmul.f32 %v9949_v59, %v9947_v22 }
 0x36f   :  { %v9953_v38 = vpop.eup %9952  ;;  %v1147_v5 = vsel %vm1053_vm3, %v9951_v32, 0.0  ;;  %v1180_v40 = vpack.c.bf16 %v1165_v31, %v1164_v24  ;;  %v1181_v55 = vpack.c.bf16 %v1167_v57, %v1166_v42 }
 0x370   :  { %v9955_v56 = vpop.eup %9954  ;;  %v1148_v35 = vsel %vm1053_vm3, %v9953_v38, 0.0  ;;  %v1182_v27 = vpack.c.bf16 %v1169_v15, %v1168_v63  ;;  %v1183_v45 = vpack.c.bf16 %v1171_v9, %v1170_v20 }
 0x371   :  { %v9957_v47 = vpop.eup %9956  ;;  %v1149_v50 = vadd.f32 %v1148_v35, %v1147_v5  ;;  %9365 = vmatprep.mubr.msk.bf16.mxu0 %vm1053_vm3, %v1180_v40  ;;  %v1150_v2 = vsel %vm1053_vm3, %v9955_v56, 0.0 }
 0x372   :  { %9366 = vmatmul.mubr.msk.bf16.vlgmr.msra.gmra.mxu0 %vm1053_vm3, %v1181_v55  ;;  %v9959_v62 = vpop.eup %9958  ;;  %v1152_v16 = vsel %vm1053_vm3, %v9957_v47, 0.0 }
 0x373   :  { %v1151_v39 = vadd.f32 %v1150_v2, %v1149_v50  ;;  %9369 = vmatprep.mubr.msk.bf16.mxu0 %vm1053_vm3, %v1182_v27  ;;  %v9961_v49 = vpop.eup %9960  ;;  %v1154_v44 = vsel %vm1053_vm3, %v9959_v62, 0.0  ;;  %v1315_v50 = vpop.permute.xlu0 %1314 }
 0x374   :  { %v9963_v33 = vpop.eup %9962  ;;  %v1156_v7 = vsel %vm1053_vm3, %v9961_v49, 0.0  ;;  %v1317_v27 = vpop.permute.xlu1 %1316 }
 0x375   :  { %v1153_v36 = vadd.f32 %v1152_v16, %v1151_v39  ;;  %v9965_v19 = vpop.eup %9964  ;;  %v1158_v48 = vsel %vm1053_vm3, %v9963_v33, 0.0 }
 0x376   :  { %v1160_v26 = vsel %vm1053_vm3, %v9965_v19, 0.0 }
 0x377   :  { %v1155_v0 = vadd.f32 %v1154_v44, %v1153_v36  ;;  %v1331_v39 = vpop.permute.xlu0 %1330 }
 0x378   :  { %v1333_v16 = vpop.permute.xlu1 %1332 }
 0x379   :  { %v1157_v12 = vadd.f32 %v1156_v7, %v1155_v0 }
 0x37a   :  { %9370 = vmatmul.mubr.msk.bf16.gmra.mxu0 %vm1053_vm3, %v1183_v45 }
 0x37b   :  { %v1159_v14 = vadd.f32 %v1158_v48, %v1157_v12  ;;  %v1319_v9 = vpop.permute.xlu0 %1318 }
 0x37d   :  { %v1161_v61 = vadd.f32 %v1160_v26, %v1159_v14 }
 0x37f   :  { %9966 = vrcp.f32 %v1161_v61 }
 0x38c   :  { %v9967_v22 = vpop.eup %9966 }
 0x38d   :  { %v1172_v52 = vmul.f32 %v9967_v22, %v9951_v32  ;;  %v1173_v59 = vmul.f32 %v9967_v22, %v9953_v38  ;;  %v1174_v24 = vmul.f32 %v9967_v22, %v9955_v56  ;;  %v1175_v31 = vmul.f32 %v9967_v22, %v9957_v47  ;;  %v9906_v32 = vld [vmem:[%s14871_s2 + $0x5c] ss:$36 sps:$4 sm:$0xff]   ;;  %v9907_v38 = vld [vmem:[%s14871_s2 + $0x14] ss:$36 sps:$4 sm:$0xff]   ;;  %v11050_v56 = vpop.f32.mrf.mxu0 }
 0x38e   :  { %v1176_v42 = vmul.f32 %v9967_v22, %v9959_v62  ;;  %v1177_v57 = vmul.f32 %v9967_v22, %v9961_v49  ;;  %v1178_v40 = vmul.f32 %v9967_v22, %v9963_v33  ;;  %v1179_v55 = vmul.f32 %v9967_v22, %v9965_v19  ;;  %9382 = vmatpush3.bf16.msra.mxu1 %v9906_v32  ;;  %v1335_v49 = vpop.permute.xlu1 %1334  ;;  %v1321_v33 = vpop.permute.xlu0 %1320 }
 0x38f   :  { %v1184_v63 = vpack.c.bf16 %v1173_v59, %v1172_v52  ;;  %v1185_v15 = vpack.c.bf16 %v1175_v31, %v1174_v24  ;;  %9383 = vmatprep.subr.bf16.mxu1 %v14976_v18 }
 0x390   :  { %v1186_v5 = vpack.c.bf16 %v1177_v57, %v1176_v42  ;;  %v1187_v35 = vpack.c.bf16 %v1179_v55, %v1178_v40 }
 0x391   :  { %9373 = vmatprep.mubr.msk.bf16.mxu0 %vm1053_vm3, %v1184_v63 }
 0x392   :  { %9374 = vmatmul.mubr.msk.bf16.gmra.mxu0 %vm1053_vm3, %v1185_v15  ;;  %9384 = vmatpush3.bf16.msra.mxu1 %v9907_v38  ;;  %v1337_v7 = vpop.permute.xlu1 %1336  ;;  %v1323_v48 = vpop.permute.xlu0 %1322 }
 0x393   :  { %9377 = vmatprep.mubr.msk.bf16.mxu0 %vm1053_vm3, %v1186_v5  ;;  %9389 = vmatprep.subr.bf16.mxu1 %v14976_v18 }
 0x396   :  { %v1339_v61 = vpop.permute.xlu1 %1338  ;;  %v1325_v63 = vpop.permute.xlu0 %1324 }
 0x39a   :  { %9378 = vmatmul.mubr.msk.bf16.gmra.mxu0 %vm1053_vm3, %v1187_v35  ;;  %v1341_v15 = vpop.permute.xlu1 %1340 }
 0x39b   :  { %9405 = vmatprep.mubr.msk.bf16.mxu0 %vm10480_vm0, %v14976_v18 }
 0x432   :  { %v9367_v47 = vpop.f32.mrf.mxu0 }
 0x433   :  { %v1364_v14 = vmul.f32 %v9367_v47, %v1319_v9 }
 0x434   :  { %v1251_v2 = vpop.f32.mrf.mxu0 }
 0x435   :  { %v1362_v45 = vmul.f32 %v1315_v50, %v1251_v2  ;;  %v1381_v24 = vsel %vm221_vm1, %v1364_v14, 0.0 }
 0x436   :  { %v9368_v62 = vpop.f32.mrf.mxu0 }
 0x437   :  { %v1378_v26 = vsel %vm221_vm1, %v1362_v45, 0.0  ;;  %v1365_v31 = vmul.f32 %v9368_v62, %v1321_v33  ;;  %v1343_v45 = vpop.permute.xlu1 %1342 }
 0x438   :  { %v1254_v20 = vpop.f32.mrf.mxu0 }
 0x439   :  { %v1363_v0 = vmul.f32 %v1317_v27, %v1254_v20  ;;  %v1383_v40 = vsel %vm221_vm1, %v1365_v31, 0.0  ;;  %v1327_v20 = vpop.permute.xlu0 %1326 }
 0x43a   :  { %v9371_v36 = vpop.f32.mrf.mxu0 }
 0x43b   :  { %v1379_v12 = vsel %vm221_vm1, %v1363_v0, 0.0 }
 0x43c   :  { %v1267_v44 = vpop.f32.mrf.mxu0  ;;  %v1380_v22 = vadd.f32 %v1379_v12, %v1378_v26 }
 0x43d   :  { %v1366_v55 = vmul.f32 %v1323_v48, %v1267_v44 }
 0x43e   :  { %v9372_v19 = vpop.f32.mrf.mxu0  ;;  %v1382_v42 = vadd.f32 %v1381_v24, %v1380_v22  ;;  %v1368_v22 = vmul.f32 %v9371_v36, %v1327_v20 }
 0x43f   :  { %v1385_v9 = vsel %vm221_vm1, %v1366_v55, 0.0 }
 0x440   :  { %v1270_v52 = vpop.f32.mrf.mxu0  ;;  %v1384_v32 = vadd.f32 %v1383_v40, %v1382_v42  ;;  %v1389_v55 = vsel %vm221_vm1, %v1368_v22, 0.0 }
 0x441   :  { %v1367_v47 = vmul.f32 %v1325_v63, %v1270_v52  ;;  %v1329_v63 = vpop.permute.xlu0 %1328 }
 0x442   :  { %v1386_v12 = vadd.f32 %v1385_v9, %v1384_v32 }
 0x452   :  { %v9375_v59 = vpop.f32.mrf.mxu0 }
 0x453   :  { %v1372_v50 = vmul.f32 %v9375_v59, %v1335_v49 }
 0x454   :  { %v1283_v57 = vpop.f32.mrf.mxu0 }
 0x455   :  { %v1370_v35 = vmul.f32 %v1331_v39, %v1283_v57  ;;  %v1387_v39 = vsel %vm221_vm1, %v1367_v47, 0.0  ;;  %v1396_v44 = vsel %vm221_vm1, %v1372_v50, 0.0 }
 0x456   :  { %v9376_v5 = vpop.f32.mrf.mxu0  ;;  %v1388_v59 = vadd.f32 %v1387_v39, %v1386_v12 }
 0x457   :  { %v1393_v62 = vsel %vm221_vm1, %v1370_v35, 0.0  ;;  %v1373_v33 = vmul.f32 %v9376_v5, %v1337_v7  ;;  %v1345_v5 = vpop.permute.xlu1 %1344  ;;  %v1369_v35 = vmul.f32 %v9372_v19, %v1329_v63  ;;  %v8793_v19 = vld [vmem:[%s14874_s5 + $0x6] ss:$0 sm:$0xff] }
 0x458   :  { %v1286_v38 = vpop.f32.mrf.mxu0 }
 0x459   :  { %v1371_v27 = vmul.f32 %v1333_v16, %v1286_v38  ;;  %v1398_v52 = vsel %vm221_vm1, %v1373_v33, 0.0  ;;  %v1390_v38 = vadd.f32 %v1389_v55, %v1388_v59  ;;  %v9909_v55 = vld [vmem:[%s14871_s2 + $0x18] ss:$36 sps:$4 sm:$0xff]  }
 0x45a   :  { %v9379_v2 = vpop.f32.mrf.mxu0 }
 0x45b   :  { %v1394_v0 = vsel %vm221_vm1, %v1371_v27, 0.0  ;;  %v1376_v7 = vmul.f32 %v9379_v2, %v1343_v45  ;;  %v1391_v27 = vsel %vm221_vm1, %v1369_v35, 0.0  ;;  %v10256_v45 = vld [vmem:[#allocation2] sm:$0xff] }
 0x45c   :  { %v1395_v14 = vadd.f32 %v1394_v0, %v1393_v62  ;;  %v1299_v26 = vpop.f32.mrf.mxu0  ;;  %v1392_v20 = vadd.f32 %v1391_v27, %v1390_v38  ;;  %v9910_v35 = vld [vmem:[#allocation5 + $0x48] ss:$12 sps:$4 sm:$0xff]  }
 0x45d   :  { %v1374_v48 = vmul.f32 %v1339_v61, %v1299_v26  ;;  %v1404_v47 = vsel %vm221_vm1, %v1376_v7, 0.0  ;;  %9398 = vmatpush3.bf16.msra.mxu0 %v9910_v35 }
 0x45e   :  { %v1397_v49 = vadd.f32 %v1396_v44, %v1395_v14  ;;  %v9380_v16 = vpop.f32.mrf.mxu0  ;;  %9399 = vmatprep.subr.bf16.mxu0 %v14976_v18 }
 0x45f   :  { %v1400_v42 = vsel %vm221_vm1, %v1374_v48, 0.0  ;;  %v1377_v32 = vmul.f32 %v9380_v16, %v1345_v5  ;;  %v10257_v48 = vld [vmem:[#allocation2 + $0x8] sm:$0xff] }
 0x460   :  { %v1399_v24 = vadd.f32 %v1398_v52, %v1397_v49  ;;  %v1302_v31 = vpop.f32.mrf.mxu0 }
 0x461   :  { %v1375_v57 = vmul.f32 %v1341_v15, %v1302_v31  ;;  %v1406_v2 = vsel %vm221_vm1, %v1377_v32, 0.0  ;;  %v9911_v32 = vld [vmem:[#allocation5 + $0x30] ss:$12 sps:$4 sm:$0xff]  }
 0x462   :  { %v1401_v40 = vadd.f32 %v1400_v42, %v1399_v24  ;;  %9400 = vmatpush3.bf16.msra.mxu0 %v9911_v32 }
 0x463   :  { %v1402_v61 = vsel %vm221_vm1, %v1375_v57, 0.0  ;;  %9401 = vmatprep.subr.bf16.mxu0 %v14976_v18 }
 0x464   :  { %v1403_v36 = vadd.f32 %v1402_v61, %v1401_v40  ;;  %v9908_v40 = vld [vmem:[%s14871_s2 + $0x60] ss:$36 sps:$4 sm:$0xff]   ;;  %v9912_v61 = vld [vmem:[#allocation5 + $0x18] ss:$12 sps:$4 sm:$0xff]  }
 0x466   :  { %v1405_v50 = vadd.f32 %v1404_v47, %v1403_v36  ;;  %9402 = vmatpush3.bf16.msra.mxu0 %v9912_v61 }
 0x467   :  { %9403 = vmatprep.subr.bf16.mxu0 %v14976_v18 }
 0x468   :  { %v1407_v15 = vadd.f32 %v1406_v2, %v1405_v50 }
 0x46a   :  { %v1408_v9 = vpack.c.bf16 %v1407_v15, %v1392_v20 }
 0x46c   :  { %9386 = vmatmul.mubr.msk.bf16.vlgmr.msra.gmra.mxu1 %vm221_vm1, %v1408_v9  ;;  %v8796_v9 = vld [vmem:[%s14874_s5 + $0xd] ss:$0 sm:$0xff] }
 0x46d   :  { %9393 = vmatprep.mubr.msk.bf16.mxu1 %vm10480_vm0, %v14976_v18  ;;  %9390 = vmatpush3.bf16.msra.mxu1 %v9908_v40 }
 0x46e   :  { %9391 = vmatprep.subr.bf16.mxu1 %v14976_v18 }
 0x471   :  { %9392 = vmatpush3.bf16.msra.mxu1 %v9909_v55 }
 0x52c   :  { %v1458_v62 = vpop.f32.mrf.mxu1 }
 0x52d   :  { %v1459_v33 = vadd.f32 %v8793_v19, %v1458_v62 }
 0x52e   :  { %v9387_v0 = vpop.f32.mrf.mxu1 }
 0x52f   :  { %v1465_v12 = vadd.f32 %v10256_v45, %v1459_v33  ;;  %v8797_v0 = vld [vmem:[%s14874_s5 + $0xe] ss:$0 sm:$0xff] }
 0x530   :  { %v1461_v14 = vpop.f32.mrf.mxu1 }
 0x531   :  { %v1462_v26 = vadd.f32 %v8793_v19, %v1461_v14  ;;  %v1467_v39 = vsel %vm221_vm1, %v1465_v12, 0.0 }
 0x532   :  { %1468 = vadd.xlane.f32.xlu0 %v1467_v39  ;;  %v9388_v44 = vpop.f32.mrf.mxu1  ;;  %v14979_v39 = vmov 0  }
 0x533   :  { %v1466_v49 = vadd.f32 %v10257_v48, %v1462_v26  ;;  %v9913_v44 = vld [vmem:[#allocation5] ss:$12 sps:$4 sm:$0xff]   ;;  %v8794_v48 = vld [vmem:[%s14874_s5 + $0x7] ss:$0 sm:$0xff] }
 0x534   :  { %9404 = vmatpush3.bf16.msra.mxu0 %v9913_v44 }
 0x535   :  { %v1470_v16 = vsel %vm221_vm1, %v1466_v49, 0.0 }
 0x536   :  { %1471 = vadd.xlane.f32.xlu1 %v1470_v16 }
 0x5bb   :  { %v1469_v22 = vpop.xlane.xlu0 %1468 }
 0x5bc   :  { %v1474_v52 = vmul.f32 0.03125, %v1469_v22 }
 0x5be   :  { %v1476_v59 = vsub.f32 %v1465_v12, %v1474_v52 }
 0x5bf   :  { %v1472_v24 = vpop.xlane.xlu1 %1471 }
 0x5c0   :  { %v1475_v31 = vmul.f32 0.03125, %v1472_v24  ;;  %v1478_v7 = vmul.f32 %v1476_v59, %v1476_v59 }
 0x5c2   :  { %v1477_v42 = vsub.f32 %v1466_v49, %v1475_v31  ;;  %v1480_v57 = vsel %vm221_vm1, %v1478_v7, 0.0 }
 0x5c3   :  { %1481 = vadd.xlane.f32.xlu0 %v1480_v57  ;;  %v9914_v57 = vld [vmem:[%s14871_s2 + $0x58] ss:$36 sps:$4 sm:$0xff]  }
 0x5c4   :  { %v1479_v63 = vmul.f32 %v1477_v42, %v1477_v42  ;;  %9409 = vmatprep.subr.bf16.mxu0 %v9914_v57 }
 0x5c6   :  { %v1483_v5 = vsel %vm221_vm1, %v1479_v63, 0.0  ;;  %v9915_v63 = vld [vmem:[%s14871_s2 + $0x10] ss:$36 sps:$4 sm:$0xff]  }
 0x5c7   :  { %1484 = vadd.xlane.f32.xlu0 %v1483_v5 }
 0x64c   :  { %v1482_v38 = vpop.xlane.xlu0 %1481 }
 0x64d   :  { %v1486_v36 = vmul.f32 0.03125, %v1482_v38 }
 0x64f   :  { %v1488_v47 = vadd.f32 1e-05, %v1486_v36 }
 0x650   :  { %v1485_v50 = vpop.xlane.xlu0 %1484 }
 0x651   :  { %9968 = vrsqrt.f32 %v1488_v47  ;;  %v1487_v27 = vmul.f32 0.03125, %v1485_v50 }
 0x653   :  { %v1489_v2 = vadd.f32 1e-05, %v1487_v27 }
 0x655   :  { %9970 = vrsqrt.f32 %v1489_v2 }
 0x65e   :  { %v9969_v20 = vpop.eup %9968 }
 0x65f   :  { %v1492_v15 = vmul.f32 %v9969_v20, %v1476_v59 }
 0x661   :  { %v1494_v33 = vmul.f32 %v8796_v9, %v1492_v15  ;;  %v14989_v15 = vld [vmem:[#allocation23_spill] sm:$0xff] }
 0x662   :  { %v9971_v19 = vpop.eup %9970 }
 0x663   :  { %v1493_v62 = vmul.f32 %v9971_v19, %v1477_v42  ;;  %v1496_v12 = vadd.f32 %v8797_v0, %v1494_v33  ;;  %v14991_v19 = vld [vmem:[#allocation25_spill] sm:$0xff]  ;;  %v14993_v33 = vld [vmem:[#allocation27_spill] sm:$0xff] }
 0x665   :  { %v1495_v45 = vmul.f32 %v8796_v9, %v1493_v62  ;;  %v14990_v9 = vld [vmem:[#allocation22_spill] sm:$0xff]  ;;  %v14992_v62 = vld [vmem:[#allocation24_spill] sm:$0xff] }
 0x667   :  { %v1497_v14 = vadd.f32 %v8797_v0, %v1495_v45  ;;  %v14994_v0 = vld [vmem:[#allocation26_spill] sm:$0xff]  ;;  %v14995_v45 = vld [vmem:[#allocation28_spill] sm:$0xff] }
 0x669   :  { %v1498_v26 = vpack.c.bf16 %v1497_v14, %v1496_v12 }
 0x66b   :  { %9394 = vmatmul.mubr.msk.bf16.vlgmr.msra.gmra.mxu1 %vm221_vm1, %v1498_v26 }
 0x66c   :  { %1715 = vmatprep.mubr.bf16.mxu1 %v14979_v39 }
 0x72b   :  { %v1548_v49 = vpop.f32.mrf.mxu1 }
 0x72c   :  { %v1549_v22 = vadd.f32 %v8794_v48, %v1548_v49 }
 0x72d   :  { %v9395_v16 = vpop.f32.mrf.mxu1 }
 0x72e   :  { %v1555_v31 = vmax.f32 %v1549_v22, 0.0 }
 0x72f   :  { %v1551_v52 = vpop.f32.mrf.mxu1 }
 0x730   :  { %v1552_v59 = vadd.f32 %v8794_v48, %v1551_v52 }
 0x731   :  { %v9396_v24 = vpop.f32.mrf.mxu1 }
 0x732   :  { %v1556_v7 = vmax.f32 %v1552_v59, 0.0 }
 0x734   :  { %v1557_v42 = vpack.c.bf16 %v1556_v7, %v1555_v31 }
 0x736   :  { %9406 = vmatmul.mubr.msk.bf16.vlgmr.msra.gmra.mxu0 %vm1582_vm4, %v1557_v42 }
 0x737   :  { %9413 = vmatprep.mubr.msk.bf16.mxu0 %vm221_vm1, %v10626_v30  ;;  %9410 = vmatpush3.bf16.msra.mxu0 %v9914_v57  ;;  %v9922_v57 = vld [vmem:[#allocation5 + $0x4c] ss:$12 sps:$4 sm:$0xff]  }
 0x738   :  { %9411 = vmatprep.subr.bf16.mxu0 %v9915_v63 }
 0x73b   :  { %9412 = vmatpush3.bf16.msra.mxu0 %v9915_v63  ;;  %v9923_v63 = vld [vmem:[#allocation5 + $0x34] ss:$12 sps:$4 sm:$0xff]  }
 0x73e   :  { %9414 = vmatmul.mubr.msk.bf16.vlgmr.msra.gmra.mxu0 %vm221_vm1, %v10621_v29  ;;  %v8795_v29 = vld [vmem:[%s14874_s5 + $0x8] ss:$0 sm:$0xff] }
 0x73f   :  { %9417 = vmatprep.mubr.msk.bf16.mxu0 %vm221_vm1, %v10610_v25 }
 0x746   :  { %9418 = vmatmul.mubr.msk.bf16.gmra.mxu0 %vm221_vm1, %v10591_v17 }
 0x747   :  { %9421 = vmatprep.mubr.msk.bf16.mxu0 %vm221_vm1, %v10578_v13 }
 0x74e   :  { %9422 = vmatmul.mubr.msk.bf16.gmra.mxu0 %vm221_vm1, %v10571_v10 }
 0x74f   :  { %9425 = vmatprep.mubr.msk.bf16.mxu0 %vm221_vm1, %v10557_v6 }
 0x756   :  { %9426 = vmatmul.mubr.msk.bf16.gmra.mxu0 %vm221_vm1, %v10552_v4 }
 0x7f6   :  { %v1620_v25 = vpop.f32.mrf.mxu0 }
 0x7f7   :  { %v1621_v30 = vadd.f32 %v8795_v29, %v1620_v25  ;;  %v9924_v25 = vld [vmem:[#allocation5 + $0x1c] ss:$12 sps:$4 sm:$0xff]  }
 0x7f8   :  { %v9407_v5 = vpop.f32.mrf.mxu0 }
 0x7f9   :  { %v1627_v17 = vadd.f32 %v1621_v30, %v1496_v12  ;;  %v14996_v30 = vld [vmem:[#allocation12_spill] sm:$0xff] }
 0x7fa   :  { %v1623_v40 = vpop.f32.mrf.mxu0 }
 0x7fb   :  { %v1624_v55 = vadd.f32 %v8795_v29, %v1623_v40  ;;  %v1629_v13 = vsel %vm221_vm1, %v1627_v17, 0.0 }
 0x7fc   :  { %1630 = vadd.xlane.f32.xlu1 %v1629_v13  ;;  %v9408_v10 = vpop.f32.mrf.mxu0 }
 0x7fd   :  { %v1628_v35 = vadd.f32 %v1624_v55, %v1497_v14 }
 0x7ff   :  { %v1632_v6 = vsel %vm221_vm1, %v1628_v35, 0.0 }
 0x800   :  { %1633 = vadd.xlane.f32.xlu0 %v1632_v6 }
 0x885   :  { %v1631_v32 = vpop.xlane.xlu1 %1630 }
 0x886   :  { %v1635_v4 = vmul.f32 0.03125, %v1631_v32 }
 0x888   :  { %v1637_v61 = vsub.f32 %v1627_v17, %v1635_v4 }
 0x889   :  { %v1634_v38 = vpop.xlane.xlu0 %1633 }
 0x88a   :  { %v1636_v36 = vmul.f32 0.03125, %v1634_v38  ;;  %v1639_v47 = vmul.f32 %v1637_v61, %v1637_v61 }
 0x88c   :  { %v1638_v50 = vsub.f32 %v1628_v35, %v1636_v36  ;;  %v1641_v27 = vsel %vm221_vm1, %v1639_v47, 0.0  ;;  %v9925_v35 = vld [vmem:[#allocation5 + $0x4] ss:$12 sps:$4 sm:$0xff]  }
 0x88d   :  { %1642 = vadd.xlane.f32.xlu1 %v1641_v27 }
 0x88e   :  { %v1640_v2 = vmul.f32 %v1638_v50, %v1638_v50 }
 0x890   :  { %v1644_v20 = vsel %vm221_vm1, %v1640_v2, 0.0 }
 0x891   :  { %1645 = vadd.xlane.f32.xlu0 %v1644_v20 }
 0x89e   :  { %1772 = vrot.lane.b32.xlu1 %v10681_v28, %s10484_s28  ;;  %v9916_v28 = vld [vmem:[%s14871_s2 + $0x48] ss:$36 sps:$4 sm:$0xff]  }
 0x8a2   :  { %1776 = vrot.lane.b32.xlu1 %v10697_v37, %s10484_s28  ;;  %v9918_v37 = vld [vmem:[%s14871_s2 + $0x4c] ss:$36 sps:$4 sm:$0xff]  }
 0x8a3   :  { %1695 = vmatprep.subr.bf16.mxu1 %v9918_v37 }
 0x8a4   :  { %1696 = vmatpush1.bf16.msra.mxu1 %v9916_v28 }
 0x8a6   :  { %1778 = vrot.lane.b32.xlu1 %v10708_v43, %s10484_s28  ;;  %v9921_v43 = vld [vmem:[%s14871_s2 + $0x4] ss:$36 sps:$4 sm:$0xff]  }
 0x8a7   :  { %1774 = vrot.lane.b32.xlu0 %v10689_v34, %s10484_s28  ;;  %v9919_v34 = vld [vmem:[%s14871_s2] ss:$36 sps:$4 sm:$0xff]   ;;  %1697 = vmatprep.subr.bf16.mxu1 %v9921_v43 }
 0x8a8   :  { %1698 = vmatpush1.bf16.msra.mxu1 %v9919_v34 }
 0x8a9   :  { %9429 = vmatprep.subr.bf16.mxu1 %v9922_v57 }
 0x8aa   :  { %1782 = vrot.lane.b32.xlu1 %v10724_v51, %s10484_s28  ;;  %v14981_v51 = vld [vmem:[#allocation15_spill] sm:$0xff] }
 0x8ab   :  { %1780 = vrot.lane.b32.xlu0 %v10714_v46, %s10484_s28  ;;  %v14980_v46 = vld [vmem:[#allocation13_spill] sm:$0xff] }
 0x8ae   :  { %1786 = vrot.lane.b32.xlu1 %v10739_v58, %s10484_s28  ;;  %v14983_v58 = vld [vmem:[#allocation17_spill] sm:$0xff] }
 0x8af   :  { %1784 = vrot.lane.b32.xlu0 %v10729_v53, %s10484_s28  ;;  %v14982_v53 = vld [vmem:[#allocation14_spill] sm:$0xff] }
 0x8b2   :  { %1790 = vrot.lane.b32.xlu1 %v10754_v1, %s10484_s28  ;;  %v14985_v1 = vld [vmem:[#allocation19_spill] sm:$0xff] }
 0x8b3   :  { %1788 = vrot.lane.b32.xlu0 %v10744_v60, %s10484_s28  ;;  %v14984_v60 = vld [vmem:[#allocation16_spill] sm:$0xff] }
 0x8b6   :  { %1794 = vrot.lane.b32.xlu1 %v10771_v11, %s10484_s28  ;;  %v14987_v11 = vld [vmem:[#allocation21_spill] sm:$0xff] }
 0x8b7   :  { %1792 = vrot.lane.b32.xlu0 %v10759_v3, %s10484_s28  ;;  %v14986_v3 = vld [vmem:[#allocation18_spill] sm:$0xff] }
 0x8ba   :  { %1798 = vrot.lane.b32.xlu1 %v10787_v21, %s10484_s28  ;;  %v14988_v21 = vld [vmem:[#allocation20_spill] sm:$0xff] }
 0x8bb   :  { %1796 = vrot.lane.b32.xlu0 %v14980_v46, %s10484_s28 }
 0x8be   :  { %1802 = vrot.lane.b32.xlu1 %v14981_v51, %s10484_s28 }
 0x8bf   :  { %1800 = vrot.lane.b32.xlu0 %v14982_v53, %s10484_s28 }
 0x8c2   :  { %1806 = vrot.lane.b32.xlu1 %v14983_v58, %s10484_s28 }
 0x8c3   :  { %1804 = vrot.lane.b32.xlu0 %v14984_v60, %s10484_s28 }
 0x8c6   :  { %1810 = vrot.lane.b32.xlu1 %v14985_v1, %s10484_s28 }
 0x8c7   :  { %1808 = vrot.lane.b32.xlu0 %v14986_v3, %s10484_s28 }
 0x8ca   :  { %1814 = vrot.lane.b32.xlu1 %v14987_v11, %s10484_s28 }
 0x8cb   :  { %1812 = vrot.lane.b32.xlu0 %v14988_v21, %s10484_s28 }
 0x8ce   :  { %1818 = vrot.lane.b32.xlu1 %v14989_v15, %s10484_s28 }
 0x8cf   :  { %1816 = vrot.lane.b32.xlu0 %v14990_v9, %s10484_s28 }
 0x8d2   :  { %1822 = vrot.lane.b32.xlu1 %v14991_v19, %s10484_s28 }
 0x8d3   :  { %1820 = vrot.lane.b32.xlu0 %v14992_v62, %s10484_s28 }
 0x8d6   :  { %1826 = vrot.lane.b32.xlu1 %v14993_v33, %s10484_s28 }
 0x8d7   :  { %1824 = vrot.lane.b32.xlu0 %v14994_v0, %s10484_s28 }
 0x8da   :  { %1830 = vrot.lane.b32.xlu1 %v10888_v41, %s10484_s28  ;;  %v8798_v41 = vld [vmem:[%s14874_s5 + $0xf] ss:$0 sm:$0xff] }
 0x8db   :  { %1828 = vrot.lane.b32.xlu0 %v14995_v45, %s10484_s28 }
 0x8de   :  { %1834 = vrot.lane.b32.xlu1 %v11050_v56, %s10484_s28 }
 0x8df   :  { %1832 = vrot.lane.b32.xlu0 %v10891_v8, %s10484_s28  ;;  %v8799_v8 = vld [vmem:[%s14874_s5 + $0x10] ss:$0 sm:$0xff] }
 0x916   :  { %v1643_v12 = vpop.xlane.xlu1 %1642 }
 0x917   :  { %v1647_v14 = vmul.f32 0.03125, %v1643_v12 }
 0x919   :  { %v1649_v26 = vadd.f32 1e-05, %v1647_v14 }
 0x91a   :  { %v1646_v44 = vpop.xlane.xlu0 %1645  ;;  %v1773_v9 = vpop.permute.xlu1 %1772 }
 0x91b   :  { %9972 = vrsqrt.f32 %v1649_v26  ;;  %v1648_v48 = vmul.f32 0.03125, %v1646_v44 }
 0x91d   :  { %v1650_v49 = vadd.f32 1e-05, %v1648_v48 }
 0x91e   :  { %v1777_v26 = vpop.permute.xlu1 %1776 }
 0x91f   :  { %9974 = vrsqrt.f32 %v1650_v49 }
 0x928   :  { %v9973_v16 = vpop.eup %9972 }
 0x929   :  { %v1653_v22 = vmul.f32 %v9973_v16, %v1637_v61 }
 0x92b   :  { %v1655_v56 = vmul.f32 %v8798_v41, %v1653_v22  ;;  %v1775_v22 = vpop.permute.xlu0 %1774 }
 0x92c   :  { %v9975_v52 = vpop.eup %9974 }
 0x92d   :  { %v1654_v59 = vmul.f32 %v9975_v52, %v1638_v50  ;;  %v11211_v31 = vadd.f32 %v8799_v8, %v1655_v56  ;;  %v1779_v52 = vpop.permute.xlu1 %1778 }
 0x92f   :  { %v1656_v24 = vmul.f32 %v8798_v41, %v1654_v59  ;;  %v1781_v56 = vpop.permute.xlu0 %1780 }
 0x931   :  { %v11213_v7 = vadd.f32 %v8799_v8, %v1656_v24  ;;  %v1783_v8 = vpop.permute.xlu1 %1782 }
 0x933   :  { %v1659_v42 = vpack.c.bf16 %v11213_v7, %v11211_v31  ;;  %v1785_v24 = vpop.permute.xlu0 %1784 }
 0x935   :  { %8857 = vmatmul.mubr.msk.bf16.vlgmr.msra.gmra.mxu1 %vm221_vm1, %v1659_v42  ;;  %v1787_v42 = vpop.permute.xlu1 %1786 }
 0x936   :  { %9430 = vmatpush3.bf16.msra.mxu1 %v9922_v57 }
 0x937   :  { %9431 = vmatprep.subr.bf16.mxu1 %v9923_v63  ;;  %v1789_v57 = vpop.permute.xlu0 %1788 }
 0x93a   :  { %9432 = vmatpush3.bf16.msra.mxu1 %v9923_v63  ;;  %v1791_v63 = vpop.permute.xlu1 %1790 }
 0x93b   :  { %9433 = vmatprep.subr.bf16.mxu1 %v9924_v25 }
 0x93e   :  { %9434 = vmatpush3.bf16.msra.mxu1 %v9924_v25  ;;  %v1793_v25 = vpop.permute.xlu0 %1792 }
 0x93f   :  { %9435 = vmatprep.subr.bf16.mxu1 %v9925_v35 }
 0x942   :  { %9436 = vmatpush3.bf16.msra.mxu1 %v9925_v35 }
 0x9f5   :  { %v11218_v29 = vpop.f32.mrf.mxu1 }
 0x9f6   :  { %v2034_v5 = vrot.slane %v11218_v29, %v14996_v30  ;;  %v2027_v17 = vcombine.high %v11218_v29, %v11218_v29 }
 0x9f7   :  { %v11226_v10 = vpop.f32.mrf.mxu1 }
 0x9f8   :  { %v2050_v40 = vrot.slane %v2034_v5, %v14996_v30  ;;  %v2042_v55 = vcombine.high %v2034_v5, %v2034_v5  ;;  %v2041_v13 = vrot.slane %v2027_v17, %v14996_v30  ;;  %v1795_v5 = vpop.permute.xlu1 %1794  ;;  %v1797_v17 = vpop.permute.xlu0 %1796 }
 0x9f9   :  { %v11232_v47 = vpop.f32.mrf.mxu1 }
 0x9fa   :  { %v2128_v6 = vrot.slane %v2050_v40, %v10670_v23  ;;  %v2064_v32 = vrot.slane %v2042_v55, %v14996_v30  ;;  %v2072_v4 = vcombine.high %v2050_v40, %v2050_v40  ;;  %v2043_v36 = vcombine.high %v2041_v13, %v2041_v13 }
 0x9fb   :  { %v2057_v27 = vrot.slane %v2041_v13, %v14996_v30  ;;  %v2083_v28 = vrot.slane %v11232_v47, %v14996_v30  ;;  %v2076_v53 = vcombine.high %v11232_v47, %v11232_v47 }
 0x9fc   :  { %2189 = vrot.lane.b32.xlu0 %v2128_v6, %s10477_s17  ;;  %v2132_v61 = vrot.slane %v2064_v32, %v10670_v23  ;;  %v2074_v38 = vcombine.high %v2064_v32, %v2064_v32  ;;  %v2136_v50 = vrot.slane %v2072_v4, %v10670_v23  ;;  %v2071_v20 = vrot.slane %v2043_v36, %v14996_v30  ;;  %v1799_v40 = vpop.permute.xlu1 %1798  ;;  %v1801_v55 = vpop.permute.xlu0 %1800 }
 0x9fd   :  { %v2144_v37 = vrot.slane %v2057_v27, %v10670_v23  ;;  %v2073_v34 = vcombine.high %v2057_v27, %v2057_v27  ;;  %v2091_v51 = vcombine.high %v2083_v28, %v2083_v28  ;;  %v2099_v60 = vrot.slane %v2083_v28, %v14996_v30  ;;  %v9415_v4 = vpop.f32.mrf.mxu0 }
 0x9fe   :  { %2191 = vrot.lane.b32.xlu1 %v2132_v61, %s10477_s17  ;;  %v2140_v2 = vrot.slane %v2074_v38, %v10670_v23  ;;  %v2148_v43 = vrot.slane %v2071_v20, %v10670_v23  ;;  %v2075_v46 = vcombine.high %v2071_v20, %v2071_v20  ;;  %v2090_v11 = vrot.slane %v2076_v53, %v14996_v30 }
 0x9ff   :  { %v2152_v58 = vrot.slane %v2073_v34, %v10670_v23  ;;  %v2113_v3 = vrot.slane %v2091_v51, %v14996_v30  ;;  %v2160_v21 = vrot.slane %v2099_v60, %v10670_v23  ;;  %v2121_v15 = vcombine.high %v2099_v60, %v2099_v60  ;;  %v1926_v38 = vpop.f32.mrf.mxu0 }
 0xa00   :  { %2193 = vrot.lane.b32.xlu0 %v2136_v50, %s10477_s17  ;;  %v2156_v1 = vrot.slane %v2075_v46, %v10670_v23  ;;  %v2092_v33 = vcombine.high %v2090_v11, %v2090_v11  ;;  %v2106_v45 = vrot.slane %v2090_v11, %v14996_v30  ;;  %v1803_v13 = vpop.permute.xlu1 %1802  ;;  %v1805_v35 = vpop.permute.xlu0 %1804 }
 0xa01   :  { %v2164_v19 = vrot.slane %v2113_v3, %v10670_v23  ;;  %v2123_v62 = vcombine.high %v2113_v3, %v2113_v3  ;;  %v2168_v0 = vrot.slane %v2121_v15, %v10670_v23  ;;  %v9416_v27 = vpop.f32.mrf.mxu0  ;;  %v1836_v3 = vsel %vm221_vm1, %v1773_v9, %v1775_v22 }
 0xa02   :  { %2195 = vrot.lane.b32.xlu1 %v2140_v2, %s10477_s17  ;;  %v2120_v14 = vrot.slane %v2092_v33, %v14996_v30  ;;  %v2176_v44 = vrot.slane %v2106_v45, %v10670_v23  ;;  %v2122_v48 = vcombine.high %v2106_v45, %v2106_v45  ;;  %v11305_v33 = vld [vmem:[%s14874_s5 + $0x9] ss:$0 sm:$0xff] }
 0xa03   :  { %v2172_v12 = vrot.slane %v2123_v62, %v10670_v23  ;;  %v1929_v20 = vpop.f32.mrf.mxu0 }
 0xa04   :  { %2197 = vrot.lane.b32.xlu0 %v2144_v37, %s10477_s17  ;;  %v2180_v49 = vrot.slane %v2120_v14, %v10670_v23  ;;  %v2124_v16 = vcombine.high %v2120_v14, %v2120_v14  ;;  %v2184_v41 = vrot.slane %v2122_v48, %v10670_v23  ;;  %v1807_v6 = vpop.permute.xlu1 %1806  ;;  %v11274_v32 = vpop.permute.xlu0 %1808 }
 0xa05   :  { %v9419_v37 = vpop.f32.mrf.mxu0 }
 0xa06   :  { %2199 = vrot.lane.b32.xlu1 %v2148_v43, %s10477_s17  ;;  %v2188_v59 = vrot.slane %v2124_v16, %v10670_v23 }
 0xa07   :  { %v1942_v43 = vpop.f32.mrf.mxu0 }
 0xa08   :  { %2201 = vrot.lane.b32.xlu0 %v2152_v58, %s10477_s17  ;;  %v11276_v61 = vpop.permute.xlu1 %1810  ;;  %v11278_v36 = vpop.permute.xlu0 %1812 }
 0xa09   :  { %v9420_v51 = vpop.f32.mrf.mxu0 }
 0xa0a   :  { %2203 = vrot.lane.b32.xlu1 %v2156_v1, %s10477_s17 }
 0xa0b   :  { %v1945_v60 = vpop.f32.mrf.mxu0 }
 0xa0c   :  { %2205 = vrot.lane.b32.xlu0 %v2160_v21, %s10477_s17  ;;  %v11280_v50 = vpop.permute.xlu1 %1814  ;;  %v11282_v2 = vpop.permute.xlu0 %1816  ;;  %v1837_v21 = vsel %vm221_vm1, %v1777_v26, %v1779_v52  ;;  %v1840_v26 = vsel %vm221_vm1, %v1789_v57, %v1791_v63 }
 0xa0d   :  { %v11294_v1 = vpop.f32.mrf.mxu0  ;;  %v1930_v45 = vadd.f32 %v1929_v20, %v1837_v21 }
 0xa0e   :  { %2207 = vrot.lane.b32.xlu1 %v2164_v19, %s10477_s17  ;;  %v1927_v19 = vadd.f32 %v1926_v38, %v1836_v3 }
 0xa0f   :  { %v1958_v62 = vpop.f32.mrf.mxu0  ;;  %v1994_v16 = vadd.f32 %v11305_v33, %v1930_v45 }
 0xa10   :  { %2209 = vrot.lane.b32.xlu0 %v2168_v0, %s10477_s17  ;;  %v11284_v28 = vpop.permute.xlu1 %1818  ;;  %v11286_v34 = vpop.permute.xlu0 %1820  ;;  %v1838_v0 = vsel %vm221_vm1, %v1781_v56, %v1783_v8  ;;  %v1993_v9 = vadd.f32 %v11305_v33, %v1927_v19 }
 0xa11   :  { %v11313_v48 = vpop.f32.mrf.mxu0  ;;  %v2010_v57 = vadd.f32 %v1994_v16, %v11218_v29 }
 0xa12   :  { %2211 = vrot.lane.b32.xlu1 %v2172_v12, %s10477_s17  ;;  %v1839_v12 = vsel %vm221_vm1, %v1785_v24, %v1787_v42  ;;  %v2009_v52 = vadd.f32 %v1993_v9, %v11218_v29  ;;  %v1842_v24 = vsel %vm221_vm1, %v1797_v17, %v1799_v40  ;;  %v1844_v17 = vsel %vm221_vm1, %v1805_v35, %v1807_v6 }
 0xa13   :  { %v1938_v22 = vadd.f32 %v9416_v27, %v1839_v12  ;;  %v1961_v42 = vpop.f32.mrf.mxu0  ;;  %v1843_v27 = vsel %vm221_vm1, %v1801_v55, %v1803_v13  ;;  %v1951_v21 = vadd.f32 %v9419_v37, %v1842_v24  ;;  %v1845_v13 = vsel %vm221_vm1, %v11274_v32, %v11276_v61 }
 0xa14   :  { %2213 = vrot.lane.b32.xlu0 %v2176_v44, %s10477_s17  ;;  %v11288_v46 = vpop.permute.xlu1 %1822  ;;  %v11290_v53 = vpop.permute.xlu0 %1824  ;;  %v1935_v44 = vadd.f32 %v9415_v4, %v1838_v0  ;;  %v1954_v9 = vadd.f32 %v9420_v51, %v1843_v27  ;;  %v1959_v6 = vadd.f32 %v1958_v62, %v1844_v17  ;;  %v1847_v62 = vsel %vm221_vm1, %v11282_v2, %v11284_v28 }
 0xa15   :  { %v1996_v20 = vadd.f32 %v11305_v33, %v1938_v22  ;;  %v11325_v3 = vpop.f32.mrf.mxu0  ;;  %v1999_v35 = vadd.f32 %v11305_v33, %v1951_v21  ;;  %v1846_v22 = vsel %vm221_vm1, %v11278_v36, %v11280_v50 }
 0xa16   :  { %2215 = vrot.lane.b32.xlu1 %v2180_v49, %s10477_s17  ;;  %v1995_v8 = vadd.f32 %v11305_v33, %v1935_v44  ;;  %v2000_v61 = vadd.f32 %v11305_v33, %v1954_v9  ;;  %v2001_v50 = vadd.f32 %v11305_v33, %v1959_v6 }
 0xa17   :  { %v1974_v44 = vpop.f32.mrf.mxu0  ;;  %v2015_v36 = vadd.f32 %v1999_v35, %v11218_v29 }
 0xa18   :  { %2217 = vrot.lane.b32.xlu0 %v2184_v41, %s10477_s17  ;;  %v11292_v58 = vpop.permute.xlu1 %1826  ;;  %v11297_v11 = vpop.permute.xlu0 %1828  ;;  %v1841_v41 = vsel %vm221_vm1, %v1793_v25, %v1795_v5  ;;  %v2011_v5 = vadd.f32 %v1995_v8, %v11218_v29  ;;  %v2016_v2 = vadd.f32 %v2000_v61, %v11218_v29 }
 0xa19   :  { %v1946_v63 = vadd.f32 %v1945_v60, %v1841_v41  ;;  %v2012_v60 = vadd.f32 %v1996_v20, %v11218_v29  ;;  %v9428_v24 = vpop.f32.mrf.mxu0 }
 0xa1a   :  { %2219 = vrot.lane.b32.xlu1 %v2188_v59, %s10477_s17  ;;  %v1943_v59 = vadd.f32 %v1942_v43, %v1840_v26 }
 0xa1b   :  { %v1998_v12 = vadd.f32 %v11305_v33, %v1946_v63  ;;  %v1967_v63 = vadd.f32 %v11294_v1, %v1846_v22  ;;  %v1849_v1 = vsel %vm221_vm1, %v11290_v53, %v11292_v58  ;;  %v1977_v21 = vpop.f32.mrf.mxu0 }
 0xa1c   :  { %v11300_v15 = vpop.permute.xlu1 %1830  ;;  %v11309_v14 = vpop.permute.xlu0 %1832  ;;  %v1997_v43 = vadd.f32 %v11305_v33, %v1943_v59  ;;  %v1978_v58 = vadd.f32 %v1977_v21, %v1849_v1 }
 0xa1d   :  { %v2014_v32 = vadd.f32 %v1998_v12, %v11218_v29  ;;  %v11386_v1 = vpop.f32.mrf.mxu1 }
 0xa1e   :  { %v2013_v37 = vadd.f32 %v1997_v43, %v11218_v29  ;;  %v1850_v29 = vsel %vm221_vm1, %v11297_v11, %v11300_v15 }
 0xa1f   :  { %v1983_v11 = vadd.f32 %v11325_v3, %v1850_v29 }
 0xa20   :  { %v11315_v49 = vpop.permute.xlu1 %1834 }
 0xa21   :  { %v1851_v15 = vsel %vm221_vm1, %v11309_v14, %v11315_v49  ;;  %v2007_v61 = vadd.f32 %v11305_v33, %v1983_v11 }
 0xa6e   :  { %v2190_v56 = vpop.permute.xlu0 %2189 }
 0xa6f   :  { %v2237_v4 = vadd.f32 %v2190_v56, %v2009_v52  ;;  %v1962_v56 = vadd.f32 %v1961_v42, %v1845_v13 }
 0xa70   :  { %v2192_v38 = vpop.permute.xlu1 %2191 }
 0xa71   :  { %v2238_v25 = vadd.f32 %v2192_v38, %v2010_v57  ;;  %v2253_v19 = vmax.f32 %v2237_v4, 0.0  ;;  %v1848_v38 = vsel %vm221_vm1, %v11286_v34, %v11288_v46  ;;  %v2002_v28 = vadd.f32 %v11305_v33, %v1962_v56 }
 0xa72   :  { %v2194_v40 = vpop.permute.xlu0 %2193  ;;  %v2017_v46 = vadd.f32 %v2001_v50, %v11232_v47 }
 0xa73   :  { %v2254_v0 = vmax.f32 %v2238_v25, 0.0  ;;  %v2239_v45 = vadd.f32 %v2194_v40, %v2011_v5  ;;  %v1970_v5 = vadd.f32 %v11313_v48, %v1847_v62  ;;  %v2003_v40 = vadd.f32 %v11305_v33, %v1967_v63 }
 0xa74   :  { %v2196_v55 = vpop.permute.xlu1 %2195  ;;  %v2018_v53 = vadd.f32 %v2002_v28, %v11232_v47 }
 0xa75   :  { %v2269_v26 = vpack.c.bf16 %v2254_v0, %v2253_v19  ;;  %v2240_v16 = vadd.f32 %v2196_v55, %v2012_v60  ;;  %v2255_v52 = vmax.f32 %v2239_v45, 0.0  ;;  %v1975_v19 = vadd.f32 %v1974_v44, %v1848_v38 }
 0xa76   :  { %v2198_v41 = vpop.permute.xlu0 %2197  ;;  %v2004_v9 = vadd.f32 %v11305_v33, %v1970_v5  ;;  %v2019_v44 = vadd.f32 %v2003_v40, %v11232_v47 }
 0xa77   :  { %v2256_v51 = vmax.f32 %v2240_v16, 0.0  ;;  %v2241_v59 = vadd.f32 %v2198_v41, %v2013_v37  ;;  %9437 = vmatprep.mubr.msk.bf16.mxu1 %vm1582_vm4, %v2269_v26  ;;  %v2005_v26 = vadd.f32 %v11305_v33, %v1975_v19  ;;  %v2006_v41 = vadd.f32 %v11305_v33, %v1978_v58  ;;  %v10258_v19 = vld [vmem:[%s14870_s1] sm:$0xff] }
 0xa78   :  { %v2200_v8 = vpop.permute.xlu1 %2199  ;;  %v2020_v22 = vadd.f32 %v2004_v9, %v11232_v47  ;;  %v10260_v9 = vld [vmem:[%s14870_s1 + $0x8] sm:$0xff] }
 0xa79   :  { %v2270_v4 = vpack.c.bf16 %v2256_v51, %v2255_v52  ;;  %v2242_v57 = vadd.f32 %v2200_v8, %v2014_v32  ;;  %v2257_v42 = vmax.f32 %v2241_v59, 0.0  ;;  %v1986_v51 = vadd.f32 %v9428_v24, %v1851_v15 }
 0xa7a   :  { %v2202_v20 = vpop.permute.xlu0 %2201  ;;  %v2021_v3 = vadd.f32 %v2005_v26, %v11232_v47  ;;  %v2022_v62 = vadd.f32 %v2006_v41, %v11232_v47  ;;  %v2023_v24 = vadd.f32 %v2007_v61, %v11232_v47 }
 0xa7b   :  { %v2258_v27 = vmax.f32 %v2242_v57, 0.0  ;;  %v2243_v25 = vadd.f32 %v2202_v20, %v2015_v36  ;;  %9438 = vmatmul.mubr.msk.bf16.vlgmr.msra.gmra.mxu1 %vm1582_vm4, %v2270_v4  ;;  %v2008_v57 = vadd.f32 %v11305_v33, %v1986_v51 }
 0xa7c   :  { %v2204_v43 = vpop.permute.xlu1 %2203 }
 0xa7d   :  { %v2271_v17 = vpack.c.bf16 %v2258_v27, %v2257_v42  ;;  %v2244_v34 = vadd.f32 %v2204_v43, %v2016_v2  ;;  %v2259_v45 = vmax.f32 %v2243_v25, 0.0  ;;  %v2024_v27 = vadd.f32 %v2008_v57, %v11232_v47 }
 0xa7e   :  { %v2206_v0 = vpop.permute.xlu0 %2205 }
 0xa7f   :  { %v2260_v48 = vmax.f32 %v2244_v34, 0.0  ;;  %v2245_v60 = vadd.f32 %v2206_v0, %v2017_v46  ;;  %9441 = vmatprep.mubr.msk.bf16.mxu1 %vm1582_vm4, %v2271_v17  ;;  %v11391_v17 = vld [vmem:[%s14874_s5 + $0xa] ss:$0 sm:$0xff] }
 0xa80   :  { %v2208_v12 = vpop.permute.xlu1 %2207 }
 0xa81   :  { %v2272_v55 = vpack.c.bf16 %v2260_v48, %v2259_v45  ;;  %v2246_v13 = vadd.f32 %v2208_v12, %v2018_v53  ;;  %v2261_v37 = vmax.f32 %v2245_v60, 0.0  ;;  %v10259_v53 = vld [vmem:[%s14870_s1 + $0x10] sm:$0xff] }
 0xa82   :  { %v2210_v16 = vpop.permute.xlu0 %2209 }
 0xa83   :  { %v2262_v35 = vmax.f32 %v2246_v13, 0.0  ;;  %v2247_v6 = vadd.f32 %v2210_v16, %v2019_v44  ;;  %9442 = vmatmul.mubr.msk.bf16.gmra.mxu1 %vm1582_vm4, %v2272_v55  ;;  %v10261_v16 = vld [vmem:[%s14870_s1 + $0x18] sm:$0xff] }
 0xa84   :  { %v2212_v52 = vpop.permute.xlu1 %2211 }
 0xa85   :  { %v2273_v59 = vpack.c.bf16 %v2262_v35, %v2261_v37  ;;  %v2248_v32 = vadd.f32 %v2212_v52, %v2020_v22  ;;  %v2263_v14 = vmax.f32 %v2247_v6, 0.0  ;;  %v10262_v6 = vld [vmem:[%s14870_s1 + $0x20] sm:$0xff]  ;;  %v10263_v52 = vld [vmem:[%s14870_s1 + $0x30] sm:$0xff] }
 0xa86   :  { %v2214_v56 = vpop.permute.xlu0 %2213 }
 0xa87   :  { %v2264_v49 = vmax.f32 %v2248_v32, 0.0  ;;  %v2249_v8 = vadd.f32 %v2214_v56, %v2021_v3  ;;  %9445 = vmatprep.mubr.msk.bf16.mxu1 %vm1582_vm4, %v2273_v59 }
 0xa88   :  { %v2216_v4 = vpop.permute.xlu1 %2215 }
 0xa89   :  { %v2274_v36 = vpack.c.bf16 %v2264_v49, %v2263_v14  ;;  %v2250_v50 = vadd.f32 %v2216_v4, %v2022_v62  ;;  %v2265_v38 = vmax.f32 %v2249_v8, 0.0  ;;  %v10264_v14 = vld [vmem:[%s14870_s1 + $0x28] sm:$0xff] }
 0xa8a   :  { %v2218_v63 = vpop.permute.xlu0 %2217 }
 0xa8b   :  { %v2266_v20 = vmax.f32 %v2250_v50, 0.0  ;;  %v2251_v42 = vadd.f32 %v2218_v63, %v2023_v24  ;;  %9446 = vmatmul.mubr.msk.bf16.gmra.mxu1 %vm1582_vm4, %v2274_v36  ;;  %v10265_v50 = vld [vmem:[%s14870_s1 + $0x38] sm:$0xff] }
 0xa8c   :  { %v2220_v25 = vpop.permute.xlu1 %2219 }
 0xa8d   :  { %v2275_v2 = vpack.c.bf16 %v2266_v20, %v2265_v38  ;;  %v2252_v28 = vadd.f32 %v2220_v25, %v2024_v27  ;;  %v2267_v5 = vmax.f32 %v2251_v42, 0.0  ;;  %v10266_v38 = vld [vmem:[%s14870_s1 + $0x40] sm:$0xff] }
 0xa8f   :  { %v2268_v43 = vmax.f32 %v2252_v28, 0.0  ;;  %9449 = vmatprep.mubr.msk.bf16.mxu1 %vm1582_vm4, %v2275_v2 }
 0xa91   :  { %v2276_v33 = vpack.c.bf16 %v2268_v43, %v2267_v5  ;;  %v10267_v5 = vld [vmem:[%s14870_s1 + $0x50] sm:$0xff] }
 0xa93   :  { %9450 = vmatmul.mubr.msk.bf16.gmra.mxu1 %vm1582_vm4, %v2276_v33 }
 0xb3b   :  { %v9439_v21 = vpop.f32.mrf.mxu1 }
 0xb3c   :  { %v2372_v47 = vadd.f32 %v9439_v21, %v11391_v17  ;;  %v10268_v21 = vld [vmem:[%s14870_s1 + $0x48] sm:$0xff] }
 0xb3d   :  { %v2363_v34 = vpop.f32.mrf.mxu1 }
 0xb3e   :  { %v2364_v46 = vadd.f32 %v11391_v17, %v2363_v34  ;;  %v11407_v58 = vadd.f32 %v10259_v53, %v2372_v47  ;;  %v10269_v47 = vld [vmem:[%s14870_s1 + $0x58] sm:$0xff]  ;;  %v10270_v53 = vld [vmem:[%s14870_s1 + $0x60] sm:$0xff] }
 0xb3f   :  { %v9440_v40 = vpop.f32.mrf.mxu1 }
 0xb40   :  { %v11398_v29 = vadd.f32 %v10258_v19, %v2364_v46  ;;  %v2375_v45 = vadd.f32 %v9440_v40, %v11391_v17  ;;  %v2448_v15 = vsel %vm221_vm1, %v11407_v58, 0.0 }
 0xb41   :  { %v2366_v0 = vpop.f32.mrf.mxu1 }
 0xb42   :  { %v2367_v48 = vadd.f32 %v11391_v17, %v2366_v0  ;;  %v2442_v60 = vsel %vm221_vm1, %v11398_v29, 0.0  ;;  %v11423_v37 = vadd.f32 %v10261_v16, %v2375_v45 }
 0xb43   :  { %v9443_v12 = vpop.f32.mrf.mxu1  ;;  %2443 = vadd.xlane.f32.xlu0 %v2442_v60 }
 0xb44   :  { %v11412_v55 = vadd.f32 %v10260_v9, %v2367_v48  ;;  %v2388_v13 = vadd.f32 %v9443_v12, %v11391_v17  ;;  %v2451_v61 = vsel %vm221_vm1, %v11423_v37, 0.0 }
 0xb45   :  { %v2379_v44 = vpop.f32.mrf.mxu1 }
 0xb46   :  { %v2380_v26 = vadd.f32 %v11391_v17, %v2379_v44  ;;  %v2445_v11 = vsel %vm221_vm1, %v11412_v55, 0.0  ;;  %v11433_v51 = vadd.f32 %v10263_v52, %v2388_v13  ;;  %v10271_v44 = vld [vmem:[%s14870_s1 + $0x70] sm:$0xff] }
 0xb47   :  { %v9444_v35 = vpop.f32.mrf.mxu1  ;;  %2446 = vadd.xlane.f32.xlu1 %v2445_v11  ;;  %2449 = vadd.xlane.f32.xlu0 %v2448_v15 }
 0xb48   :  { %v11428_v22 = vadd.f32 %v10262_v6, %v2380_v26  ;;  %v2391_v59 = vadd.f32 %v9444_v35, %v11391_v17  ;;  %v2460_v62 = vsel %vm221_vm1, %v11433_v51, 0.0  ;;  %v10272_v35 = vld [vmem:[%s14870_s1 + $0x68] sm:$0xff] }
 0xb49   :  { %v2382_v41 = vpop.f32.mrf.mxu1 }
 0xb4a   :  { %v2383_v32 = vadd.f32 %v11391_v17, %v2382_v41  ;;  %v2454_v3 = vsel %vm221_vm1, %v11428_v22, 0.0  ;;  %v11455_v24 = vadd.f32 %v10265_v50, %v2391_v59  ;;  %v10273_v41 = vld [vmem:[%s14870_s1 + $0x78] sm:$0xff] }
 0xb4b   :  { %v9447_v56 = vpop.f32.mrf.mxu1  ;;  %2455 = vadd.xlane.f32.xlu1 %v2454_v3  ;;  %2452 = vadd.xlane.f32.xlu0 %v2451_v61 }
 0xb4c   :  { %v11444_v49 = vadd.f32 %v10264_v14, %v2383_v32  ;;  %v2404_v4 = vadd.f32 %v9447_v56, %v11391_v17  ;;  %v2463_v28 = vsel %vm221_vm1, %v11455_v24, 0.0 }
 0xb4d   :  { %v2395_v8 = vpop.f32.mrf.mxu1 }
 0xb4e   :  { %v2396_v57 = vadd.f32 %v11391_v17, %v2395_v8  ;;  %v2457_v36 = vsel %vm221_vm1, %v11444_v49, 0.0  ;;  %v11471_v43 = vadd.f32 %v10267_v5, %v2404_v4 }
 0xb4f   :  { %v9448_v63 = vpop.f32.mrf.mxu1  ;;  %2461 = vadd.xlane.f32.xlu1 %v2460_v62  ;;  %2458 = vadd.xlane.f32.xlu0 %v2457_v36 }
 0xb50   :  { %v11460_v20 = vadd.f32 %v10266_v38, %v2396_v57  ;;  %v2407_v42 = vadd.f32 %v9448_v63, %v11391_v17  ;;  %v2472_v45 = vsel %vm221_vm1, %v11471_v43, 0.0 }
 0xb51   :  { %v2398_v27 = vpop.f32.mrf.mxu1 }
 0xb52   :  { %v2399_v25 = vadd.f32 %v11391_v17, %v2398_v27  ;;  %v2466_v2 = vsel %vm221_vm1, %v11460_v20, 0.0  ;;  %v11481_v46 = vadd.f32 %v10269_v47, %v2407_v42 }
 0xb53   :  { %v9451_v33 = vpop.f32.mrf.mxu1  ;;  %2467 = vadd.xlane.f32.xlu1 %v2466_v2  ;;  %2464 = vadd.xlane.f32.xlu0 %v2463_v28 }
 0xb54   :  { %v11476_v34 = vadd.f32 %v10268_v21, %v2399_v25  ;;  %v2420_v19 = vadd.f32 %v9451_v33, %v11391_v17  ;;  %v2475_v13 = vsel %vm221_vm1, %v11481_v46, 0.0 }
 0xb55   :  { %v2411_v40 = vpop.f32.mrf.mxu1 }
 0xb56   :  { %v2412_v0 = vadd.f32 %v11391_v17, %v2411_v40  ;;  %v2469_v48 = vsel %vm221_vm1, %v11476_v34, 0.0  ;;  %v11499_v26 = vadd.f32 %v10271_v44, %v2420_v19 }
 0xb57   :  { %v9452_v60 = vpop.f32.mrf.mxu1  ;;  %2473 = vadd.xlane.f32.xlu1 %v2472_v45  ;;  %2470 = vadd.xlane.f32.xlu0 %v2469_v48 }
 0xb58   :  { %v11492_v12 = vadd.f32 %v10270_v53, %v2412_v0  ;;  %v2423_v11 = vadd.f32 %v9452_v60, %v11391_v17 }
 0xb59   :  { %v2414_v9 = vpop.f32.mrf.mxu1 }
 0xb5a   :  { %v2415_v15 = vadd.f32 %v11391_v17, %v2414_v9  ;;  %v2478_v16 = vsel %vm221_vm1, %v11492_v12, 0.0  ;;  %v11513_v52 = vadd.f32 %v10273_v41, %v2423_v11  ;;  %v2484_v17 = vsel %vm221_vm1, %v11499_v26, 0.0 }
 0xb5b   :  { %2479 = vadd.xlane.f32.xlu1 %v2478_v16  ;;  %2476 = vadd.xlane.f32.xlu0 %v2475_v13 }
 0xb5c   :  { %v11508_v6 = vadd.f32 %v10272_v35, %v2415_v15  ;;  %v2487_v32 = vsel %vm221_vm1, %v11513_v52, 0.0 }
 0xb5e   :  { %v2481_v59 = vsel %vm221_vm1, %v11508_v6, 0.0 }
 0xb5f   :  { %2485 = vadd.xlane.f32.xlu1 %v2484_v17  ;;  %2482 = vadd.xlane.f32.xlu0 %v2481_v59 }
 0xb63   :  { %2488 = vadd.xlane.f32.xlu0 %v2487_v32 }
 0xbcc   :  { %v2444_v3 = vpop.xlane.xlu0 %2443 }
 0xbcd   :  { %v2490_v61 = vmul.f32 0.03125, %v2444_v3 }
 0xbcf   :  { %v11522_v56 = vsub.f32 %v11398_v29, %v2490_v61 }
 0xbd0   :  { %v2447_v14 = vpop.xlane.xlu1 %2446  ;;  %v2450_v8 = vpop.xlane.xlu0 %2449 }
 0xbd1   :  { %v2491_v62 = vmul.f32 0.03125, %v2447_v14  ;;  %v2492_v4 = vmul.f32 0.03125, %v2450_v8  ;;  %v2522_v57 = vmul.f32 %v11522_v56, %v11522_v56 }
 0xbd3   :  { %v11527_v36 = vsub.f32 %v11412_v55, %v2491_v62  ;;  %v11530_v50 = vsub.f32 %v11407_v58, %v2492_v4  ;;  %v2538_v63 = vsel %vm221_vm1, %v2522_v57, 0.0 }
 0xbd4   :  { %v2456_v38 = vpop.xlane.xlu1 %2455  ;;  %2539 = vadd.xlane.f32.xlu1 %v2538_v63  ;;  %v2453_v42 = vpop.xlane.xlu0 %2452 }
 0xbd5   :  { %v2494_v29 = vmul.f32 0.03125, %v2456_v38  ;;  %v2493_v27 = vmul.f32 0.03125, %v2453_v42  ;;  %v2523_v25 = vmul.f32 %v11527_v36, %v11527_v36  ;;  %v2524_v2 = vmul.f32 %v11530_v50, %v11530_v50 }
 0xbd7   :  { %v11538_v28 = vsub.f32 %v11428_v22, %v2494_v29  ;;  %v11541_v55 = vsub.f32 %v11423_v37, %v2493_v27  ;;  %v2541_v58 = vsel %vm221_vm1, %v2523_v25, 0.0  ;;  %v2544_v5 = vsel %vm221_vm1, %v2524_v2, 0.0 }
 0xbd8   :  { %v2462_v33 = vpop.xlane.xlu1 %2461  ;;  %2542 = vadd.xlane.f32.xlu0 %v2541_v58  ;;  %2545 = vadd.xlane.f32.xlu1 %v2544_v5  ;;  %v2459_v21 = vpop.xlane.xlu0 %2458 }
 0xbd9   :  { %v2496_v47 = vmul.f32 0.03125, %v2462_v33  ;;  %v2495_v40 = vmul.f32 0.03125, %v2459_v21  ;;  %v2526_v19 = vmul.f32 %v11538_v28, %v11538_v28  ;;  %v2525_v22 = vmul.f32 %v11541_v55, %v11541_v55 }
 0xbdb   :  { %v11550_v0 = vsub.f32 %v11433_v51, %v2496_v47  ;;  %v11553_v37 = vsub.f32 %v11444_v49, %v2495_v40  ;;  %v2550_v45 = vsel %vm221_vm1, %v2526_v19, 0.0  ;;  %v2547_v48 = vsel %vm221_vm1, %v2525_v22, 0.0 }
 0xbdc   :  { %v2468_v60 = vpop.xlane.xlu1 %2467  ;;  %2551 = vadd.xlane.f32.xlu1 %v2550_v45  ;;  %2548 = vadd.xlane.f32.xlu0 %v2547_v48  ;;  %v2465_v53 = vpop.xlane.xlu0 %2464 }
 0xbdd   :  { %v2498_v9 = vmul.f32 0.03125, %v2468_v60  ;;  %v2497_v13 = vmul.f32 0.03125, %v2465_v53  ;;  %v2528_v44 = vmul.f32 %v11550_v0, %v11550_v0  ;;  %v2527_v51 = vmul.f32 %v11553_v37, %v11553_v37 }
 0xbdf   :  { %v11562_v11 = vsub.f32 %v11460_v20, %v2498_v9  ;;  %v11565_v49 = vsub.f32 %v11455_v24, %v2497_v13  ;;  %v2556_v15 = vsel %vm221_vm1, %v2528_v44, 0.0  ;;  %v2553_v16 = vsel %vm221_vm1, %v2527_v51, 0.0  ;;  %v9926_v24 = vld [vmem:[%s14871_s2 + $0x64] ss:$36 sps:$4 sm:$0xff]   ;;  %v9927_v13 = vld [vmem:[%s14871_s2 + $0x1c] ss:$36 sps:$4 sm:$0xff]  }
 0xbe0   :  { %v2474_v35 = vpop.xlane.xlu1 %2473  ;;  %2557 = vadd.xlane.f32.xlu1 %v2556_v15  ;;  %2554 = vadd.xlane.f32.xlu0 %v2553_v16  ;;  %v2471_v41 = vpop.xlane.xlu0 %2470  ;;  %v9929_v44 = vld [vmem:[#allocation5 + $0x38] ss:$12 sps:$4 sm:$0xff]   ;;  %v9930_v51 = vld [vmem:[#allocation5 + $0x20] ss:$12 sps:$4 sm:$0xff]  }
 0xbe1   :  { %v2500_v17 = vmul.f32 0.03125, %v2474_v35  ;;  %v2499_v59 = vmul.f32 0.03125, %v2471_v41  ;;  %v2530_v32 = vmul.f32 %v11562_v11, %v11562_v11  ;;  %v2529_v20 = vmul.f32 %v11565_v49, %v11565_v49  ;;  %9453 = vmatprep.subr.bf16.mxu0 %v9926_v24 }
 0xbe2   :  { %9454 = vmatpush3.bf16.msra.mxu0 %v9926_v24 }
 0xbe3   :  { %v11577_v3 = vsub.f32 %v11471_v43, %v2500_v17  ;;  %v11580_v61 = vsub.f32 %v11476_v34, %v2499_v59  ;;  %v2562_v14 = vsel %vm221_vm1, %v2530_v32, 0.0  ;;  %v2559_v8 = vsel %vm221_vm1, %v2529_v20, 0.0  ;;  %9455 = vmatprep.subr.bf16.mxu0 %v9927_v13 }
 0xbe4   :  { %v2480_v62 = vpop.xlane.xlu1 %2479  ;;  %2563 = vadd.xlane.f32.xlu1 %v2562_v14  ;;  %2560 = vadd.xlane.f32.xlu0 %v2559_v8  ;;  %v2477_v4 = vpop.xlane.xlu0 %2476 }
 0xbe5   :  { %v2502_v57 = vmul.f32 0.03125, %v2480_v62  ;;  %v2501_v63 = vmul.f32 0.03125, %v2477_v4  ;;  %v2532_v38 = vmul.f32 %v11577_v3, %v11577_v3  ;;  %v2531_v43 = vmul.f32 %v11580_v61, %v11580_v61 }
 0xbe6   :  { %9456 = vmatpush3.bf16.msra.mxu0 %v9927_v13 }
 0xbe7   :  { %v11589_v34 = vsub.f32 %v11492_v12, %v2502_v57  ;;  %v11592_v42 = vsub.f32 %v11481_v46, %v2501_v63  ;;  %v2568_v29 = vsel %vm221_vm1, %v2532_v38, 0.0  ;;  %v2565_v27 = vsel %vm221_vm1, %v2531_v43, 0.0 }
 0xbe8   :  { %v2486_v25 = vpop.xlane.xlu1 %2485  ;;  %2569 = vadd.xlane.f32.xlu1 %v2568_v29  ;;  %2566 = vadd.xlane.f32.xlu0 %v2565_v27  ;;  %v2483_v2 = vpop.xlane.xlu0 %2482 }
 0xbe9   :  { %v2504_v58 = vmul.f32 0.03125, %v2486_v25  ;;  %v2503_v5 = vmul.f32 0.03125, %v2483_v2  ;;  %v2534_v33 = vmul.f32 %v11589_v34, %v11589_v34  ;;  %v2533_v12 = vmul.f32 %v11592_v42, %v11592_v42 }
 0xbeb   :  { %v11601_v21 = vsub.f32 %v11499_v26, %v2504_v58  ;;  %v11604_v46 = vsub.f32 %v11508_v6, %v2503_v5  ;;  %v2574_v47 = vsel %vm221_vm1, %v2534_v33, 0.0  ;;  %v2571_v40 = vsel %vm221_vm1, %v2533_v12, 0.0 }
 0xbec   :  { %2575 = vadd.xlane.f32.xlu1 %v2574_v47  ;;  %2572 = vadd.xlane.f32.xlu0 %v2571_v40  ;;  %v2489_v19 = vpop.xlane.xlu0 %2488 }
 0xbed   :  { %v2505_v22 = vmul.f32 0.03125, %v2489_v19  ;;  %v2536_v45 = vmul.f32 %v11601_v21, %v11601_v21  ;;  %v2535_v48 = vmul.f32 %v11604_v46, %v11604_v46 }
 0xbef   :  { %v11613_v26 = vsub.f32 %v11513_v52, %v2505_v22  ;;  %v2580_v6 = vsel %vm221_vm1, %v2536_v45, 0.0  ;;  %v2577_v60 = vsel %vm221_vm1, %v2535_v48, 0.0  ;;  %v9928_v52 = vld [vmem:[#allocation5 + $0x50] ss:$12 sps:$4 sm:$0xff]  }
 0xbf0   :  { %2581 = vadd.xlane.f32.xlu1 %v2580_v6  ;;  %2578 = vadd.xlane.f32.xlu0 %v2577_v60  ;;  %v11627_v6 = vld [vmem:[%s14874_s5 + $0x11] ss:$0 sm:$0xff] }
 0xbf1   :  { %v2537_v53 = vmul.f32 %v11613_v26, %v11613_v26  ;;  %9473 = vmatprep.subr.bf16.mxu1 %v9928_v52 }
 0xbf2   :  { %9474 = vmatpush3.bf16.msra.mxu1 %v9928_v52 }
 0xbf3   :  { %v2583_v9 = vsel %vm221_vm1, %v2537_v53, 0.0  ;;  %9475 = vmatprep.subr.bf16.mxu1 %v9929_v44 }
 0xbf4   :  { %2584 = vadd.xlane.f32.xlu0 %v2583_v9 }
 0xbf6   :  { %9476 = vmatpush3.bf16.msra.mxu1 %v9929_v44 }
 0xbf7   :  { %9477 = vmatprep.subr.bf16.mxu1 %v9930_v51 }
 0xbfa   :  { %9478 = vmatpush3.bf16.msra.mxu1 %v9930_v51 }
 0xc5d   :  { %v2540_v15 = vpop.xlane.xlu1 %2539 }
 0xc5e   :  { %v2586_v16 = vmul.f32 0.03125, %v2540_v15 }
 0xc60   :  { %v2602_v35 = vadd.f32 1e-05, %v2586_v16 }
 0xc61   :  { %v2546_v41 = vpop.xlane.xlu1 %2545  ;;  %v2543_v17 = vpop.xlane.xlu0 %2542 }
 0xc62   :  { %9976 = vrsqrt.f32 %v2602_v35  ;;  %v2588_v59 = vmul.f32 0.03125, %v2546_v41  ;;  %v2587_v32 = vmul.f32 0.03125, %v2543_v17 }
 0xc64   :  { %v2604_v20 = vadd.f32 1e-05, %v2588_v59  ;;  %v2603_v24 = vadd.f32 1e-05, %v2587_v32  ;;  %v11635_v59 = vld [vmem:[%s14874_s5 + $0x12] ss:$0 sm:$0xff] }
 0xc65   :  { %v2552_v14 = vpop.xlane.xlu1 %2551  ;;  %v2549_v8 = vpop.xlane.xlu0 %2548 }
 0xc66   :  { %9978 = vrsqrt.f32 %v2604_v20  ;;  %v2590_v62 = vmul.f32 0.03125, %v2552_v14  ;;  %v2589_v4 = vmul.f32 0.03125, %v2549_v8 }
 0xc67   :  { %9980 = vrsqrt.f32 %v2603_v24 }
 0xc68   :  { %v2606_v57 = vadd.f32 1e-05, %v2590_v62  ;;  %v2605_v63 = vadd.f32 1e-05, %v2589_v4 }
 0xc69   :  { %v2558_v38 = vpop.xlane.xlu1 %2557  ;;  %v2555_v43 = vpop.xlane.xlu0 %2554 }
 0xc6a   :  { %9982 = vrsqrt.f32 %v2606_v57  ;;  %v2592_v29 = vmul.f32 0.03125, %v2558_v38  ;;  %v2591_v27 = vmul.f32 0.03125, %v2555_v43 }
 0xc6b   :  { %9984 = vrsqrt.f32 %v2605_v63 }
 0xc6c   :  { %v2608_v25 = vadd.f32 1e-05, %v2592_v29  ;;  %v2607_v2 = vadd.f32 1e-05, %v2591_v27 }
 0xc6d   :  { %v2564_v58 = vpop.xlane.xlu1 %2563  ;;  %v2561_v5 = vpop.xlane.xlu0 %2560 }
 0xc6e   :  { %9986 = vrsqrt.f32 %v2608_v25  ;;  %v2594_v33 = vmul.f32 0.03125, %v2564_v58  ;;  %v2593_v12 = vmul.f32 0.03125, %v2561_v5 }
 0xc6f   :  { %v9977_v47 = vpop.eup %9976  ;;  %9988 = vrsqrt.f32 %v2607_v2 }
 0xc70   :  { %v2610_v40 = vadd.f32 1e-05, %v2594_v33  ;;  %v2609_v19 = vadd.f32 1e-05, %v2593_v12  ;;  %v2634_v48 = vmul.f32 %v9977_v47, %v11522_v56 }
 0xc71   :  { %v2570_v22 = vpop.xlane.xlu1 %2569  ;;  %v2567_v45 = vpop.xlane.xlu0 %2566 }
 0xc72   :  { %9990 = vrsqrt.f32 %v2610_v40  ;;  %v2596_v60 = vmul.f32 0.03125, %v2570_v22  ;;  %v2595_v53 = vmul.f32 0.03125, %v2567_v45  ;;  %v2654_v56 = vmul.f32 %v11627_v6, %v2634_v48 }
 0xc73   :  { %v9979_v9 = vpop.eup %9978  ;;  %9992 = vrsqrt.f32 %v2609_v19 }
 0xc74   :  { %v9981_v13 = vpop.eup %9980  ;;  %v2636_v52 = vmul.f32 %v9979_v9, %v11530_v50  ;;  %v2612_v44 = vadd.f32 1e-05, %v2596_v60  ;;  %v2611_v51 = vadd.f32 1e-05, %v2595_v53  ;;  %v11641_v57 = vadd.f32 %v11635_v59, %v2654_v56 }
 0xc75   :  { %v2576_v15 = vpop.xlane.xlu1 %2575  ;;  %v2573_v16 = vpop.xlane.xlu0 %2572  ;;  %v2635_v35 = vmul.f32 %v9981_v13, %v11527_v36 }
 0xc76   :  { %9994 = vrsqrt.f32 %v2612_v44  ;;  %v2598_v41 = vmul.f32 0.03125, %v2576_v15  ;;  %v2597_v17 = vmul.f32 0.03125, %v2573_v16  ;;  %v2656_v24 = vmul.f32 %v11627_v6, %v2636_v52 }
 0xc77   :  { %v9983_v32 = vpop.eup %9982  ;;  %9996 = vrsqrt.f32 %v2611_v51  ;;  %v2655_v50 = vmul.f32 %v11627_v6, %v2635_v35 }
 0xc78   :  { %v9985_v20 = vpop.eup %9984  ;;  %v2614_v14 = vadd.f32 1e-05, %v2598_v41  ;;  %v2613_v8 = vadd.f32 1e-05, %v2597_v17  ;;  %v2638_v38 = vmul.f32 %v9983_v32, %v11538_v28  ;;  %v11651_v33 = vadd.f32 %v11635_v59, %v2656_v24 }
 0xc79   :  { %v2637_v36 = vmul.f32 %v9985_v20, %v11541_v55  ;;  %v2582_v62 = vpop.xlane.xlu1 %2581  ;;  %v2579_v4 = vpop.xlane.xlu0 %2578  ;;  %v11644_v63 = vadd.f32 %v11635_v59, %v2655_v50 }
 0xc7a   :  { %9998 = vrsqrt.f32 %v2614_v14  ;;  %v2600_v43 = vmul.f32 0.03125, %v2582_v62  ;;  %v2599_v29 = vmul.f32 0.03125, %v2579_v4  ;;  %v2658_v40 = vmul.f32 %v11627_v6, %v2638_v38 }
 0xc7b   :  { %v9987_v27 = vpop.eup %9986  ;;  %v2657_v25 = vmul.f32 %v11627_v6, %v2637_v36  ;;  %10000 = vrsqrt.f32 %v2613_v8  ;;  %v2690_v55 = vpack.c.bf16 %v11644_v63, %v11641_v57 }
 0xc7c   :  { %v9989_v2 = vpop.eup %9988  ;;  %v2616_v58 = vadd.f32 1e-05, %v2600_v43  ;;  %v2615_v5 = vadd.f32 1e-05, %v2599_v29  ;;  %v2640_v19 = vmul.f32 %v9987_v27, %v11550_v0 }
 0xc7d   :  { %9457 = vmatprep.mubr.msk.bf16.mxu0 %vm221_vm1, %v2690_v55  ;;  %v2585_v12 = vpop.xlane.xlu0 %2584  ;;  %v11655_v28 = vadd.f32 %v11635_v59, %v2657_v25  ;;  %v2639_v47 = vmul.f32 %v9989_v2, %v11553_v37  ;;  %v11666_v37 = vadd.f32 %v11635_v59, %v2658_v40 }
 0xc7e   :  { %10002 = vrsqrt.f32 %v2616_v58  ;;  %v2601_v22 = vmul.f32 0.03125, %v2585_v12  ;;  %v2660_v44 = vmul.f32 %v11627_v6, %v2640_v19 }
 0xc7f   :  { %v9991_v45 = vpop.eup %9990  ;;  %10004 = vrsqrt.f32 %v2615_v5  ;;  %v2691_v48 = vpack.c.bf16 %v11655_v28, %v11651_v33  ;;  %v2659_v60 = vmul.f32 %v11627_v6, %v2639_v47 }
 0xc80   :  { %v9993_v53 = vpop.eup %9992  ;;  %v2617_v9 = vadd.f32 1e-05, %v2601_v22  ;;  %v2642_v13 = vmul.f32 %v9991_v45, %v11562_v11  ;;  %v11679_v56 = vadd.f32 %v11635_v59, %v2660_v44  ;;  %v10274_v45 = vld [vmem:[#allocation7] sm:$0xff]  }
 0xc81   :  { %9458 = vmatmul.mubr.msk.bf16.vlgmr.msra.gmra.mxu0 %vm221_vm1, %v2691_v48  ;;  %v11669_v0 = vadd.f32 %v11635_v59, %v2659_v60  ;;  %v2641_v52 = vmul.f32 %v9993_v53, %v11565_v49  ;;  %v9931_v48 = vld [vmem:[#allocation5 + $0x8] ss:$12 sps:$4 sm:$0xff]   ;;  %v8884_v53 = vld [vmem:[%s14874_s5 + $0xb] ss:$0 sm:$0xff] }
 0xc82   :  { %10006 = vrsqrt.f32 %v2617_v9  ;;  %v2662_v35 = vmul.f32 %v11627_v6, %v2642_v13  ;;  %9479 = vmatprep.subr.bf16.mxu1 %v9931_v48 }
 0xc83   :  { %v9995_v51 = vpop.eup %9994  ;;  %v2692_v15 = vpack.c.bf16 %v11669_v0, %v11666_v37  ;;  %v2661_v16 = vmul.f32 %v11627_v6, %v2641_v52  ;;  %9480 = vmatpush3.bf16.msra.mxu1 %v9931_v48 }
 0xc84   :  { %v9997_v11 = vpop.eup %9996  ;;  %v2644_v17 = vmul.f32 %v9995_v51, %v11577_v3  ;;  %v11690_v14 = vadd.f32 %v11635_v59, %v2662_v35 }
 0xc85   :  { %9461 = vmatprep.mubr.msk.bf16.mxu0 %vm221_vm1, %v2692_v15  ;;  %v11682_v41 = vadd.f32 %v11635_v59, %v2661_v16  ;;  %v2643_v49 = vmul.f32 %v9997_v11, %v11580_v61 }
 0xc86   :  { %v2664_v61 = vmul.f32 %v11627_v6, %v2644_v17 }
 0xc87   :  { %v9999_v32 = vpop.eup %9998  ;;  %v2693_v50 = vpack.c.bf16 %v11682_v41, %v11679_v56  ;;  %v2663_v20 = vmul.f32 %v11627_v6, %v2643_v49 }
 0xc88   :  { %v10001_v24 = vpop.eup %10000  ;;  %v2646_v3 = vmul.f32 %v9999_v32, %v11589_v34  ;;  %v11705_v27 = vadd.f32 %v11635_v59, %v2664_v61 }
 0xc89   :  { %9462 = vmatmul.mubr.msk.bf16.gmra.mxu0 %vm221_vm1, %v2693_v50  ;;  %v11694_v8 = vadd.f32 %v11635_v59, %v2663_v20  ;;  %v2645_v36 = vmul.f32 %v10001_v24, %v11592_v42 }
 0xc8a   :  { %v2666_v34 = vmul.f32 %v11627_v6, %v2646_v3 }
 0xc8b   :  { %v10003_v62 = vpop.eup %10002  ;;  %v2694_v4 = vpack.c.bf16 %v11694_v8, %v11690_v14  ;;  %v2665_v38 = vmul.f32 %v11627_v6, %v2645_v36 }
 0xc8c   :  { %v10005_v43 = vpop.eup %10004  ;;  %v2648_v29 = vmul.f32 %v10003_v62, %v11601_v21  ;;  %v11719_v12 = vadd.f32 %v11635_v59, %v2666_v34 }
 0xc8d   :  { %9465 = vmatprep.mubr.msk.bf16.mxu0 %vm221_vm1, %v2694_v4  ;;  %v11708_v42 = vadd.f32 %v11635_v59, %v2665_v38  ;;  %v2647_v25 = vmul.f32 %v10005_v43, %v11604_v46  ;;  %v10276_v38 = vld [vmem:[%s14871_s2 + $0x50] ss:$36 sps:$4 sm:$0xff]  }
 0xc8e   :  { %v2668_v5 = vmul.f32 %v11627_v6, %v2648_v29 }
 0xc8f   :  { %v10007_v55 = vpop.eup %10006  ;;  %v2695_v2 = vpack.c.bf16 %v11708_v42, %v11705_v27  ;;  %v2667_v58 = vmul.f32 %v11627_v6, %v2647_v25  ;;  %v10277_v25 = vld [vmem:[%s14871_s2 + $0xc] ss:$36 sps:$4 sm:$0xff]  }
 0xc90   :  { %v2649_v21 = vmul.f32 %v10007_v55, %v11613_v26  ;;  %v11728_v19 = vadd.f32 %v11635_v59, %v2668_v5  ;;  %v10278_v5 = vld [vmem:[%s14871_s2 + $0x8] ss:$36 sps:$4 sm:$0xff]  }
 0xc91   :  { %9466 = vmatmul.mubr.msk.bf16.gmra.mxu0 %vm221_vm1, %v2695_v2  ;;  %v11722_v47 = vadd.f32 %v11635_v59, %v2667_v58 }
 0xc92   :  { %v2669_v46 = vmul.f32 %v11627_v6, %v2649_v21  ;;  %v10275_v6 = vld [vmem:[%s14871_s2 + $0x54] ss:$36 sps:$4 sm:$0xff]  }
 0xc93   :  { %v2696_v40 = vpack.c.bf16 %v11722_v47, %v11719_v12  ;;  %3421 = vmatprep.subr.bf16.mxu1 %v10275_v6 }
 0xc94   :  { %v11731_v26 = vadd.f32 %v11635_v59, %v2669_v46 }
 0xc95   :  { %9469 = vmatprep.mubr.msk.bf16.mxu0 %vm221_vm1, %v2696_v40 }
 0xc96   :  { %v2697_v22 = vpack.c.bf16 %v11731_v26, %v11728_v19 }
 0xc99   :  { %9470 = vmatmul.mubr.msk.bf16.gmra.mxu0 %vm221_vm1, %v2697_v22 }
 0xc9a   :  { %9513 = vmatprep.mubr.bf16.mxu0 %v10274_v45 }
 0xd41   :  { %v9459_v60 = vpop.f32.mrf.mxu0 }
 0xd42   :  { %v2781_v44 = vadd.f32 %v9459_v60, %v8884_v53 }
 0xd43   :  { %v2772_v59 = vpop.f32.mrf.mxu0 }
 0xd44   :  { %v2773_v13 = vadd.f32 %v8884_v53, %v2772_v59  ;;  %v2837_v17 = vmax.f32 %v2781_v44, 0.0 }
 0xd45   :  { %v9460_v9 = vpop.f32.mrf.mxu0 }
 0xd46   :  { %v2784_v52 = vadd.f32 %v9460_v9, %v8884_v53  ;;  %v2835_v35 = vmax.f32 %v2773_v13, 0.0 }
 0xd47   :  { %v2775_v51 = vpop.f32.mrf.mxu0 }
 0xd48   :  { %v2776_v15 = vadd.f32 %v8884_v53, %v2775_v51  ;;  %v2838_v16 = vmax.f32 %v2784_v52, 0.0 }
 0xd49   :  { %v9463_v11 = vpop.f32.mrf.mxu0 }
 0xd4a   :  { %v2836_v49 = vmax.f32 %v2776_v15, 0.0  ;;  %v2852_v20 = vpack.c.bf16 %v2838_v16, %v2837_v17  ;;  %v2797_v3 = vadd.f32 %v9463_v11, %v8884_v53 }
 0xd4b   :  { %v2788_v32 = vpop.f32.mrf.mxu0 }
 0xd4c   :  { %v2851_v50 = vpack.c.bf16 %v2836_v49, %v2835_v35  ;;  %v2789_v36 = vadd.f32 %v8884_v53, %v2788_v32  ;;  %v2841_v2 = vmax.f32 %v2797_v3, 0.0 }
 0xd4d   :  { %v9464_v24 = vpop.f32.mrf.mxu0 }
 0xd4e   :  { %v2800_v61 = vadd.f32 %v9464_v24, %v8884_v53  ;;  %9481 = vmatprep.mubr.msk.bf16.mxu1 %vm1582_vm4, %v2851_v50  ;;  %v2839_v34 = vmax.f32 %v2789_v36, 0.0 }
 0xd4f   :  { %v2791_v62 = vpop.f32.mrf.mxu0  ;;  %9482 = vmatmul.mubr.msk.bf16.vlgmr.msra.gmra.mxu1 %vm1582_vm4, %v2852_v20 }
 0xd50   :  { %v2792_v4 = vadd.f32 %v8884_v53, %v2791_v62  ;;  %3422 = vmatpush1.bf16.msra.mxu1 %v10276_v38  ;;  %v2842_v43 = vmax.f32 %v2800_v61, 0.0 }
 0xd51   :  { %v9467_v29 = vpop.f32.mrf.mxu0  ;;  %3423 = vmatprep.subr.bf16.mxu1 %v10277_v25 }
 0xd52   :  { %v2840_v55 = vmax.f32 %v2792_v4, 0.0  ;;  %v2854_v46 = vpack.c.bf16 %v2842_v43, %v2841_v2  ;;  %v2813_v48 = vadd.f32 %v9467_v29, %v8884_v53 }
 0xd53   :  { %v2804_v58 = vpop.f32.mrf.mxu0 }
 0xd54   :  { %v2853_v21 = vpack.c.bf16 %v2840_v55, %v2839_v34  ;;  %3424 = vmatpush1.bf16.msra.mxu1 %v10278_v5  ;;  %v2805_v22 = vadd.f32 %v8884_v53, %v2804_v58  ;;  %v2845_v44 = vmax.f32 %v2813_v48, 0.0 }
 0xd55   :  { %v9468_v40 = vpop.f32.mrf.mxu0  ;;  %9567 = vmatprep.subr.bf16.mxu1 %v14976_v18 }
 0xd56   :  { %v2816_v45 = vadd.f32 %v9468_v40, %v8884_v53  ;;  %9485 = vmatprep.mubr.msk.bf16.mxu1 %vm1582_vm4, %v2853_v21  ;;  %v2843_v13 = vmax.f32 %v2805_v22, 0.0 }
 0xd57   :  { %v2807_v6 = vpop.f32.mrf.mxu0  ;;  %9486 = vmatmul.mubr.msk.bf16.gmra.mxu1 %vm1582_vm4, %v2854_v46  ;;  %v8895_v46 = vld [vmem:[%s14874_s5 + $0xc] ss:$0 sm:$0xff] }
 0xd58   :  { %v2808_v60 = vadd.f32 %v8884_v53, %v2807_v6  ;;  %v2846_v59 = vmax.f32 %v2816_v45, 0.0 }
 0xd59   :  { %v9471_v9 = vpop.f32.mrf.mxu0 }
 0xd5a   :  { %v2844_v52 = vmax.f32 %v2808_v60, 0.0  ;;  %v2856_v16 = vpack.c.bf16 %v2846_v59, %v2845_v44  ;;  %v2829_v17 = vadd.f32 %v9471_v9, %v8884_v53 }
 0xd5b   :  { %v2820_v51 = vpop.f32.mrf.mxu0 }
 0xd5c   :  { %v2855_v15 = vpack.c.bf16 %v2844_v52, %v2843_v13  ;;  %v2821_v35 = vadd.f32 %v8884_v53, %v2820_v51  ;;  %v2849_v61 = vmax.f32 %v2829_v17, 0.0 }
 0xd5d   :  { %v9472_v11 = vpop.f32.mrf.mxu0 }
 0xd5e   :  { %v2832_v49 = vadd.f32 %v9472_v11, %v8884_v53  ;;  %9489 = vmatprep.mubr.msk.bf16.mxu1 %vm1582_vm4, %v2855_v15  ;;  %v2847_v24 = vmax.f32 %v2821_v35, 0.0 }
 0xd5f   :  { %v2823_v32 = vpop.f32.mrf.mxu0  ;;  %9490 = vmatmul.mubr.msk.bf16.gmra.mxu1 %vm1582_vm4, %v2856_v16 }
 0xd60   :  { %v2824_v50 = vadd.f32 %v8884_v53, %v2823_v32  ;;  %v2850_v20 = vmax.f32 %v2832_v49, 0.0 }
 0xd62   :  { %v2848_v36 = vmax.f32 %v2824_v50, 0.0  ;;  %v2858_v62 = vpack.c.bf16 %v2850_v20, %v2849_v61 }
 0xd64   :  { %v2857_v3 = vpack.c.bf16 %v2848_v36, %v2847_v24 }
 0xd66   :  { %9493 = vmatprep.mubr.msk.bf16.mxu1 %vm1582_vm4, %v2857_v3 }
 0xd67   :  { %9494 = vmatmul.mubr.msk.bf16.gmra.mxu1 %vm1582_vm4, %v2858_v62 }
 0xd68   :  { %3441 = vmatprep.mubr.bf16.mxu1 %v14979_v39 }
 0xe0f   :  { %v9483_v4 = vpop.f32.mrf.mxu1 }
 0xe10   :  { %v2954_v3 = vadd.f32 %v9483_v4, %v8895_v46 }
 0xe11   :  { %v2945_v38 = vpop.f32.mrf.mxu1 }
 0xe13   :  { %v9484_v43 = vpop.f32.mrf.mxu1 }
 0xe14   :  { %v2957_v4 = vadd.f32 %v9484_v43, %v8895_v46 }
 0xe15   :  { %v11762_v29 = vpop.f32.mrf.mxu1 }
 0xe17   :  { %v9487_v25 = vpop.f32.mrf.mxu1 }
 0xe18   :  { %v2970_v17 = vadd.f32 %v9487_v25, %v8895_v46 }
 0xe19   :  { %v2961_v34 = vpop.f32.mrf.mxu1 }
 0xe1a   :  { %v2962_v24 = vadd.f32 %v8895_v46, %v2961_v34 }
 0xe1b   :  { %v9488_v53 = vpop.f32.mrf.mxu1 }
 0xe1c   :  { %v2973_v36 = vadd.f32 %v9488_v53, %v8895_v46  ;;  %v11809_v62 = vadd.f32 %v2962_v24, %v11666_v37 }
 0xe1d   :  { %v2964_v55 = vpop.f32.mrf.mxu1 }
 0xe1e   :  { %v2965_v25 = vadd.f32 %v8895_v46, %v2964_v55 }
 0xe1f   :  { %v9491_v2 = vpop.f32.mrf.mxu1 }
 0xe20   :  { %v2986_v60 = vadd.f32 %v9491_v2, %v8895_v46  ;;  %v2946_v2 = vadd.f32 %v8895_v46, %v2945_v38  ;;  %v11826_v55 = vadd.f32 %v2965_v25, %v11669_v0 }
 0xe21   :  { %v2977_v58 = vpop.f32.mrf.mxu1 }
 0xe22   :  { %v11779_v16 = vadd.f32 %v2986_v60, %v11705_v27  ;;  %v3039_v38 = vsel %vm221_vm1, %v11826_v55, 0.0 }
 0xe23   :  { %v9492_v21 = vpop.f32.mrf.mxu1 }
 0xe24   :  { %v2989_v11 = vadd.f32 %v9492_v21, %v8895_v46  ;;  %v3054_v20 = vsel %vm221_vm1, %v11779_v16, 0.0  ;;  %v11832_v21 = vadd.f32 %v2957_v4, %v11655_v28 }
 0xe25   :  { %v2980_v5 = vpop.f32.mrf.mxu1 }
 0xe26   :  { %v11792_v27 = vadd.f32 %v2989_v11, %v11708_v42  ;;  %v2981_v32 = vadd.f32 %v8895_v46, %v2980_v5  ;;  %v3033_v0 = vsel %vm221_vm1, %v11832_v21, 0.0 }
 0xe27   :  { %v9495_v40 = vpop.f32.mrf.mxu1 }
 0xe28   :  { %v3002_v22 = vadd.f32 %v9495_v40, %v8895_v46  ;;  %v11806_v61 = vadd.f32 %v2981_v32, %v11694_v8  ;;  %v11819_v8 = vadd.f32 %v2954_v3, %v11651_v33  ;;  %v2949_v33 = vadd.f32 %v8895_v46, %v11762_v29 }
 0xe29   :  { %v2993_v45 = vpop.f32.mrf.mxu1 }
 0xe2a   :  { %v11768_v48 = vadd.f32 %v3002_v22, %v11728_v19  ;;  %v2994_v6 = vadd.f32 %v8895_v46, %v2993_v45  ;;  %v2978_v19 = vadd.f32 %v8895_v46, %v2977_v58  ;;  %v3051_v34 = vsel %vm221_vm1, %v11806_v61, 0.0 }
 0xe2b   :  { %v9496_v59 = vpop.f32.mrf.mxu1  ;;  %v11829_v58 = vadd.f32 %v2946_v2, %v11641_v57  ;;  %v3030_v43 = vsel %vm221_vm1, %v11819_v8, 0.0  ;;  %v11844_v5 = vadd.f32 %v2949_v33, %v11644_v63 }
 0xe2c   :  { %v11771_v9 = vadd.f32 %v2994_v6, %v11719_v12  ;;  %v3005_v13 = vadd.f32 %v9496_v59, %v8895_v46  ;;  %v3066_v52 = vsel %vm221_vm1, %v11768_v48, 0.0 }
 0xe2d   :  { %3067 = vadd.xlane.f32.xlu1 %v3066_v52  ;;  %v2996_v44 = vpop.f32.mrf.mxu1  ;;  %v3024_v57 = vsel %vm221_vm1, %v11829_v58, 0.0  ;;  %v3027_v28 = vsel %vm221_vm1, %v11844_v5, 0.0 }
 0xe2e   :  { %v11776_v51 = vadd.f32 %v3005_v13, %v11731_v26  ;;  %v2997_v15 = vadd.f32 %v8895_v46, %v2996_v44  ;;  %v3060_v12 = vsel %vm221_vm1, %v11771_v9, 0.0  ;;  %v11789_v26 = vadd.f32 %v2978_v19, %v11690_v14 }
 0xe2f   :  { %v3057_v14 = vsel %vm221_vm1, %v11792_v27, 0.0 }
 0xe30   :  { %v3069_v35 = vsel %vm221_vm1, %v11776_v51, 0.0  ;;  %v11786_v49 = vadd.f32 %v2997_v15, %v11722_v47  ;;  %v11799_v47 = vadd.f32 %v2970_v17, %v11679_v56  ;;  %v3048_v42 = vsel %vm221_vm1, %v11789_v26, 0.0 }
 0xe31   :  { %3070 = vadd.xlane.f32.xlu0 %v3069_v35  ;;  %3061 = vadd.xlane.f32.xlu1 %v3060_v12  ;;  %v11812_v56 = vadd.f32 %v2973_v36, %v11682_v41  ;;  %v3036_v41 = vsel %vm221_vm1, %v11809_v62, 0.0 }
 0xe32   :  { %v3063_v50 = vsel %vm221_vm1, %v11786_v49, 0.0  ;;  %v3042_v53 = vsel %vm221_vm1, %v11799_v47, 0.0 }
 0xe33   :  { %v3045_v37 = vsel %vm221_vm1, %v11812_v56, 0.0 }
 0xe35   :  { %3064 = vadd.xlane.f32.xlu0 %v3063_v50  ;;  %3055 = vadd.xlane.f32.xlu1 %v3054_v20 }
 0xe39   :  { %3058 = vadd.xlane.f32.xlu0 %v3057_v14  ;;  %3049 = vadd.xlane.f32.xlu1 %v3048_v42 }
 0xe3d   :  { %3052 = vadd.xlane.f32.xlu0 %v3051_v34  ;;  %3043 = vadd.xlane.f32.xlu1 %v3042_v53 }
 0xe41   :  { %3046 = vadd.xlane.f32.xlu0 %v3045_v37  ;;  %3037 = vadd.xlane.f32.xlu1 %v3036_v41 }
 0xe45   :  { %3040 = vadd.xlane.f32.xlu0 %v3039_v38  ;;  %3031 = vadd.xlane.f32.xlu1 %v3030_v43 }
 0xe49   :  { %3034 = vadd.xlane.f32.xlu0 %v3033_v0  ;;  %3025 = vadd.xlane.f32.xlu1 %v3024_v57 }
 0xe4d   :  { %3028 = vadd.xlane.f32.xlu0 %v3027_v28 }
 0xeb6   :  { %v3068_v29 = vpop.xlane.xlu1 %3067 }
 0xeb7   :  { %v3086_v46 = vmul.f32 0.03125, %v3068_v29 }
 0xeb9   :  { %v11849_v40 = vsub.f32 %v11768_v48, %v3086_v46 }
 0xeba   :  { %v3071_v22 = vpop.xlane.xlu0 %3070  ;;  %v3062_v45 = vpop.xlane.xlu1 %3061 }
 0xebb   :  { %v3087_v6 = vmul.f32 0.03125, %v3071_v22  ;;  %v3084_v60 = vmul.f32 0.03125, %v3062_v45  ;;  %v3118_v59 = vmul.f32 %v11849_v40, %v11849_v40 }
 0xebd   :  { %v11854_v63 = vsub.f32 %v11776_v51, %v3087_v6  ;;  %v11857_v13 = vsub.f32 %v11771_v9, %v3084_v60  ;;  %v3162_v52 = vsel %vm221_vm1, %v3118_v59, 0.0 }
 0xebe   :  { %v3065_v44 = vpop.xlane.xlu0 %3064  ;;  %3163 = vadd.xlane.f32.xlu1 %v3162_v52  ;;  %v3056_v15 = vpop.xlane.xlu1 %3055 }
 0xebf   :  { %v3085_v48 = vmul.f32 0.03125, %v3065_v44  ;;  %v3082_v19 = vmul.f32 0.03125, %v3056_v15  ;;  %v3119_v11 = vmul.f32 %v11854_v63, %v11854_v63  ;;  %v3116_v35 = vmul.f32 %v11857_v13, %v11857_v13 }
 0xec1   :  { %v11865_v12 = vsub.f32 %v11786_v49, %v3085_v48  ;;  %v11868_v51 = vsub.f32 %v11779_v16, %v3082_v19  ;;  %v3165_v9 = vsel %vm221_vm1, %v3119_v11, 0.0  ;;  %v3156_v17 = vsel %vm221_vm1, %v3116_v35, 0.0 }
 0xec2   :  { %3166 = vadd.xlane.f32.xlu0 %v3165_v9  ;;  %v3059_v32 = vpop.xlane.xlu0 %3058  ;;  %3157 = vadd.xlane.f32.xlu1 %v3156_v17  ;;  %v3050_v50 = vpop.xlane.xlu1 %3049 }
 0xec3   :  { %v3083_v20 = vmul.f32 0.03125, %v3059_v32  ;;  %v3080_v24 = vmul.f32 0.03125, %v3050_v50  ;;  %v3117_v36 = vmul.f32 %v11865_v12, %v11865_v12  ;;  %v3114_v49 = vmul.f32 %v11868_v51, %v11868_v51 }
 0xec5   :  { %v11877_v14 = vsub.f32 %v11792_v27, %v3083_v20  ;;  %v11880_v16 = vsub.f32 %v11789_v26, %v3080_v24  ;;  %v3159_v42 = vsel %vm221_vm1, %v3117_v36, 0.0  ;;  %v3150_v3 = vsel %vm221_vm1, %v3114_v49, 0.0 }
 0xec6   :  { %3160 = vadd.xlane.f32.xlu0 %v3159_v42  ;;  %v3053_v25 = vpop.xlane.xlu0 %3052  ;;  %3151 = vadd.xlane.f32.xlu1 %v3150_v3  ;;  %v3044_v34 = vpop.xlane.xlu1 %3043 }
 0xec7   :  { %v3081_v53 = vmul.f32 0.03125, %v3053_v25  ;;  %v3078_v2 = vmul.f32 0.03125, %v3044_v34  ;;  %v3115_v4 = vmul.f32 %v11877_v14, %v11877_v14  ;;  %v3112_v27 = vmul.f32 %v11880_v16, %v11880_v16 }
 0xec9   :  { %v11889_v37 = vsub.f32 %v11806_v61, %v3081_v53  ;;  %v11892_v26 = vsub.f32 %v11799_v47, %v3078_v2  ;;  %v3153_v41 = vsel %vm221_vm1, %v3115_v4, 0.0  ;;  %v3144_v33 = vsel %vm221_vm1, %v3112_v27, 0.0 }
 0xeca   :  { %3154 = vadd.xlane.f32.xlu0 %v3153_v41  ;;  %v3047_v38 = vpop.xlane.xlu0 %3046  ;;  %3145 = vadd.xlane.f32.xlu1 %v3144_v33  ;;  %v3038_v43 = vpop.xlane.xlu1 %3037 }
 0xecb   :  { %v3079_v0 = vmul.f32 0.03125, %v3047_v38  ;;  %v3076_v57 = vmul.f32 0.03125, %v3038_v43  ;;  %v3113_v28 = vmul.f32 %v11889_v37, %v11889_v37  ;;  %v3110_v61 = vmul.f32 %v11892_v26, %v11892_v26 }
 0xecd   :  { %v11901_v29 = vsub.f32 %v11812_v56, %v3079_v0  ;;  %v11904_v47 = vsub.f32 %v11809_v62, %v3076_v57  ;;  %v3147_v46 = vsel %vm221_vm1, %v3113_v28, 0.0  ;;  %v3138_v22 = vsel %vm221_vm1, %v3110_v61, 0.0 }
 0xece   :  { %3148 = vadd.xlane.f32.xlu0 %v3147_v46  ;;  %v3041_v45 = vpop.xlane.xlu0 %3040  ;;  %3139 = vadd.xlane.f32.xlu1 %v3138_v22  ;;  %v3032_v6 = vpop.xlane.xlu1 %3031 }
 0xecf   :  { %v3077_v60 = vmul.f32 0.03125, %v3041_v45  ;;  %v3074_v59 = vmul.f32 0.03125, %v3032_v6  ;;  %v3111_v52 = vmul.f32 %v11901_v29, %v11901_v29  ;;  %v3108_v56 = vmul.f32 %v11904_v47, %v11904_v47 }
 0xed1   :  { %v11913_v44 = vsub.f32 %v11826_v55, %v3077_v60  ;;  %v11916_v62 = vsub.f32 %v11819_v8, %v3074_v59  ;;  %v3141_v15 = vsel %vm221_vm1, %v3111_v52, 0.0  ;;  %v3132_v48 = vsel %vm221_vm1, %v3108_v56, 0.0 }
 0xed2   :  { %3142 = vadd.xlane.f32.xlu0 %v3141_v15  ;;  %v3035_v19 = vpop.xlane.xlu0 %3034  ;;  %3133 = vadd.xlane.f32.xlu1 %v3132_v48  ;;  %v3026_v11 = vpop.xlane.xlu1 %3025 }
 0xed3   :  { %v3075_v35 = vmul.f32 0.03125, %v3035_v19  ;;  %v3072_v9 = vmul.f32 0.03125, %v3026_v11  ;;  %v3109_v17 = vmul.f32 %v11913_v44, %v11913_v44  ;;  %v3106_v55 = vmul.f32 %v11916_v62, %v11916_v62 }
 0xed5   :  { %v11925_v32 = vsub.f32 %v11832_v21, %v3075_v35  ;;  %v11928_v8 = vsub.f32 %v11829_v58, %v3072_v9  ;;  %v3135_v50 = vsel %vm221_vm1, %v3109_v17, 0.0  ;;  %v3126_v20 = vsel %vm221_vm1, %v3106_v55, 0.0  ;;  %v11947_v55 = vld [vmem:[%s14874_s5 + $0x13] ss:$0 sm:$0xff] }
 0xed6   :  { %3136 = vadd.xlane.f32.xlu0 %v3135_v50  ;;  %v3029_v24 = vpop.xlane.xlu0 %3028  ;;  %3127 = vadd.xlane.f32.xlu1 %v3126_v20 }
 0xed7   :  { %v3073_v36 = vmul.f32 0.03125, %v3029_v24  ;;  %v3107_v49 = vmul.f32 %v11925_v32, %v11925_v32  ;;  %v3104_v42 = vmul.f32 %v11928_v8, %v11928_v8 }
 0xed9   :  { %v11937_v21 = vsub.f32 %v11844_v5, %v3073_v36  ;;  %v3129_v58 = vsel %vm221_vm1, %v3107_v49, 0.0  ;;  %v3120_v3 = vsel %vm221_vm1, %v3104_v42, 0.0 }
 0xeda   :  { %3130 = vadd.xlane.f32.xlu0 %v3129_v58  ;;  %3121 = vadd.xlane.f32.xlu1 %v3120_v3 }
 0xedb   :  { %v3105_v25 = vmul.f32 %v11937_v21, %v11937_v21 }
 0xedd   :  { %v3123_v34 = vsel %vm221_vm1, %v3105_v25, 0.0 }
 0xede   :  { %3124 = vadd.xlane.f32.xlu0 %v3123_v34 }
 0xf47   :  { %v3164_v53 = vpop.xlane.xlu1 %3163 }
 0xf48   :  { %v3182_v2 = vmul.f32 0.03125, %v3164_v53  ;;  %v11954_v53 = vld [vmem:[%s14874_s5 + $0x14] ss:$0 sm:$0xff] }
 0xf4a   :  { %v3198_v4 = vadd.f32 1e-05, %v3182_v2 }
 0xf4b   :  { %v3167_v27 = vpop.xlane.xlu0 %3166  ;;  %v3158_v41 = vpop.xlane.xlu1 %3157 }
 0xf4c   :  { %10008 = vrsqrt.f32 %v3198_v4  ;;  %v3183_v5 = vmul.f32 0.03125, %v3167_v27  ;;  %v3180_v33 = vmul.f32 0.03125, %v3158_v41 }
 0xf4e   :  { %v3199_v38 = vadd.f32 1e-05, %v3183_v5  ;;  %v3196_v43 = vadd.f32 1e-05, %v3180_v33 }
 0xf4f   :  { %v3161_v0 = vpop.xlane.xlu0 %3160  ;;  %v3152_v57 = vpop.xlane.xlu1 %3151 }
 0xf50   :  { %10010 = vrsqrt.f32 %v3199_v38  ;;  %v3181_v28 = vmul.f32 0.03125, %v3161_v0  ;;  %v3178_v61 = vmul.f32 0.03125, %v3152_v57 }
 0xf51   :  { %10012 = vrsqrt.f32 %v3196_v43 }
 0xf52   :  { %v3197_v46 = vadd.f32 1e-05, %v3181_v28  ;;  %v3194_v22 = vadd.f32 1e-05, %v3178_v61 }
 0xf53   :  { %v3155_v45 = vpop.xlane.xlu0 %3154  ;;  %v3146_v6 = vpop.xlane.xlu1 %3145 }
 0xf54   :  { %10014 = vrsqrt.f32 %v3197_v46  ;;  %v3179_v60 = vmul.f32 0.03125, %v3155_v45  ;;  %v3176_v59 = vmul.f32 0.03125, %v3146_v6 }
 0xf55   :  { %10016 = vrsqrt.f32 %v3194_v22 }
 0xf56   :  { %v3195_v52 = vadd.f32 1e-05, %v3179_v60  ;;  %v3192_v56 = vadd.f32 1e-05, %v3176_v59 }
 0xf57   :  { %v3149_v15 = vpop.xlane.xlu0 %3148  ;;  %v3140_v48 = vpop.xlane.xlu1 %3139 }
 0xf58   :  { %10018 = vrsqrt.f32 %v3195_v52  ;;  %v3177_v19 = vmul.f32 0.03125, %v3149_v15  ;;  %v3174_v11 = vmul.f32 0.03125, %v3140_v48 }
 0xf59   :  { %v10009_v35 = vpop.eup %10008  ;;  %10020 = vrsqrt.f32 %v3192_v56 }
 0xf5a   :  { %v3193_v9 = vadd.f32 1e-05, %v3177_v19  ;;  %v3190_v17 = vadd.f32 1e-05, %v3174_v11  ;;  %v3230_v50 = vmul.f32 %v10009_v35, %v11849_v40 }
 0xf5b   :  { %v3143_v20 = vpop.xlane.xlu0 %3142  ;;  %v3134_v24 = vpop.xlane.xlu1 %3133 }
 0xf5c   :  { %10022 = vrsqrt.f32 %v3193_v9  ;;  %v3175_v36 = vmul.f32 0.03125, %v3143_v20  ;;  %v3172_v49 = vmul.f32 0.03125, %v3134_v24  ;;  %v3250_v58 = vmul.f32 %v11947_v55, %v3230_v50 }
 0xf5d   :  { %v10011_v42 = vpop.eup %10010  ;;  %10024 = vrsqrt.f32 %v3190_v17 }
 0xf5e   :  { %v10013_v3 = vpop.eup %10012  ;;  %v3191_v25 = vadd.f32 1e-05, %v3175_v36  ;;  %v3188_v34 = vadd.f32 1e-05, %v3172_v49  ;;  %v3231_v2 = vmul.f32 %v10011_v42, %v11854_v63  ;;  %v11960_v43 = vadd.f32 %v11954_v53, %v3250_v58 }
 0xf5f   :  { %v3137_v40 = vpop.xlane.xlu0 %3136  ;;  %v3128_v4 = vpop.xlane.xlu1 %3127  ;;  %v3228_v27 = vmul.f32 %v10013_v3, %v11857_v13 }
 0xf60   :  { %10026 = vrsqrt.f32 %v3191_v25  ;;  %v3173_v41 = vmul.f32 0.03125, %v3137_v40  ;;  %v3170_v5 = vmul.f32 0.03125, %v3128_v4  ;;  %v3251_v33 = vmul.f32 %v11947_v55, %v3231_v2  ;;  %14997 = vst [vmem:[#allocation13_spill] sm:$0xff] %v11960_v43 }
 0xf61   :  { %v10015_v38 = vpop.eup %10014  ;;  %10028 = vrsqrt.f32 %v3188_v34  ;;  %v3248_v22 = vmul.f32 %v11947_v55, %v3228_v27 }
 0xf62   :  { %v10017_v0 = vpop.eup %10016  ;;  %v3189_v57 = vadd.f32 1e-05, %v3173_v41  ;;  %v3186_v28 = vadd.f32 1e-05, %v3170_v5  ;;  %v11963_v61 = vadd.f32 %v11954_v53, %v3251_v33  ;;  %v3229_v63 = vmul.f32 %v10015_v38, %v11865_v12 }
 0xf63   :  { %v3131_v46 = vpop.xlane.xlu0 %3130  ;;  %v3122_v13 = vpop.xlane.xlu1 %3121  ;;  %v3226_v45 = vmul.f32 %v10017_v0, %v11868_v51  ;;  %v11978_v35 = vadd.f32 %v11954_v53, %v3248_v22 }
 0xf64   :  { %14998 = vst [vmem:[#allocation15_spill] sm:$0xff] %v11963_v61  ;;  %10030 = vrsqrt.f32 %v3189_v57  ;;  %v3171_v6 = vmul.f32 0.03125, %v3131_v46  ;;  %v3168_v60 = vmul.f32 0.03125, %v3122_v13  ;;  %v11970_v59 = vpack.c.bf16 %v11963_v61, %v11960_v43 }
 0xf65   :  { %v10019_v52 = vpop.eup %10018  ;;  %10032 = vrsqrt.f32 %v3186_v28  ;;  %v3249_v56 = vmul.f32 %v11947_v55, %v3229_v63  ;;  %v3246_v15 = vmul.f32 %v11947_v55, %v3226_v45  ;;  %15000 = vst [vmem:[#allocation17_spill] sm:$0xff] %v11978_v35 }
 0xf66   :  { %14999 = vst [vmem:[#allocation14_spill] sm:$0xff] %v11970_v59  ;;  %v10021_v12 = vpop.eup %10020  ;;  %v3187_v48 = vadd.f32 1e-05, %v3171_v6  ;;  %v3184_v19 = vadd.f32 1e-05, %v3168_v60  ;;  %9497 = vmatprep.subr.bf16.mxu0 %v11970_v59  ;;  %v3227_v51 = vmul.f32 %v10019_v52, %v11877_v14 }
 0xf67   :  { %v3125_v11 = vpop.xlane.xlu0 %3124  ;;  %9498 = vmatpush3.bf16.msra.mxu0 %v11970_v59  ;;  %v11981_v9 = vadd.f32 %v11954_v53, %v3249_v56  ;;  %v3224_v17 = vmul.f32 %v10021_v12, %v11880_v16  ;;  %v11990_v36 = vadd.f32 %v11954_v53, %v3246_v15 }
 0xf68   :  { %10034 = vrsqrt.f32 %v3187_v48  ;;  %v3169_v50 = vmul.f32 0.03125, %v3125_v11  ;;  %v3247_v20 = vmul.f32 %v11947_v55, %v3227_v51 }
 0xf69   :  { %15001 = vst [vmem:[#allocation16_spill] sm:$0xff] %v11981_v9  ;;  %v10023_v24 = vpop.eup %10022  ;;  %10036 = vrsqrt.f32 %v3184_v19  ;;  %v11987_v14 = vpack.c.bf16 %v11981_v9, %v11978_v35  ;;  %15003 = vst [vmem:[#allocation18_spill] sm:$0xff] %v11990_v36  ;;  %v3244_v3 = vmul.f32 %v11947_v55, %v3224_v17 }
 0xf6a   :  { %v10025_v49 = vpop.eup %10024  ;;  %v3185_v42 = vadd.f32 1e-05, %v3169_v50  ;;  %v11993_v58 = vadd.f32 %v11954_v53, %v3247_v20  ;;  %v3225_v16 = vmul.f32 %v10023_v24, %v11889_v37  ;;  %v10280_v24 = vld [vmem:[#allocation7 + $0x8] sm:$0xff]  }
 0xf6b   :  { %15002 = vst [vmem:[#allocation19_spill] sm:$0xff] %v11987_v14  ;;  %9499 = vmatprep.subr.bf16.mxu0 %v11987_v14  ;;  %v3222_v25 = vmul.f32 %v10025_v49, %v11892_v26  ;;  %v12007_v37 = vadd.f32 %v11954_v53, %v3244_v3  ;;  %v10281_v49 = vld [vmem:[#allocation7 + $0x10] sm:$0xff]   ;;  %v10285_v3 = vld [vmem:[#allocation7 + $0x28] sm:$0xff]  }
 0xf6c   :  { %15004 = vst [vmem:[#allocation21_spill] sm:$0xff] %v11993_v58  ;;  %10038 = vrsqrt.f32 %v3185_v42  ;;  %9500 = vmatpush3.bf16.msra.mxu0 %v11987_v14  ;;  %v12002_v34 = vpack.c.bf16 %v11993_v58, %v11990_v36  ;;  %v3245_v2 = vmul.f32 %v11947_v55, %v3225_v16  ;;  %v10283_v42 = vld [vmem:[#allocation7 + $0x18] sm:$0xff]   ;;  %v10284_v16 = vld [vmem:[#allocation7 + $0x20] sm:$0xff]  }
 0xf6d   :  { %v10027_v40 = vpop.eup %10026  ;;  %15006 = vst [vmem:[#allocation23_spill] sm:$0xff] %v12007_v37  ;;  %v3242_v41 = vmul.f32 %v11947_v55, %v3222_v25  ;;  %v10286_v25 = vld [vmem:[#allocation7 + $0x30] sm:$0xff]  }
 0xf6e   :  { %15005 = vst [vmem:[#allocation20_spill] sm:$0xff] %v12002_v34  ;;  %v10029_v4 = vpop.eup %10028  ;;  %9501 = vmatprep.subr.bf16.mxu0 %v12002_v34  ;;  %v12010_v27 = vadd.f32 %v11954_v53, %v3245_v2  ;;  %v3223_v26 = vmul.f32 %v10027_v40, %v11901_v29  ;;  %v10287_v2 = vld [vmem:[#allocation7 + $0x38] sm:$0xff]  }
 0xf6f   :  { %v3220_v5 = vmul.f32 %v10029_v4, %v11904_v47  ;;  %v12023_v28 = vadd.f32 %v11954_v53, %v3242_v41 }
 0xf70   :  { %15007 = vst [vmem:[#allocation22_spill] sm:$0xff] %v12010_v27  ;;  %9502 = vmatpush3.bf16.msra.mxu0 %v12002_v34  ;;  %v12018_v33 = vpack.c.bf16 %v12010_v27, %v12007_v37  ;;  %v3243_v38 = vmul.f32 %v11947_v55, %v3223_v26 }
 0xf71   :  { %v10031_v0 = vpop.eup %10030  ;;  %15009 = vst [vmem:[#allocation24_spill] sm:$0xff] %v12023_v28  ;;  %v3240_v63 = vmul.f32 %v11947_v55, %v3220_v5 }
 0xf72   :  { %15008 = vst [vmem:[#allocation25_spill] sm:$0xff] %v12018_v33  ;;  %v10033_v57 = vpop.eup %10032  ;;  %9503 = vmatprep.subr.bf16.mxu0 %v12018_v33  ;;  %v12026_v29 = vadd.f32 %v11954_v53, %v3243_v38  ;;  %v3221_v47 = vmul.f32 %v10031_v0, %v11913_v44  ;;  %v10288_v0 = vld [vmem:[%s14871_s2 + $0x5c] ss:$36 sps:$4 sm:$0xff]  }
 0xf73   :  { %v3218_v46 = vmul.f32 %v10033_v57, %v11916_v62  ;;  %v12039_v60 = vadd.f32 %v11954_v53, %v3240_v63 }
 0xf74   :  { %15010 = vst [vmem:[#allocation27_spill] sm:$0xff] %v12026_v29  ;;  %9504 = vmatpush3.bf16.msra.mxu0 %v12018_v33  ;;  %v12034_v13 = vpack.c.bf16 %v12026_v29, %v12023_v28  ;;  %v3241_v22 = vmul.f32 %v11947_v55, %v3221_v47  ;;  %v10289_v47 = vld [vmem:[%s14871_s2 + $0x14] ss:$36 sps:$4 sm:$0xff]  }
 0xf75   :  { %v10035_v45 = vpop.eup %10034  ;;  %15012 = vst [vmem:[#allocation28_spill] sm:$0xff] %v12039_v60  ;;  %v3238_v52 = vmul.f32 %v11947_v55, %v3218_v46 }
 0xf76   :  { %15011 = vst [vmem:[#allocation26_spill] sm:$0xff] %v12034_v13  ;;  %v10037_v6 = vpop.eup %10036  ;;  %9505 = vmatprep.subr.bf16.mxu0 %v12034_v13  ;;  %v12042_v44 = vadd.f32 %v11954_v53, %v3241_v22  ;;  %v3219_v62 = vmul.f32 %v10035_v45, %v11925_v32 }
 0xf77   :  { %v3216_v56 = vmul.f32 %v10037_v6, %v11928_v8  ;;  %v12055_v19 = vadd.f32 %v11954_v53, %v3238_v52 }
 0xf78   :  { %15013 = vst [vmem:[#allocation31_spill] sm:$0xff] %v12042_v44  ;;  %9506 = vmatpush3.bf16.msra.mxu0 %v12034_v13  ;;  %v12050_v15 = vpack.c.bf16 %v12042_v44, %v12039_v60  ;;  %v3239_v12 = vmul.f32 %v11947_v55, %v3219_v62 }
 0xf79   :  { %v10039_v48 = vpop.eup %10038  ;;  %15015 = vst [vmem:[#allocation33_spill] sm:$0xff] %v12055_v19  ;;  %v3236_v8 = vmul.f32 %v11947_v55, %v3216_v56 }
 0xf7a   :  { %15014 = vst [vmem:[#allocation32_spill] sm:$0xff] %v12050_v15  ;;  %9507 = vmatprep.subr.bf16.mxu0 %v12050_v15  ;;  %v12058_v32 = vadd.f32 %v11954_v53, %v3239_v12  ;;  %v3217_v51 = vmul.f32 %v10039_v48, %v11937_v21 }
 0xf7b   :  { %v12070_v50 = vadd.f32 %v11954_v53, %v3236_v8 }
 0xf7c   :  { %15016 = vst [vmem:[#allocation34_spill] sm:$0xff] %v12058_v32  ;;  %9508 = vmatpush3.bf16.msra.mxu0 %v12050_v15  ;;  %v12065_v11 = vpack.c.bf16 %v12058_v32, %v12055_v19  ;;  %v3237_v17 = vmul.f32 %v11947_v55, %v3217_v51  ;;  %v10279_v55 = vld [vmem:[%s14871_s2 + $0x68] ss:$36 sps:$4 sm:$0xff]  }
 0xf7d   :  { %15018 = vst [vmem:[#allocation36_spill] sm:$0xff] %v12070_v50 }
 0xf7e   :  { %15017 = vst [vmem:[#allocation35_spill] sm:$0xff] %v12065_v11  ;;  %9509 = vmatprep.subr.bf16.mxu0 %v12065_v11  ;;  %v12073_v20 = vadd.f32 %v11954_v53, %v3237_v17  ;;  %v10282_v53 = vld [vmem:[%s14871_s2 + $0x20] ss:$36 sps:$4 sm:$0xff]  }
 0xf80   :  { %15019 = vst [vmem:[#allocation37_spill] sm:$0xff] %v12073_v20  ;;  %9510 = vmatpush3.bf16.msra.mxu0 %v12065_v11  ;;  %v12078_v21 = vpack.c.bf16 %v12073_v20, %v12070_v50 }
 0xf82   :  { %15020 = vst [vmem:[#allocation38_spill] sm:$0xff] %v12078_v21  ;;  %9511 = vmatprep.subr.bf16.mxu0 %v12078_v21 }
 0xf84   :  { %9512 = vmatpush3.bf16.msra.mxu0 %v12078_v21 }
 0xf85   :  { %9529 = vmatprep.subr.bf16.mxu0 %v10279_v55 }
 0xf87   :  { %9514 = vmatmul.mubr.bf16.vlgmr.msra.gmra.mxu0 %v10280_v24 }
 0xf88   :  { %9517 = vmatprep.mubr.bf16.mxu0 %v10281_v49  ;;  %9530 = vmatpush3.bf16.msra.mxu0 %v10279_v55 }
 0xf89   :  { %9531 = vmatprep.subr.bf16.mxu0 %v10282_v53 }
 0xf8c   :  { %9532 = vmatpush3.bf16.msra.mxu0 %v10282_v53 }
 0xf8d   :  { %9870 = vmatprep.subr.msk.bf16.mxu0 %vm1213_vm2, %v10970_v54 }
 0xf8f   :  { %9518 = vmatmul.mubr.bf16.gmra.mxu0 %v10283_v42  ;;  %v10290_v42 = vld [vmem:[%s14874_s5 + $0x4] ss:$0 sm:$0xff] }
 0xf90   :  { %9521 = vmatprep.mubr.bf16.mxu0 %v10284_v16  ;;  %v12119_v16 = vadd.f32 %v10290_v42, %v11226_v10 }
 0xf97   :  { %9522 = vmatmul.mubr.bf16.gmra.mxu0 %v10285_v3  ;;  %v3563_v3 = vrot.slane %v12119_v16, %v14996_v30 }
 0xf98   :  { %9525 = vmatprep.mubr.bf16.mxu0 %v10286_v25 }
 0xf99   :  { %v3579_v25 = vrot.slane %v3563_v3, %v14996_v30 }
 0xf9b   :  { %v3657_v10 = vrot.slane %v3579_v25, %v10670_v23 }
 0xf9f   :  { %9526 = vmatmul.mubr.bf16.gmra.mxu0 %v10287_v2  ;;  %v3571_v2 = vcombine.high %v3563_v3, %v3563_v3 }
0x1047   :  { %v9515_v40 = vpop.f32.mrf.mxu0 }
0x1049   :  { %v3314_v4 = vpop.f32.mrf.mxu0 }
0x104b   :  { %v9516_v26 = vpop.f32.mrf.mxu0 }
0x104c   :  { %v3378_v63 = vpack.c.bf16 %v9516_v26, %v9515_v40 }
0x104d   :  { %v3317_v41 = vpop.f32.mrf.mxu0 }
0x104e   :  { %v3377_v5 = vpack.c.bf16 %v3317_v41, %v3314_v4  ;;  %v12129_v4 = vld [vmem:[%s14874_s5 + $0x5] ss:$0 sm:$0xff]  ;;  %v3593_v41 = vrot.slane %v3571_v2, %v14996_v30 }
0x104f   :  { %v9519_v38 = vpop.f32.mrf.mxu0 }
0x1050   :  { %8910 = vmatmul.mubr.msk.bf16.vlgmr.msra.gmra.mxu1 %vm221_vm1, %v3377_v5 }
0x1051   :  { %3451 = vmatprep.mubr.bf16.mxu1 %v14979_v39  ;;  %9568 = vmatpush3.bf16.msra.mxu1 %v10288_v0  ;;  %v3330_v57 = vpop.f32.mrf.mxu0 }
0x1052   :  { %9569 = vmatprep.subr.bf16.mxu1 %v14976_v18 }
0x1053   :  { %v9520_v46 = vpop.f32.mrf.mxu0 }
0x1054   :  { %v3380_v52 = vpack.c.bf16 %v9520_v46, %v9519_v38  ;;  %v3556_v46 = vcombine.high %v12119_v16, %v12119_v16 }
0x1055   :  { %9570 = vmatpush3.bf16.msra.mxu1 %v10289_v47  ;;  %v3333_v22 = vpop.f32.mrf.mxu0  ;;  %v3661_v47 = vrot.slane %v3593_v41, %v10670_v23 }
0x1056   :  { %9575 = vmatprep.subr.bf16.mxu1 %v14976_v18  ;;  %v3379_v45 = vpack.c.bf16 %v3333_v22, %v3330_v57 }
0x1057   :  { %v9523_v6 = vpop.f32.mrf.mxu0 }
0x1058   :  { %8911 = vmatmul.mubr.msk.bf16.gmra.mxu1 %vm221_vm1, %v3378_v63  ;;  %v3601_v63 = vcombine.high %v3579_v25, %v3579_v25 }
0x1059   :  { %3461 = vmatprep.mubr.bf16.mxu1 %v14979_v39  ;;  %v3346_v62 = vpop.f32.mrf.mxu0 }
0x105b   :  { %v9524_v56 = vpop.f32.mrf.mxu0 }
0x105c   :  { %v3382_v17 = vpack.c.bf16 %v9524_v56, %v9523_v6  ;;  %v3603_v56 = vcombine.high %v3593_v41, %v3593_v41 }
0x105d   :  { %v3349_v12 = vpop.f32.mrf.mxu0 }
0x105e   :  { %v3381_v48 = vpack.c.bf16 %v3349_v12, %v3346_v62  ;;  %v3570_v12 = vrot.slane %v3556_v46, %v14996_v30 }
0x105f   :  { %v9527_v51 = vpop.f32.mrf.mxu0 }
0x1060   :  { %8912 = vmatmul.mubr.msk.bf16.gmra.mxu1 %vm221_vm1, %v3379_v45 }
0x1061   :  { %3471 = vmatprep.mubr.bf16.mxu1 %v14979_v39  ;;  %v3362_v8 = vpop.f32.mrf.mxu0 }
0x1063   :  { %v9528_v55 = vpop.f32.mrf.mxu0 }
0x1064   :  { %v3384_v53 = vpack.c.bf16 %v9528_v55, %v9527_v51  ;;  %v3669_v55 = vrot.slane %v3603_v56, %v10670_v23 }
0x1065   :  { %v3365_v24 = vpop.f32.mrf.mxu0 }
0x1066   :  { %v3383_v49 = vpack.c.bf16 %v3365_v24, %v3362_v8  ;;  %v3586_v24 = vrot.slane %v3570_v12, %v14996_v30 }
0x1068   :  { %8913 = vmatmul.mubr.msk.bf16.gmra.mxu1 %vm221_vm1, %v3380_v52  ;;  %v3665_v52 = vrot.slane %v3601_v63, %v10670_v23 }
0x1069   :  { %3481 = vmatprep.mubr.bf16.mxu1 %v14979_v39 }
0x1070   :  { %8914 = vmatmul.mubr.msk.bf16.gmra.mxu1 %vm221_vm1, %v3381_v48 }
0x1071   :  { %3491 = vmatprep.mubr.bf16.mxu1 %v14979_v39 }
0x1078   :  { %8915 = vmatmul.mubr.msk.bf16.gmra.mxu1 %vm221_vm1, %v3382_v17 }
0x1079   :  { %3501 = vmatprep.mubr.bf16.mxu1 %v14979_v39 }
0x1080   :  { %8916 = vmatmul.mubr.msk.bf16.gmra.mxu1 %vm221_vm1, %v3383_v49  ;;  %v3572_v49 = vcombine.high %v3570_v12, %v3570_v12 }
0x1081   :  { %3511 = vmatprep.mubr.bf16.mxu1 %v14979_v39 }
0x1082   :  { %v3600_v41 = vrot.slane %v3572_v49, %v14996_v30 }
0x1084   :  { %v3677_v12 = vrot.slane %v3600_v41, %v10670_v23  ;;  %v3604_v61 = vcombine.high %v3600_v41, %v3600_v41 }
0x1088   :  { %8917 = vmatmul.mubr.msk.bf16.gmra.mxu1 %vm221_vm1, %v3384_v53 }
0x1089   :  { %9571 = vmatprep.mubr.msk.bf16.mxu1 %vm10480_vm0, %v14976_v18 }
0x1110   :  { %v12124_v40 = vpop.f32.mrf.mxu1 }
0x1111   :  { %v12133_v26 = vadd.f32 %v12129_v4, %v12124_v40 }
0x1112   :  { %v12137_v5 = vpop.f32.mrf.mxu1 }
0x1113   :  { %v12140_v38 = vadd.f32 %v3657_v10, %v12133_v26  ;;  %v3673_v10 = vrot.slane %v3586_v24, %v10670_v23 }
0x1114   :  { %v12142_v0 = vpop.f32.mrf.mxu1 }
0x1115   :  { %v12146_v57 = vadd.f32 %v12129_v4, %v12142_v0  ;;  %3766 = vrot.lane.b32.xlu1 %v12140_v38, %s10483_s25 }
0x1116   :  { %v12153_v22 = vpop.f32.mrf.mxu1 }
0x1117   :  { %v12156_v45 = vadd.f32 %v3661_v47, %v12146_v57 }
0x1118   :  { %v12158_v6 = vpop.f32.mrf.mxu1 }
0x1119   :  { %v12162_v62 = vadd.f32 %v12129_v4, %v12158_v6  ;;  %3768 = vrot.lane.b32.xlu0 %v12156_v45, %s10483_s25 }
0x111a   :  { %v12168_v48 = vpop.f32.mrf.mxu1 }
0x111b   :  { %v12171_v51 = vadd.f32 %v3665_v52, %v12162_v62  ;;  %v12206_v52 = vadd.f32 %v10290_v42, %v11386_v1 }
0x111c   :  { %v12173_v8 = vpop.f32.mrf.mxu1 }
0x111d   :  { %v12177_v17 = vadd.f32 %v12129_v4, %v12173_v8  ;;  %3770 = vrot.lane.b32.xlu1 %v12171_v51, %s10483_s25  ;;  %v3605_v20 = vcombine.high %v12206_v52, %v12206_v52 }
0x111e   :  { %v12183_v53 = vpop.f32.mrf.mxu1 }
0x111f   :  { %v12186_v3 = vadd.f32 %v3669_v55, %v12177_v17  ;;  %v3602_v55 = vcombine.high %v3586_v24, %v3586_v24  ;;  %v3612_v24 = vrot.slane %v12206_v52, %v14996_v30 }
0x1120   :  { %v12188_v25 = vpop.f32.mrf.mxu1 }
0x1121   :  { %v12192_v2 = vadd.f32 %v12129_v4, %v12188_v25  ;;  %3772 = vrot.lane.b32.xlu1 %v12186_v3, %s10483_s25  ;;  %v3681_v42 = vrot.slane %v3602_v55, %v10670_v23  ;;  %v3685_v55 = vrot.slane %v3604_v61, %v10670_v23  ;;  %v3628_v41 = vrot.slane %v3612_v24, %v14996_v30 }
0x1122   :  { %v12198_v47 = vpop.f32.mrf.mxu1  ;;  %v3620_v58 = vcombine.high %v3612_v24, %v3612_v24 }
0x1123   :  { %v12201_v63 = vadd.f32 %v3673_v10, %v12192_v2  ;;  %v3689_v29 = vrot.slane %v3628_v41, %v10670_v23  ;;  %v3650_v32 = vcombine.high %v3628_v41, %v3628_v41  ;;  %v3619_v41 = vrot.slane %v3605_v20, %v14996_v30 }
0x1124   :  { %v12203_v46 = vpop.f32.mrf.mxu1  ;;  %v3642_v61 = vrot.slane %v3620_v58, %v14996_v30 }
0x1125   :  { %v12210_v56 = vadd.f32 %v12129_v4, %v12203_v46  ;;  %3774 = vrot.lane.b32.xlu0 %v12201_v63, %s10483_s25  ;;  %v3697_v59 = vrot.slane %v3650_v32, %v10670_v23  ;;  %v3635_v32 = vrot.slane %v3619_v41, %v14996_v30  ;;  %v3621_v11 = vcombine.high %v3619_v41, %v3619_v41 }
0x1126   :  { %v12215_v49 = vpop.f32.mrf.mxu1  ;;  %v3693_v60 = vrot.slane %v3642_v61, %v10670_v23  ;;  %v3652_v14 = vcombine.high %v3642_v61, %v3642_v61 }
0x1127   :  { %v12218_v10 = vadd.f32 %v3677_v12, %v12210_v56 }
0x1128   :  { %v12220_v54 = vpop.f32.mrf.mxu1  ;;  %v3701_v15 = vrot.slane %v3652_v14, %v10670_v23  ;;  %v3649_v14 = vrot.slane %v3621_v11, %v14996_v30 }
0x1129   :  { %v12224_v1 = vadd.f32 %v12129_v4, %v12220_v54  ;;  %3776 = vrot.lane.b32.xlu1 %v12218_v10, %s10483_s25 }
0x112a   :  { %v12231_v9 = vpop.f32.mrf.mxu1 }
0x112b   :  { %v12234_v12 = vadd.f32 %v3681_v42, %v12224_v1 }
0x112c   :  { %v12236_v43 = vpop.f32.mrf.mxu1 }
0x112d   :  { %v12240_v35 = vadd.f32 %v12129_v4, %v12236_v43  ;;  %3778 = vrot.lane.b32.xlu0 %v12234_v12, %s10483_s25 }
0x112e   :  { %v12246_v27 = vpop.f32.mrf.mxu1 }
0x112f   :  { %v12249_v36 = vadd.f32 %v3685_v55, %v12240_v35 }
0x1130   :  { %v12251_v42 = vpop.f32.mrf.mxu1 }
0x1131   :  { %15021 = vst [vmem:[#allocation39_spill] sm:$0xff] %v12251_v42  ;;  %v12255_v37 = vadd.f32 %v12129_v4, %v12251_v42  ;;  %3780 = vrot.lane.b32.xlu1 %v12249_v36, %s10483_s25 }
0x1132   :  { %v12261_v44 = vpop.f32.mrf.mxu1 }
0x1133   :  { %v3742_v24 = vadd.f32 %v3689_v29, %v12255_v37 }
0x1134   :  { %v12264_v28 = vpop.f32.mrf.mxu1 }
0x1135   :  { %15022 = vst [vmem:[#allocation40_spill] sm:$0xff] %v12264_v28  ;;  %v12268_v55 = vadd.f32 %v12129_v4, %v12264_v28  ;;  %3782 = vrot.lane.b32.xlu0 %v3742_v24, %s10483_s25 }
0x1136   :  { %v12274_v19 = vpop.f32.mrf.mxu1 }
0x1137   :  { %15023 = vst [vmem:[#allocation41_spill] sm:$0xff] %v12274_v19  ;;  %v3743_v58 = vadd.f32 %v3693_v60, %v12268_v55 }
0x1138   :  { %v12277_v50 = vpop.f32.mrf.mxu1 }
0x1139   :  { %15024 = vst [vmem:[#allocation42_spill] sm:$0xff] %v12277_v50  ;;  %v12281_v29 = vadd.f32 %v12129_v4, %v12277_v50  ;;  %3784 = vrot.lane.b32.xlu1 %v3743_v58, %s10483_s25 }
0x113a   :  { %v12286_v34 = vpop.f32.mrf.mxu1 }
0x113b   :  { %15025 = vst [vmem:[#allocation43_spill] sm:$0xff] %v12286_v34  ;;  %v3744_v33 = vadd.f32 %v3697_v59, %v12281_v29 }
0x113c   :  { %v12289_v13 = vpop.f32.mrf.mxu1 }
0x113d   :  { %15026 = vst [vmem:[#allocation44_spill] sm:$0xff] %v12289_v13  ;;  %v12293_v60 = vadd.f32 %v12129_v4, %v12289_v13  ;;  %3786 = vrot.lane.b32.xlu0 %v3744_v33, %s10483_s25  ;;  %v3705_v13 = vrot.slane %v3635_v32, %v10670_v23 }
0x113e   :  { %v12298_v61 = vpop.f32.mrf.mxu1 }
0x113f   :  { %15027 = vst [vmem:[#allocation45_spill] sm:$0xff] %v12298_v61  ;;  %v3745_v20 = vadd.f32 %v3701_v15, %v12293_v60  ;;  %v3709_v61 = vrot.slane %v3649_v14, %v10670_v23 }
0x1140   :  { %v12301_v21 = vpop.f32.mrf.mxu1 }
0x1141   :  { %15028 = vst [vmem:[#allocation46_spill] sm:$0xff] %v12301_v21  ;;  %v12305_v59 = vadd.f32 %v12129_v4, %v12301_v21  ;;  %3788 = vrot.lane.b32.xlu1 %v3745_v20, %s10483_s25  ;;  %v3651_v21 = vcombine.high %v3635_v32, %v3635_v32 }
0x1142   :  { %v12310_v50 = vpop.f32.mrf.mxu1 }
0x1143   :  { %15029 = vst [vmem:[#allocation47_spill] sm:$0xff] %v12310_v50  ;;  %v3746_v41 = vadd.f32 %v3705_v13, %v12305_v59  ;;  %v3713_v30 = vrot.slane %v3651_v21, %v10670_v23 }
0x1144   :  { %v12313_v34 = vpop.f32.mrf.mxu1 }
0x1145   :  { %15030 = vst [vmem:[#allocation48_spill] sm:$0xff] %v12313_v34  ;;  %v12317_v15 = vadd.f32 %v12129_v4, %v12313_v34  ;;  %3790 = vrot.lane.b32.xlu0 %v3746_v41, %s10483_s25  ;;  %v3653_v34 = vcombine.high %v3649_v14, %v3649_v14  ;;  %v3544_v14 = vadd.f32 %v12224_v1, %v12119_v16 }
0x1146   :  { %v12321_v28 = vpop.f32.mrf.mxu1 }
0x1147   :  { %15031 = vst [vmem:[#allocation49_spill] sm:$0xff] %v12321_v28  ;;  %v3747_v19 = vadd.f32 %v3709_v61, %v12317_v15  ;;  %v3717_v28 = vrot.slane %v3653_v34, %v10670_v23  ;;  %v3538_v34 = vadd.f32 %v12133_v26, %v12119_v16 }
0x1148   :  { %v12324_v11 = vpop.f32.mrf.mxu1 }
0x1149   :  { %15032 = vst [vmem:[#allocation50_spill] sm:$0xff] %v12324_v11  ;;  %v12328_v13 = vadd.f32 %v12129_v4, %v12324_v11  ;;  %3792 = vrot.lane.b32.xlu1 %v3747_v19, %s10483_s25 }
0x114a   :  { %v12332_v50 = vpop.f32.mrf.mxu1 }
0x114b   :  { %v3748_v42 = vadd.f32 %v3713_v30, %v12328_v13 }
0x114c   :  { %v12335_v32 = vpop.f32.mrf.mxu1 }
0x114d   :  { %v12339_v61 = vadd.f32 %v12129_v4, %v12335_v32  ;;  %3794 = vrot.lane.b32.xlu0 %v3748_v42, %s10483_s25 }
0x114f   :  { %v3749_v11 = vadd.f32 %v3717_v28, %v12339_v61 }
0x1151   :  { %4230 = vrot.lane.b32.xlu0 %v12140_v38, %s10477_s17  ;;  %3796 = vrot.lane.b32.xlu1 %v3749_v11, %s10483_s25 }
0x1155   :  { %4246 = vrot.lane.b32.xlu0 %v3742_v24, %s10477_s17  ;;  %4232 = vrot.lane.b32.xlu1 %v12156_v45, %s10477_s17 }
0x1159   :  { %4234 = vrot.lane.b32.xlu0 %v12171_v51, %s10477_s17  ;;  %4248 = vrot.lane.b32.xlu1 %v3743_v58, %s10477_s17 }
0x115d   :  { %4236 = vrot.lane.b32.xlu0 %v12186_v3, %s10477_s17  ;;  %4250 = vrot.lane.b32.xlu1 %v3744_v33, %s10477_s17  ;;  %v3539_v33 = vadd.f32 %v12146_v57, %v12119_v16 }
0x1161   :  { %4238 = vrot.lane.b32.xlu0 %v12201_v63, %s10477_s17  ;;  %4252 = vrot.lane.b32.xlu1 %v3745_v20, %s10477_s17 }
0x1165   :  { %4240 = vrot.lane.b32.xlu0 %v12218_v10, %s10477_s17  ;;  %4254 = vrot.lane.b32.xlu1 %v3746_v41, %s10477_s17  ;;  %v15033_v10 = vld [vmem:[#allocation30_spill] sm:$0xff]  ;;  %v3545_v41 = vadd.f32 %v12240_v35, %v12119_v16 }
0x1169   :  { %4242 = vrot.lane.b32.xlu0 %v12234_v12, %s10477_s17  ;;  %4256 = vrot.lane.b32.xlu1 %v3747_v19, %s10477_s17  ;;  %v3541_v19 = vadd.f32 %v12177_v17, %v12119_v16  ;;  %v3542_v12 = vadd.f32 %v12192_v2, %v12119_v16 }
0x116d   :  { %4244 = vrot.lane.b32.xlu0 %v12249_v36, %s10477_s17  ;;  %4258 = vrot.lane.b32.xlu1 %v3748_v42, %s10477_s17  ;;  %v3540_v36 = vadd.f32 %v12162_v62, %v12119_v16  ;;  %v3543_v42 = vadd.f32 %v12210_v56, %v12119_v16  ;;  %v3548_v16 = vadd.f32 %v12281_v29, %v12206_v52 }
0x1171   :  { %4260 = vrot.lane.b32.xlu1 %v3749_v11, %s10477_s17 }
0x1187   :  { %v3767_v30 = vpop.permute.xlu1 %3766 }
0x1188   :  { %v3814_v21 = vmul.f32 %v3767_v30, %v3538_v34 }
0x118b   :  { %v3769_v28 = vpop.permute.xlu0 %3768 }
0x118c   :  { %v3815_v4 = vmul.f32 %v3769_v28, %v3539_v33  ;;  %v3546_v33 = vadd.f32 %v12255_v37, %v12206_v52  ;;  %v3547_v28 = vadd.f32 %v12268_v55, %v12206_v52 }
0x118e   :  { %v3830_v38 = vpack.c.bf16 %v3815_v4, %v3814_v21 }
0x118f   :  { %v3771_v45 = vpop.permute.xlu1 %3770 }
0x1190   :  { %9533 = vmatprep.mubr.msk.bf16.mxu0 %vm221_vm1, %v3830_v38  ;;  %v3816_v3 = vmul.f32 %v3771_v45, %v3540_v36  ;;  %v3549_v45 = vadd.f32 %v12293_v60, %v12206_v52 }
0x1193   :  { %v3773_v51 = vpop.permute.xlu1 %3772 }
0x1194   :  { %v3817_v63 = vmul.f32 %v3773_v51, %v3541_v19 }
0x1196   :  { %v3831_v26 = vpack.c.bf16 %v3817_v63, %v3816_v3  ;;  %v3550_v3 = vadd.f32 %v12305_v59, %v12206_v52  ;;  %v3551_v63 = vadd.f32 %v12317_v15, %v12206_v52 }
0x1197   :  { %v3775_v57 = vpop.permute.xlu0 %3774 }
0x1198   :  { %9534 = vmatmul.mubr.msk.bf16.vlgmr.msra.gmra.mxu0 %vm221_vm1, %v3831_v26  ;;  %v3818_v24 = vmul.f32 %v3775_v57, %v3542_v12 }
0x1199   :  { %9550 = vmatpush3.bf16.msra.mxu0 %v15033_v10 }
0x119a   :  { %9583 = vmatprep.subr.bf16.mxu0 %v14976_v18 }
0x119b   :  { %v3777_v62 = vpop.permute.xlu1 %3776 }
0x119c   :  { %v3819_v17 = vmul.f32 %v3777_v62, %v3543_v42  ;;  %v3552_v42 = vadd.f32 %v12328_v13, %v12206_v52  ;;  %v3553_v62 = vadd.f32 %v12339_v61, %v12206_v52 }
0x119e   :  { %v3832_v58 = vpack.c.bf16 %v3819_v17, %v3818_v24 }
0x119f   :  { %v3779_v20 = vpop.permute.xlu0 %3778 }
0x11a0   :  { %9537 = vmatprep.mubr.msk.bf16.mxu0 %vm221_vm1, %v3832_v58  ;;  %v3820_v2 = vmul.f32 %v3779_v20, %v3544_v14 }
0x11a3   :  { %v3781_v11 = vpop.permute.xlu1 %3780 }
0x11a4   :  { %v3821_v30 = vmul.f32 %v3781_v11, %v3545_v41 }
0x11a6   :  { %v3833_v34 = vpack.c.bf16 %v3821_v30, %v3820_v2 }
0x11a7   :  { %v3783_v56 = vpop.permute.xlu0 %3782 }
0x11a8   :  { %9538 = vmatmul.mubr.msk.bf16.gmra.mxu0 %vm221_vm1, %v3833_v34  ;;  %v3822_v4 = vmul.f32 %v3783_v56, %v3546_v33 }
0x11ab   :  { %v3785_v21 = vpop.permute.xlu1 %3784 }
0x11ac   :  { %v3823_v38 = vmul.f32 %v3785_v21, %v3547_v28 }
0x11ae   :  { %v3834_v1 = vpack.c.bf16 %v3823_v38, %v3822_v4 }
0x11af   :  { %v3787_v35 = vpop.permute.xlu0 %3786 }
0x11b0   :  { %9541 = vmatprep.mubr.msk.bf16.mxu0 %vm221_vm1, %v3834_v1  ;;  %v3824_v19 = vmul.f32 %v3787_v35, %v3548_v16 }
0x11b3   :  { %v3789_v36 = vpop.permute.xlu1 %3788 }
0x11b4   :  { %v3825_v51 = vmul.f32 %v3789_v36, %v3549_v45 }
0x11b6   :  { %v3835_v37 = vpack.c.bf16 %v3825_v51, %v3824_v19 }
0x11b7   :  { %v3791_v55 = vpop.permute.xlu0 %3790 }
0x11b8   :  { %9542 = vmatmul.mubr.msk.bf16.gmra.mxu0 %vm221_vm1, %v3835_v37  ;;  %v3826_v57 = vmul.f32 %v3791_v55, %v3550_v3 }
0x11bb   :  { %v3793_v26 = vpop.permute.xlu1 %3792 }
0x11bc   :  { %v3827_v12 = vmul.f32 %v3793_v26, %v3551_v63 }
0x11be   :  { %v3836_v29 = vpack.c.bf16 %v3827_v12, %v3826_v57 }
0x11bf   :  { %v3795_v60 = vpop.permute.xlu0 %3794 }
0x11c0   :  { %9545 = vmatprep.mubr.msk.bf16.mxu0 %vm221_vm1, %v3836_v29  ;;  %v3828_v17 = vmul.f32 %v3795_v60, %v3552_v42 }
0x11c3   :  { %v3797_v24 = vpop.permute.xlu1 %3796 }
0x11c4   :  { %v3829_v58 = vmul.f32 %v3797_v24, %v3553_v62 }
0x11c6   :  { %v3837_v59 = vpack.c.bf16 %v3829_v58, %v3828_v17 }
0x11c8   :  { %9546 = vmatmul.mubr.msk.bf16.gmra.mxu0 %vm221_vm1, %v3837_v59 }
0x1258   :  { %v9535_v15 = vpop.f32.mrf.mxu0 }
0x1259   :  { %v3961_v30 = vmul.f32 0.35355338, %v9535_v15 }
0x125a   :  { %v3896_v20 = vpop.f32.mrf.mxu0 }
0x125b   :  { %v3959_v11 = vmul.f32 0.35355338, %v3896_v20  ;;  %v3977_v61 = vsel %vm1053_vm3, %v3961_v30, -inf }
0x125c   :  { %v9536_v14 = vpop.f32.mrf.mxu0 }
0x125d   :  { %v3962_v56 = vmul.f32 0.35355338, %v9536_v14  ;;  %v3975_v13 = vsel %vm1053_vm3, %v3959_v11, -inf }
0x125e   :  { %v3899_v41 = vpop.f32.mrf.mxu0  ;;  %v3978_v38 = vmax.f32 %v3975_v13, %v3977_v61 }
0x125f   :  { %v3960_v34 = vmul.f32 0.35355338, %v3899_v41  ;;  %v3979_v1 = vsel %vm1053_vm3, %v3962_v56, -inf }
0x1261   :  { %v3976_v21 = vsel %vm1053_vm3, %v3960_v34, -inf }
0x1262   :  { %v3980_v19 = vmax.f32 %v3976_v21, %v3979_v1 }
0x1268   :  { %v9539_v2 = vpop.f32.mrf.mxu0 }
0x1269   :  { %v3965_v16 = vmul.f32 0.35355338, %v9539_v2 }
0x126a   :  { %v3912_v33 = vpop.f32.mrf.mxu0 }
0x126b   :  { %v3963_v28 = vmul.f32 0.35355338, %v3912_v33  ;;  %v3985_v3 = vsel %vm1053_vm3, %v3965_v16, -inf }
0x126c   :  { %v9540_v52 = vpop.f32.mrf.mxu0 }
0x126d   :  { %v3981_v4 = vsel %vm1053_vm3, %v3963_v28, -inf  ;;  %v3966_v45 = vmul.f32 0.35355338, %v9540_v52 }
0x126e   :  { %v3915_v35 = vpop.f32.mrf.mxu0  ;;  %v3982_v51 = vmax.f32 %v3978_v38, %v3981_v4 }
0x126f   :  { %v3964_v36 = vmul.f32 0.35355338, %v3915_v35  ;;  %v3987_v63 = vsel %vm1053_vm3, %v3966_v45, -inf }
0x1270   :  { %v3986_v26 = vmax.f32 %v3982_v51, %v3985_v3 }
0x1271   :  { %v3983_v37 = vsel %vm1053_vm3, %v3964_v36, -inf }
0x1272   :  { %v3984_v55 = vmax.f32 %v3980_v19, %v3983_v37 }
0x1274   :  { %v3988_v57 = vmax.f32 %v3984_v55, %v3987_v63 }
0x1276   :  { %v3989_v12 = vmax.f32 %v3986_v26, %v3988_v57 }
0x1278   :  { %v4005_v29 = vsub.f32 %v3959_v11, %v3989_v12  ;;  %v4006_v60 = vsub.f32 %v3960_v34, %v3989_v12  ;;  %v4007_v42 = vsub.f32 %v3961_v30, %v3989_v12  ;;  %v4008_v62 = vsub.f32 %v3962_v56, %v3989_v12  ;;  %v9543_v15 = vpop.f32.mrf.mxu0 }
0x1279   :  { %v4009_v24 = vsub.f32 %v3963_v28, %v3989_v12  ;;  %v4010_v20 = vsub.f32 %v3964_v36, %v3989_v12  ;;  %v4011_v41 = vsub.f32 %v3965_v16, %v3989_v12  ;;  %v4012_v13 = vsub.f32 %v3966_v45, %v3989_v12 }
0x127a   :  { %v4021_v17 = vmul.f32 1.442695, %v4005_v29  ;;  %v4023_v58 = vmul.f32 1.442695, %v4006_v60  ;;  %v4025_v59 = vmul.f32 1.442695, %v4007_v42  ;;  %v3928_v33 = vpop.f32.mrf.mxu0 }
0x127b   :  { %v4027_v14 = vmul.f32 1.442695, %v4008_v62  ;;  %v4029_v2 = vmul.f32 1.442695, %v4009_v24  ;;  %v4031_v52 = vmul.f32 1.442695, %v4010_v20 }
0x127c   :  { %10040 = vpow2.f32 %v4021_v17  ;;  %v4033_v11 = vmul.f32 1.442695, %v4011_v41  ;;  %v9544_v30 = vpop.f32.mrf.mxu0  ;;  %v4035_v34 = vmul.f32 1.442695, %v4012_v13  ;;  %v3967_v28 = vmul.f32 0.35355338, %v3928_v33 }
0x127d   :  { %10042 = vpow2.f32 %v4023_v58  ;;  %v3969_v4 = vmul.f32 0.35355338, %v9543_v15  ;;  %v3970_v51 = vmul.f32 0.35355338, %v9544_v30 }
0x127e   :  { %10044 = vpow2.f32 %v4025_v59  ;;  %v3931_v56 = vpop.f32.mrf.mxu0  ;;  %v3990_v19 = vsel %vm1053_vm3, %v3967_v28, -inf }
0x127f   :  { %10046 = vpow2.f32 %v4027_v14  ;;  %v3968_v38 = vmul.f32 0.35355338, %v3931_v56  ;;  %v3992_v57 = vsel %vm1053_vm3, %v3969_v4, -inf  ;;  %v3994_v59 = vsel %vm1053_vm3, %v3970_v51, -inf }
0x1280   :  { %10048 = vpow2.f32 %v4029_v2  ;;  %v3993_v62 = vmax.f32 %v3990_v19, %v3992_v57 }
0x1281   :  { %10050 = vpow2.f32 %v4031_v52  ;;  %v3991_v12 = vsel %vm1053_vm3, %v3968_v38, -inf }
0x1282   :  { %10052 = vpow2.f32 %v4033_v11  ;;  %v3995_v2 = vmax.f32 %v3991_v12, %v3994_v59 }
0x1283   :  { %10054 = vpow2.f32 %v4035_v34 }
0x1288   :  { %v9547_v61 = vpop.f32.mrf.mxu0 }
0x1289   :  { %v12419_v21 = vpop.eup %10040  ;;  %v3973_v24 = vmul.f32 0.35355338, %v9547_v61 }
0x128a   :  { %v12421_v1 = vpop.eup %10042  ;;  %v4053_v35 = vsel %vm1053_vm3, %v12419_v21, 0.0  ;;  %v3944_v16 = vpop.f32.mrf.mxu0 }
0x128b   :  { %v12425_v45 = vpop.eup %10044  ;;  %v4054_v36 = vsel %vm1053_vm3, %v12421_v1, 0.0  ;;  %v3971_v37 = vmul.f32 0.35355338, %v3944_v16  ;;  %v4000_v61 = vsel %vm1053_vm3, %v3973_v24, -inf }
0x128c   :  { %v12430_v55 = vpop.eup %10046  ;;  %v4055_v3 = vadd.f32 %v4054_v36, %v4053_v35  ;;  %v9548_v63 = vpop.f32.mrf.mxu0  ;;  %v4056_v26 = vsel %vm1053_vm3, %v12425_v45, 0.0 }
0x128d   :  { %v3996_v29 = vsel %vm1053_vm3, %v3971_v37, -inf  ;;  %v10049_v60 = vpop.eup %10048  ;;  %v4058_v58 = vsel %vm1053_vm3, %v12430_v55, 0.0  ;;  %v3974_v15 = vmul.f32 0.35355338, %v9548_v63 }
0x128e   :  { %v4057_v42 = vadd.f32 %v4056_v26, %v4055_v3  ;;  %v3947_v17 = vpop.f32.mrf.mxu0  ;;  %v10051_v14 = vpop.eup %10050  ;;  %v3997_v33 = vmax.f32 %v3993_v62, %v3996_v29  ;;  %v4060_v13 = vsel %vm1053_vm3, %v10049_v60, 0.0 }
0x128f   :  { %v3972_v20 = vmul.f32 0.35355338, %v3947_v17  ;;  %v12442_v11 = vpop.eup %10052  ;;  %v4062_v56 = vsel %vm1053_vm3, %v10051_v14, 0.0  ;;  %v4002_v35 = vsel %vm1053_vm3, %v3974_v15, -inf }
0x1290   :  { %v4059_v41 = vadd.f32 %v4058_v58, %v4057_v42  ;;  %v10055_v16 = vpop.eup %10054  ;;  %v4001_v19 = vmax.f32 %v3997_v33, %v4000_v61  ;;  %v4064_v63 = vsel %vm1053_vm3, %v12442_v11, 0.0 }
0x1291   :  { %v3998_v52 = vsel %vm1053_vm3, %v3972_v20, -inf  ;;  %v4066_v12 = vsel %vm1053_vm3, %v10055_v16, 0.0 }
0x1292   :  { %v4061_v30 = vadd.f32 %v4060_v13, %v4059_v41  ;;  %v3999_v34 = vmax.f32 %v3995_v2, %v3998_v52 }
0x1294   :  { %v4063_v36 = vadd.f32 %v4062_v56, %v4061_v30  ;;  %v4003_v3 = vmax.f32 %v3999_v34, %v4002_v35 }
0x1296   :  { %v4065_v26 = vadd.f32 %v4064_v63, %v4063_v36  ;;  %v4004_v57 = vmax.f32 %v4001_v19, %v4003_v3 }
0x1298   :  { %v4067_v29 = vadd.f32 %v4066_v12, %v4065_v26  ;;  %v4013_v42 = vsub.f32 %v3967_v28, %v4004_v57  ;;  %v4014_v62 = vsub.f32 %v3968_v38, %v4004_v57  ;;  %v4015_v17 = vsub.f32 %v3969_v4, %v4004_v57 }
0x1299   :  { %v4016_v58 = vsub.f32 %v3970_v51, %v4004_v57  ;;  %v4017_v59 = vsub.f32 %v3971_v37, %v4004_v57  ;;  %v4018_v13 = vsub.f32 %v3972_v20, %v4004_v57  ;;  %v4019_v30 = vsub.f32 %v3973_v24, %v4004_v57 }
0x129a   :  { %10056 = vrcp.f32 %v4067_v29  ;;  %v4037_v41 = vmul.f32 1.442695, %v4013_v42  ;;  %v4039_v2 = vmul.f32 1.442695, %v4014_v62  ;;  %v4041_v52 = vmul.f32 1.442695, %v4015_v17 }
0x129b   :  { %v4043_v33 = vmul.f32 1.442695, %v4016_v58  ;;  %v4045_v34 = vmul.f32 1.442695, %v4017_v59  ;;  %v4020_v56 = vsub.f32 %v3974_v15, %v4004_v57  ;;  %v4047_v61 = vmul.f32 1.442695, %v4018_v13 }
0x129c   :  { %10058 = vpow2.f32 %v4037_v41  ;;  %v4049_v28 = vmul.f32 1.442695, %v4019_v30 }
0x129d   :  { %10060 = vpow2.f32 %v4039_v2  ;;  %v4051_v4 = vmul.f32 1.442695, %v4020_v56 }
0x129e   :  { %10062 = vpow2.f32 %v4041_v52  ;;  %v10293_v52 = vld [vmem:[#allocation5 + $0x30] ss:$12 sps:$4 sm:$0xff]  }
0x129f   :  { %10064 = vpow2.f32 %v4043_v33 }
0x12a0   :  { %10066 = vpow2.f32 %v4045_v34 }
0x12a1   :  { %10068 = vpow2.f32 %v4047_v61  ;;  %v10294_v61 = vld [vmem:[#allocation5 + $0x18] ss:$12 sps:$4 sm:$0xff]  }
0x12a2   :  { %10070 = vpow2.f32 %v4049_v28 }
0x12a3   :  { %10072 = vpow2.f32 %v4051_v4 }
0x12a7   :  { %v10057_v38 = vpop.eup %10056 }
0x12a8   :  { %v4085_v51 = vmul.f32 %v10057_v38, %v12419_v21  ;;  %v4086_v37 = vmul.f32 %v10057_v38, %v12421_v1  ;;  %v4087_v20 = vmul.f32 %v10057_v38, %v12425_v45  ;;  %v4088_v24 = vmul.f32 %v10057_v38, %v12430_v55 }
0x12a9   :  { %v10059_v35 = vpop.eup %10058  ;;  %v4089_v36 = vmul.f32 %v10057_v38, %v10049_v60  ;;  %v4090_v15 = vmul.f32 %v10057_v38, %v10051_v14  ;;  %v10292_v60 = vld [vmem:[#allocation5 + $0x48] ss:$12 sps:$4 sm:$0xff]   ;;  %v4091_v62 = vmul.f32 %v10057_v38, %v12442_v11  ;;  %v4092_v17 = vmul.f32 %v10057_v38, %v10055_v16  ;;  %v10295_v38 = vld [vmem:[#allocation5] ss:$12 sps:$4 sm:$0xff]  }
0x12aa   :  { %v10061_v19 = vpop.eup %10060  ;;  %v4068_v3 = vsel %vm1053_vm3, %v10059_v35, 0.0  ;;  %v4101_v63 = vpack.c.bf16 %v4086_v37, %v4085_v51  ;;  %v4102_v26 = vpack.c.bf16 %v4088_v24, %v4087_v20  ;;  %v12470_v51 = vld [vmem:[#allocation5 + $0x4c] ss:$12 sps:$4 sm:$0xff]  }
0x12ab   :  { %v10063_v57 = vpop.eup %10062  ;;  %v4069_v12 = vsel %vm1053_vm3, %v10061_v19, 0.0  ;;  %v4103_v21 = vpack.c.bf16 %v4090_v15, %v4089_v36  ;;  %v4104_v30 = vpack.c.bf16 %v4092_v17, %v4091_v62 }
0x12ac   :  { %v10065_v29 = vpop.eup %10064  ;;  %v4070_v42 = vadd.f32 %v4069_v12, %v4068_v3  ;;  %9551 = vmatprep.mubr.msk.bf16.mxu0 %vm1053_vm3, %v4101_v63  ;;  %v4071_v1 = vsel %vm1053_vm3, %v10063_v57, 0.0 }
0x12ad   :  { %9552 = vmatmul.mubr.msk.bf16.vlgmr.msra.gmra.mxu0 %vm1053_vm3, %v4102_v26  ;;  %v10067_v45 = vpop.eup %10066  ;;  %v4073_v14 = vsel %vm1053_vm3, %v10065_v29, 0.0 }
0x12ae   :  { %v4072_v55 = vadd.f32 %v4071_v1, %v4070_v42  ;;  %9555 = vmatprep.mubr.msk.bf16.mxu0 %vm1053_vm3, %v4103_v21  ;;  %9584 = vmatpush3.bf16.msra.mxu0 %v10292_v60  ;;  %v10069_v58 = vpop.eup %10068  ;;  %v4075_v41 = vsel %vm1053_vm3, %v10067_v45, 0.0 }
0x12af   :  { %9585 = vmatprep.subr.bf16.mxu0 %v14976_v18  ;;  %v10071_v2 = vpop.eup %10070  ;;  %v4077_v33 = vsel %vm1053_vm3, %v10069_v58, 0.0 }
0x12b0   :  { %v4074_v59 = vadd.f32 %v4073_v14, %v4072_v55  ;;  %v10073_v34 = vpop.eup %10072  ;;  %v4079_v11 = vsel %vm1053_vm3, %v10071_v2, 0.0 }
0x12b1   :  { %v4081_v28 = vsel %vm1053_vm3, %v10073_v34, 0.0 }
0x12b2   :  { %v4076_v13 = vadd.f32 %v4075_v41, %v4074_v59  ;;  %9586 = vmatpush3.bf16.msra.mxu0 %v10293_v52 }
0x12b3   :  { %9587 = vmatprep.subr.bf16.mxu0 %v14976_v18 }
0x12b4   :  { %v4078_v56 = vadd.f32 %v4077_v33, %v4076_v13 }
0x12b5   :  { %9556 = vmatmul.mubr.msk.bf16.gmra.mxu0 %vm1053_vm3, %v4104_v30 }
0x12b6   :  { %v4080_v16 = vadd.f32 %v4079_v11, %v4078_v56  ;;  %9588 = vmatpush3.bf16.msra.mxu0 %v10294_v61 }
0x12b7   :  { %9589 = vmatprep.subr.bf16.mxu0 %v14976_v18 }
0x12b8   :  { %v4082_v4 = vadd.f32 %v4081_v28, %v4080_v16 }
0x12ba   :  { %10074 = vrcp.f32 %v4082_v4  ;;  %9590 = vmatpush3.bf16.msra.mxu0 %v10295_v38 }
0x12bb   :  { %9615 = vmatprep.subr.bf16.mxu0 %v12470_v51 }
0x12c7   :  { %v10075_v37 = vpop.eup %10074 }
0x12c8   :  { %v4093_v20 = vmul.f32 %v10075_v37, %v10059_v35  ;;  %v4094_v24 = vmul.f32 %v10075_v37, %v10061_v19  ;;  %v4095_v36 = vmul.f32 %v10075_v37, %v10063_v57  ;;  %v4096_v15 = vmul.f32 %v10075_v37, %v10065_v29  ;;  %v4231_v19 = vpop.permute.xlu0 %4230  ;;  %v4233_v57 = vpop.permute.xlu1 %4232 }
0x12c9   :  { %v4097_v3 = vmul.f32 %v10075_v37, %v10067_v45  ;;  %v4098_v63 = vmul.f32 %v10075_v37, %v10069_v58  ;;  %v4099_v21 = vmul.f32 %v10075_v37, %v10071_v2  ;;  %v4100_v1 = vmul.f32 %v10075_v37, %v10073_v34 }
0x12ca   :  { %v4105_v26 = vpack.c.bf16 %v4094_v24, %v4093_v20  ;;  %v4106_v12 = vpack.c.bf16 %v4096_v15, %v4095_v36 }
0x12cb   :  { %v4107_v42 = vpack.c.bf16 %v4098_v63, %v4097_v3  ;;  %v4108_v55 = vpack.c.bf16 %v4100_v1, %v4099_v21 }
0x12cc   :  { %9559 = vmatprep.mubr.msk.bf16.mxu0 %vm1053_vm3, %v4105_v26  ;;  %v4247_v60 = vpop.permute.xlu0 %4246  ;;  %v4249_v14 = vpop.permute.xlu1 %4248 }
0x12cd   :  { %9560 = vmatmul.mubr.msk.bf16.gmra.mxu0 %vm1053_vm3, %v4106_v12 }
0x12ce   :  { %9563 = vmatprep.mubr.msk.bf16.mxu0 %vm1053_vm3, %v4107_v42 }
0x12d0   :  { %v4235_v17 = vpop.permute.xlu0 %4234  ;;  %v4251_v58 = vpop.permute.xlu1 %4250 }
0x12d4   :  { %v4237_v2 = vpop.permute.xlu0 %4236  ;;  %v4253_v52 = vpop.permute.xlu1 %4252 }
0x12d5   :  { %9564 = vmatmul.mubr.msk.bf16.gmra.mxu0 %vm1053_vm3, %v4108_v55 }
0x12d6   :  { %9591 = vmatprep.mubr.msk.bf16.mxu0 %vm10480_vm0, %v14976_v18 }
0x12d8   :  { %v4239_v56 = vpop.permute.xlu0 %4238  ;;  %v4255_v61 = vpop.permute.xlu1 %4254 }
0x12dc   :  { %v4241_v15 = vpop.permute.xlu0 %4240  ;;  %v4257_v3 = vpop.permute.xlu1 %4256 }
0x136d   :  { %v9553_v35 = vpop.f32.mrf.mxu0 }
0x136e   :  { %v4280_v11 = vmul.f32 %v9553_v35, %v4235_v17 }
0x136f   :  { %v4167_v29 = vpop.f32.mrf.mxu0 }
0x1370   :  { %v4278_v33 = vmul.f32 %v4231_v19, %v4167_v29  ;;  %v4297_v37 = vsel %vm221_vm1, %v4280_v11, 0.0  ;;  %v4243_v29 = vpop.permute.xlu0 %4242 }
0x1371   :  { %v9554_v45 = vpop.f32.mrf.mxu0 }
0x1372   :  { %v4294_v16 = vsel %vm221_vm1, %v4278_v33, 0.0  ;;  %v4281_v20 = vmul.f32 %v9554_v45, %v4237_v2 }
0x1373   :  { %v4170_v62 = vpop.f32.mrf.mxu0 }
0x1374   :  { %v4279_v13 = vmul.f32 %v4233_v57, %v4170_v62  ;;  %v4299_v26 = vsel %vm221_vm1, %v4281_v20, 0.0 }
0x1375   :  { %v9557_v59 = vpop.f32.mrf.mxu0 }
0x1376   :  { %v4295_v34 = vsel %vm221_vm1, %v4279_v13, 0.0  ;;  %v4259_v13 = vpop.permute.xlu1 %4258 }
0x1377   :  { %v4183_v41 = vpop.f32.mrf.mxu0  ;;  %v4296_v28 = vadd.f32 %v4295_v34, %v4294_v16  ;;  %v4284_v16 = vmul.f32 %v9557_v59, %v4243_v29 }
0x1378   :  { %v4282_v12 = vmul.f32 %v4239_v56, %v4183_v41 }
0x1379   :  { %v9558_v30 = vpop.f32.mrf.mxu0  ;;  %v4298_v24 = vadd.f32 %v4297_v37, %v4296_v28 }
0x137a   :  { %v4301_v62 = vsel %vm221_vm1, %v4282_v12, 0.0 }
0x137b   :  { %v4186_v4 = vpop.f32.mrf.mxu0  ;;  %v4300_v21 = vadd.f32 %v4299_v26, %v4298_v24  ;;  %v4305_v26 = vsel %vm221_vm1, %v4284_v16, 0.0 }
0x137c   :  { %v4283_v55 = vmul.f32 %v4241_v15, %v4186_v4  ;;  %v4261_v15 = vpop.permute.xlu1 %4260 }
0x137d   :  { %v4302_v33 = vadd.f32 %v4301_v62, %v4300_v21  ;;  %v10298_v62 = vld [vmem:[%s14871_s2 + $0x18] ss:$36 sps:$4 sm:$0xff]  }
0x138d   :  { %v9561_v38 = vpop.f32.mrf.mxu0 }
0x138e   :  { %v4288_v35 = vmul.f32 %v9561_v38, %v4251_v58 }
0x138f   :  { %v4199_v36 = vpop.f32.mrf.mxu0 }
0x1390   :  { %v4286_v42 = vmul.f32 %v4247_v60, %v4199_v36  ;;  %v4303_v60 = vsel %vm221_vm1, %v4283_v55, 0.0  ;;  %v4312_v41 = vsel %vm221_vm1, %v4288_v35, 0.0  ;;  %v4245_v36 = vpop.permute.xlu0 %4244 }
0x1391   :  { %v9562_v63 = vpop.f32.mrf.mxu0  ;;  %v4304_v4 = vadd.f32 %v4303_v60, %v4302_v33  ;;  %v4285_v12 = vmul.f32 %v9558_v30, %v4245_v36  ;;  %v10297_v30 = vld [vmem:[%s14871_s2 + $0x60] ss:$36 sps:$4 sm:$0xff]  }
0x1392   :  { %v4309_v45 = vsel %vm221_vm1, %v4286_v42, 0.0  ;;  %v4289_v17 = vmul.f32 %v9562_v63, %v4253_v52 }
0x1393   :  { %v4202_v1 = vpop.f32.mrf.mxu0  ;;  %v4306_v21 = vadd.f32 %v4305_v26, %v4304_v4  ;;  %v4307_v35 = vsel %vm221_vm1, %v4285_v12, 0.0 }
0x1394   :  { %v4287_v19 = vmul.f32 %v4249_v14, %v4202_v1  ;;  %v4314_v28 = vsel %vm221_vm1, %v4289_v17, 0.0  ;;  %v12508_v17 = vpop.f32.mrf.mxu1 }
0x1395   :  { %v9565_v57 = vpop.f32.mrf.mxu0 }
0x1396   :  { %v4310_v2 = vsel %vm221_vm1, %v4287_v19, 0.0  ;;  %v4292_v52 = vmul.f32 %v9565_v57, %v4259_v13  ;;  %v4308_v57 = vadd.f32 %v4307_v35, %v4306_v21  ;;  %v10300_v13 = vld [vmem:[%s14874_s5 + $0x6] ss:$0 sm:$0xff] }
0x1397   :  { %v4311_v34 = vadd.f32 %v4310_v2, %v4309_v45  ;;  %v4215_v11 = vpop.f32.mrf.mxu0  ;;  %v10299_v45 = vld [vmem:[%s14871_s2 + $0x4c] ss:$36 sps:$4 sm:$0xff]  }
0x1398   :  { %v4290_v56 = vmul.f32 %v4255_v61, %v4215_v11  ;;  %v4320_v1 = vsel %vm221_vm1, %v4292_v52, 0.0 }
0x1399   :  { %v4313_v58 = vadd.f32 %v4312_v41, %v4311_v34  ;;  %v9566_v14 = vpop.f32.mrf.mxu0 }
0x139a   :  { %v4316_v20 = vsel %vm221_vm1, %v4290_v56, 0.0  ;;  %v4293_v42 = vmul.f32 %v9566_v14, %v4261_v15 }
0x139b   :  { %v4315_v38 = vadd.f32 %v4314_v28, %v4313_v58  ;;  %v4218_v37 = vpop.f32.mrf.mxu0 }
0x139c   :  { %v4291_v24 = vmul.f32 %v4257_v3, %v4218_v37  ;;  %v4322_v19 = vsel %vm221_vm1, %v4293_v42, 0.0 }
0x139d   :  { %v4317_v63 = vadd.f32 %v4316_v20, %v4315_v38 }
0x139e   :  { %v4318_v61 = vsel %vm221_vm1, %v4291_v24, 0.0 }
0x139f   :  { %v4319_v59 = vadd.f32 %v4318_v61, %v4317_v63 }
0x13a1   :  { %v4321_v55 = vadd.f32 %v4320_v1, %v4319_v59 }
0x13a3   :  { %v4323_v3 = vadd.f32 %v4322_v19, %v4321_v55  ;;  %v10301_v55 = vld [vmem:[%s14874_s5 + $0xd] ss:$0 sm:$0xff] }
0x13a5   :  { %v4324_v29 = vpack.c.bf16 %v4323_v3, %v4308_v57  ;;  %v10302_v3 = vld [vmem:[%s14874_s5 + $0xe] ss:$0 sm:$0xff] }
0x13a7   :  { %9572 = vmatmul.mubr.msk.bf16.vlgmr.msra.gmra.mxu1 %vm221_vm1, %v4324_v29 }
0x13a8   :  { %9576 = vmatpush3.bf16.msra.mxu1 %v10297_v30  ;;  %9579 = vmatprep.mubr.msk.bf16.mxu1 %vm10480_vm0, %v14976_v18 }
0x13a9   :  { %9577 = vmatprep.subr.bf16.mxu1 %v14976_v18 }
0x13ac   :  { %9578 = vmatpush3.bf16.msra.mxu1 %v10298_v62 }
0x13ad   :  { %4541 = vmatprep.subr.bf16.mxu1 %v10299_v45  ;;  %v10303_v45 = vld [vmem:[%s14871_s2 + $0x48] ss:$36 sps:$4 sm:$0xff]  }
0x1467   :  { %v4362_v2 = vpop.f32.mrf.mxu1 }
0x1468   :  { %v4363_v33 = vadd.f32 %v10300_v13, %v4362_v2  ;;  %v10304_v2 = vld [vmem:[%s14871_s2 + $0x4] ss:$36 sps:$4 sm:$0xff]  }
0x1469   :  { %v9573_v34 = vpop.f32.mrf.mxu1 }
0x146a   :  { %v4369_v11 = vadd.f32 %v4363_v33, %v11211_v31  ;;  %v12539_v33 = vld [vmem:[%s14871_s2 + $0x58] ss:$36 sps:$4 sm:$0xff]  }
0x146b   :  { %v4365_v60 = vpop.f32.mrf.mxu1 }
0x146c   :  { %v4366_v41 = vadd.f32 %v10300_v13, %v4365_v60  ;;  %v4371_v56 = vsel %vm221_vm1, %v4369_v11, 0.0  ;;  %v10305_v13 = vld [vmem:[%s14871_s2] ss:$36 sps:$4 sm:$0xff]  }
0x146d   :  { %4372 = vadd.xlane.f32.xlu0 %v4371_v56  ;;  %v9574_v58 = vpop.f32.mrf.mxu1  ;;  %v10307_v60 = vld [vmem:[%s14874_s5 + $0x7] ss:$0 sm:$0xff] }
0x146e   :  { %v4370_v14 = vadd.f32 %v4366_v41, %v11213_v7 }
0x1470   :  { %v4374_v16 = vsel %vm221_vm1, %v4370_v14, 0.0 }
0x1471   :  { %4375 = vadd.xlane.f32.xlu1 %v4374_v16 }
0x14f6   :  { %v4373_v28 = vpop.xlane.xlu0 %4372 }
0x14f7   :  { %v4377_v4 = vmul.f32 0.03125, %v4373_v28 }
0x14f9   :  { %v4379_v38 = vsub.f32 %v4369_v11, %v4377_v4 }
0x14fa   :  { %v4376_v37 = vpop.xlane.xlu1 %4375 }
0x14fb   :  { %v4378_v52 = vmul.f32 0.03125, %v4376_v37  ;;  %v4381_v20 = vmul.f32 %v4379_v38, %v4379_v38  ;;  %v10309_v37 = vld [vmem:[#allocation5 + $0x1c] ss:$12 sps:$4 sm:$0xff]  }
0x14fd   :  { %v4380_v24 = vsub.f32 %v4370_v14, %v4378_v52  ;;  %v4383_v31 = vsel %vm221_vm1, %v4381_v20, 0.0  ;;  %v10310_v52 = vld [vmem:[#allocation5 + $0x4] ss:$12 sps:$4 sm:$0xff]  }
0x14fe   :  { %4384 = vadd.xlane.f32.xlu0 %v4383_v31  ;;  %v12547_v20 = vld [vmem:[#allocation5 + $0x50] ss:$12 sps:$4 sm:$0xff]   ;;  %v10312_v31 = vld [vmem:[%s14874_s5 + $0x8] ss:$0 sm:$0xff] }
0x14ff   :  { %v4382_v36 = vmul.f32 %v4380_v24, %v4380_v24 }
0x1501   :  { %v4386_v15 = vsel %vm221_vm1, %v4382_v36, 0.0 }
0x1502   :  { %4387 = vadd.xlane.f32.xlu0 %v4386_v15 }
0x1587   :  { %v4385_v63 = vpop.xlane.xlu0 %4384 }
0x1588   :  { %v4389_v26 = vmul.f32 0.03125, %v4385_v63 }
0x158a   :  { %v4391_v7 = vadd.f32 1e-05, %v4389_v26 }
0x158b   :  { %v4388_v12 = vpop.xlane.xlu0 %4387 }
0x158c   :  { %10076 = vrsqrt.f32 %v4391_v7  ;;  %v4390_v42 = vmul.f32 0.03125, %v4388_v12 }
0x158e   :  { %v4392_v61 = vadd.f32 1e-05, %v4390_v42 }
0x1590   :  { %10078 = vrsqrt.f32 %v4392_v61 }
0x1599   :  { %v10077_v21 = vpop.eup %10076 }
0x159a   :  { %v4395_v59 = vmul.f32 %v10077_v21, %v4379_v38  ;;  %v10308_v38 = vld [vmem:[#allocation5 + $0x34] ss:$12 sps:$4 sm:$0xff]  }
0x159c   :  { %v4397_v35 = vmul.f32 %v10301_v55, %v4395_v59 }
0x159d   :  { %v10079_v1 = vpop.eup %10078 }
0x159e   :  { %v4396_v19 = vmul.f32 %v10079_v1, %v4380_v24  ;;  %v4399_v29 = vadd.f32 %v10302_v3, %v4397_v35 }
0x15a0   :  { %v4398_v57 = vmul.f32 %v10301_v55, %v4396_v19 }
0x15a2   :  { %v4400_v30 = vadd.f32 %v10302_v3, %v4398_v57 }
0x15a4   :  { %v4401_v62 = vpack.c.bf16 %v4400_v30, %v4399_v29 }
0x15a6   :  { %9580 = vmatmul.mubr.msk.bf16.vlgmr.msra.gmra.mxu1 %vm221_vm1, %v4401_v62 }
0x15a7   :  { %4542 = vmatpush1.bf16.msra.mxu1 %v10303_v45  ;;  %4561 = vmatprep.mubr.bf16.mxu1 %v14979_v39 }
0x15a8   :  { %4543 = vmatprep.subr.bf16.mxu1 %v10304_v2 }
0x15ab   :  { %4544 = vmatpush1.bf16.msra.mxu1 %v10305_v13  ;;  %v10313_v13 = vld [vmem:[%s14874_s5 + $0xf] ss:$0 sm:$0xff] }
0x15ac   :  { %9595 = vmatprep.subr.bf16.mxu1 %v12539_v33 }
0x1666   :  { %v4439_v34 = vpop.f32.mrf.mxu1 }
0x1667   :  { %v4440_v41 = vadd.f32 %v10307_v60, %v4439_v34 }
0x1668   :  { %v9581_v11 = vpop.f32.mrf.mxu1 }
0x1669   :  { %v4446_v16 = vmax.f32 %v4440_v41, 0.0 }
0x166a   :  { %v4442_v56 = vpop.f32.mrf.mxu1 }
0x166b   :  { %v4443_v58 = vadd.f32 %v10307_v60, %v4442_v56 }
0x166c   :  { %v9582_v14 = vpop.f32.mrf.mxu1 }
0x166d   :  { %v4447_v28 = vmax.f32 %v4443_v58, 0.0  ;;  %v15046_v58 = vld [vmem:[#allocation38_spill] sm:$0xff] }
0x166e   :  { %v10315_v14 = vld [vmem:[%s14871_s2 + $0x10] ss:$36 sps:$4 sm:$0xff]  }
0x166f   :  { %v4448_v4 = vpack.c.bf16 %v4447_v28, %v4446_v16  ;;  %v10316_v16 = vld [vmem:[%s14871_s2 + $0x64] ss:$36 sps:$4 sm:$0xff]   ;;  %v15047_v28 = vld [vmem:[#allocation35_spill] sm:$0xff] }
0x1671   :  { %9592 = vmatmul.mubr.msk.bf16.vlgmr.msra.gmra.mxu0 %vm1582_vm4, %v4448_v4  ;;  %v15048_v4 = vld [vmem:[#allocation32_spill] sm:$0xff] }
0x1672   :  { %9616 = vmatpush3.bf16.msra.mxu0 %v12470_v51 }
0x1673   :  { %9617 = vmatprep.subr.bf16.mxu0 %v10308_v38 }
0x1676   :  { %9618 = vmatpush3.bf16.msra.mxu0 %v10308_v38  ;;  %v15049_v38 = vld [vmem:[#allocation26_spill] sm:$0xff] }
0x1677   :  { %9619 = vmatprep.subr.bf16.mxu0 %v10309_v37 }
0x167a   :  { %9620 = vmatpush3.bf16.msra.mxu0 %v10309_v37  ;;  %v15050_v37 = vld [vmem:[#allocation25_spill] sm:$0xff] }
0x167b   :  { %9621 = vmatprep.subr.bf16.mxu0 %v10310_v52 }
0x167e   :  { %9622 = vmatpush3.bf16.msra.mxu0 %v10310_v52  ;;  %v15051_v52 = vld [vmem:[#allocation20_spill] sm:$0xff] }
0x167f   :  { %9659 = vmatprep.subr.bf16.mxu0 %v12547_v20 }
0x1731   :  { %v4486_v24 = vpop.f32.mrf.mxu0 }
0x1732   :  { %v4487_v36 = vadd.f32 %v10312_v31, %v4486_v24  ;;  %v15052_v24 = vld [vmem:[#allocation19_spill] sm:$0xff] }
0x1733   :  { %v9593_v51 = vpop.f32.mrf.mxu0 }
0x1734   :  { %v4493_v15 = vadd.f32 %v4487_v36, %v4399_v29  ;;  %v15054_v51 = vld [vmem:[#allocation12_spill] sm:$0xff] }
0x1735   :  { %v4489_v63 = vpop.f32.mrf.mxu0 }
0x1736   :  { %v4490_v26 = vadd.f32 %v10312_v31, %v4489_v63  ;;  %v4495_v7 = vsel %vm221_vm1, %v4493_v15, 0.0  ;;  %v15053_v31 = vld [vmem:[#allocation14_spill] sm:$0xff] }
0x1737   :  { %4496 = vadd.xlane.f32.xlu1 %v4495_v7  ;;  %v9594_v12 = vpop.f32.mrf.mxu0 }
0x1738   :  { %v4494_v42 = vadd.f32 %v4490_v26, %v4400_v30 }
0x173a   :  { %v4498_v61 = vsel %vm221_vm1, %v4494_v42, 0.0 }
0x173b   :  { %4499 = vadd.xlane.f32.xlu0 %v4498_v61 }
0x17c0   :  { %v4497_v21 = vpop.xlane.xlu1 %4496 }
0x17c1   :  { %v4501_v59 = vmul.f32 0.03125, %v4497_v21 }
0x17c3   :  { %v4503_v1 = vsub.f32 %v4493_v15, %v4501_v59 }
0x17c4   :  { %v4500_v55 = vpop.xlane.xlu0 %4499 }
0x17c5   :  { %v4502_v35 = vmul.f32 0.03125, %v4500_v55  ;;  %v4505_v19 = vmul.f32 %v4503_v1, %v4503_v1 }
0x17c7   :  { %v4504_v57 = vsub.f32 %v4494_v42, %v4502_v35  ;;  %v4507_v3 = vsel %vm221_vm1, %v4505_v19, 0.0 }
0x17c8   :  { %4508 = vadd.xlane.f32.xlu1 %v4507_v3 }
0x17c9   :  { %v4506_v29 = vmul.f32 %v4504_v57, %v4504_v57 }
0x17cb   :  { %v4510_v62 = vsel %vm221_vm1, %v4506_v29, 0.0 }
0x17cc   :  { %4511 = vadd.xlane.f32.xlu0 %v4510_v62 }
0x17d9   :  { %4606 = vrot.lane.b32.xlu1 %v12124_v40, %s10484_s28  ;;  %v15034_v40 = vld [vmem:[#allocation39_spill] sm:$0xff] }
0x17dd   :  { %4610 = vrot.lane.b32.xlu1 %v12142_v0, %s10484_s28  ;;  %v15041_v0 = vld [vmem:[#allocation47_spill] sm:$0xff] }
0x17e1   :  { %4612 = vrot.lane.b32.xlu1 %v12153_v22, %s10484_s28  ;;  %v15042_v22 = vld [vmem:[#allocation46_spill] sm:$0xff] }
0x17e2   :  { %4608 = vrot.lane.b32.xlu0 %v12137_v5, %s10484_s28  ;;  %v15035_v5 = vld [vmem:[#allocation41_spill] sm:$0xff] }
0x17e5   :  { %4616 = vrot.lane.b32.xlu1 %v12168_v48, %s10484_s28  ;;  %v15044_v48 = vld [vmem:[#allocation48_spill] sm:$0xff] }
0x17e6   :  { %4614 = vrot.lane.b32.xlu0 %v12158_v6, %s10484_s28  ;;  %v15043_v6 = vld [vmem:[#allocation49_spill] sm:$0xff] }
0x17e9   :  { %4620 = vrot.lane.b32.xlu1 %v12183_v53, %s10484_s28 }
0x17ea   :  { %4618 = vrot.lane.b32.xlu0 %v12173_v8, %s10484_s28  ;;  %v15045_v8 = vld [vmem:[#allocation50_spill] sm:$0xff] }
0x17ed   :  { %4624 = vrot.lane.b32.xlu1 %v12198_v47, %s10484_s28 }
0x17ee   :  { %4622 = vrot.lane.b32.xlu0 %v12188_v25, %s10484_s28 }
0x17f1   :  { %4628 = vrot.lane.b32.xlu1 %v12215_v49, %s10484_s28 }
0x17f2   :  { %4626 = vrot.lane.b32.xlu0 %v12203_v46, %s10484_s28 }
0x17f5   :  { %4632 = vrot.lane.b32.xlu1 %v12231_v9, %s10484_s28  ;;  %v15036_v9 = vld [vmem:[#allocation40_spill] sm:$0xff] }
0x17f6   :  { %4630 = vrot.lane.b32.xlu0 %v12220_v54, %s10484_s28  ;;  %v15037_v54 = vld [vmem:[#allocation43_spill] sm:$0xff] }
0x17f9   :  { %4636 = vrot.lane.b32.xlu1 %v12246_v27, %s10484_s28  ;;  %v15038_v27 = vld [vmem:[#allocation42_spill] sm:$0xff] }
0x17fa   :  { %4634 = vrot.lane.b32.xlu0 %v12236_v43, %s10484_s28  ;;  %v15039_v43 = vld [vmem:[#allocation45_spill] sm:$0xff] }
0x17fd   :  { %4640 = vrot.lane.b32.xlu1 %v12261_v44, %s10484_s28  ;;  %v15040_v44 = vld [vmem:[#allocation44_spill] sm:$0xff] }
0x17fe   :  { %4638 = vrot.lane.b32.xlu0 %v15034_v40, %s10484_s28 }
0x1801   :  { %4644 = vrot.lane.b32.xlu1 %v15035_v5, %s10484_s28 }
0x1802   :  { %4642 = vrot.lane.b32.xlu0 %v15036_v9, %s10484_s28 }
0x1805   :  { %4648 = vrot.lane.b32.xlu1 %v15037_v54, %s10484_s28 }
0x1806   :  { %4646 = vrot.lane.b32.xlu0 %v15038_v27, %s10484_s28 }
0x1809   :  { %4652 = vrot.lane.b32.xlu1 %v15039_v43, %s10484_s28 }
0x180a   :  { %4650 = vrot.lane.b32.xlu0 %v15040_v44, %s10484_s28 }
0x180d   :  { %4656 = vrot.lane.b32.xlu1 %v15041_v0, %s10484_s28 }
0x180e   :  { %4654 = vrot.lane.b32.xlu0 %v15042_v22, %s10484_s28 }
0x1811   :  { %4660 = vrot.lane.b32.xlu1 %v15043_v6, %s10484_s28 }
0x1812   :  { %4658 = vrot.lane.b32.xlu0 %v15044_v48, %s10484_s28 }
0x1815   :  { %4664 = vrot.lane.b32.xlu1 %v12332_v50, %s10484_s28 }
0x1816   :  { %4662 = vrot.lane.b32.xlu0 %v15045_v8, %s10484_s28 }
0x1819   :  { %4668 = vrot.lane.b32.xlu1 %v12508_v17, %s10484_s28 }
0x181a   :  { %4666 = vrot.lane.b32.xlu0 %v12335_v32, %s10484_s28  ;;  %v10314_v32 = vld [vmem:[%s14874_s5 + $0x10] ss:$0 sm:$0xff] }
0x1851   :  { %v4509_v53 = vpop.xlane.xlu1 %4508 }
0x1852   :  { %v4513_v25 = vmul.f32 0.03125, %v4509_v53 }
0x1854   :  { %v4515_v47 = vadd.f32 1e-05, %v4513_v25 }
0x1855   :  { %v4512_v46 = vpop.xlane.xlu0 %4511 }
0x1856   :  { %10080 = vrsqrt.f32 %v4515_v47  ;;  %v4514_v49 = vmul.f32 0.03125, %v4512_v46  ;;  %v4607_v47 = vpop.permute.xlu1 %4606 }
0x1858   :  { %v4516_v30 = vadd.f32 1e-05, %v4514_v49 }
0x185a   :  { %10082 = vrsqrt.f32 %v4516_v30 }
0x1863   :  { %v10081_v45 = vpop.eup %10080 }
0x1864   :  { %v4519_v2 = vmul.f32 %v10081_v45, %v4503_v1 }
0x1866   :  { %v4521_v34 = vmul.f32 %v10313_v13, %v4519_v2 }
0x1867   :  { %v10083_v50 = vpop.eup %10082 }
0x1868   :  { %v4520_v17 = vmul.f32 %v10083_v50, %v4504_v57  ;;  %v12627_v60 = vadd.f32 %v10314_v32, %v4521_v34  ;;  %v4611_v34 = vpop.permute.xlu1 %4610 }
0x186a   :  { %v4522_v11 = vmul.f32 %v10313_v13, %v4520_v17 }
0x186c   :  { %v12629_v41 = vadd.f32 %v10314_v32, %v4522_v11 }
0x186e   :  { %v4525_v56 = vpack.c.bf16 %v12629_v41, %v12627_v60 }
0x1870   :  { %8937 = vmatmul.mubr.msk.bf16.vlgmr.msra.gmra.mxu1 %vm221_vm1, %v4525_v56 }
0x1871   :  { %9596 = vmatpush3.bf16.msra.mxu1 %v12539_v33  ;;  %9599 = vmatprep.mubr.msk.bf16.mxu1 %vm221_vm1, %v15046_v58  ;;  %v10317_v33 = vld [vmem:[%s14871_s2 + $0x1c] ss:$36 sps:$4 sm:$0xff]   ;;  %v4609_v58 = vpop.permute.xlu0 %4608 }
0x1872   :  { %9597 = vmatprep.subr.bf16.mxu1 %v10315_v14 }
0x1875   :  { %9598 = vmatpush3.bf16.msra.mxu1 %v10315_v14 }
0x1876   :  { %9639 = vmatprep.subr.bf16.mxu1 %v10316_v16 }
0x1878   :  { %9600 = vmatmul.mubr.msk.bf16.vlgmr.msra.gmra.mxu1 %vm221_vm1, %v15047_v28 }
0x1879   :  { %9603 = vmatprep.mubr.msk.bf16.mxu1 %vm221_vm1, %v15048_v4  ;;  %9640 = vmatpush3.bf16.msra.mxu1 %v10316_v16  ;;  %v4613_v16 = vpop.permute.xlu1 %4612  ;;  %v4615_v4 = vpop.permute.xlu0 %4614 }
0x187a   :  { %9641 = vmatprep.subr.bf16.mxu1 %v10317_v33 }
0x187d   :  { %9642 = vmatpush3.bf16.msra.mxu1 %v10317_v33  ;;  %v4617_v33 = vpop.permute.xlu1 %4616 }
0x1880   :  { %9604 = vmatmul.mubr.msk.bf16.gmra.mxu1 %vm221_vm1, %v15049_v38  ;;  %v4619_v38 = vpop.permute.xlu0 %4618 }
0x1881   :  { %9607 = vmatprep.mubr.msk.bf16.mxu1 %vm221_vm1, %v15050_v37  ;;  %v4621_v37 = vpop.permute.xlu1 %4620 }
0x1888   :  { %9608 = vmatmul.mubr.msk.bf16.gmra.mxu1 %vm221_vm1, %v15051_v52  ;;  %v4623_v52 = vpop.permute.xlu0 %4622 }
0x1889   :  { %9611 = vmatprep.mubr.msk.bf16.mxu1 %vm221_vm1, %v15052_v24  ;;  %v4625_v24 = vpop.permute.xlu1 %4624 }
0x1890   :  { %9612 = vmatmul.mubr.msk.bf16.gmra.mxu1 %vm221_vm1, %v15053_v31  ;;  %v4627_v31 = vpop.permute.xlu0 %4626 }
0x1930   :  { %v12660_v36 = vpop.f32.mrf.mxu1 }
0x1931   :  { %v4864_v15 = vrot.slane %v12660_v36, %v15054_v51  ;;  %v4857_v63 = vcombine.high %v12660_v36, %v12660_v36 }
0x1932   :  { %v12668_v42 = vpop.f32.mrf.mxu1 }
0x1933   :  { %v4880_v26 = vrot.slane %v4864_v15, %v15054_v51  ;;  %v4872_v7 = vcombine.high %v4864_v15, %v4864_v15  ;;  %v4871_v12 = vrot.slane %v4857_v63, %v15054_v51  ;;  %v4629_v15 = vpop.permute.xlu1 %4628  ;;  %v4631_v63 = vpop.permute.xlu0 %4630 }
0x1934   :  { %v12674_v19 = vpop.f32.mrf.mxu1 }
0x1935   :  { %v4958_v61 = vrot.slane %v4880_v26, %v10670_v23  ;;  %v4894_v21 = vrot.slane %v4872_v7, %v15054_v51  ;;  %v4902_v59 = vcombine.high %v4880_v26, %v4880_v26  ;;  %v4873_v35 = vcombine.high %v4871_v12, %v4871_v12 }
0x1936   :  { %v4887_v3 = vrot.slane %v4871_v12, %v15054_v51  ;;  %v4913_v40 = vrot.slane %v12674_v19, %v15054_v51  ;;  %v4906_v44 = vcombine.high %v12674_v19, %v12674_v19 }
0x1937   :  { %5019 = vrot.lane.b32.xlu0 %v4958_v61, %s10477_s17  ;;  %v4962_v1 = vrot.slane %v4894_v21, %v10670_v23  ;;  %v4904_v55 = vcombine.high %v4894_v21, %v4894_v21  ;;  %v4966_v57 = vrot.slane %v4902_v59, %v10670_v23  ;;  %v4901_v62 = vrot.slane %v4873_v35, %v15054_v51  ;;  %v4633_v26 = vpop.permute.xlu1 %4632  ;;  %v4635_v7 = vpop.permute.xlu0 %4634 }
0x1938   :  { %v4974_v5 = vrot.slane %v4887_v3, %v10670_v23  ;;  %v4903_v9 = vcombine.high %v4887_v3, %v4887_v3  ;;  %v4921_v43 = vcombine.high %v4913_v40, %v4913_v40  ;;  %v4929_v22 = vrot.slane %v4913_v40, %v15054_v51  ;;  %v12716_v61 = vpop.f32.mrf.mxu1 }
0x1939   :  { %5021 = vrot.lane.b32.xlu1 %v4962_v1, %s10477_s17  ;;  %v4970_v29 = vrot.slane %v4904_v55, %v10670_v23  ;;  %v4978_v54 = vrot.slane %v4901_v62, %v10670_v23  ;;  %v4905_v27 = vcombine.high %v4901_v62, %v4901_v62  ;;  %v4920_v8 = vrot.slane %v4906_v44, %v15054_v51 }
0x193a   :  { %v4982_v0 = vrot.slane %v4903_v9, %v10670_v23  ;;  %v4943_v48 = vrot.slane %v4921_v43, %v15054_v51  ;;  %v4990_v53 = vrot.slane %v4929_v22, %v10670_v23  ;;  %v4951_v25 = vcombine.high %v4929_v22, %v4929_v22  ;;  %v9601_v59 = vpop.f32.mrf.mxu1 }
0x193b   :  { %5023 = vrot.lane.b32.xlu0 %v4966_v57, %s10477_s17  ;;  %v4986_v6 = vrot.slane %v4905_v27, %v10670_v23  ;;  %v4922_v30 = vcombine.high %v4920_v8, %v4920_v8  ;;  %v4936_v2 = vrot.slane %v4920_v8, %v15054_v51  ;;  %v4637_v12 = vpop.permute.xlu1 %4636  ;;  %v12718_v21 = vpop.permute.xlu0 %4638 }
0x193c   :  { %v4994_v46 = vrot.slane %v4943_v48, %v10670_v23  ;;  %v4953_v49 = vcombine.high %v4943_v48, %v4943_v48  ;;  %v4998_v45 = vrot.slane %v4951_v25, %v10670_v23  ;;  %v4760_v55 = vpop.f32.mrf.mxu1  ;;  %v4670_v25 = vsel %vm221_vm1, %v4607_v47, %v4609_v58 }
0x193d   :  { %5025 = vrot.lane.b32.xlu1 %v4970_v29, %s10477_s17  ;;  %v4950_v13 = vrot.slane %v4922_v30, %v15054_v51  ;;  %v5006_v17 = vrot.slane %v4936_v2, %v10670_v23  ;;  %v4952_v11 = vcombine.high %v4936_v2, %v4936_v2  ;;  %v4671_v30 = vsel %vm221_vm1, %v4611_v34, %v4613_v16 }
0x193e   :  { %v5002_v50 = vrot.slane %v4953_v49, %v10670_v23  ;;  %v9602_v3 = vpop.f32.mrf.mxu1  ;;  %v4761_v49 = vadd.f32 %v4760_v55, %v4670_v25  ;;  %v4673_v47 = vsel %vm221_vm1, %v4619_v38, %v4621_v37  ;;  %v4674_v16 = vsel %vm221_vm1, %v4623_v52, %v4625_v24 }
0x193f   :  { %5027 = vrot.lane.b32.xlu0 %v4974_v5, %s10477_s17  ;;  %v5010_v32 = vrot.slane %v4950_v13, %v10670_v23  ;;  %v4954_v56 = vcombine.high %v4950_v13, %v4950_v13  ;;  %v5014_v14 = vrot.slane %v4952_v11, %v10670_v23  ;;  %v12720_v1 = vpop.permute.xlu1 %4640  ;;  %v12722_v35 = vpop.permute.xlu0 %4642  ;;  %v12750_v11 = vld [vmem:[%s14874_s5 + $0x9] ss:$0 sm:$0xff]  ;;  %v4772_v58 = vadd.f32 %v9602_v3, %v4673_v47 }
0x1940   :  { %v4763_v62 = vpop.f32.mrf.mxu1  ;;  %v4676_v37 = vsel %vm221_vm1, %v4631_v63, %v4633_v26 }
0x1941   :  { %5029 = vrot.lane.b32.xlu1 %v4978_v54, %s10477_s17  ;;  %v5018_v28 = vrot.slane %v4954_v56, %v10670_v23  ;;  %v4764_v2 = vadd.f32 %v4763_v62, %v4671_v30  ;;  %v4826_v55 = vadd.f32 %v12750_v11, %v4772_v58  ;;  %v4675_v62 = vsel %vm221_vm1, %v4627_v31, %v4629_v15 }
0x1942   :  { %v9605_v5 = vpop.f32.mrf.mxu1  ;;  %v4678_v58 = vsel %vm221_vm1, %v12718_v21, %v12720_v1 }
0x1943   :  { %5031 = vrot.lane.b32.xlu0 %v4982_v0, %s10477_s17  ;;  %v4645_v57 = vpop.permute.xlu1 %4644  ;;  %v12724_v29 = vpop.permute.xlu0 %4646  ;;  %v4824_v34 = vadd.f32 %v12750_v11, %v4764_v2  ;;  %v4785_v30 = vadd.f32 %v9605_v5, %v4676_v37  ;;  %v4842_v15 = vadd.f32 %v4826_v55, %v12660_v36 }
0x1944   :  { %v4776_v27 = vpop.f32.mrf.mxu1 }
0x1945   :  { %5033 = vrot.lane.b32.xlu1 %v4986_v6, %s10477_s17  ;;  %v4829_v5 = vadd.f32 %v12750_v11, %v4785_v30 }
0x1946   :  { %v9606_v44 = vpop.f32.mrf.mxu1 }
0x1947   :  { %5035 = vrot.lane.b32.xlu0 %v4990_v53, %s10477_s17  ;;  %v12726_v40 = vpop.permute.xlu1 %4648  ;;  %v12728_v9 = vpop.permute.xlu0 %4650 }
0x1948   :  { %v4779_v22 = vpop.f32.mrf.mxu1  ;;  %v4680_v55 = vsel %vm221_vm1, %v12724_v29, %v12726_v40  ;;  %v4845_v40 = vadd.f32 %v4829_v5, %v12660_v36 }
0x1949   :  { %5037 = vrot.lane.b32.xlu1 %v4994_v46, %s10477_s17  ;;  %v4780_v3 = vadd.f32 %v4779_v22, %v4675_v62 }
0x194a   :  { %v9609_v8 = vpop.f32.mrf.mxu1 }
0x194b   :  { %5039 = vrot.lane.b32.xlu0 %v4998_v45, %s10477_s17  ;;  %v12730_v54 = vpop.permute.xlu1 %4652  ;;  %v12732_v43 = vpop.permute.xlu0 %4654  ;;  %v4828_v63 = vadd.f32 %v12750_v11, %v4780_v3 }
0x194c   :  { %v4792_v46 = vpop.f32.mrf.mxu1 }
0x194d   :  { %5041 = vrot.lane.b32.xlu1 %v5002_v50, %s10477_s17  ;;  %v4672_v50 = vsel %vm221_vm1, %v4615_v4, %v4617_v33  ;;  %v4777_v33 = vadd.f32 %v4776_v27, %v4674_v16  ;;  %v4677_v27 = vsel %vm221_vm1, %v4635_v7, %v4637_v12  ;;  %v4679_v7 = vsel %vm221_vm1, %v12722_v35, %v4645_v57 }
0x194e   :  { %v9610_v13 = vpop.f32.mrf.mxu1  ;;  %v4844_v35 = vadd.f32 %v4828_v63, %v12660_v36  ;;  %v4801_v57 = vadd.f32 %v9609_v8, %v4680_v55 }
0x194f   :  { %5043 = vrot.lane.b32.xlu0 %v5006_v17, %s10477_s17  ;;  %v12734_v0 = vpop.permute.xlu1 %4656  ;;  %v12736_v6 = vpop.permute.xlu0 %4658  ;;  %v4769_v17 = vadd.f32 %v9601_v59, %v4672_v50  ;;  %v4827_v24 = vadd.f32 %v12750_v11, %v4777_v33 }
0x1951   :  { %5045 = vrot.lane.b32.xlu1 %v5010_v32, %s10477_s17  ;;  %v4823_v32 = vadd.f32 %v12750_v11, %v4761_v49  ;;  %v4825_v4 = vadd.f32 %v12750_v11, %v4769_v17  ;;  %v4840_v49 = vadd.f32 %v4824_v34, %v12660_v36  ;;  %v4843_v33 = vadd.f32 %v4827_v24, %v12660_v36 }
0x1953   :  { %5047 = vrot.lane.b32.xlu0 %v5014_v14, %s10477_s17  ;;  %v12738_v48 = vpop.permute.xlu1 %4660  ;;  %v12740_v53 = vpop.permute.xlu0 %4662  ;;  %v4839_v59 = vadd.f32 %v4823_v32, %v12660_v36  ;;  %v4841_v17 = vadd.f32 %v4825_v4, %v12660_v36  ;;  %v4788_v32 = vadd.f32 %v9606_v44, %v4677_v27  ;;  %v4793_v44 = vadd.f32 %v4792_v46, %v4678_v58 }
0x1954   :  { %v4681_v46 = vsel %vm221_vm1, %v12728_v9, %v12730_v54  ;;  %v4833_v9 = vadd.f32 %v12750_v11, %v4801_v57  ;;  %v4682_v54 = vsel %vm221_vm1, %v12732_v43, %v12734_v0  ;;  %v10321_v57 = vld [vmem:[#allocation5 + $0x8] ss:$12 sps:$4 sm:$0xff]  }
0x1955   :  { %5049 = vrot.lane.b32.xlu1 %v5018_v28, %s10477_s17  ;;  %v4795_v28 = vpop.f32.mrf.mxu1 }
0x1956   :  { %v4796_v62 = vadd.f32 %v4795_v28, %v4679_v7  ;;  %v4804_v28 = vadd.f32 %v9610_v13, %v4681_v46 }
0x1957   :  { %v12744_v45 = vpop.permute.xlu1 %4664  ;;  %v12754_v56 = vpop.permute.xlu0 %4666 }
0x1958   :  { %v12766_v2 = vpop.f32.mrf.mxu1 }
0x195a   :  { %v4808_v12 = vpop.f32.mrf.mxu1 }
0x195b   :  { %v12757_v14 = vpop.permute.xlu1 %4668  ;;  %v4809_v13 = vadd.f32 %v4808_v12, %v4682_v54  ;;  %v4684_v12 = vsel %vm221_vm1, %v12740_v53, %v12744_v45 }
0x195c   :  { %v9614_v3 = vpop.f32.mrf.mxu1 }
0x19a9   :  { %v5020_v38 = vpop.permute.xlu0 %5019 }
0x19aa   :  { %v5067_v25 = vadd.f32 %v5020_v38, %v4839_v59  ;;  %v4830_v59 = vadd.f32 %v12750_v11, %v4788_v32  ;;  %v4811_v32 = vpop.f32.mrf.mxu1 }
0x19ab   :  { %v5022_v52 = vpop.permute.xlu1 %5021 }
0x19ac   :  { %v5068_v50 = vadd.f32 %v5022_v52, %v4840_v49  ;;  %v5083_v26 = vmax.f32 %v5067_v25, 0.0  ;;  %v4831_v49 = vadd.f32 %v12750_v11, %v4793_v44  ;;  %v4832_v52 = vadd.f32 %v12750_v11, %v4796_v62 }
0x19ad   :  { %v5024_v31 = vpop.permute.xlu0 %5023  ;;  %v4846_v8 = vadd.f32 %v4830_v59, %v12660_v36  ;;  %v4683_v36 = vsel %vm221_vm1, %v12736_v6, %v12738_v48  ;;  %v4849_v6 = vadd.f32 %v4833_v9, %v12674_v19  ;;  %v4817_v48 = vadd.f32 %v12766_v2, %v4684_v12  ;;  %v10320_v59 = vld [vmem:[#allocation5 + $0x20] ss:$12 sps:$4 sm:$0xff]  }
0x19ae   :  { %v5084_v22 = vmax.f32 %v5068_v50, 0.0  ;;  %v5069_v47 = vadd.f32 %v5024_v31, %v4841_v17  ;;  %v4848_v43 = vadd.f32 %v4832_v52, %v12674_v19  ;;  %v4812_v0 = vadd.f32 %v4811_v32, %v4683_v36 }
0x19af   :  { %v5026_v34 = vpop.permute.xlu1 %5025  ;;  %v4837_v2 = vadd.f32 %v12750_v11, %v4817_v48  ;;  %v15057_v48 = vld [vmem:[#allocation37_spill] sm:$0xff] }
0x19b0   :  { %v5099_v16 = vpack.c.bf16 %v5084_v22, %v5083_v26  ;;  %v5070_v4 = vadd.f32 %v5026_v34, %v4842_v15  ;;  %v5085_v37 = vmax.f32 %v5069_v47, 0.0  ;;  %v4847_v26 = vadd.f32 %v4831_v49, %v12674_v19  ;;  %v10319_v22 = vld [vmem:[#allocation5 + $0x38] ss:$12 sps:$4 sm:$0xff]  }
0x19b1   :  { %v5028_v38 = vpop.permute.xlu0 %5027  ;;  %v4834_v47 = vadd.f32 %v12750_v11, %v4804_v28  ;;  %v4685_v34 = vsel %vm221_vm1, %v12754_v56, %v12757_v14  ;;  %v4836_v45 = vadd.f32 %v12750_v11, %v4812_v0 }
0x19b2   :  { %v5086_v21 = vmax.f32 %v5070_v4, 0.0  ;;  %v5071_v1 = vadd.f32 %v5028_v38, %v4843_v33  ;;  %9623 = vmatprep.mubr.msk.bf16.mxu0 %vm1582_vm4, %v5099_v16  ;;  %v4835_v16 = vadd.f32 %v12750_v11, %v4809_v13  ;;  %v4820_v55 = vadd.f32 %v9614_v3, %v4685_v34 }
0x19b3   :  { %v5030_v25 = vpop.permute.xlu1 %5029  ;;  %v4850_v53 = vadd.f32 %v4834_v47, %v12674_v19  ;;  %v12834_v47 = vld [vmem:[%s14874_s5 + $0xa] ss:$0 sm:$0xff] }
0x19b4   :  { %v5100_v30 = vpack.c.bf16 %v5086_v21, %v5085_v37  ;;  %v5072_v29 = vadd.f32 %v5030_v25, %v4844_v35  ;;  %v5087_v27 = vmax.f32 %v5071_v1, 0.0  ;;  %v4851_v35 = vadd.f32 %v4835_v16, %v12674_v19 }
0x19b5   :  { %v5032_v24 = vpop.permute.xlu0 %5031  ;;  %v4838_v46 = vadd.f32 %v12750_v11, %v4820_v55 }
0x19b6   :  { %v5088_v50 = vmax.f32 %v5072_v29, 0.0  ;;  %v5073_v17 = vadd.f32 %v5032_v24, %v4845_v40  ;;  %9624 = vmatmul.mubr.msk.bf16.vlgmr.msra.gmra.mxu0 %vm1582_vm4, %v5100_v30  ;;  %v4852_v29 = vadd.f32 %v4836_v45, %v12674_v19  ;;  %v4853_v24 = vadd.f32 %v4837_v2, %v12674_v19 }
0x19b7   :  { %v5034_v31 = vpop.permute.xlu1 %5033  ;;  %9660 = vmatpush3.bf16.msra.mxu0 %v12547_v20  ;;  %v4854_v9 = vadd.f32 %v4838_v46, %v12674_v19 }
0x19b8   :  { %v5101_v15 = vpack.c.bf16 %v5088_v50, %v5087_v27  ;;  %v5074_v63 = vadd.f32 %v5034_v31, %v4846_v8  ;;  %9661 = vmatprep.subr.bf16.mxu0 %v10319_v22  ;;  %v5089_v58 = vmax.f32 %v5073_v17, 0.0  ;;  %v10322_v27 = vld [vmem:[%s14871_s2 + $0x54] ss:$36 sps:$4 sm:$0xff]  }
0x19b9   :  { %v5036_v5 = vpop.permute.xlu0 %5035 }
0x19ba   :  { %v5090_v7 = vmax.f32 %v5074_v63, 0.0  ;;  %v5075_v20 = vadd.f32 %v5036_v5, %v4847_v26  ;;  %9627 = vmatprep.mubr.msk.bf16.mxu0 %vm1582_vm4, %v5101_v15 }
0x19bb   :  { %v5038_v44 = vpop.permute.xlu1 %5037  ;;  %9662 = vmatpush3.bf16.msra.mxu0 %v10319_v22 }
0x19bc   :  { %v5102_v4 = vpack.c.bf16 %v5090_v7, %v5089_v58  ;;  %v5076_v33 = vadd.f32 %v5038_v44, %v4848_v43  ;;  %9663 = vmatprep.subr.bf16.mxu0 %v10320_v59  ;;  %v5091_v38 = vmax.f32 %v5075_v20, 0.0  ;;  %v15055_v43 = vld [vmem:[#allocation36_spill] sm:$0xff]  ;;  %v15056_v7 = vld [vmem:[#allocation33_spill] sm:$0xff] }
0x19bd   :  { %v5040_v62 = vpop.permute.xlu0 %5039 }
0x19be   :  { %v5092_v56 = vmax.f32 %v5076_v33, 0.0  ;;  %v5077_v14 = vadd.f32 %v5040_v62, %v4849_v6  ;;  %9628 = vmatmul.mubr.msk.bf16.gmra.mxu0 %vm1582_vm4, %v5102_v4 }
0x19bf   :  { %v5042_v37 = vpop.permute.xlu1 %5041  ;;  %9664 = vmatpush3.bf16.msra.mxu0 %v10320_v59  ;;  %v15058_v59 = vld [vmem:[#allocation34_spill] sm:$0xff] }
0x19c0   :  { %v5103_v21 = vpack.c.bf16 %v5092_v56, %v5091_v38  ;;  %v5078_v1 = vadd.f32 %v5042_v37, %v4850_v53  ;;  %9665 = vmatprep.subr.bf16.mxu0 %v10321_v57  ;;  %v5093_v25 = vmax.f32 %v5077_v14, 0.0  ;;  %v15059_v56 = vld [vmem:[#allocation28_spill] sm:$0xff] }
0x19c1   :  { %v5044_v3 = vpop.permute.xlu0 %5043  ;;  %v15060_v37 = vld [vmem:[#allocation24_spill] sm:$0xff] }
0x19c2   :  { %v5094_v49 = vmax.f32 %v5078_v1, 0.0  ;;  %v5079_v30 = vadd.f32 %v5044_v3, %v4851_v35  ;;  %9631 = vmatprep.mubr.msk.bf16.mxu0 %vm1582_vm4, %v5103_v21 }
0x19c3   :  { %v5046_v40 = vpop.permute.xlu1 %5045  ;;  %9666 = vmatpush3.bf16.msra.mxu0 %v10321_v57 }
0x19c4   :  { %v5104_v28 = vpack.c.bf16 %v5094_v49, %v5093_v25  ;;  %v5080_v52 = vadd.f32 %v5046_v40, %v4852_v29  ;;  %6163 = vmatprep.subr.bf16.mxu0 %v10322_v27  ;;  %v5095_v50 = vmax.f32 %v5079_v30, 0.0  ;;  %v15061_v25 = vld [vmem:[#allocation31_spill] sm:$0xff] }
0x19c5   :  { %v5048_v11 = vpop.permute.xlu0 %5047  ;;  %v15062_v40 = vld [vmem:[#allocation27_spill] sm:$0xff] }
0x19c6   :  { %v5096_v17 = vmax.f32 %v5080_v52, 0.0  ;;  %v5081_v8 = vadd.f32 %v5048_v11, %v4853_v24  ;;  %9632 = vmatmul.mubr.msk.bf16.gmra.mxu0 %vm1582_vm4, %v5104_v28 }
0x19c7   :  { %v5050_v54 = vpop.permute.xlu1 %5049 }
0x19c8   :  { %v5105_v32 = vpack.c.bf16 %v5096_v17, %v5095_v50  ;;  %v5082_v31 = vadd.f32 %v5050_v54, %v4854_v9  ;;  %v5097_v13 = vmax.f32 %v5081_v8, 0.0  ;;  %v15063_v50 = vld [vmem:[#allocation23_spill] sm:$0xff]  ;;  %v15064_v54 = vld [vmem:[#allocation18_spill] sm:$0xff] }
0x19ca   :  { %v5098_v15 = vmax.f32 %v5082_v31, 0.0  ;;  %9635 = vmatprep.mubr.msk.bf16.mxu0 %vm1582_vm4, %v5105_v32 }
0x19cc   :  { %v5106_v63 = vpack.c.bf16 %v5098_v15, %v5097_v13 }
0x19ce   :  { %9636 = vmatmul.mubr.msk.bf16.gmra.mxu0 %vm1582_vm4, %v5106_v63 }
0x1a76   :  { %v9625_v26 = vpop.f32.mrf.mxu0 }
0x1a77   :  { %v5174_v36 = vadd.f32 %v12834_v47, %v9625_v26  ;;  %v15065_v26 = vld [vmem:[#allocation22_spill] sm:$0xff] }
0x1a78   :  { %v5165_v22 = vpop.f32.mrf.mxu0 }
0x1a79   :  { %v5166_v19 = vadd.f32 %v12834_v47, %v5165_v22  ;;  %v12842_v20 = vadd.f32 %v5174_v36, %v15056_v7  ;;  %v15066_v36 = vld [vmem:[#allocation21_spill] sm:$0xff] }
0x1a7a   :  { %v9626_v5 = vpop.f32.mrf.mxu0 }
0x1a7b   :  { %v12839_v0 = vadd.f32 %v5166_v19, %v15055_v43  ;;  %v5177_v12 = vadd.f32 %v12834_v47, %v9626_v5  ;;  %v5250_v45 = vsel %vm221_vm1, %v12842_v20, 0.0 }
0x1a7c   :  { %v5168_v58 = vpop.f32.mrf.mxu0 }
0x1a7d   :  { %v5169_v34 = vadd.f32 %v12834_v47, %v5168_v58  ;;  %v5244_v44 = vsel %vm221_vm1, %v12839_v0, 0.0  ;;  %v12853_v55 = vadd.f32 %v5177_v12, %v15058_v59 }
0x1a7e   :  { %v9629_v6 = vpop.f32.mrf.mxu0  ;;  %5245 = vadd.xlane.f32.xlu0 %v5244_v44  ;;  %v15067_v44 = vld [vmem:[#allocation17_spill] sm:$0xff] }
0x1a7f   :  { %v12849_v16 = vadd.f32 %v5169_v34, %v15057_v48  ;;  %v5190_v4 = vadd.f32 %v12834_v47, %v9629_v6  ;;  %v5253_v46 = vsel %vm221_vm1, %v12853_v55, 0.0 }
0x1a80   :  { %v5181_v33 = vpop.f32.mrf.mxu0 }
0x1a81   :  { %v5182_v62 = vadd.f32 %v12834_v47, %v5181_v33  ;;  %v5247_v53 = vsel %vm221_vm1, %v12849_v16, 0.0  ;;  %v12864_v2 = vadd.f32 %v5190_v4, %v15060_v37  ;;  %v15068_v33 = vld [vmem:[#allocation13_spill] sm:$0xff]  ;;  %v15070_v37 = vld [vmem:[#allocation15_spill] sm:$0xff] }
0x1a82   :  { %v9630_v38 = vpop.f32.mrf.mxu0  ;;  %5248 = vadd.xlane.f32.xlu1 %v5247_v53  ;;  %5251 = vadd.xlane.f32.xlu0 %v5250_v45 }
0x1a83   :  { %v12861_v14 = vadd.f32 %v5182_v62, %v15059_v56  ;;  %v5193_v1 = vadd.f32 %v12834_v47, %v9630_v38  ;;  %v5262_v29 = vsel %vm221_vm1, %v12864_v2, 0.0  ;;  %v15069_v38 = vld [vmem:[#allocation16_spill] sm:$0xff] }
0x1a84   :  { %v5184_v21 = vpop.f32.mrf.mxu0 }
0x1a85   :  { %v5185_v35 = vadd.f32 %v12834_v47, %v5184_v21  ;;  %v5256_v57 = vsel %vm221_vm1, %v12861_v14, 0.0  ;;  %v12878_v28 = vadd.f32 %v5193_v1, %v15062_v40 }
0x1a86   :  { %v9633_v3 = vpop.f32.mrf.mxu0  ;;  %5257 = vadd.xlane.f32.xlu1 %v5256_v57  ;;  %5254 = vadd.xlane.f32.xlu0 %v5253_v46 }
0x1a87   :  { %v12873_v49 = vadd.f32 %v5185_v35, %v15061_v25  ;;  %v5206_v52 = vadd.f32 %v12834_v47, %v9633_v3  ;;  %v5265_v15 = vsel %vm221_vm1, %v12878_v28, 0.0 }
0x1a88   :  { %v5197_v30 = vpop.f32.mrf.mxu0 }
0x1a89   :  { %v5198_v24 = vadd.f32 %v12834_v47, %v5197_v30  ;;  %v5259_v27 = vsel %vm221_vm1, %v12873_v49, 0.0  ;;  %v12889_v32 = vadd.f32 %v5206_v52, %v15064_v54 }
0x1a8a   :  { %v9634_v11 = vpop.f32.mrf.mxu0  ;;  %5263 = vadd.xlane.f32.xlu1 %v5262_v29  ;;  %5260 = vadd.xlane.f32.xlu0 %v5259_v27 }
0x1a8b   :  { %v12885_v17 = vadd.f32 %v5198_v24, %v15063_v50  ;;  %v5209_v8 = vadd.f32 %v12834_v47, %v9634_v11  ;;  %v5274_v7 = vsel %vm221_vm1, %v12889_v32, 0.0 }
0x1a8c   :  { %v5200_v9 = vpop.f32.mrf.mxu0 }
0x1a8d   :  { %v5201_v31 = vadd.f32 %v12834_v47, %v5200_v9  ;;  %v5268_v13 = vsel %vm221_vm1, %v12885_v17, 0.0  ;;  %v12900_v19 = vadd.f32 %v5209_v8, %v15066_v36 }
0x1a8e   :  { %v9637_v63 = vpop.f32.mrf.mxu0  ;;  %5269 = vadd.xlane.f32.xlu1 %v5268_v13  ;;  %5266 = vadd.xlane.f32.xlu0 %v5265_v15 }
0x1a8f   :  { %v12897_v22 = vadd.f32 %v5201_v31, %v15065_v26  ;;  %v5222_v43 = vadd.f32 %v12834_v47, %v9637_v63  ;;  %v5277_v4 = vsel %vm221_vm1, %v12900_v19, 0.0 }
0x1a90   :  { %v5213_v5 = vpop.f32.mrf.mxu0 }
0x1a91   :  { %v5214_v58 = vadd.f32 %v12834_v47, %v5213_v5  ;;  %v5271_v12 = vsel %vm221_vm1, %v12897_v22, 0.0  ;;  %v12914_v59 = vadd.f32 %v5222_v43, %v15068_v33 }
0x1a92   :  { %v9638_v34 = vpop.f32.mrf.mxu0  ;;  %5275 = vadd.xlane.f32.xlu1 %v5274_v7  ;;  %5272 = vadd.xlane.f32.xlu0 %v5271_v12 }
0x1a93   :  { %v12909_v6 = vadd.f32 %v5214_v58, %v15067_v44  ;;  %v5225_v62 = vadd.f32 %v12834_v47, %v9638_v34  ;;  %v5286_v1 = vsel %vm221_vm1, %v12914_v59, 0.0 }
0x1a94   :  { %v5216_v48 = vpop.f32.mrf.mxu0 }
0x1a95   :  { %v5217_v53 = vadd.f32 %v12834_v47, %v5216_v48  ;;  %v5280_v45 = vsel %vm221_vm1, %v12909_v6, 0.0  ;;  %v12924_v21 = vadd.f32 %v5225_v62, %v15070_v37 }
0x1a96   :  { %5281 = vadd.xlane.f32.xlu1 %v5280_v45  ;;  %5278 = vadd.xlane.f32.xlu0 %v5277_v4 }
0x1a97   :  { %v12921_v56 = vadd.f32 %v5217_v53, %v15069_v38  ;;  %v5289_v47 = vsel %vm221_vm1, %v12924_v21, 0.0 }
0x1a99   :  { %v5283_v35 = vsel %vm221_vm1, %v12921_v56, 0.0 }
0x1a9a   :  { %5287 = vadd.xlane.f32.xlu1 %v5286_v1  ;;  %5284 = vadd.xlane.f32.xlu0 %v5283_v35 }
0x1a9e   :  { %5290 = vadd.xlane.f32.xlu0 %v5289_v47 }
0x1b07   :  { %v5246_v57 = vpop.xlane.xlu0 %5245 }
0x1b08   :  { %v5292_v46 = vmul.f32 0.03125, %v5246_v57 }
0x1b0a   :  { %v12933_v3 = vsub.f32 %v12839_v0, %v5292_v46 }
0x1b0b   :  { %v5249_v25 = vpop.xlane.xlu1 %5248  ;;  %v5252_v30 = vpop.xlane.xlu0 %5251 }
0x1b0c   :  { %v5293_v29 = vmul.f32 0.03125, %v5249_v25  ;;  %v5294_v40 = vmul.f32 0.03125, %v5252_v30  ;;  %v5324_v52 = vmul.f32 %v12933_v3, %v12933_v3 }
0x1b0e   :  { %v12938_v24 = vsub.f32 %v12849_v16, %v5293_v29  ;;  %v12941_v27 = vsub.f32 %v12842_v20, %v5294_v40  ;;  %v5340_v11 = vsel %vm221_vm1, %v5324_v52, 0.0 }
0x1b0f   :  { %v5258_v50 = vpop.xlane.xlu1 %5257  ;;  %5341 = vadd.xlane.f32.xlu1 %v5340_v11  ;;  %v5255_v8 = vpop.xlane.xlu0 %5254 }
0x1b10   :  { %v5296_v0 = vmul.f32 0.03125, %v5258_v50  ;;  %v5295_v9 = vmul.f32 0.03125, %v5255_v8  ;;  %v5325_v54 = vmul.f32 %v12938_v24, %v12938_v24  ;;  %v5326_v31 = vmul.f32 %v12941_v27, %v12941_v27 }
0x1b12   :  { %v12949_v13 = vsub.f32 %v12861_v14, %v5296_v0  ;;  %v12952_v16 = vsub.f32 %v12853_v55, %v5295_v9  ;;  %v5343_v20 = vsel %vm221_vm1, %v5325_v54, 0.0  ;;  %v5346_v15 = vsel %vm221_vm1, %v5326_v31, 0.0 }
0x1b13   :  { %v5264_v63 = vpop.xlane.xlu1 %5263  ;;  %5344 = vadd.xlane.f32.xlu0 %v5343_v20  ;;  %5347 = vadd.xlane.f32.xlu1 %v5346_v15  ;;  %v5261_v26 = vpop.xlane.xlu0 %5260 }
0x1b14   :  { %v5298_v36 = vmul.f32 0.03125, %v5264_v63  ;;  %v5297_v5 = vmul.f32 0.03125, %v5261_v26  ;;  %v5328_v43 = vmul.f32 %v12949_v13, %v12949_v13  ;;  %v5327_v14 = vmul.f32 %v12952_v16, %v12952_v16 }
0x1b16   :  { %v12961_v58 = vsub.f32 %v12864_v2, %v5298_v36  ;;  %v12964_v55 = vsub.f32 %v12873_v49, %v5297_v5  ;;  %v5352_v7 = vsel %vm221_vm1, %v5328_v43, 0.0  ;;  %v5349_v12 = vsel %vm221_vm1, %v5327_v14, 0.0 }
0x1b17   :  { %v5270_v34 = vpop.xlane.xlu1 %5269  ;;  %5353 = vadd.xlane.f32.xlu1 %v5352_v7  ;;  %5350 = vadd.xlane.f32.xlu0 %v5349_v12  ;;  %v5267_v44 = vpop.xlane.xlu0 %5266 }
0x1b18   :  { %v5300_v48 = vmul.f32 0.03125, %v5270_v34  ;;  %v5299_v4 = vmul.f32 0.03125, %v5267_v44  ;;  %v5330_v33 = vmul.f32 %v12961_v58, %v12961_v58  ;;  %v5329_v2 = vmul.f32 %v12964_v55, %v12964_v55 }
0x1b1a   :  { %v12973_v62 = vsub.f32 %v12885_v17, %v5300_v48  ;;  %v12976_v49 = vsub.f32 %v12878_v28, %v5299_v4  ;;  %v5358_v53 = vsel %vm221_vm1, %v5330_v33, 0.0  ;;  %v5355_v45 = vsel %vm221_vm1, %v5329_v2, 0.0 }
0x1b1b   :  { %v5276_v38 = vpop.xlane.xlu1 %5275  ;;  %5359 = vadd.xlane.f32.xlu1 %v5358_v53  ;;  %5356 = vadd.xlane.f32.xlu0 %v5355_v45  ;;  %v5273_v37 = vpop.xlane.xlu0 %5272 }
0x1b1c   :  { %v5302_v1 = vmul.f32 0.03125, %v5276_v38  ;;  %v5301_v35 = vmul.f32 0.03125, %v5273_v37  ;;  %v5332_v47 = vmul.f32 %v12973_v62, %v12973_v62  ;;  %v5331_v17 = vmul.f32 %v12976_v49, %v12976_v49 }
0x1b1e   :  { %v12985_v57 = vsub.f32 %v12889_v32, %v5302_v1  ;;  %v12988_v28 = vsub.f32 %v12897_v22, %v5301_v35  ;;  %v5364_v46 = vsel %vm221_vm1, %v5332_v47, 0.0  ;;  %v5361_v25 = vsel %vm221_vm1, %v5331_v17, 0.0 }
0x1b1f   :  { %v5282_v30 = vpop.xlane.xlu1 %5281  ;;  %5365 = vadd.xlane.f32.xlu1 %v5364_v46  ;;  %5362 = vadd.xlane.f32.xlu0 %v5361_v25  ;;  %v5279_v29 = vpop.xlane.xlu0 %5278 }
0x1b20   :  { %v5304_v40 = vmul.f32 0.03125, %v5282_v30  ;;  %v5303_v52 = vmul.f32 0.03125, %v5279_v29  ;;  %v5334_v11 = vmul.f32 %v12985_v57, %v12985_v57  ;;  %v5333_v32 = vmul.f32 %v12988_v28, %v12988_v28 }
0x1b22   :  { %v12997_v50 = vsub.f32 %v12909_v6, %v5304_v40  ;;  %v13000_v22 = vsub.f32 %v12900_v19, %v5303_v52  ;;  %v5370_v8 = vsel %vm221_vm1, %v5334_v11, 0.0  ;;  %v5367_v0 = vsel %vm221_vm1, %v5333_v32, 0.0 }
0x1b23   :  { %v5288_v9 = vpop.xlane.xlu1 %5287  ;;  %5371 = vadd.xlane.f32.xlu1 %v5370_v8  ;;  %5368 = vadd.xlane.f32.xlu0 %v5367_v0  ;;  %v5285_v54 = vpop.xlane.xlu0 %5284 }
0x1b24   :  { %v5306_v31 = vmul.f32 0.03125, %v5288_v9  ;;  %v5305_v20 = vmul.f32 0.03125, %v5285_v54  ;;  %v5336_v15 = vmul.f32 %v12997_v50, %v12997_v50  ;;  %v5335_v6 = vmul.f32 %v13000_v22, %v13000_v22 }
0x1b26   :  { %v13009_v63 = vsub.f32 %v12914_v59, %v5306_v31  ;;  %v13012_v19 = vsub.f32 %v12921_v56, %v5305_v20  ;;  %v5376_v26 = vsel %vm221_vm1, %v5336_v15, 0.0  ;;  %v5373_v36 = vsel %vm221_vm1, %v5335_v6, 0.0 }
0x1b27   :  { %5377 = vadd.xlane.f32.xlu1 %v5376_v26  ;;  %5374 = vadd.xlane.f32.xlu0 %v5373_v36  ;;  %v5291_v5 = vpop.xlane.xlu0 %5290 }
0x1b28   :  { %v5307_v43 = vmul.f32 0.03125, %v5291_v5  ;;  %v5338_v14 = vmul.f32 %v13009_v63, %v13009_v63  ;;  %v5337_v7 = vmul.f32 %v13012_v19, %v13012_v19 }
0x1b2a   :  { %v13021_v59 = vsub.f32 %v12924_v21, %v5307_v43  ;;  %v5382_v56 = vsel %vm221_vm1, %v5338_v14, 0.0  ;;  %v5379_v12 = vsel %vm221_vm1, %v5337_v7, 0.0 }
0x1b2b   :  { %5383 = vadd.xlane.f32.xlu1 %v5382_v56  ;;  %5380 = vadd.xlane.f32.xlu0 %v5379_v12 }
0x1b2c   :  { %v5339_v34 = vmul.f32 %v13021_v59, %v13021_v59 }
0x1b2e   :  { %v5385_v44 = vsel %vm221_vm1, %v5339_v34, 0.0 }
0x1b2f   :  { %5386 = vadd.xlane.f32.xlu0 %v5385_v44 }
0x1b98   :  { %v5342_v48 = vpop.xlane.xlu1 %5341 }
0x1b99   :  { %v5388_v4 = vmul.f32 0.03125, %v5342_v48 }
0x1b9b   :  { %v5404_v33 = vadd.f32 1e-05, %v5388_v4 }
0x1b9c   :  { %v5348_v2 = vpop.xlane.xlu1 %5347  ;;  %v5345_v53 = vpop.xlane.xlu0 %5344 }
0x1b9d   :  { %10084 = vrsqrt.f32 %v5404_v33  ;;  %v5390_v21 = vmul.f32 0.03125, %v5348_v2  ;;  %v5389_v45 = vmul.f32 0.03125, %v5345_v53  ;;  %v13034_v33 = vld [vmem:[%s14874_s5 + $0x11] ss:$0 sm:$0xff] }
0x1b9f   :  { %v5406_v38 = vadd.f32 1e-05, %v5390_v21  ;;  %v5405_v37 = vadd.f32 1e-05, %v5389_v45 }
0x1ba0   :  { %v5354_v1 = vpop.xlane.xlu1 %5353  ;;  %v5351_v35 = vpop.xlane.xlu0 %5350 }
0x1ba1   :  { %10086 = vrsqrt.f32 %v5406_v38  ;;  %v5392_v47 = vmul.f32 0.03125, %v5354_v1  ;;  %v5391_v17 = vmul.f32 0.03125, %v5351_v35 }
0x1ba2   :  { %10088 = vrsqrt.f32 %v5405_v37 }
0x1ba3   :  { %v5408_v46 = vadd.f32 1e-05, %v5392_v47  ;;  %v5407_v25 = vadd.f32 1e-05, %v5391_v17  ;;  %v13043_v17 = vld [vmem:[%s14874_s5 + $0x12] ss:$0 sm:$0xff] }
0x1ba4   :  { %v5360_v30 = vpop.xlane.xlu1 %5359  ;;  %v5357_v29 = vpop.xlane.xlu0 %5356 }
0x1ba5   :  { %10090 = vrsqrt.f32 %v5408_v46  ;;  %v5394_v40 = vmul.f32 0.03125, %v5360_v30  ;;  %v5393_v52 = vmul.f32 0.03125, %v5357_v29 }
0x1ba6   :  { %10092 = vrsqrt.f32 %v5407_v25 }
0x1ba7   :  { %v5410_v11 = vadd.f32 1e-05, %v5394_v40  ;;  %v5409_v32 = vadd.f32 1e-05, %v5393_v52 }
0x1ba8   :  { %v5366_v8 = vpop.xlane.xlu1 %5365  ;;  %v5363_v0 = vpop.xlane.xlu0 %5362 }
0x1ba9   :  { %10094 = vrsqrt.f32 %v5410_v11  ;;  %v5396_v9 = vmul.f32 0.03125, %v5366_v8  ;;  %v5395_v54 = vmul.f32 0.03125, %v5363_v0 }
0x1baa   :  { %v10085_v31 = vpop.eup %10084  ;;  %10096 = vrsqrt.f32 %v5409_v32 }
0x1bab   :  { %v5412_v20 = vadd.f32 1e-05, %v5396_v9  ;;  %v5411_v15 = vadd.f32 1e-05, %v5395_v54  ;;  %v5436_v36 = vmul.f32 %v10085_v31, %v12933_v3 }
0x1bac   :  { %v5372_v6 = vpop.xlane.xlu1 %5371  ;;  %v5369_v26 = vpop.xlane.xlu0 %5368 }
0x1bad   :  { %10098 = vrsqrt.f32 %v5412_v20  ;;  %v5398_v5 = vmul.f32 0.03125, %v5372_v6  ;;  %v5397_v43 = vmul.f32 0.03125, %v5369_v26  ;;  %v5452_v3 = vmul.f32 %v13034_v33, %v5436_v36 }
0x1bae   :  { %v10087_v14 = vpop.eup %10086  ;;  %10100 = vrsqrt.f32 %v5411_v15 }
0x1baf   :  { %v10089_v7 = vpop.eup %10088  ;;  %v5438_v56 = vmul.f32 %v10087_v14, %v12941_v27  ;;  %v5414_v12 = vadd.f32 1e-05, %v5398_v5  ;;  %v5413_v34 = vadd.f32 1e-05, %v5397_v43  ;;  %v13046_v46 = vadd.f32 %v13043_v17, %v5452_v3 }
0x1bb0   :  { %v5378_v44 = vpop.xlane.xlu1 %5377  ;;  %v5375_v48 = vpop.xlane.xlu0 %5374  ;;  %v5437_v4 = vmul.f32 %v10089_v7, %v12938_v24 }
0x1bb1   :  { %10102 = vrsqrt.f32 %v5414_v12  ;;  %v5400_v2 = vmul.f32 0.03125, %v5378_v44  ;;  %v5399_v53 = vmul.f32 0.03125, %v5375_v48  ;;  %v5454_v38 = vmul.f32 %v13034_v33, %v5438_v56 }
0x1bb2   :  { %v10091_v21 = vpop.eup %10090  ;;  %10104 = vrsqrt.f32 %v5413_v34  ;;  %v5453_v27 = vmul.f32 %v13034_v33, %v5437_v4 }
0x1bb3   :  { %v10093_v45 = vpop.eup %10092  ;;  %v5416_v37 = vadd.f32 1e-05, %v5400_v2  ;;  %v5415_v1 = vadd.f32 1e-05, %v5399_v53  ;;  %v5440_v30 = vmul.f32 %v10091_v21, %v12949_v13  ;;  %v13056_v8 = vadd.f32 %v13043_v17, %v5454_v38 }
0x1bb4   :  { %v5439_v24 = vmul.f32 %v10093_v45, %v12952_v16  ;;  %v5384_v35 = vpop.xlane.xlu1 %5383  ;;  %v5381_v47 = vpop.xlane.xlu0 %5380  ;;  %v13049_v25 = vadd.f32 %v13043_v17, %v5453_v27 }
0x1bb5   :  { %10106 = vrsqrt.f32 %v5416_v37  ;;  %v5402_v29 = vmul.f32 0.03125, %v5384_v35  ;;  %v5401_v40 = vmul.f32 0.03125, %v5381_v47  ;;  %v5456_v15 = vmul.f32 %v13034_v33, %v5440_v30 }
0x1bb6   :  { %v10095_v52 = vpop.eup %10094  ;;  %v5455_v16 = vmul.f32 %v13034_v33, %v5439_v24  ;;  %10108 = vrsqrt.f32 %v5415_v1  ;;  %v5484_v11 = vpack.c.bf16 %v13049_v25, %v13046_v46 }
0x1bb7   :  { %v10097_v32 = vpop.eup %10096  ;;  %v5418_v0 = vadd.f32 1e-05, %v5402_v29  ;;  %v5417_v9 = vadd.f32 1e-05, %v5401_v40  ;;  %v5442_v13 = vmul.f32 %v10095_v52, %v12961_v58 }
0x1bb8   :  { %v13059_v54 = vadd.f32 %v13043_v17, %v5455_v16  ;;  %9643 = vmatprep.mubr.msk.bf16.mxu1 %vm221_vm1, %v5484_v11  ;;  %v5387_v31 = vpop.xlane.xlu0 %5386  ;;  %v5441_v20 = vmul.f32 %v10097_v32, %v12964_v55  ;;  %v13072_v55 = vadd.f32 %v13043_v17, %v5456_v15 }
0x1bb9   :  { %10110 = vrsqrt.f32 %v5418_v0  ;;  %v5403_v6 = vmul.f32 0.03125, %v5387_v31  ;;  %v5458_v12 = vmul.f32 %v13034_v33, %v5442_v13 }
0x1bba   :  { %v10099_v26 = vpop.eup %10098  ;;  %v5485_v36 = vpack.c.bf16 %v13059_v54, %v13056_v8  ;;  %10112 = vrsqrt.f32 %v5417_v9  ;;  %v5457_v5 = vmul.f32 %v13034_v33, %v5441_v20 }
0x1bbb   :  { %v10101_v43 = vpop.eup %10100  ;;  %v5419_v14 = vadd.f32 1e-05, %v5403_v6  ;;  %v5444_v58 = vmul.f32 %v10099_v26, %v12973_v62  ;;  %v13085_v3 = vadd.f32 %v13043_v17, %v5458_v12  ;;  %v10326_v26 = vld [vmem:[#allocation7] sm:$0xff]  }
0x1bbc   :  { %v5443_v7 = vmul.f32 %v10101_v43, %v12976_v49  ;;  %9644 = vmatmul.mubr.msk.bf16.vlgmr.msra.gmra.mxu1 %vm221_vm1, %v5485_v36  ;;  %v13075_v56 = vadd.f32 %v13043_v17, %v5457_v5  ;;  %v10327_v43 = vld [vmem:[%s14874_s5 + $0xb] ss:$0 sm:$0xff] }
0x1bbd   :  { %10114 = vrsqrt.f32 %v5419_v14  ;;  %v5460_v49 = vmul.f32 %v13034_v33, %v5444_v58 }
0x1bbe   :  { %v10103_v34 = vpop.eup %10102  ;;  %v5486_v44 = vpack.c.bf16 %v13075_v56, %v13072_v55  ;;  %v5459_v48 = vmul.f32 %v13034_v33, %v5443_v7 }
0x1bbf   :  { %v10105_v62 = vpop.eup %10104  ;;  %v5446_v4 = vmul.f32 %v10103_v34, %v12985_v57  ;;  %v13095_v37 = vadd.f32 %v13043_v17, %v5460_v49 }
0x1bc0   :  { %9647 = vmatprep.mubr.msk.bf16.mxu1 %vm221_vm1, %v5486_v44  ;;  %v13088_v2 = vadd.f32 %v13043_v17, %v5459_v48  ;;  %v5445_v53 = vmul.f32 %v10105_v62, %v12988_v28 }
0x1bc1   :  { %v5462_v24 = vmul.f32 %v13034_v33, %v5446_v4 }
0x1bc2   :  { %v10107_v21 = vpop.eup %10106  ;;  %v5487_v27 = vpack.c.bf16 %v13088_v2, %v13085_v3  ;;  %v5461_v45 = vmul.f32 %v13034_v33, %v5445_v53 }
0x1bc3   :  { %v10109_v38 = vpop.eup %10108  ;;  %v5448_v28 = vmul.f32 %v10107_v21, %v12997_v50 }
0x1bc4   :  { %v5447_v57 = vmul.f32 %v10109_v38, %v13000_v22  ;;  %9648 = vmatmul.mubr.msk.bf16.gmra.mxu1 %vm221_vm1, %v5487_v27  ;;  %v13100_v1 = vadd.f32 %v13043_v17, %v5461_v45  ;;  %v13110_v22 = vadd.f32 %v13043_v17, %v5462_v24 }
0x1bc5   :  { %v5464_v50 = vmul.f32 %v13034_v33, %v5448_v28 }
0x1bc6   :  { %v10111_v35 = vpop.eup %10110  ;;  %v5488_v47 = vpack.c.bf16 %v13100_v1, %v13095_v37  ;;  %v5463_v30 = vmul.f32 %v13034_v33, %v5447_v57 }
0x1bc7   :  { %v10113_v29 = vpop.eup %10112  ;;  %v5450_v40 = vmul.f32 %v10111_v35, %v13009_v63  ;;  %v13124_v13 = vadd.f32 %v13043_v17, %v5464_v50  ;;  %v10328_v35 = vld [vmem:[%s14871_s2 + $0x50] ss:$36 sps:$4 sm:$0xff]  }
0x1bc8   :  { %9651 = vmatprep.mubr.msk.bf16.mxu1 %vm221_vm1, %v5488_v47  ;;  %v13113_v52 = vadd.f32 %v13043_v17, %v5463_v30  ;;  %v5449_v16 = vmul.f32 %v10113_v29, %v13012_v19  ;;  %v10329_v29 = vld [vmem:[%s14871_s2 + $0xc] ss:$36 sps:$4 sm:$0xff]  }
0x1bc9   :  { %v5466_v9 = vmul.f32 %v13034_v33, %v5450_v40 }
0x1bca   :  { %v10115_v11 = vpop.eup %10114  ;;  %v5489_v32 = vpack.c.bf16 %v13113_v52, %v13110_v22  ;;  %v5465_v0 = vmul.f32 %v13034_v33, %v5449_v16 }
0x1bcb   :  { %v5451_v63 = vmul.f32 %v10115_v11, %v13021_v59  ;;  %v13133_v15 = vadd.f32 %v13043_v17, %v5466_v9 }
0x1bcc   :  { %9652 = vmatmul.mubr.msk.bf16.gmra.mxu1 %vm221_vm1, %v5489_v32  ;;  %v13127_v31 = vadd.f32 %v13043_v17, %v5465_v0  ;;  %v10330_v0 = vld [vmem:[%s14871_s2 + $0x8] ss:$36 sps:$4 sm:$0xff]  }
0x1bcd   :  { %v5467_v19 = vmul.f32 %v13034_v33, %v5451_v63 }
0x1bce   :  { %v5490_v20 = vpack.c.bf16 %v13127_v31, %v13124_v13 }
0x1bcf   :  { %v13136_v59 = vadd.f32 %v13043_v17, %v5467_v19 }
0x1bd0   :  { %9655 = vmatprep.mubr.msk.bf16.mxu1 %vm221_vm1, %v5490_v20 }
0x1bd1   :  { %v5491_v6 = vpack.c.bf16 %v13136_v59, %v13133_v15 }
0x1bd4   :  { %9656 = vmatmul.mubr.msk.bf16.gmra.mxu1 %vm221_vm1, %v5491_v6 }
0x1bd5   :  { %9699 = vmatprep.mubr.bf16.mxu1 %v10326_v26 }
0x1c7c   :  { %v9645_v36 = vpop.f32.mrf.mxu1 }
0x1c7d   :  { %v5559_v17 = vadd.f32 %v10327_v43, %v9645_v36 }
0x1c7e   :  { %v5550_v33 = vpop.f32.mrf.mxu1 }
0x1c7f   :  { %v5551_v14 = vadd.f32 %v10327_v43, %v5550_v33  ;;  %v5615_v49 = vmax.f32 %v5559_v17, 0.0 }
0x1c80   :  { %v9646_v5 = vpop.f32.mrf.mxu1 }
0x1c81   :  { %v5562_v58 = vadd.f32 %v10327_v43, %v9646_v5  ;;  %v5613_v48 = vmax.f32 %v5551_v14, 0.0 }
0x1c82   :  { %v5553_v7 = vpop.f32.mrf.mxu1 }
0x1c83   :  { %v5554_v12 = vadd.f32 %v10327_v43, %v5553_v7  ;;  %v5616_v34 = vmax.f32 %v5562_v58, 0.0 }
0x1c84   :  { %v9649_v44 = vpop.f32.mrf.mxu1 }
0x1c85   :  { %v5614_v62 = vmax.f32 %v5554_v12, 0.0  ;;  %v5630_v21 = vpack.c.bf16 %v5616_v34, %v5615_v49  ;;  %v5575_v57 = vadd.f32 %v10327_v43, %v9649_v44 }
0x1c86   :  { %v5566_v4 = vpop.f32.mrf.mxu1 }
0x1c87   :  { %v5629_v53 = vpack.c.bf16 %v5614_v62, %v5613_v48  ;;  %v5567_v45 = vadd.f32 %v10327_v43, %v5566_v4  ;;  %v5619_v50 = vmax.f32 %v5575_v57, 0.0 }
0x1c88   :  { %v9650_v27 = vpop.f32.mrf.mxu1 }
0x1c89   :  { %v5578_v38 = vadd.f32 %v10327_v43, %v9650_v27  ;;  %9667 = vmatprep.mubr.msk.bf16.mxu0 %vm1582_vm4, %v5629_v53  ;;  %v5617_v40 = vmax.f32 %v5567_v45, 0.0 }
0x1c8a   :  { %v5569_v24 = vpop.f32.mrf.mxu1  ;;  %9668 = vmatmul.mubr.msk.bf16.vlgmr.msra.gmra.mxu0 %vm1582_vm4, %v5630_v21 }
0x1c8b   :  { %v5570_v28 = vadd.f32 %v10327_v43, %v5569_v24  ;;  %6164 = vmatpush1.bf16.msra.mxu0 %v10328_v35  ;;  %v5620_v47 = vmax.f32 %v5578_v38, 0.0 }
0x1c8c   :  { %v9653_v30 = vpop.f32.mrf.mxu1  ;;  %6165 = vmatprep.subr.bf16.mxu0 %v10329_v29 }
0x1c8d   :  { %v5618_v16 = vmax.f32 %v5570_v28, 0.0  ;;  %v5632_v63 = vpack.c.bf16 %v5620_v47, %v5619_v50  ;;  %v5591_v6 = vadd.f32 %v10327_v43, %v9653_v30 }
0x1c8e   :  { %v5582_v11 = vpop.f32.mrf.mxu1 }
0x1c8f   :  { %v5631_v32 = vpack.c.bf16 %v5618_v16, %v5617_v40  ;;  %6166 = vmatpush1.bf16.msra.mxu0 %v10330_v0  ;;  %v5583_v19 = vadd.f32 %v10327_v43, %v5582_v11  ;;  %v5623_v17 = vmax.f32 %v5591_v6, 0.0 }
0x1c90   :  { %v9654_v9 = vpop.f32.mrf.mxu1  ;;  %9753 = vmatprep.subr.bf16.mxu0 %v14976_v18 }
0x1c91   :  { %v5594_v20 = vadd.f32 %v10327_v43, %v9654_v9  ;;  %9671 = vmatprep.mubr.msk.bf16.mxu0 %vm1582_vm4, %v5631_v32  ;;  %v5621_v14 = vmax.f32 %v5583_v19, 0.0  ;;  %v10331_v9 = vld [vmem:[%s14874_s5 + $0xc] ss:$0 sm:$0xff] }
0x1c92   :  { %v5585_v26 = vpop.f32.mrf.mxu1  ;;  %9672 = vmatmul.mubr.msk.bf16.gmra.mxu0 %vm1582_vm4, %v5632_v63 }
0x1c93   :  { %v5586_v36 = vadd.f32 %v10327_v43, %v5585_v26  ;;  %v5624_v33 = vmax.f32 %v5594_v20, 0.0 }
0x1c94   :  { %v9657_v5 = vpop.f32.mrf.mxu1 }
0x1c95   :  { %v5622_v58 = vmax.f32 %v5586_v36, 0.0  ;;  %v5634_v34 = vpack.c.bf16 %v5624_v33, %v5623_v17  ;;  %v5607_v49 = vadd.f32 %v10327_v43, %v9657_v5 }
0x1c96   :  { %v5598_v7 = vpop.f32.mrf.mxu1 }
0x1c97   :  { %v5633_v12 = vpack.c.bf16 %v5622_v58, %v5621_v14  ;;  %v5599_v48 = vadd.f32 %v10327_v43, %v5598_v7  ;;  %v5627_v38 = vmax.f32 %v5607_v49, 0.0 }
0x1c98   :  { %v9658_v44 = vpop.f32.mrf.mxu1 }
0x1c99   :  { %v5610_v62 = vadd.f32 %v10327_v43, %v9658_v44  ;;  %9675 = vmatprep.mubr.msk.bf16.mxu0 %vm1582_vm4, %v5633_v12  ;;  %v5625_v27 = vmax.f32 %v5599_v48, 0.0 }
0x1c9a   :  { %v5601_v4 = vpop.f32.mrf.mxu1  ;;  %9676 = vmatmul.mubr.msk.bf16.gmra.mxu0 %vm1582_vm4, %v5634_v34 }
0x1c9b   :  { %v5602_v53 = vadd.f32 %v10327_v43, %v5601_v4  ;;  %v5628_v21 = vmax.f32 %v5610_v62, 0.0 }
0x1c9d   :  { %v5626_v45 = vmax.f32 %v5602_v53, 0.0  ;;  %v5636_v24 = vpack.c.bf16 %v5628_v21, %v5627_v38 }
0x1c9f   :  { %v5635_v57 = vpack.c.bf16 %v5626_v45, %v5625_v27 }
0x1ca1   :  { %9679 = vmatprep.mubr.msk.bf16.mxu0 %vm1582_vm4, %v5635_v57 }
0x1ca2   :  { %9680 = vmatmul.mubr.msk.bf16.gmra.mxu0 %vm1582_vm4, %v5636_v24 }
0x1ca3   :  { %6183 = vmatprep.mubr.bf16.mxu0 %v14979_v39 }
0x1d4a   :  { %v9669_v28 = vpop.f32.mrf.mxu0 }
0x1d4b   :  { %v5704_v57 = vadd.f32 %v10331_v9, %v9669_v28 }
0x1d4c   :  { %v5695_v35 = vpop.f32.mrf.mxu0 }
0x1d4e   :  { %v9670_v47 = vpop.f32.mrf.mxu0 }
0x1d4f   :  { %v5707_v28 = vadd.f32 %v10331_v9, %v9670_v47 }
0x1d50   :  { %v13164_v30 = vpop.f32.mrf.mxu0 }
0x1d52   :  { %v9673_v29 = vpop.f32.mrf.mxu0 }
0x1d53   :  { %v5720_v49 = vadd.f32 %v10331_v9, %v9673_v29 }
0x1d54   :  { %v5711_v40 = vpop.f32.mrf.mxu0 }
0x1d55   :  { %v13201_v21 = vadd.f32 %v5720_v49, %v13085_v3  ;;  %v5712_v27 = vadd.f32 %v10331_v9, %v5711_v40 }
0x1d56   :  { %v9674_v43 = vpop.f32.mrf.mxu0 }
0x1d57   :  { %v5723_v45 = vadd.f32 %v10331_v9, %v9674_v43  ;;  %v13211_v24 = vadd.f32 %v5712_v27, %v13072_v55  ;;  %v5792_v40 = vsel %vm221_vm1, %v13201_v21, 0.0  ;;  %v13221_v43 = vadd.f32 %v5704_v57, %v13056_v8 }
0x1d58   :  { %v5714_v16 = vpop.f32.mrf.mxu0  ;;  %v5699_v8 = vadd.f32 %v10331_v9, %v13164_v30 }
0x1d59   :  { %v13214_v3 = vadd.f32 %v5723_v45, %v13088_v2  ;;  %v5715_v29 = vadd.f32 %v10331_v9, %v5714_v16  ;;  %v5786_v16 = vsel %vm221_vm1, %v13211_v24, 0.0 }
0x1d5a   :  { %v9677_v50 = vpop.f32.mrf.mxu0  ;;  %v13242_v47 = vadd.f32 %v5699_v8, %v13049_v25 }
0x1d5b   :  { %v5736_v36 = vadd.f32 %v10331_v9, %v9677_v50  ;;  %v5696_v50 = vadd.f32 %v10331_v9, %v5695_v35  ;;  %v13224_v55 = vadd.f32 %v5715_v29, %v13075_v56  ;;  %v5795_v2 = vsel %vm221_vm1, %v13214_v3, 0.0 }
0x1d5c   :  { %v5727_v11 = vpop.f32.mrf.mxu0  ;;  %v5780_v35 = vsel %vm221_vm1, %v13221_v43, 0.0  ;;  %v5777_v30 = vsel %vm221_vm1, %v13242_v47, 0.0 }
0x1d5d   :  { %v13181_v34 = vadd.f32 %v5736_v36, %v13110_v22  ;;  %v5789_v56 = vsel %vm221_vm1, %v13224_v55, 0.0 }
0x1d5e   :  { %v9678_v32 = vpop.f32.mrf.mxu0 }
0x1d5f   :  { %v5739_v44 = vadd.f32 %v10331_v9, %v9678_v32  ;;  %v5804_v53 = vsel %vm221_vm1, %v13181_v34, 0.0  ;;  %v13234_v32 = vadd.f32 %v5707_v28, %v13059_v54 }
0x1d60   :  { %v5730_v0 = vpop.f32.mrf.mxu0 }
0x1d61   :  { %v13194_v22 = vadd.f32 %v5739_v44, %v13113_v52  ;;  %v5731_v4 = vadd.f32 %v10331_v9, %v5730_v0 }
0x1d62   :  { %v9681_v63 = vpop.f32.mrf.mxu0 }
0x1d63   :  { %v5752_v19 = vadd.f32 %v10331_v9, %v9681_v63  ;;  %v5807_v52 = vsel %vm221_vm1, %v13194_v22, 0.0 }
0x1d64   :  { %v5743_v20 = vpop.f32.mrf.mxu0 }
0x1d65   :  { %v13170_v6 = vadd.f32 %v5752_v19, %v13133_v15  ;;  %v5744_v26 = vadd.f32 %v10331_v9, %v5743_v20  ;;  %v5728_v15 = vadd.f32 %v10331_v9, %v5727_v11  ;;  %v13231_v11 = vadd.f32 %v5696_v50, %v13046_v46 }
0x1d66   :  { %v9682_v33 = vpop.f32.mrf.mxu0  ;;  %v5783_v46 = vsel %vm221_vm1, %v13234_v32, 0.0 }
0x1d67   :  { %v13173_v5 = vadd.f32 %v5744_v26, %v13124_v13  ;;  %v5755_v14 = vadd.f32 %v10331_v9, %v9682_v33  ;;  %v5816_v58 = vsel %vm221_vm1, %v13170_v6, 0.0  ;;  %v5774_v54 = vsel %vm221_vm1, %v13231_v11, 0.0 }
0x1d68   :  { %5817 = vadd.xlane.f32.xlu1 %v5816_v58  ;;  %v5746_v17 = vpop.f32.mrf.mxu0 }
0x1d69   :  { %v13178_v7 = vadd.f32 %v5755_v14, %v13136_v59  ;;  %v5747_v12 = vadd.f32 %v10331_v9, %v5746_v17  ;;  %v5810_v62 = vsel %vm221_vm1, %v13173_v5, 0.0  ;;  %v13191_v59 = vadd.f32 %v5728_v15, %v13095_v37 }
0x1d6a   :  { %v13204_v37 = vadd.f32 %v5731_v4, %v13100_v1 }
0x1d6b   :  { %v13184_v48 = vadd.f32 %v5747_v12, %v13127_v31  ;;  %v5819_v13 = vsel %vm221_vm1, %v13178_v7, 0.0  ;;  %v5798_v38 = vsel %vm221_vm1, %v13191_v59, 0.0 }
0x1d6c   :  { %5820 = vadd.xlane.f32.xlu0 %v5819_v13  ;;  %5811 = vadd.xlane.f32.xlu1 %v5810_v62  ;;  %v5801_v1 = vsel %vm221_vm1, %v13204_v37, 0.0 }
0x1d6d   :  { %v5813_v31 = vsel %vm221_vm1, %v13184_v48, 0.0 }
0x1d70   :  { %5814 = vadd.xlane.f32.xlu0 %v5813_v31  ;;  %5805 = vadd.xlane.f32.xlu1 %v5804_v53 }
0x1d74   :  { %5808 = vadd.xlane.f32.xlu0 %v5807_v52  ;;  %5799 = vadd.xlane.f32.xlu1 %v5798_v38 }
0x1d78   :  { %5802 = vadd.xlane.f32.xlu0 %v5801_v1  ;;  %5793 = vadd.xlane.f32.xlu1 %v5792_v40 }
0x1d7c   :  { %5796 = vadd.xlane.f32.xlu0 %v5795_v2  ;;  %5787 = vadd.xlane.f32.xlu1 %v5786_v16 }
0x1d80   :  { %5790 = vadd.xlane.f32.xlu0 %v5789_v56  ;;  %5781 = vadd.xlane.f32.xlu1 %v5780_v35 }
0x1d84   :  { %5784 = vadd.xlane.f32.xlu0 %v5783_v46  ;;  %5775 = vadd.xlane.f32.xlu1 %v5774_v54 }
0x1d88   :  { %5778 = vadd.xlane.f32.xlu0 %v5777_v30 }
0x1df1   :  { %v5818_v0 = vpop.xlane.xlu1 %5817 }
0x1df2   :  { %v5836_v63 = vmul.f32 0.03125, %v5818_v0 }
0x1df4   :  { %v13251_v9 = vsub.f32 %v13170_v6, %v5836_v63 }
0x1df5   :  { %v5821_v19 = vpop.xlane.xlu0 %5820  ;;  %v5812_v25 = vpop.xlane.xlu1 %5811 }
0x1df6   :  { %v5837_v20 = vmul.f32 0.03125, %v5821_v19  ;;  %v5834_v26 = vmul.f32 0.03125, %v5812_v25  ;;  %v5868_v36 = vmul.f32 %v13251_v9, %v13251_v9 }
0x1df8   :  { %v13256_v33 = vsub.f32 %v13178_v7, %v5837_v20  ;;  %v13259_v14 = vsub.f32 %v13173_v5, %v5834_v26  ;;  %v5912_v58 = vsel %vm221_vm1, %v5868_v36, 0.0 }
0x1df9   :  { %v5815_v17 = vpop.xlane.xlu0 %5814  ;;  %5913 = vadd.xlane.f32.xlu1 %v5912_v58  ;;  %v5806_v12 = vpop.xlane.xlu1 %5805 }
0x1dfa   :  { %v5835_v6 = vmul.f32 0.03125, %v5815_v17  ;;  %v5832_v15 = vmul.f32 0.03125, %v5806_v12  ;;  %v5869_v44 = vmul.f32 %v13256_v33, %v13256_v33  ;;  %v5866_v13 = vmul.f32 %v13259_v14, %v13259_v14 }
0x1dfc   :  { %v13267_v62 = vsub.f32 %v13184_v48, %v5835_v6  ;;  %v13270_v7 = vsub.f32 %v13181_v34, %v5832_v15  ;;  %v5915_v5 = vsel %vm221_vm1, %v5869_v44, 0.0  ;;  %v5906_v49 = vsel %vm221_vm1, %v5866_v13, 0.0 }
0x1dfd   :  { %5916 = vadd.xlane.f32.xlu0 %v5915_v5  ;;  %v5809_v4 = vpop.xlane.xlu0 %5808  ;;  %5907 = vadd.xlane.f32.xlu1 %v5906_v49  ;;  %v5800_v31 = vpop.xlane.xlu1 %5799 }
0x1dfe   :  { %v5833_v53 = vmul.f32 0.03125, %v5809_v4  ;;  %v5830_v27 = vmul.f32 0.03125, %v5800_v31  ;;  %v5867_v45 = vmul.f32 %v13267_v62, %v13267_v62  ;;  %v5864_v48 = vmul.f32 %v13270_v7, %v13270_v7 }
0x1e00   :  { %v13279_v52 = vsub.f32 %v13194_v22, %v5833_v53  ;;  %v13282_v34 = vsub.f32 %v13191_v59, %v5830_v27  ;;  %v5909_v38 = vsel %vm221_vm1, %v5867_v45, 0.0  ;;  %v5900_v57 = vsel %vm221_vm1, %v5864_v48, 0.0 }
0x1e01   :  { %5910 = vadd.xlane.f32.xlu0 %v5909_v38  ;;  %v5803_v29 = vpop.xlane.xlu0 %5802  ;;  %5901 = vadd.xlane.f32.xlu1 %v5900_v57  ;;  %v5794_v1 = vpop.xlane.xlu1 %5793 }
0x1e02   :  { %v5831_v40 = vmul.f32 0.03125, %v5803_v29  ;;  %v5828_v50 = vmul.f32 0.03125, %v5794_v1  ;;  %v5865_v28 = vmul.f32 %v13279_v52, %v13279_v52  ;;  %v5862_v22 = vmul.f32 %v13282_v34, %v13282_v34 }
0x1e04   :  { %v13291_v2 = vsub.f32 %v13204_v37, %v5831_v40  ;;  %v13294_v59 = vsub.f32 %v13201_v21, %v5828_v50  ;;  %v5903_v16 = vsel %vm221_vm1, %v5865_v28, 0.0  ;;  %v5894_v8 = vsel %vm221_vm1, %v5862_v22, 0.0 }
0x1e05   :  { %5904 = vadd.xlane.f32.xlu0 %v5903_v16  ;;  %v5797_v56 = vpop.xlane.xlu0 %5796  ;;  %5895 = vadd.xlane.f32.xlu1 %v5894_v8  ;;  %v5788_v35 = vpop.xlane.xlu1 %5787 }
0x1e06   :  { %v5829_v46 = vmul.f32 0.03125, %v5797_v56  ;;  %v5826_v54 = vmul.f32 0.03125, %v5788_v35  ;;  %v5863_v30 = vmul.f32 %v13291_v2, %v13291_v2  ;;  %v5860_v37 = vmul.f32 %v13294_v59, %v13294_v59 }
0x1e08   :  { %v13303_v0 = vsub.f32 %v13214_v3, %v5829_v46  ;;  %v13306_v21 = vsub.f32 %v13211_v24, %v5826_v54  ;;  %v5897_v63 = vsel %vm221_vm1, %v5863_v30, 0.0  ;;  %v5888_v19 = vsel %vm221_vm1, %v5860_v37, 0.0 }
0x1e09   :  { %5898 = vadd.xlane.f32.xlu0 %v5897_v63  ;;  %v5791_v25 = vpop.xlane.xlu0 %5790  ;;  %5889 = vadd.xlane.f32.xlu1 %v5888_v19  ;;  %v5782_v20 = vpop.xlane.xlu1 %5781 }
0x1e0a   :  { %v5827_v26 = vmul.f32 0.03125, %v5791_v25  ;;  %v5824_v36 = vmul.f32 0.03125, %v5782_v20  ;;  %v5861_v58 = vmul.f32 %v13303_v0, %v13303_v0  ;;  %v5858_v3 = vmul.f32 %v13306_v21, %v13306_v21 }
0x1e0c   :  { %v13315_v17 = vsub.f32 %v13224_v55, %v5827_v26  ;;  %v13318_v24 = vsub.f32 %v13221_v43, %v5824_v36  ;;  %v5891_v12 = vsel %vm221_vm1, %v5861_v58, 0.0  ;;  %v5882_v6 = vsel %vm221_vm1, %v5858_v3, 0.0 }
0x1e0d   :  { %5892 = vadd.xlane.f32.xlu0 %v5891_v12  ;;  %v5785_v15 = vpop.xlane.xlu0 %5784  ;;  %5883 = vadd.xlane.f32.xlu1 %v5882_v6  ;;  %v5776_v44 = vpop.xlane.xlu1 %5775 }
0x1e0e   :  { %v5825_v13 = vmul.f32 0.03125, %v5785_v15  ;;  %v5822_v5 = vmul.f32 0.03125, %v5776_v44  ;;  %v5859_v49 = vmul.f32 %v13315_v17, %v13315_v17  ;;  %v5856_v55 = vmul.f32 %v13318_v24, %v13318_v24 }
0x1e10   :  { %v13327_v4 = vsub.f32 %v13234_v32, %v5825_v13  ;;  %v13330_v43 = vsub.f32 %v13231_v11, %v5822_v5  ;;  %v5885_v31 = vsel %vm221_vm1, %v5859_v49, 0.0  ;;  %v5876_v53 = vsel %vm221_vm1, %v5856_v55, 0.0 }
0x1e11   :  { %5886 = vadd.xlane.f32.xlu0 %v5885_v31  ;;  %v5779_v27 = vpop.xlane.xlu0 %5778  ;;  %5877 = vadd.xlane.f32.xlu1 %v5876_v53 }
0x1e12   :  { %v5823_v45 = vmul.f32 0.03125, %v5779_v27  ;;  %v5857_v48 = vmul.f32 %v13327_v4, %v13327_v4  ;;  %v5854_v38 = vmul.f32 %v13330_v43, %v13330_v43 }
0x1e14   :  { %v13339_v32 = vsub.f32 %v13242_v47, %v5823_v45  ;;  %v5879_v11 = vsel %vm221_vm1, %v5857_v48, 0.0  ;;  %v5870_v57 = vsel %vm221_vm1, %v5854_v38, 0.0  ;;  %v13350_v38 = vld [vmem:[%s14874_s5 + $0x13] ss:$0 sm:$0xff] }
0x1e15   :  { %5880 = vadd.xlane.f32.xlu0 %v5879_v11  ;;  %5871 = vadd.xlane.f32.xlu1 %v5870_v57 }
0x1e16   :  { %v5855_v29 = vmul.f32 %v13339_v32, %v13339_v32 }
0x1e18   :  { %v5873_v1 = vsel %vm221_vm1, %v5855_v29, 0.0 }
0x1e19   :  { %5874 = vadd.xlane.f32.xlu0 %v5873_v1 }
0x1e82   :  { %v5914_v40 = vpop.xlane.xlu1 %5913 }
0x1e83   :  { %v5932_v50 = vmul.f32 0.03125, %v5914_v40 }
0x1e85   :  { %v5948_v28 = vadd.f32 1e-05, %v5932_v50 }
0x1e86   :  { %v5917_v22 = vpop.xlane.xlu0 %5916  ;;  %v5908_v16 = vpop.xlane.xlu1 %5907 }
0x1e87   :  { %10116 = vrsqrt.f32 %v5948_v28  ;;  %v5933_v47 = vmul.f32 0.03125, %v5917_v22  ;;  %v5930_v8 = vmul.f32 0.03125, %v5908_v16 }
0x1e89   :  { %v5949_v56 = vadd.f32 1e-05, %v5933_v47  ;;  %v5946_v35 = vadd.f32 1e-05, %v5930_v8 }
0x1e8a   :  { %v5911_v46 = vpop.xlane.xlu0 %5910  ;;  %v5902_v54 = vpop.xlane.xlu1 %5901 }
0x1e8b   :  { %10118 = vrsqrt.f32 %v5949_v56  ;;  %v5931_v30 = vmul.f32 0.03125, %v5911_v46  ;;  %v5928_v37 = vmul.f32 0.03125, %v5902_v54  ;;  %v13359_v56 = vld [vmem:[%s14874_s5 + $0x14] ss:$0 sm:$0xff] }
0x1e8c   :  { %10120 = vrsqrt.f32 %v5946_v35 }
0x1e8d   :  { %v5947_v63 = vadd.f32 1e-05, %v5931_v30  ;;  %v5944_v19 = vadd.f32 1e-05, %v5928_v37 }
0x1e8e   :  { %v5905_v25 = vpop.xlane.xlu0 %5904  ;;  %v5896_v20 = vpop.xlane.xlu1 %5895 }
0x1e8f   :  { %10122 = vrsqrt.f32 %v5947_v63  ;;  %v5929_v26 = vmul.f32 0.03125, %v5905_v25  ;;  %v5926_v36 = vmul.f32 0.03125, %v5896_v20 }
0x1e90   :  { %10124 = vrsqrt.f32 %v5944_v19 }
0x1e91   :  { %v5945_v58 = vadd.f32 1e-05, %v5929_v26  ;;  %v5942_v3 = vadd.f32 1e-05, %v5926_v36 }
0x1e92   :  { %v5899_v12 = vpop.xlane.xlu0 %5898  ;;  %v5890_v6 = vpop.xlane.xlu1 %5889 }
0x1e93   :  { %10126 = vrsqrt.f32 %v5945_v58  ;;  %v5927_v15 = vmul.f32 0.03125, %v5899_v12  ;;  %v5924_v44 = vmul.f32 0.03125, %v5890_v6 }
0x1e94   :  { %v10117_v13 = vpop.eup %10116  ;;  %10128 = vrsqrt.f32 %v5942_v3 }
0x1e95   :  { %v5943_v5 = vadd.f32 1e-05, %v5927_v15  ;;  %v5940_v49 = vadd.f32 1e-05, %v5924_v44  ;;  %v5980_v55 = vmul.f32 %v10117_v13, %v13251_v9 }
0x1e96   :  { %v5893_v31 = vpop.xlane.xlu0 %5892  ;;  %v5884_v53 = vpop.xlane.xlu1 %5883 }
0x1e97   :  { %10130 = vrsqrt.f32 %v5943_v5  ;;  %v5925_v27 = vmul.f32 0.03125, %v5893_v31  ;;  %v5922_v45 = vmul.f32 0.03125, %v5884_v53  ;;  %v5996_v11 = vmul.f32 %v13350_v38, %v5980_v55 }
0x1e98   :  { %v10119_v48 = vpop.eup %10118  ;;  %10132 = vrsqrt.f32 %v5940_v49 }
0x1e99   :  { %v10121_v57 = vpop.eup %10120  ;;  %v5941_v29 = vadd.f32 1e-05, %v5925_v27  ;;  %v5938_v1 = vadd.f32 1e-05, %v5922_v45  ;;  %v5981_v40 = vmul.f32 %v10119_v48, %v13256_v33  ;;  %v13362_v35 = vadd.f32 %v13359_v56, %v5996_v11 }
0x1e9a   :  { %v5887_v9 = vpop.xlane.xlu0 %5886  ;;  %v5878_v50 = vpop.xlane.xlu1 %5877  ;;  %v5978_v28 = vmul.f32 %v10121_v57, %v13259_v14 }
0x1e9b   :  { %10134 = vrsqrt.f32 %v5941_v29  ;;  %v5923_v22 = vmul.f32 0.03125, %v5887_v9  ;;  %v5920_v16 = vmul.f32 0.03125, %v5878_v50  ;;  %v5997_v47 = vmul.f32 %v13350_v38, %v5981_v40  ;;  %15071 = vst [vmem:[#allocation30_spill] sm:$0xff] %v13362_v35 }
0x1e9c   :  { %v10123_v8 = vpop.eup %10122  ;;  %10136 = vrsqrt.f32 %v5938_v1  ;;  %v5994_v19 = vmul.f32 %v13350_v38, %v5978_v28 }
0x1e9d   :  { %v10125_v33 = vpop.eup %10124  ;;  %v5939_v46 = vadd.f32 1e-05, %v5923_v22  ;;  %v5936_v54 = vadd.f32 1e-05, %v5920_v16  ;;  %v13365_v14 = vadd.f32 %v13359_v56, %v5997_v47  ;;  %v5979_v30 = vmul.f32 %v10123_v8, %v13267_v62 }
0x1e9e   :  { %v5881_v37 = vpop.xlane.xlu0 %5880  ;;  %v5872_v63 = vpop.xlane.xlu1 %5871  ;;  %v5976_v25 = vmul.f32 %v10125_v33, %v13270_v7  ;;  %v13380_v13 = vadd.f32 %v13359_v56, %v5994_v19 }
0x1e9f   :  { %15072 = vst [vmem:[#allocation39_spill] sm:$0xff] %v13365_v14  ;;  %10138 = vrsqrt.f32 %v5939_v46  ;;  %v5921_v20 = vmul.f32 0.03125, %v5881_v37  ;;  %v5918_v26 = vmul.f32 0.03125, %v5872_v63  ;;  %v13372_v36 = vpack.c.bf16 %v13365_v14, %v13362_v35 }
0x1ea0   :  { %v10127_v58 = vpop.eup %10126  ;;  %10140 = vrsqrt.f32 %v5936_v54  ;;  %v5995_v3 = vmul.f32 %v13350_v38, %v5979_v30  ;;  %v5992_v12 = vmul.f32 %v13350_v38, %v5976_v25  ;;  %15074 = vst [vmem:[#allocation40_spill] sm:$0xff] %v13380_v13 }
0x1ea1   :  { %15073 = vst [vmem:[#allocation41_spill] sm:$0xff] %v13372_v36  ;;  %v10129_v62 = vpop.eup %10128  ;;  %v5937_v6 = vadd.f32 1e-05, %v5921_v20  ;;  %v5934_v15 = vadd.f32 1e-05, %v5918_v26  ;;  %9683 = vmatprep.subr.bf16.mxu1 %v13372_v36  ;;  %v5977_v7 = vmul.f32 %v10127_v58, %v13279_v52 }
0x1ea2   :  { %v5875_v44 = vpop.xlane.xlu0 %5874  ;;  %9684 = vmatpush3.bf16.msra.mxu1 %v13372_v36  ;;  %v13383_v5 = vadd.f32 %v13359_v56, %v5995_v3  ;;  %v5974_v49 = vmul.f32 %v10129_v62, %v13282_v34  ;;  %v13392_v27 = vadd.f32 %v13359_v56, %v5992_v12 }
0x1ea3   :  { %10142 = vrsqrt.f32 %v5937_v6  ;;  %v5919_v55 = vmul.f32 0.03125, %v5875_v44  ;;  %v5993_v31 = vmul.f32 %v13350_v38, %v5977_v7 }
0x1ea4   :  { %15075 = vst [vmem:[#allocation43_spill] sm:$0xff] %v13383_v5  ;;  %v10131_v53 = vpop.eup %10130  ;;  %10144 = vrsqrt.f32 %v5934_v15  ;;  %v13389_v52 = vpack.c.bf16 %v13383_v5, %v13380_v13  ;;  %15077 = vst [vmem:[#allocation45_spill] sm:$0xff] %v13392_v27  ;;  %v5990_v57 = vmul.f32 %v13350_v38, %v5974_v49 }
0x1ea5   :  { %v10133_v45 = vpop.eup %10132  ;;  %v5935_v48 = vadd.f32 1e-05, %v5919_v55  ;;  %v13395_v11 = vadd.f32 %v13359_v56, %v5993_v31  ;;  %v5975_v34 = vmul.f32 %v10131_v53, %v13291_v2  ;;  %v10335_v53 = vld [vmem:[#allocation7 + $0x8] sm:$0xff]  }
0x1ea6   :  { %15076 = vst [vmem:[#allocation42_spill] sm:$0xff] %v13389_v52  ;;  %9685 = vmatprep.subr.bf16.mxu1 %v13389_v52  ;;  %v5972_v29 = vmul.f32 %v10133_v45, %v13294_v59  ;;  %v13409_v2 = vadd.f32 %v13359_v56, %v5990_v57  ;;  %v10336_v45 = vld [vmem:[#allocation7 + $0x10] sm:$0xff]   ;;  %v10339_v57 = vld [vmem:[#allocation7 + $0x20] sm:$0xff]  }
0x1ea7   :  { %15078 = vst [vmem:[#allocation44_spill] sm:$0xff] %v13395_v11  ;;  %10146 = vrsqrt.f32 %v5935_v48  ;;  %9686 = vmatpush3.bf16.msra.mxu1 %v13389_v52  ;;  %v13404_v1 = vpack.c.bf16 %v13395_v11, %v13392_v27  ;;  %v5991_v40 = vmul.f32 %v13350_v38, %v5975_v34  ;;  %v15095_v48 = vld [vmem:[#allocation29_spill] sm:$0xff] }
0x1ea8   :  { %v10135_v9 = vpop.eup %10134  ;;  %15080 = vst [vmem:[#allocation46_spill] sm:$0xff] %v13409_v2  ;;  %v5988_v22 = vmul.f32 %v13350_v38, %v5972_v29  ;;  %v10338_v34 = vld [vmem:[#allocation7 + $0x18] sm:$0xff]   ;;  %v10340_v29 = vld [vmem:[#allocation7 + $0x28] sm:$0xff]  }
0x1ea9   :  { %15079 = vst [vmem:[#allocation47_spill] sm:$0xff] %v13404_v1  ;;  %v10137_v50 = vpop.eup %10136  ;;  %9687 = vmatprep.subr.bf16.mxu1 %v13404_v1  ;;  %v13412_v28 = vadd.f32 %v13359_v56, %v5991_v40  ;;  %v5973_v59 = vmul.f32 %v10135_v9, %v13303_v0  ;;  %v10341_v40 = vld [vmem:[#allocation7 + $0x30] sm:$0xff]   ;;  %v10342_v9 = vld [vmem:[#allocation7 + $0x38] sm:$0xff]  }
0x1eaa   :  { %v5970_v16 = vmul.f32 %v10137_v50, %v13306_v21  ;;  %v13425_v54 = vadd.f32 %v13359_v56, %v5988_v22 }
0x1eab   :  { %15081 = vst [vmem:[#allocation49_spill] sm:$0xff] %v13412_v28  ;;  %9688 = vmatpush3.bf16.msra.mxu1 %v13404_v1  ;;  %v13420_v47 = vpack.c.bf16 %v13412_v28, %v13409_v2  ;;  %v5989_v8 = vmul.f32 %v13350_v38, %v5973_v59 }
0x1eac   :  { %v10139_v33 = vpop.eup %10138  ;;  %15083 = vst [vmem:[#allocation50_spill] sm:$0xff] %v13425_v54  ;;  %v5986_v30 = vmul.f32 %v13350_v38, %v5970_v16 }
0x1ead   :  { %15082 = vst [vmem:[#allocation48_spill] sm:$0xff] %v13420_v47  ;;  %v10141_v46 = vpop.eup %10140  ;;  %9689 = vmatprep.subr.bf16.mxu1 %v13420_v47  ;;  %v13428_v0 = vadd.f32 %v13359_v56, %v5989_v8  ;;  %v5971_v21 = vmul.f32 %v10139_v33, %v13315_v17 }
0x1eae   :  { %v5968_v37 = vmul.f32 %v10141_v46, %v13318_v24  ;;  %v13441_v26 = vadd.f32 %v13359_v56, %v5986_v30  ;;  %v10343_v46 = vld [vmem:[%s14871_s2 + $0x5c] ss:$36 sps:$4 sm:$0xff]   ;;  %v10344_v30 = vld [vmem:[%s14871_s2 + $0x14] ss:$36 sps:$4 sm:$0xff]  }
0x1eaf   :  { %15084 = vst [vmem:[#allocation38_spill] sm:$0xff] %v13428_v0  ;;  %9690 = vmatpush3.bf16.msra.mxu1 %v13420_v47  ;;  %v13436_v63 = vpack.c.bf16 %v13428_v0, %v13425_v54  ;;  %v5987_v19 = vmul.f32 %v13350_v38, %v5971_v21 }
0x1eb0   :  { %v10143_v25 = vpop.eup %10142  ;;  %15086 = vst [vmem:[#allocation32_spill] sm:$0xff] %v13441_v26  ;;  %v5984_v58 = vmul.f32 %v13350_v38, %v5968_v37 }
0x1eb1   :  { %15085 = vst [vmem:[#allocation35_spill] sm:$0xff] %v13436_v63  ;;  %v10145_v20 = vpop.eup %10144  ;;  %9691 = vmatprep.subr.bf16.mxu1 %v13436_v63  ;;  %v13444_v17 = vadd.f32 %v13359_v56, %v5987_v19  ;;  %v5969_v24 = vmul.f32 %v10143_v25, %v13327_v4 }
0x1eb2   :  { %v5966_v3 = vmul.f32 %v10145_v20, %v13330_v43  ;;  %v13457_v15 = vadd.f32 %v13359_v56, %v5984_v58 }
0x1eb3   :  { %15087 = vst [vmem:[#allocation26_spill] sm:$0xff] %v13444_v17  ;;  %9692 = vmatpush3.bf16.msra.mxu1 %v13436_v63  ;;  %v13452_v12 = vpack.c.bf16 %v13444_v17, %v13441_v26  ;;  %v5985_v62 = vmul.f32 %v13350_v38, %v5969_v24 }
0x1eb4   :  { %v10147_v6 = vpop.eup %10146  ;;  %15089 = vst [vmem:[#allocation20_spill] sm:$0xff] %v13457_v15  ;;  %v5982_v43 = vmul.f32 %v13350_v38, %v5966_v3 }
0x1eb5   :  { %15088 = vst [vmem:[#allocation25_spill] sm:$0xff] %v13452_v12  ;;  %9693 = vmatprep.subr.bf16.mxu1 %v13452_v12  ;;  %v13460_v4 = vadd.f32 %v13359_v56, %v5985_v62  ;;  %v5967_v7 = vmul.f32 %v10147_v6, %v13339_v32 }
0x1eb6   :  { %v13472_v55 = vadd.f32 %v13359_v56, %v5982_v43 }
0x1eb7   :  { %15090 = vst [vmem:[#allocation19_spill] sm:$0xff] %v13460_v4  ;;  %9694 = vmatpush3.bf16.msra.mxu1 %v13452_v12  ;;  %v13467_v44 = vpack.c.bf16 %v13460_v4, %v13457_v15  ;;  %v5983_v49 = vmul.f32 %v13350_v38, %v5967_v7  ;;  %v10334_v38 = vld [vmem:[%s14871_s2 + $0x68] ss:$36 sps:$4 sm:$0xff]  }
0x1eb8   :  { %15092 = vst [vmem:[#allocation36_spill] sm:$0xff] %v13472_v55 }
0x1eb9   :  { %15091 = vst [vmem:[#allocation14_spill] sm:$0xff] %v13467_v44  ;;  %9695 = vmatprep.subr.bf16.mxu1 %v13467_v44  ;;  %v13475_v31 = vadd.f32 %v13359_v56, %v5983_v49  ;;  %v10337_v56 = vld [vmem:[%s14871_s2 + $0x20] ss:$36 sps:$4 sm:$0xff]  }
0x1ebb   :  { %15093 = vst [vmem:[#allocation33_spill] sm:$0xff] %v13475_v31  ;;  %9696 = vmatpush3.bf16.msra.mxu1 %v13467_v44  ;;  %v13480_v32 = vpack.c.bf16 %v13475_v31, %v13472_v55 }
0x1ebd   :  { %15094 = vst [vmem:[#allocation37_spill] sm:$0xff] %v13480_v32  ;;  %9697 = vmatprep.subr.bf16.mxu1 %v13480_v32 }
0x1ebf   :  { %9698 = vmatpush3.bf16.msra.mxu1 %v13480_v32 }
0x1ec0   :  { %9715 = vmatprep.subr.bf16.mxu1 %v10334_v38 }
0x1ec2   :  { %9700 = vmatmul.mubr.bf16.vlgmr.msra.gmra.mxu1 %v10335_v53 }
0x1ec3   :  { %9703 = vmatprep.mubr.bf16.mxu1 %v10336_v45  ;;  %9716 = vmatpush3.bf16.msra.mxu1 %v10334_v38 }
0x1ec4   :  { %9717 = vmatprep.subr.bf16.mxu1 %v10337_v56 }
0x1ec7   :  { %9718 = vmatpush3.bf16.msra.mxu1 %v10337_v56 }
0x1ec8   :  { %9871 = vmatprep.subr.msk.bf16.mxu1 %vm1213_vm2, %v15095_v48 }
0x1eca   :  { %9704 = vmatmul.mubr.bf16.gmra.mxu1 %v10338_v34  ;;  %v10345_v34 = vld [vmem:[%s14874_s5 + $0x4] ss:$0 sm:$0xff] }
0x1ecb   :  { %9707 = vmatprep.mubr.bf16.mxu1 %v10339_v57  ;;  %v13521_v57 = vadd.f32 %v10345_v34, %v12668_v42 }
0x1ed2   :  { %9708 = vmatmul.mubr.bf16.gmra.mxu1 %v10340_v29  ;;  %v6305_v29 = vrot.slane %v13521_v57, %v15054_v51 }
0x1ed3   :  { %9711 = vmatprep.mubr.bf16.mxu1 %v10341_v40 }
0x1ed4   :  { %v6321_v40 = vrot.slane %v6305_v29, %v15054_v51 }
0x1ed6   :  { %v6399_v42 = vrot.slane %v6321_v40, %v10670_v23 }
0x1eda   :  { %9712 = vmatmul.mubr.bf16.gmra.mxu1 %v10342_v9  ;;  %v6313_v9 = vcombine.high %v6305_v29, %v6305_v29 }
0x1f82   :  { %v9701_v50 = vpop.f32.mrf.mxu1 }
0x1f84   :  { %v6056_v59 = vpop.f32.mrf.mxu1 }
0x1f86   :  { %v9702_v22 = vpop.f32.mrf.mxu1 }
0x1f87   :  { %v6120_v37 = vpack.c.bf16 %v9702_v22, %v9701_v50 }
0x1f88   :  { %v6059_v16 = vpop.f32.mrf.mxu1 }
0x1f89   :  { %v6119_v8 = vpack.c.bf16 %v6059_v16, %v6056_v59  ;;  %v13531_v59 = vld [vmem:[%s14874_s5 + $0x5] ss:$0 sm:$0xff]  ;;  %v6335_v16 = vrot.slane %v6313_v9, %v15054_v51 }
0x1f8a   :  { %v9705_v33 = vpop.f32.mrf.mxu1 }
0x1f8b   :  { %8970 = vmatmul.mubr.msk.bf16.vlgmr.msra.gmra.mxu0 %vm221_vm1, %v6119_v8 }
0x1f8c   :  { %6193 = vmatprep.mubr.bf16.mxu0 %v14979_v39  ;;  %9754 = vmatpush3.bf16.msra.mxu0 %v10343_v46  ;;  %v6072_v21 = vpop.f32.mrf.mxu1 }
0x1f8d   :  { %9755 = vmatprep.subr.bf16.mxu0 %v14976_v18 }
0x1f8e   :  { %v9706_v19 = vpop.f32.mrf.mxu1 }
0x1f8f   :  { %v6122_v3 = vpack.c.bf16 %v9706_v19, %v9705_v33  ;;  %v6298_v19 = vcombine.high %v13521_v57, %v13521_v57 }
0x1f90   :  { %9756 = vmatpush3.bf16.msra.mxu0 %v10344_v30  ;;  %v6075_v25 = vpop.f32.mrf.mxu1  ;;  %v6403_v30 = vrot.slane %v6335_v16, %v10670_v23 }
0x1f91   :  { %9761 = vmatprep.subr.bf16.mxu0 %v14976_v18  ;;  %v6121_v20 = vpack.c.bf16 %v6075_v25, %v6072_v21 }
0x1f92   :  { %v9709_v24 = vpop.f32.mrf.mxu1 }
0x1f93   :  { %8971 = vmatmul.mubr.msk.bf16.gmra.mxu0 %vm221_vm1, %v6120_v37  ;;  %v6343_v37 = vcombine.high %v6321_v40, %v6321_v40 }
0x1f94   :  { %6203 = vmatprep.mubr.bf16.mxu0 %v14979_v39  ;;  %v6088_v58 = vpop.f32.mrf.mxu1 }
0x1f96   :  { %v9710_v62 = vpop.f32.mrf.mxu1 }
0x1f97   :  { %v6124_v38 = vpack.c.bf16 %v9710_v62, %v9709_v24  ;;  %v6345_v62 = vcombine.high %v6335_v16, %v6335_v16 }
0x1f98   :  { %v6091_v6 = vpop.f32.mrf.mxu1 }
0x1f99   :  { %v6123_v7 = vpack.c.bf16 %v6091_v6, %v6088_v58  ;;  %v6312_v6 = vrot.slane %v6298_v19, %v15054_v51 }
0x1f9a   :  { %v9713_v43 = vpop.f32.mrf.mxu1 }
0x1f9b   :  { %8972 = vmatmul.mubr.msk.bf16.gmra.mxu0 %vm221_vm1, %v6121_v20 }
0x1f9c   :  { %6213 = vmatprep.mubr.bf16.mxu0 %v14979_v39  ;;  %v6104_v49 = vpop.f32.mrf.mxu1 }
0x1f9e   :  { %v9714_v53 = vpop.f32.mrf.mxu1 }
0x1f9f   :  { %v6126_v48 = vpack.c.bf16 %v9714_v53, %v9713_v43  ;;  %v6411_v53 = vrot.slane %v6345_v62, %v10670_v23 }
0x1fa0   :  { %v6107_v45 = vpop.f32.mrf.mxu1 }
0x1fa1   :  { %v6125_v56 = vpack.c.bf16 %v6107_v45, %v6104_v49  ;;  %v6328_v45 = vrot.slane %v6312_v6, %v15054_v51 }
0x1fa3   :  { %8973 = vmatmul.mubr.msk.bf16.gmra.mxu0 %vm221_vm1, %v6122_v3  ;;  %v6407_v3 = vrot.slane %v6343_v37, %v10670_v23 }
0x1fa4   :  { %6223 = vmatprep.mubr.bf16.mxu0 %v14979_v39 }
0x1fab   :  { %8974 = vmatmul.mubr.msk.bf16.gmra.mxu0 %vm221_vm1, %v6123_v7 }
0x1fac   :  { %6233 = vmatprep.mubr.bf16.mxu0 %v14979_v39 }
0x1fb3   :  { %8975 = vmatmul.mubr.msk.bf16.gmra.mxu0 %vm221_vm1, %v6124_v38 }
0x1fb4   :  { %6243 = vmatprep.mubr.bf16.mxu0 %v14979_v39 }
0x1fbb   :  { %8976 = vmatmul.mubr.msk.bf16.gmra.mxu0 %vm221_vm1, %v6125_v56  ;;  %v6314_v56 = vcombine.high %v6312_v6, %v6312_v6 }
0x1fbc   :  { %6253 = vmatprep.mubr.bf16.mxu0 %v14979_v39 }
0x1fbd   :  { %v6342_v16 = vrot.slane %v6314_v56, %v15054_v51 }
0x1fbf   :  { %v6419_v6 = vrot.slane %v6342_v16, %v10670_v23  ;;  %v6346_v5 = vcombine.high %v6342_v16, %v6342_v16 }
0x1fc3   :  { %8977 = vmatmul.mubr.msk.bf16.gmra.mxu0 %vm221_vm1, %v6126_v48 }
0x1fc4   :  { %9757 = vmatprep.mubr.msk.bf16.mxu0 %vm10480_vm0, %v14976_v18 }
0x204b   :  { %v13526_v50 = vpop.f32.mrf.mxu0 }
0x204c   :  { %v13535_v22 = vadd.f32 %v13531_v59, %v13526_v50 }
0x204d   :  { %v13539_v8 = vpop.f32.mrf.mxu0 }
0x204e   :  { %v13542_v33 = vadd.f32 %v6399_v42, %v13535_v22  ;;  %v6415_v42 = vrot.slane %v6328_v45, %v10670_v23 }
0x204f   :  { %v13544_v46 = vpop.f32.mrf.mxu0 }
0x2050   :  { %v13548_v21 = vadd.f32 %v13531_v59, %v13544_v46  ;;  %6508 = vrot.lane.b32.xlu1 %v13542_v33, %s10483_s25 }
0x2051   :  { %v13555_v25 = vpop.f32.mrf.mxu0 }
0x2052   :  { %v13558_v20 = vadd.f32 %v6403_v30, %v13548_v21 }
0x2053   :  { %v13560_v24 = vpop.f32.mrf.mxu0 }
0x2054   :  { %v13564_v58 = vadd.f32 %v13531_v59, %v13560_v24  ;;  %6510 = vrot.lane.b32.xlu0 %v13558_v20, %s10483_s25 }
0x2055   :  { %v13570_v7 = vpop.f32.mrf.mxu0 }
0x2056   :  { %v13573_v43 = vadd.f32 %v6407_v3, %v13564_v58  ;;  %v13608_v3 = vadd.f32 %v10345_v34, %v12716_v61 }
0x2057   :  { %v13575_v49 = vpop.f32.mrf.mxu0 }
0x2058   :  { %v13579_v38 = vadd.f32 %v13531_v59, %v13575_v49  ;;  %6512 = vrot.lane.b32.xlu1 %v13573_v43, %s10483_s25  ;;  %v6347_v15 = vcombine.high %v13608_v3, %v13608_v3 }
0x2059   :  { %v13585_v48 = vpop.f32.mrf.mxu0 }
0x205a   :  { %v13588_v29 = vadd.f32 %v6411_v53, %v13579_v38  ;;  %v6344_v53 = vcombine.high %v6328_v45, %v6328_v45  ;;  %v6354_v45 = vrot.slane %v13608_v3, %v15054_v51 }
0x205b   :  { %v13590_v40 = vpop.f32.mrf.mxu0 }
0x205c   :  { %v13594_v9 = vadd.f32 %v13531_v59, %v13590_v40  ;;  %6514 = vrot.lane.b32.xlu1 %v13588_v29, %s10483_s25  ;;  %v6423_v34 = vrot.slane %v6344_v53, %v10670_v23  ;;  %v6427_v53 = vrot.slane %v6346_v5, %v10670_v23  ;;  %v6370_v16 = vrot.slane %v6354_v45, %v15054_v51 }
0x205d   :  { %v13600_v30 = vpop.f32.mrf.mxu0  ;;  %v6362_v28 = vcombine.high %v6354_v45, %v6354_v45 }
0x205e   :  { %v13603_v37 = vadd.f32 %v6415_v42, %v13594_v9  ;;  %v6431_v17 = vrot.slane %v6370_v16, %v10670_v23  ;;  %v6392_v31 = vcombine.high %v6370_v16, %v6370_v16  ;;  %v6361_v16 = vrot.slane %v6347_v15, %v15054_v51 }
0x205f   :  { %v13605_v19 = vpop.f32.mrf.mxu0  ;;  %v6384_v5 = vrot.slane %v6362_v28, %v15054_v51 }
0x2060   :  { %v13612_v62 = vadd.f32 %v13531_v59, %v13605_v19  ;;  %6516 = vrot.lane.b32.xlu0 %v13603_v37, %s10483_s25  ;;  %v6439_v52 = vrot.slane %v6392_v31, %v10670_v23  ;;  %v6377_v31 = vrot.slane %v6361_v16, %v15054_v51  ;;  %v6363_v32 = vcombine.high %v6361_v16, %v6361_v16 }
0x2061   :  { %v13617_v56 = vpop.f32.mrf.mxu0  ;;  %v6435_v4 = vrot.slane %v6384_v5, %v10670_v23  ;;  %v6394_v1 = vcombine.high %v6384_v5, %v6384_v5 }
0x2062   :  { %v13620_v42 = vadd.f32 %v6419_v6, %v13612_v62 }
0x2063   :  { %v13622_v14 = vpop.f32.mrf.mxu0  ;;  %v6443_v44 = vrot.slane %v6394_v1, %v10670_v23  ;;  %v6391_v1 = vrot.slane %v6363_v32, %v15054_v51 }
0x2064   :  { %v13626_v61 = vadd.f32 %v13531_v59, %v13622_v14  ;;  %6518 = vrot.lane.b32.xlu1 %v13620_v42, %s10483_s25 }
0x2065   :  { %v13633_v35 = vpop.f32.mrf.mxu0 }
0x2066   :  { %v13636_v6 = vadd.f32 %v6423_v34, %v13626_v61 }
0x2067   :  { %v13638_v13 = vpop.f32.mrf.mxu0 }
0x2068   :  { %v13642_v11 = vadd.f32 %v13531_v59, %v13638_v13  ;;  %6520 = vrot.lane.b32.xlu0 %v13636_v6, %s10483_s25 }
0x2069   :  { %v13648_v27 = vpop.f32.mrf.mxu0 }
0x206a   :  { %v13651_v2 = vadd.f32 %v6427_v53, %v13642_v11 }
0x206b   :  { %v13653_v34 = vpop.f32.mrf.mxu0 }
0x206c   :  { %15096 = vst [vmem:[#allocation34_spill] sm:$0xff] %v13653_v34  ;;  %v13657_v0 = vadd.f32 %v13531_v59, %v13653_v34  ;;  %6522 = vrot.lane.b32.xlu1 %v13651_v2, %s10483_s25 }
0x206d   :  { %v13663_v54 = vpop.f32.mrf.mxu0 }
0x206e   :  { %15097 = vst [vmem:[#allocation28_spill] sm:$0xff] %v13663_v54  ;;  %v6484_v45 = vadd.f32 %v6431_v17, %v13657_v0 }
0x206f   :  { %v13666_v26 = vpop.f32.mrf.mxu0 }
0x2070   :  { %15098 = vst [vmem:[#allocation24_spill] sm:$0xff] %v13666_v26  ;;  %v13670_v53 = vadd.f32 %v13531_v59, %v13666_v26  ;;  %6524 = vrot.lane.b32.xlu0 %v6484_v45, %s10483_s25 }
0x2071   :  { %v13676_v55 = vpop.f32.mrf.mxu0 }
0x2072   :  { %15099 = vst [vmem:[#allocation31_spill] sm:$0xff] %v13676_v55  ;;  %v6485_v28 = vadd.f32 %v6435_v4, %v13670_v53 }
0x2073   :  { %v13679_v36 = vpop.f32.mrf.mxu0 }
0x2074   :  { %15100 = vst [vmem:[#allocation27_spill] sm:$0xff] %v13679_v36  ;;  %v13683_v17 = vadd.f32 %v13531_v59, %v13679_v36  ;;  %6526 = vrot.lane.b32.xlu1 %v6485_v28, %s10483_s25 }
0x2075   :  { %v13688_v47 = vpop.f32.mrf.mxu0 }
0x2076   :  { %15101 = vst [vmem:[#allocation23_spill] sm:$0xff] %v13688_v47  ;;  %v6486_v63 = vadd.f32 %v6439_v52, %v13683_v17 }
0x2077   :  { %v13691_v12 = vpop.f32.mrf.mxu0 }
0x2078   :  { %15102 = vst [vmem:[#allocation18_spill] sm:$0xff] %v13691_v12  ;;  %v13695_v4 = vadd.f32 %v13531_v59, %v13691_v12  ;;  %6528 = vrot.lane.b32.xlu0 %v6486_v63, %s10483_s25  ;;  %v6447_v12 = vrot.slane %v6377_v31, %v10670_v23 }
0x2079   :  { %v13700_v5 = vpop.f32.mrf.mxu0 }
0x207a   :  { %15103 = vst [vmem:[#allocation22_spill] sm:$0xff] %v13700_v5  ;;  %v6487_v15 = vadd.f32 %v6443_v44, %v13695_v4  ;;  %v6451_v5 = vrot.slane %v6391_v1, %v10670_v23 }
0x207b   :  { %v13703_v36 = vpop.f32.mrf.mxu0 }
0x207c   :  { %15104 = vst [vmem:[#allocation21_spill] sm:$0xff] %v13703_v36  ;;  %v13707_v52 = vadd.f32 %v13531_v59, %v13703_v36  ;;  %6530 = vrot.lane.b32.xlu1 %v6487_v15, %s10483_s25  ;;  %v6393_v36 = vcombine.high %v6377_v31, %v6377_v31 }
0x207d   :  { %v13712_v47 = vpop.f32.mrf.mxu0 }
0x207e   :  { %15105 = vst [vmem:[#allocation17_spill] sm:$0xff] %v13712_v47  ;;  %v6488_v16 = vadd.f32 %v6447_v12, %v13707_v52  ;;  %v6455_v51 = vrot.slane %v6393_v36, %v10670_v23  ;;  %v6280_v36 = vadd.f32 %v13535_v22, %v13521_v57 }
0x207f   :  { %v13715_v26 = vpop.f32.mrf.mxu0 }
0x2080   :  { %15106 = vst [vmem:[#allocation13_spill] sm:$0xff] %v13715_v26  ;;  %v13719_v44 = vadd.f32 %v13531_v59, %v13715_v26  ;;  %6532 = vrot.lane.b32.xlu0 %v6488_v16, %s10483_s25  ;;  %v6395_v26 = vcombine.high %v6391_v1, %v6391_v1 }
0x2081   :  { %v13723_v55 = vpop.f32.mrf.mxu0 }
0x2082   :  { %15107 = vst [vmem:[#allocation16_spill] sm:$0xff] %v13723_v55  ;;  %v6489_v34 = vadd.f32 %v6451_v5, %v13719_v44  ;;  %v6459_v55 = vrot.slane %v6395_v26, %v10670_v23 }
0x2083   :  { %v13726_v32 = vpop.f32.mrf.mxu0 }
0x2084   :  { %15108 = vst [vmem:[#allocation15_spill] sm:$0xff] %v13726_v32  ;;  %v13730_v12 = vadd.f32 %v13531_v59, %v13726_v32  ;;  %6534 = vrot.lane.b32.xlu1 %v6489_v34, %s10483_s25 }
0x2085   :  { %v13734_v47 = vpop.f32.mrf.mxu0 }
0x2086   :  { %v6490_v54 = vadd.f32 %v6455_v51, %v13730_v12 }
0x2087   :  { %v13737_v31 = vpop.f32.mrf.mxu0 }
0x2088   :  { %v13741_v5 = vadd.f32 %v13531_v59, %v13737_v31  ;;  %6536 = vrot.lane.b32.xlu0 %v6490_v54, %s10483_s25 }
0x208a   :  { %v6491_v32 = vadd.f32 %v6459_v55, %v13741_v5 }
0x208c   :  { %6972 = vrot.lane.b32.xlu0 %v13542_v33, %s10477_s17  ;;  %6538 = vrot.lane.b32.xlu1 %v6491_v32, %s10483_s25 }
0x2090   :  { %6988 = vrot.lane.b32.xlu0 %v6484_v45, %s10477_s17  ;;  %6974 = vrot.lane.b32.xlu1 %v13558_v20, %s10477_s17 }
0x2094   :  { %6976 = vrot.lane.b32.xlu0 %v13573_v43, %s10477_s17  ;;  %6990 = vrot.lane.b32.xlu1 %v6485_v28, %s10477_s17 }
0x2098   :  { %6978 = vrot.lane.b32.xlu0 %v13588_v29, %s10477_s17  ;;  %6992 = vrot.lane.b32.xlu1 %v6486_v63, %s10477_s17  ;;  %v6281_v63 = vadd.f32 %v13548_v21, %v13521_v57 }
0x209c   :  { %6980 = vrot.lane.b32.xlu0 %v13603_v37, %s10477_s17  ;;  %6994 = vrot.lane.b32.xlu1 %v6487_v15, %s10477_s17  ;;  %v6286_v15 = vadd.f32 %v13626_v61, %v13521_v57 }
0x20a0   :  { %6982 = vrot.lane.b32.xlu0 %v13620_v42, %s10477_s17  ;;  %6996 = vrot.lane.b32.xlu1 %v6488_v16, %s10477_s17  ;;  %v6284_v42 = vadd.f32 %v13594_v9, %v13521_v57 }
0x20a4   :  { %6984 = vrot.lane.b32.xlu0 %v13636_v6, %s10477_s17  ;;  %6998 = vrot.lane.b32.xlu1 %v6489_v34, %s10477_s17  ;;  %v6285_v6 = vadd.f32 %v13612_v62, %v13521_v57 }
0x20a8   :  { %6986 = vrot.lane.b32.xlu0 %v13651_v2, %s10477_s17  ;;  %7000 = vrot.lane.b32.xlu1 %v6490_v54, %s10477_s17  ;;  %v6282_v2 = vadd.f32 %v13564_v58, %v13521_v57  ;;  %v6283_v54 = vadd.f32 %v13579_v38, %v13521_v57 }
0x20ac   :  { %7002 = vrot.lane.b32.xlu1 %v6491_v32, %s10477_s17 }
0x20c2   :  { %v6509_v51 = vpop.permute.xlu1 %6508 }
0x20c3   :  { %v6556_v55 = vmul.f32 %v6509_v51, %v6280_v36  ;;  %v6288_v51 = vadd.f32 %v13657_v0, %v13608_v3  ;;  %v6289_v36 = vadd.f32 %v13670_v53, %v13608_v3 }
0x20c6   :  { %v6511_v26 = vpop.permute.xlu0 %6510 }
0x20c7   :  { %v6557_v59 = vmul.f32 %v6511_v26, %v6281_v63 }
0x20c9   :  { %v6572_v33 = vpack.c.bf16 %v6557_v59, %v6556_v55  ;;  %v6291_v59 = vadd.f32 %v13695_v4, %v13608_v3 }
0x20ca   :  { %v6513_v20 = vpop.permute.xlu1 %6512 }
0x20cb   :  { %9719 = vmatprep.mubr.msk.bf16.mxu1 %vm221_vm1, %v6572_v33  ;;  %v6558_v29 = vmul.f32 %v6513_v20, %v6282_v2 }
0x20ce   :  { %v6515_v43 = vpop.permute.xlu1 %6514 }
0x20cf   :  { %v6559_v37 = vmul.f32 %v6515_v43, %v6283_v54  ;;  %v6292_v54 = vadd.f32 %v13707_v52, %v13608_v3  ;;  %v6293_v43 = vadd.f32 %v13719_v44, %v13608_v3 }
0x20d1   :  { %v6573_v22 = vpack.c.bf16 %v6559_v37, %v6558_v29 }
0x20d2   :  { %v6517_v21 = vpop.permute.xlu0 %6516 }
0x20d3   :  { %9720 = vmatmul.mubr.msk.bf16.vlgmr.msra.gmra.mxu1 %vm221_vm1, %v6573_v22  ;;  %v6560_v34 = vmul.f32 %v6517_v21, %v6284_v42  ;;  %v6294_v21 = vadd.f32 %v13730_v12, %v13608_v3  ;;  %v6295_v42 = vadd.f32 %v13741_v5, %v13608_v3 }
0x20d4   :  { %9736 = vmatpush3.bf16.msra.mxu1 %v15033_v10  ;;  %v6287_v10 = vadd.f32 %v13642_v11, %v13521_v57  ;;  %v6290_v57 = vadd.f32 %v13683_v17, %v13608_v3 }
0x20d5   :  { %9769 = vmatprep.subr.bf16.mxu1 %v14976_v18 }
0x20d6   :  { %v6519_v58 = vpop.permute.xlu1 %6518 }
0x20d7   :  { %v6561_v38 = vmul.f32 %v6519_v58, %v6285_v6 }
0x20d9   :  { %v6574_v45 = vpack.c.bf16 %v6561_v38, %v6560_v34 }
0x20da   :  { %v6521_v28 = vpop.permute.xlu0 %6520 }
0x20db   :  { %9723 = vmatprep.mubr.msk.bf16.mxu1 %vm221_vm1, %v6574_v45  ;;  %v6562_v9 = vmul.f32 %v6521_v28, %v6286_v15 }
0x20de   :  { %v6523_v1 = vpop.permute.xlu1 %6522 }
0x20df   :  { %v6563_v16 = vmul.f32 %v6523_v1, %v6287_v10 }
0x20e1   :  { %v6575_v32 = vpack.c.bf16 %v6563_v16, %v6562_v9 }
0x20e2   :  { %v6525_v62 = vpop.permute.xlu0 %6524 }
0x20e3   :  { %9724 = vmatmul.mubr.msk.bf16.gmra.mxu1 %vm221_vm1, %v6575_v32  ;;  %v6564_v26 = vmul.f32 %v6525_v62, %v6288_v51 }
0x20e6   :  { %v6527_v63 = vpop.permute.xlu1 %6526 }
0x20e7   :  { %v6565_v55 = vmul.f32 %v6527_v63, %v6289_v36 }
0x20e9   :  { %v6576_v61 = vpack.c.bf16 %v6565_v55, %v6564_v26 }
0x20ea   :  { %v6529_v11 = vpop.permute.xlu0 %6528 }
0x20eb   :  { %9727 = vmatprep.mubr.msk.bf16.mxu1 %vm221_vm1, %v6576_v61  ;;  %v6566_v20 = vmul.f32 %v6529_v11, %v6290_v57 }
0x20ee   :  { %v6531_v33 = vpop.permute.xlu1 %6530 }
0x20ef   :  { %v6567_v2 = vmul.f32 %v6531_v33, %v6291_v59 }
0x20f1   :  { %v6577_v0 = vpack.c.bf16 %v6567_v2, %v6566_v20 }
0x20f2   :  { %v6533_v53 = vpop.permute.xlu0 %6532 }
0x20f3   :  { %9728 = vmatmul.mubr.msk.bf16.gmra.mxu1 %vm221_vm1, %v6577_v0  ;;  %v6568_v37 = vmul.f32 %v6533_v53, %v6292_v54 }
0x20f6   :  { %v6535_v29 = vpop.permute.xlu1 %6534 }
0x20f7   :  { %v6569_v22 = vmul.f32 %v6535_v29, %v6293_v43 }
0x20f9   :  { %v6578_v17 = vpack.c.bf16 %v6569_v22, %v6568_v37 }
0x20fa   :  { %v6537_v4 = vpop.permute.xlu0 %6536 }
0x20fb   :  { %9731 = vmatprep.mubr.msk.bf16.mxu1 %vm221_vm1, %v6578_v17  ;;  %v6570_v58 = vmul.f32 %v6537_v4, %v6294_v21 }
0x20fe   :  { %v6539_v6 = vpop.permute.xlu1 %6538 }
0x20ff   :  { %v6571_v34 = vmul.f32 %v6539_v6, %v6295_v42 }
0x2101   :  { %v6579_v52 = vpack.c.bf16 %v6571_v34, %v6570_v58 }
0x2103   :  { %9732 = vmatmul.mubr.msk.bf16.gmra.mxu1 %vm221_vm1, %v6579_v52 }
0x2193   :  { %v9721_v44 = vpop.f32.mrf.mxu1 }
0x2194   :  { %v6703_v1 = vmul.f32 0.35355338, %v9721_v44 }
0x2195   :  { %v6638_v38 = vpop.f32.mrf.mxu1 }
0x2196   :  { %v6701_v15 = vmul.f32 0.35355338, %v6638_v38  ;;  %v6719_v5 = vsel %vm1053_vm3, %v6703_v1, -inf }
0x2197   :  { %v9722_v45 = vpop.f32.mrf.mxu1 }
0x2198   :  { %v6704_v16 = vmul.f32 0.35355338, %v9722_v45  ;;  %v6717_v12 = vsel %vm1053_vm3, %v6701_v15, -inf }
0x2199   :  { %v6641_v28 = vpop.f32.mrf.mxu1  ;;  %v6720_v63 = vmax.f32 %v6717_v12, %v6719_v5 }
0x219a   :  { %v6702_v9 = vmul.f32 0.35355338, %v6641_v28  ;;  %v6721_v26 = vsel %vm1053_vm3, %v6704_v16, -inf }
0x219c   :  { %v6718_v51 = vsel %vm1053_vm3, %v6702_v9, -inf }
0x219d   :  { %v6722_v59 = vmax.f32 %v6718_v51, %v6721_v26 }
0x21a3   :  { %v9725_v10 = vpop.f32.mrf.mxu1 }
0x21a4   :  { %v6707_v61 = vmul.f32 0.35355338, %v9725_v10 }
0x21a5   :  { %v6654_v32 = vpop.f32.mrf.mxu1 }
0x21a6   :  { %v6705_v62 = vmul.f32 0.35355338, %v6654_v32  ;;  %v6727_v0 = vsel %vm1053_vm3, %v6707_v61, -inf }
0x21a7   :  { %v9726_v3 = vpop.f32.mrf.mxu1 }
0x21a8   :  { %v6723_v36 = vsel %vm1053_vm3, %v6705_v62, -inf  ;;  %v6708_v11 = vmul.f32 0.35355338, %v9726_v3 }
0x21a9   :  { %v6657_v55 = vpop.f32.mrf.mxu1  ;;  %v6724_v33 = vmax.f32 %v6720_v63, %v6723_v36 }
0x21aa   :  { %v6706_v57 = vmul.f32 0.35355338, %v6657_v55  ;;  %v6729_v53 = vsel %vm1053_vm3, %v6708_v11, -inf }
0x21ab   :  { %v6728_v54 = vmax.f32 %v6724_v33, %v6727_v0 }
0x21ac   :  { %v6725_v20 = vsel %vm1053_vm3, %v6706_v57, -inf }
0x21ad   :  { %v6726_v2 = vmax.f32 %v6722_v59, %v6725_v20 }
0x21af   :  { %v6730_v43 = vmax.f32 %v6726_v2, %v6729_v53 }
0x21b1   :  { %v6731_v29 = vmax.f32 %v6728_v54, %v6730_v43 }
0x21b3   :  { %v6747_v37 = vsub.f32 %v6701_v15, %v6731_v29  ;;  %v6748_v22 = vsub.f32 %v6702_v9, %v6731_v29  ;;  %v6749_v17 = vsub.f32 %v6703_v1, %v6731_v29  ;;  %v6750_v4 = vsub.f32 %v6704_v16, %v6731_v29  ;;  %v9729_v34 = vpop.f32.mrf.mxu1 }
0x21b4   :  { %v6751_v21 = vsub.f32 %v6705_v62, %v6731_v29  ;;  %v6752_v52 = vsub.f32 %v6706_v57, %v6731_v29  ;;  %v6753_v38 = vsub.f32 %v6707_v61, %v6731_v29  ;;  %v6754_v10 = vsub.f32 %v6708_v11, %v6731_v29 }
0x21b5   :  { %v6763_v42 = vmul.f32 1.442695, %v6747_v37  ;;  %v6765_v6 = vmul.f32 1.442695, %v6748_v22  ;;  %v6767_v58 = vmul.f32 1.442695, %v6749_v17  ;;  %v6670_v28 = vpop.f32.mrf.mxu1 }
0x21b6   :  { %v6769_v44 = vmul.f32 1.442695, %v6750_v4  ;;  %v6771_v45 = vmul.f32 1.442695, %v6751_v21  ;;  %v6773_v32 = vmul.f32 1.442695, %v6752_v52 }
0x21b7   :  { %10148 = vpow2.f32 %v6763_v42  ;;  %v6775_v15 = vmul.f32 1.442695, %v6753_v38  ;;  %v9730_v1 = vpop.f32.mrf.mxu1  ;;  %v6777_v9 = vmul.f32 1.442695, %v6754_v10  ;;  %v6709_v12 = vmul.f32 0.35355338, %v6670_v28 }
0x21b8   :  { %10150 = vpow2.f32 %v6765_v6  ;;  %v6711_v5 = vmul.f32 0.35355338, %v9729_v34  ;;  %v6712_v57 = vmul.f32 0.35355338, %v9730_v1 }
0x21b9   :  { %10152 = vpow2.f32 %v6767_v58  ;;  %v6673_v16 = vpop.f32.mrf.mxu1  ;;  %v6732_v11 = vsel %vm1053_vm3, %v6709_v12, -inf }
0x21ba   :  { %10154 = vpow2.f32 %v6769_v44  ;;  %v6710_v51 = vmul.f32 0.35355338, %v6673_v16  ;;  %v6734_v53 = vsel %vm1053_vm3, %v6711_v5, -inf  ;;  %v6736_v42 = vsel %vm1053_vm3, %v6712_v57, -inf }
0x21bb   :  { %10156 = vpow2.f32 %v6771_v45  ;;  %v6735_v22 = vmax.f32 %v6732_v11, %v6734_v53 }
0x21bc   :  { %10158 = vpow2.f32 %v6773_v32  ;;  %v6733_v54 = vsel %vm1053_vm3, %v6710_v51, -inf }
0x21bd   :  { %10160 = vpow2.f32 %v6775_v15  ;;  %v6737_v44 = vmax.f32 %v6733_v54, %v6736_v42 }
0x21be   :  { %10162 = vpow2.f32 %v6777_v9 }
0x21c3   :  { %v9733_v62 = vpop.f32.mrf.mxu1 }
0x21c4   :  { %v13821_v3 = vpop.eup %10148  ;;  %v6715_v17 = vmul.f32 0.35355338, %v9733_v62 }
0x21c5   :  { %v13823_v36 = vpop.eup %10150  ;;  %v6795_v63 = vsel %vm1053_vm3, %v13821_v3, 0.0  ;;  %v6686_v26 = vpop.f32.mrf.mxu1 }
0x21c6   :  { %v13827_v55 = vpop.eup %10152  ;;  %v6796_v61 = vsel %vm1053_vm3, %v13823_v36, 0.0  ;;  %v6713_v59 = vmul.f32 0.35355338, %v6686_v26  ;;  %v6742_v9 = vsel %vm1053_vm3, %v6715_v17, -inf }
0x21c7   :  { %v13832_v33 = vpop.eup %10154  ;;  %v6797_v20 = vadd.f32 %v6796_v61, %v6795_v63  ;;  %v9734_v2 = vpop.f32.mrf.mxu1  ;;  %v6798_v0 = vsel %vm1053_vm3, %v13827_v55, 0.0 }
0x21c8   :  { %v6738_v43 = vsel %vm1053_vm3, %v6713_v59, -inf  ;;  %v10157_v29 = vpop.eup %10156  ;;  %v6800_v21 = vsel %vm1053_vm3, %v13832_v33, 0.0  ;;  %v6716_v6 = vmul.f32 0.35355338, %v9734_v2 }
0x21c9   :  { %v6799_v37 = vadd.f32 %v6798_v0, %v6797_v20  ;;  %v6689_v4 = vpop.f32.mrf.mxu1  ;;  %v10159_v34 = vpop.eup %10158  ;;  %v6739_v38 = vmax.f32 %v6735_v22, %v6738_v43  ;;  %v6802_v45 = vsel %vm1053_vm3, %v10157_v29, 0.0 }
0x21ca   :  { %v6714_v58 = vmul.f32 0.35355338, %v6689_v4  ;;  %v13844_v10 = vpop.eup %10160  ;;  %v6804_v1 = vsel %vm1053_vm3, %v10159_v34, 0.0  ;;  %v6744_v16 = vsel %vm1053_vm3, %v6716_v6, -inf }
0x21cb   :  { %v6801_v52 = vadd.f32 %v6800_v21, %v6799_v37  ;;  %v10163_v62 = vpop.eup %10162  ;;  %v6743_v26 = vmax.f32 %v6739_v38, %v6742_v9  ;;  %v6806_v11 = vsel %vm1053_vm3, %v13844_v10, 0.0 }
0x21cc   :  { %v6740_v28 = vsel %vm1053_vm3, %v6714_v58, -inf  ;;  %v6808_v0 = vsel %vm1053_vm3, %v10163_v62, 0.0 }
0x21cd   :  { %v6803_v32 = vadd.f32 %v6802_v45, %v6801_v52  ;;  %v6741_v15 = vmax.f32 %v6737_v44, %v6740_v28 }
0x21cf   :  { %v6805_v63 = vadd.f32 %v6804_v1, %v6803_v32  ;;  %v6745_v61 = vmax.f32 %v6741_v15, %v6744_v16 }
0x21d1   :  { %v6807_v20 = vadd.f32 %v6806_v11, %v6805_v63  ;;  %v6746_v2 = vmax.f32 %v6743_v26, %v6745_v61 }
0x21d3   :  { %v6809_v53 = vadd.f32 %v6808_v0, %v6807_v20  ;;  %v6755_v54 = vsub.f32 %v6709_v12, %v6746_v2  ;;  %v6756_v43 = vsub.f32 %v6710_v51, %v6746_v2  ;;  %v6757_v37 = vsub.f32 %v6711_v5, %v6746_v2 }
0x21d4   :  { %v6758_v22 = vsub.f32 %v6712_v57, %v6746_v2  ;;  %v6759_v4 = vsub.f32 %v6713_v59, %v6746_v2  ;;  %v6760_v52 = vsub.f32 %v6714_v58, %v6746_v2  ;;  %v6761_v45 = vsub.f32 %v6715_v17, %v6746_v2 }
0x21d5   :  { %10164 = vrcp.f32 %v6809_v53  ;;  %v6779_v21 = vmul.f32 1.442695, %v6755_v54  ;;  %v6781_v42 = vmul.f32 1.442695, %v6756_v43  ;;  %v6783_v44 = vmul.f32 1.442695, %v6757_v37 }
0x21d6   :  { %v6785_v38 = vmul.f32 1.442695, %v6758_v22  ;;  %v6787_v28 = vmul.f32 1.442695, %v6759_v4  ;;  %v6762_v32 = vsub.f32 %v6716_v6, %v6746_v2  ;;  %v6789_v15 = vmul.f32 1.442695, %v6760_v52 }
0x21d7   :  { %10166 = vpow2.f32 %v6779_v21  ;;  %v6791_v12 = vmul.f32 1.442695, %v6761_v45 }
0x21d8   :  { %10168 = vpow2.f32 %v6781_v42  ;;  %v6793_v5 = vmul.f32 1.442695, %v6762_v32  ;;  %v10348_v42 = vld [vmem:[#allocation5 + $0x30] ss:$12 sps:$4 sm:$0xff]  }
0x21d9   :  { %10170 = vpow2.f32 %v6783_v44 }
0x21da   :  { %10172 = vpow2.f32 %v6785_v38 }
0x21db   :  { %10174 = vpow2.f32 %v6787_v28  ;;  %v10349_v28 = vld [vmem:[#allocation5 + $0x18] ss:$12 sps:$4 sm:$0xff]  }
0x21dc   :  { %10176 = vpow2.f32 %v6789_v15 }
0x21dd   :  { %10178 = vpow2.f32 %v6791_v12  ;;  %v10350_v12 = vld [vmem:[#allocation5] ss:$12 sps:$4 sm:$0xff]  }
0x21de   :  { %10180 = vpow2.f32 %v6793_v5  ;;  %v13872_v5 = vld [vmem:[#allocation5 + $0x4c] ss:$12 sps:$4 sm:$0xff]  }
0x21e2   :  { %v10165_v51 = vpop.eup %10164 }
0x21e3   :  { %v6827_v57 = vmul.f32 %v10165_v51, %v13821_v3  ;;  %v6828_v59 = vmul.f32 %v10165_v51, %v13823_v36  ;;  %v6829_v58 = vmul.f32 %v10165_v51, %v13827_v55  ;;  %v6830_v17 = vmul.f32 %v10165_v51, %v13832_v33 }
0x21e4   :  { %v10167_v1 = vpop.eup %10166  ;;  %v6831_v9 = vmul.f32 %v10165_v51, %v10157_v29  ;;  %v6832_v6 = vmul.f32 %v10165_v51, %v10159_v34  ;;  %v10347_v29 = vld [vmem:[#allocation5 + $0x48] ss:$12 sps:$4 sm:$0xff]   ;;  %v6833_v53 = vmul.f32 %v10165_v51, %v13844_v10  ;;  %v6834_v54 = vmul.f32 %v10165_v51, %v10163_v62 }
0x21e5   :  { %v10169_v16 = vpop.eup %10168  ;;  %v6810_v63 = vsel %vm1053_vm3, %v10167_v1, 0.0  ;;  %v6843_v26 = vpack.c.bf16 %v6828_v59, %v6827_v57  ;;  %v6844_v61 = vpack.c.bf16 %v6830_v17, %v6829_v58 }
0x21e6   :  { %v10171_v11 = vpop.eup %10170  ;;  %v6811_v20 = vsel %vm1053_vm3, %v10169_v16, 0.0  ;;  %v6845_v3 = vpack.c.bf16 %v6832_v6, %v6831_v9  ;;  %v6846_v44 = vpack.c.bf16 %v6834_v54, %v6833_v53 }
0x21e7   :  { %v10173_v2 = vpop.eup %10172  ;;  %v6812_v0 = vadd.f32 %v6811_v20, %v6810_v63  ;;  %9737 = vmatprep.mubr.msk.bf16.mxu1 %vm1053_vm3, %v6843_v26  ;;  %v6813_v36 = vsel %vm1053_vm3, %v10171_v11, 0.0 }
0x21e8   :  { %9738 = vmatmul.mubr.msk.bf16.vlgmr.msra.gmra.mxu1 %vm1053_vm3, %v6844_v61  ;;  %v10175_v55 = vpop.eup %10174  ;;  %v6815_v34 = vsel %vm1053_vm3, %v10173_v2, 0.0 }
0x21e9   :  { %v6814_v33 = vadd.f32 %v6813_v36, %v6812_v0  ;;  %9741 = vmatprep.mubr.msk.bf16.mxu1 %vm1053_vm3, %v6845_v3  ;;  %9770 = vmatpush3.bf16.msra.mxu1 %v10347_v29  ;;  %v10177_v43 = vpop.eup %10176  ;;  %v6817_v22 = vsel %vm1053_vm3, %v10175_v55, 0.0 }
0x21ea   :  { %9771 = vmatprep.subr.bf16.mxu1 %v14976_v18  ;;  %v10179_v4 = vpop.eup %10178  ;;  %v6819_v52 = vsel %vm1053_vm3, %v10177_v43, 0.0 }
0x21eb   :  { %v6816_v37 = vadd.f32 %v6815_v34, %v6814_v33  ;;  %v10181_v38 = vpop.eup %10180  ;;  %v6821_v10 = vsel %vm1053_vm3, %v10179_v4, 0.0 }
0x21ec   :  { %v6823_v32 = vsel %vm1053_vm3, %v10181_v38, 0.0 }
0x21ed   :  { %v6818_v21 = vadd.f32 %v6817_v22, %v6816_v37  ;;  %9772 = vmatpush3.bf16.msra.mxu1 %v10348_v42 }
0x21ee   :  { %9773 = vmatprep.subr.bf16.mxu1 %v14976_v18 }
0x21ef   :  { %v6820_v45 = vadd.f32 %v6819_v52, %v6818_v21 }
0x21f0   :  { %9742 = vmatmul.mubr.msk.bf16.gmra.mxu1 %vm1053_vm3, %v6846_v44 }
0x21f1   :  { %v6822_v62 = vadd.f32 %v6821_v10, %v6820_v45  ;;  %9774 = vmatpush3.bf16.msra.mxu1 %v10349_v28 }
0x21f2   :  { %9775 = vmatprep.subr.bf16.mxu1 %v14976_v18 }
0x21f3   :  { %v6824_v15 = vadd.f32 %v6823_v32, %v6822_v62 }
0x21f5   :  { %10182 = vrcp.f32 %v6824_v15  ;;  %9776 = vmatpush3.bf16.msra.mxu1 %v10350_v12 }
0x21f6   :  { %9801 = vmatprep.subr.bf16.mxu1 %v13872_v5 }
0x2202   :  { %v10183_v51 = vpop.eup %10182 }
0x2203   :  { %v6835_v57 = vmul.f32 %v10183_v51, %v10167_v1  ;;  %v6836_v59 = vmul.f32 %v10183_v51, %v10169_v16  ;;  %v6837_v58 = vmul.f32 %v10183_v51, %v10171_v11  ;;  %v6838_v17 = vmul.f32 %v10183_v51, %v10173_v2  ;;  %v6973_v16 = vpop.permute.xlu0 %6972  ;;  %v6975_v11 = vpop.permute.xlu1 %6974 }
0x2204   :  { %v6839_v9 = vmul.f32 %v10183_v51, %v10175_v55  ;;  %v6840_v6 = vmul.f32 %v10183_v51, %v10177_v43  ;;  %v6841_v20 = vmul.f32 %v10183_v51, %v10179_v4  ;;  %v6842_v0 = vmul.f32 %v10183_v51, %v10181_v38 }
0x2205   :  { %v6847_v63 = vpack.c.bf16 %v6836_v59, %v6835_v57  ;;  %v6848_v26 = vpack.c.bf16 %v6838_v17, %v6837_v58 }
0x2206   :  { %v6849_v61 = vpack.c.bf16 %v6840_v6, %v6839_v9  ;;  %v6850_v3 = vpack.c.bf16 %v6842_v0, %v6841_v20 }
0x2207   :  { %9745 = vmatprep.mubr.msk.bf16.mxu1 %vm1053_vm3, %v6847_v63  ;;  %v6989_v55 = vpop.permute.xlu0 %6988  ;;  %v6991_v33 = vpop.permute.xlu1 %6990 }
0x2208   :  { %9746 = vmatmul.mubr.msk.bf16.gmra.mxu1 %vm1053_vm3, %v6848_v26 }
0x2209   :  { %9749 = vmatprep.mubr.msk.bf16.mxu1 %vm1053_vm3, %v6849_v61 }
0x220b   :  { %v6977_v34 = vpop.permute.xlu0 %6976  ;;  %v6993_v53 = vpop.permute.xlu1 %6992 }
0x220f   :  { %v6979_v37 = vpop.permute.xlu0 %6978  ;;  %v6995_v4 = vpop.permute.xlu1 %6994 }
0x2210   :  { %9750 = vmatmul.mubr.msk.bf16.gmra.mxu1 %vm1053_vm3, %v6850_v3 }
0x2211   :  { %9777 = vmatprep.mubr.msk.bf16.mxu1 %vm10480_vm0, %v14976_v18 }
0x2213   :  { %v6981_v44 = vpop.permute.xlu0 %6980  ;;  %v6997_v10 = vpop.permute.xlu1 %6996 }
0x2217   :  { %v6983_v59 = vpop.permute.xlu0 %6982  ;;  %v6999_v58 = vpop.permute.xlu1 %6998 }
0x22a8   :  { %v9739_v1 = vpop.f32.mrf.mxu1 }
0x22a9   :  { %v7022_v38 = vmul.f32 %v9739_v1, %v6977_v34  ;;  %v7001_v34 = vpop.permute.xlu1 %7000 }
0x22aa   :  { %v6909_v2 = vpop.f32.mrf.mxu1 }
0x22ab   :  { %v7020_v21 = vmul.f32 %v6973_v16, %v6909_v2  ;;  %v7039_v15 = vsel %vm221_vm1, %v7022_v38, 0.0  ;;  %v6985_v16 = vpop.permute.xlu0 %6984 }
0x22ac   :  { %v9740_v36 = vpop.f32.mrf.mxu1 }
0x22ad   :  { %v7036_v45 = vsel %vm221_vm1, %v7020_v21, 0.0  ;;  %v7023_v12 = vmul.f32 %v9740_v36, %v6979_v37 }
0x22ae   :  { %v6912_v29 = vpop.f32.mrf.mxu1 }
0x22af   :  { %v7021_v22 = vmul.f32 %v6975_v11, %v6912_v29  ;;  %v7041_v9 = vsel %vm221_vm1, %v7023_v12, 0.0  ;;  %v6987_v12 = vpop.permute.xlu0 %6986 }
0x22b0   :  { %v9743_v54 = vpop.f32.mrf.mxu1 }
0x22b1   :  { %v7037_v52 = vsel %vm221_vm1, %v7021_v22, 0.0 }
0x22b2   :  { %v6925_v43 = vpop.f32.mrf.mxu1  ;;  %v7038_v62 = vadd.f32 %v7037_v52, %v7036_v45 }
0x22b3   :  { %v7024_v6 = vmul.f32 %v6981_v44, %v6925_v43  ;;  %v7026_v44 = vmul.f32 %v9743_v54, %v6985_v16  ;;  %v10354_v16 = vld [vmem:[%s14871_s2 + $0x4c] ss:$36 sps:$4 sm:$0xff]  }
0x22b4   :  { %v9744_v42 = vpop.f32.mrf.mxu1  ;;  %v7040_v51 = vadd.f32 %v7039_v15, %v7038_v62 }
0x22b5   :  { %v7043_v11 = vsel %vm221_vm1, %v7024_v6, 0.0 }
0x22b6   :  { %v6928_v28 = vpop.f32.mrf.mxu1  ;;  %v7042_v26 = vadd.f32 %v7041_v9, %v7040_v51  ;;  %v7003_v51 = vpop.permute.xlu1 %7002 }
0x22b7   :  { %v7025_v20 = vmul.f32 %v6983_v59, %v6928_v28  ;;  %v7047_v59 = vsel %vm221_vm1, %v7026_v44, 0.0 }
0x22b8   :  { %v7044_v37 = vadd.f32 %v7043_v11, %v7042_v26  ;;  %v13910_v11 = vpop.f32.mrf.mxu0 }
0x22c8   :  { %v9747_v32 = vpop.f32.mrf.mxu1 }
0x22c9   :  { %v7030_v0 = vmul.f32 %v9747_v32, %v6993_v53 }
0x22ca   :  { %v6941_v57 = vpop.f32.mrf.mxu1 }
0x22cb   :  { %v7028_v63 = vmul.f32 %v6989_v55, %v6941_v57  ;;  %v7045_v55 = vsel %vm221_vm1, %v7025_v20, 0.0  ;;  %v7054_v43 = vsel %vm221_vm1, %v7030_v0, 0.0 }
0x22cc   :  { %v9748_v17 = vpop.f32.mrf.mxu1  ;;  %v7046_v45 = vadd.f32 %v7045_v55, %v7044_v37 }
0x22cd   :  { %v7051_v2 = vsel %vm221_vm1, %v7028_v63, 0.0  ;;  %v7031_v36 = vmul.f32 %v9748_v17, %v6995_v4  ;;  %v7027_v17 = vmul.f32 %v9744_v42, %v6987_v12  ;;  %v10352_v42 = vld [vmem:[%s14871_s2 + $0x60] ss:$36 sps:$4 sm:$0xff]  }
0x22ce   :  { %v6944_v61 = vpop.f32.mrf.mxu1  ;;  %v7048_v6 = vadd.f32 %v7047_v59, %v7046_v45 }
0x22cf   :  { %v7029_v3 = vmul.f32 %v6991_v33, %v6944_v61  ;;  %v7056_v38 = vsel %vm221_vm1, %v7031_v36, 0.0  ;;  %v7049_v61 = vsel %vm221_vm1, %v7027_v17, 0.0  ;;  %v10355_v36 = vld [vmem:[%s14874_s5 + $0x6] ss:$0 sm:$0xff] }
0x22d0   :  { %v9751_v1 = vpop.f32.mrf.mxu1  ;;  %v7050_v0 = vadd.f32 %v7049_v61, %v7048_v6  ;;  %v10356_v6 = vld [vmem:[%s14874_s5 + $0xd] ss:$0 sm:$0xff]  ;;  %v10357_v61 = vld [vmem:[%s14874_s5 + $0xe] ss:$0 sm:$0xff] }
0x22d1   :  { %v7052_v29 = vsel %vm221_vm1, %v7029_v3, 0.0  ;;  %v7034_v4 = vmul.f32 %v9751_v1, %v7001_v34  ;;  %v10353_v1 = vld [vmem:[%s14871_s2 + $0x18] ss:$36 sps:$4 sm:$0xff]  }
0x22d2   :  { %v7053_v22 = vadd.f32 %v7052_v29, %v7051_v2  ;;  %v6957_v21 = vpop.f32.mrf.mxu1 }
0x22d3   :  { %v7032_v52 = vmul.f32 %v6997_v10, %v6957_v21  ;;  %v7062_v63 = vsel %vm221_vm1, %v7034_v4, 0.0 }
0x22d4   :  { %v7055_v53 = vadd.f32 %v7054_v43, %v7053_v22  ;;  %v9752_v33 = vpop.f32.mrf.mxu1 }
0x22d5   :  { %v7058_v32 = vsel %vm221_vm1, %v7032_v52, 0.0  ;;  %v7035_v9 = vmul.f32 %v9752_v33, %v7003_v51 }
0x22d6   :  { %v7057_v62 = vadd.f32 %v7056_v38, %v7055_v53  ;;  %v6960_v28 = vpop.f32.mrf.mxu1 }
0x22d7   :  { %v7033_v15 = vmul.f32 %v6999_v58, %v6960_v28  ;;  %v7064_v20 = vsel %vm221_vm1, %v7035_v9, 0.0 }
0x22d8   :  { %v7059_v57 = vadd.f32 %v7058_v32, %v7057_v62 }
0x22d9   :  { %v7060_v10 = vsel %vm221_vm1, %v7033_v15, 0.0 }
0x22da   :  { %v7061_v54 = vadd.f32 %v7060_v10, %v7059_v57 }
0x22dc   :  { %v7063_v26 = vadd.f32 %v7062_v63, %v7061_v54 }
0x22de   :  { %v7065_v58 = vadd.f32 %v7064_v20, %v7063_v26 }
0x22e0   :  { %v7066_v3 = vpack.c.bf16 %v7065_v58, %v7050_v0 }
0x22e2   :  { %9758 = vmatmul.mubr.msk.bf16.vlgmr.msra.gmra.mxu0 %vm221_vm1, %v7066_v3  ;;  %v10358_v3 = vld [vmem:[%s14871_s2 + $0x48] ss:$36 sps:$4 sm:$0xff]  }
0x22e3   :  { %9762 = vmatpush3.bf16.msra.mxu0 %v10352_v42  ;;  %9765 = vmatprep.mubr.msk.bf16.mxu0 %vm10480_vm0, %v14976_v18  ;;  %v10359_v42 = vld [vmem:[%s14871_s2 + $0x4] ss:$36 sps:$4 sm:$0xff]  }
0x22e4   :  { %9763 = vmatprep.subr.bf16.mxu0 %v14976_v18 }
0x22e7   :  { %9764 = vmatpush3.bf16.msra.mxu0 %v10353_v1  ;;  %v10360_v1 = vld [vmem:[%s14871_s2] ss:$36 sps:$4 sm:$0xff]  }
0x22e8   :  { %7283 = vmatprep.subr.bf16.mxu0 %v10354_v16  ;;  %v13941_v16 = vld [vmem:[%s14871_s2 + $0x58] ss:$36 sps:$4 sm:$0xff]  }
0x23a2   :  { %v7104_v2 = vpop.f32.mrf.mxu0 }
0x23a3   :  { %v7105_v29 = vadd.f32 %v10355_v36, %v7104_v2 }
0x23a4   :  { %v9759_v34 = vpop.f32.mrf.mxu0 }
0x23a5   :  { %v7111_v18 = vadd.f32 %v7105_v29, %v12627_v60 }
0x23a6   :  { %v7107_v37 = vpop.f32.mrf.mxu0 }
0x23a7   :  { %v7108_v22 = vadd.f32 %v10355_v36, %v7107_v37  ;;  %v7113_v21 = vsel %vm221_vm1, %v7111_v18, 0.0 }
0x23a8   :  { %7114 = vadd.xlane.f32.xlu0 %v7113_v21  ;;  %v9760_v55 = vpop.f32.mrf.mxu0 }
0x23a9   :  { %v7112_v43 = vadd.f32 %v7108_v22, %v12629_v41 }
0x23ab   :  { %v7116_v52 = vsel %vm221_vm1, %v7112_v43, 0.0 }
0x23ac   :  { %7117 = vadd.xlane.f32.xlu1 %v7116_v52  ;;  %v10364_v52 = vld [vmem:[#allocation5 + $0x1c] ss:$12 sps:$4 sm:$0xff]  }
0x2431   :  { %v7115_v53 = vpop.xlane.xlu0 %7114 }
0x2432   :  { %v7119_v33 = vmul.f32 0.03125, %v7115_v53  ;;  %v10365_v53 = vld [vmem:[#allocation5 + $0x4] ss:$12 sps:$4 sm:$0xff]  }
0x2434   :  { %v7121_v44 = vsub.f32 %v7111_v18, %v7119_v33  ;;  %v13949_v33 = vld [vmem:[#allocation5 + $0x50] ss:$12 sps:$4 sm:$0xff]  }
0x2435   :  { %v7118_v38 = vpop.xlane.xlu1 %7117 }
0x2436   :  { %v7120_v45 = vmul.f32 0.03125, %v7118_v38  ;;  %v7123_v62 = vmul.f32 %v7121_v44, %v7121_v44  ;;  %v10367_v38 = vld [vmem:[%s14874_s5 + $0x8] ss:$0 sm:$0xff] }
0x2438   :  { %v7122_v28 = vsub.f32 %v7112_v43, %v7120_v45  ;;  %v7125_v60 = vsel %vm221_vm1, %v7123_v62, 0.0  ;;  %v10363_v43 = vld [vmem:[#allocation5 + $0x34] ss:$12 sps:$4 sm:$0xff]  }
0x2439   :  { %7126 = vadd.xlane.f32.xlu0 %v7125_v60 }
0x243a   :  { %v7124_v4 = vmul.f32 %v7122_v28, %v7122_v28 }
0x243c   :  { %v7128_v32 = vsel %vm221_vm1, %v7124_v4, 0.0 }
0x243d   :  { %7129 = vadd.xlane.f32.xlu0 %v7128_v32 }
0x24c2   :  { %v7127_v15 = vpop.xlane.xlu0 %7126 }
0x24c3   :  { %v7131_v12 = vmul.f32 0.03125, %v7127_v15 }
0x24c5   :  { %v7133_v41 = vadd.f32 1e-05, %v7131_v12 }
0x24c6   :  { %v7130_v51 = vpop.xlane.xlu0 %7129 }
0x24c7   :  { %10184 = vrsqrt.f32 %v7133_v41  ;;  %v7132_v57 = vmul.f32 0.03125, %v7130_v51 }
0x24c9   :  { %v7134_v59 = vadd.f32 1e-05, %v7132_v57 }
0x24cb   :  { %10186 = vrsqrt.f32 %v7134_v59 }
0x24d4   :  { %v10185_v17 = vpop.eup %10184 }
0x24d5   :  { %v7137_v9 = vmul.f32 %v10185_v17, %v7121_v44 }
0x24d7   :  { %v7139_v54 = vmul.f32 %v10356_v6, %v7137_v9 }
0x24d8   :  { %v10187_v10 = vpop.eup %10186 }
0x24d9   :  { %v7138_v63 = vmul.f32 %v10187_v10, %v7122_v28  ;;  %v7141_v20 = vadd.f32 %v10357_v61, %v7139_v54 }
0x24db   :  { %v7140_v26 = vmul.f32 %v10356_v6, %v7138_v63 }
0x24dd   :  { %v7142_v0 = vadd.f32 %v10357_v61, %v7140_v26 }
0x24df   :  { %v7143_v58 = vpack.c.bf16 %v7142_v0, %v7141_v20 }
0x24e1   :  { %9766 = vmatmul.mubr.msk.bf16.vlgmr.msra.gmra.mxu0 %vm221_vm1, %v7143_v58 }
0x24e2   :  { %7284 = vmatpush1.bf16.msra.mxu0 %v10358_v3  ;;  %7303 = vmatprep.mubr.bf16.mxu0 %v14979_v39  ;;  %v10362_v39 = vld [vmem:[%s14874_s5 + $0x7] ss:$0 sm:$0xff] }
0x24e3   :  { %7285 = vmatprep.subr.bf16.mxu0 %v10359_v42 }
0x24e6   :  { %7286 = vmatpush1.bf16.msra.mxu0 %v10360_v1 }
0x24e7   :  { %9781 = vmatprep.subr.bf16.mxu0 %v13941_v16 }
0x25a1   :  { %v7181_v2 = vpop.f32.mrf.mxu0 }
0x25a2   :  { %v7182_v29 = vadd.f32 %v10362_v39, %v7181_v2 }
0x25a3   :  { %v9767_v36 = vpop.f32.mrf.mxu0 }
0x25a4   :  { %v7188_v22 = vmax.f32 %v7182_v29, 0.0  ;;  %v15122_v29 = vld [vmem:[#allocation37_spill] sm:$0xff] }
0x25a5   :  { %v7184_v34 = vpop.f32.mrf.mxu0 }
0x25a6   :  { %v7185_v18 = vadd.f32 %v10362_v39, %v7184_v34  ;;  %v10370_v34 = vld [vmem:[%s14871_s2 + $0x10] ss:$36 sps:$4 sm:$0xff]  }
0x25a7   :  { %v9768_v37 = vpop.f32.mrf.mxu0 }
0x25a8   :  { %v7189_v21 = vmax.f32 %v7185_v18, 0.0  ;;  %v10371_v18 = vld [vmem:[%s14871_s2 + $0x64] ss:$36 sps:$4 sm:$0xff]   ;;  %v15123_v37 = vld [vmem:[#allocation14_spill] sm:$0xff] }
0x25aa   :  { %v7190_v55 = vpack.c.bf16 %v7189_v21, %v7188_v22  ;;  %v15124_v22 = vld [vmem:[#allocation25_spill] sm:$0xff]  ;;  %v15125_v21 = vld [vmem:[#allocation35_spill] sm:$0xff] }
0x25ac   :  { %9778 = vmatmul.mubr.msk.bf16.vlgmr.msra.gmra.mxu1 %vm1582_vm4, %v7190_v55  ;;  %v15126_v55 = vld [vmem:[#allocation48_spill] sm:$0xff] }
0x25ad   :  { %9802 = vmatpush3.bf16.msra.mxu1 %v13872_v5 }
0x25ae   :  { %9803 = vmatprep.subr.bf16.mxu1 %v10363_v43 }
0x25b1   :  { %9804 = vmatpush3.bf16.msra.mxu1 %v10363_v43  ;;  %v15127_v43 = vld [vmem:[#allocation47_spill] sm:$0xff] }
0x25b2   :  { %9805 = vmatprep.subr.bf16.mxu1 %v10364_v52 }
0x25b5   :  { %9806 = vmatpush3.bf16.msra.mxu1 %v10364_v52  ;;  %v15128_v52 = vld [vmem:[#allocation42_spill] sm:$0xff] }
0x25b6   :  { %9807 = vmatprep.subr.bf16.mxu1 %v10365_v53 }
0x25b9   :  { %9808 = vmatpush3.bf16.msra.mxu1 %v10365_v53  ;;  %v15129_v53 = vld [vmem:[#allocation41_spill] sm:$0xff] }
0x25ba   :  { %9845 = vmatprep.subr.bf16.mxu1 %v13949_v33 }
0x266c   :  { %v7228_v44 = vpop.f32.mrf.mxu1 }
0x266d   :  { %v7229_v45 = vadd.f32 %v10367_v38, %v7228_v44 }
0x266e   :  { %v9779_v5 = vpop.f32.mrf.mxu1 }
0x266f   :  { %v7235_v62 = vadd.f32 %v7229_v45, %v7141_v20 }
0x2670   :  { %v7231_v28 = vpop.f32.mrf.mxu1 }
0x2671   :  { %v7232_v60 = vadd.f32 %v10367_v38, %v7231_v28  ;;  %v7237_v4 = vsel %vm221_vm1, %v7235_v62, 0.0  ;;  %v15130_v38 = vld [vmem:[#allocation12_spill] sm:$0xff] }
0x2672   :  { %7238 = vadd.xlane.f32.xlu1 %v7237_v4  ;;  %v9780_v32 = vpop.f32.mrf.mxu1 }
0x2673   :  { %v7236_v15 = vadd.f32 %v7232_v60, %v7142_v0 }
0x2675   :  { %v7240_v12 = vsel %vm221_vm1, %v7236_v15, 0.0 }
0x2676   :  { %7241 = vadd.xlane.f32.xlu0 %v7240_v12 }
0x26fb   :  { %v7239_v41 = vpop.xlane.xlu1 %7238 }
0x26fc   :  { %v7243_v51 = vmul.f32 0.03125, %v7239_v41 }
0x26fe   :  { %v7245_v57 = vsub.f32 %v7235_v62, %v7243_v51 }
0x26ff   :  { %v7242_v59 = vpop.xlane.xlu0 %7241 }
0x2700   :  { %v7244_v17 = vmul.f32 0.03125, %v7242_v59  ;;  %v7247_v9 = vmul.f32 %v7245_v57, %v7245_v57 }
0x2702   :  { %v7246_v10 = vsub.f32 %v7236_v15, %v7244_v17  ;;  %v7249_v6 = vsel %vm221_vm1, %v7247_v9, 0.0 }
0x2703   :  { %7250 = vadd.xlane.f32.xlu1 %v7249_v6 }
0x2704   :  { %v7248_v54 = vmul.f32 %v7246_v10, %v7246_v10 }
0x2706   :  { %v7252_v63 = vsel %vm221_vm1, %v7248_v54, 0.0 }
0x2707   :  { %7253 = vadd.xlane.f32.xlu0 %v7252_v63 }
0x2714   :  { %7344 = vrot.lane.b32.xlu1 %v13526_v50, %s10484_s28  ;;  %v15109_v50 = vld [vmem:[#allocation28_spill] sm:$0xff] }
0x2718   :  { %7348 = vrot.lane.b32.xlu1 %v13544_v46, %s10484_s28  ;;  %v15111_v46 = vld [vmem:[#allocation31_spill] sm:$0xff] }
0x271c   :  { %7350 = vrot.lane.b32.xlu1 %v13555_v25, %s10484_s28  ;;  %v15116_v25 = vld [vmem:[#allocation18_spill] sm:$0xff] }
0x271d   :  { %7346 = vrot.lane.b32.xlu0 %v13539_v8, %s10484_s28  ;;  %v15110_v8 = vld [vmem:[#allocation34_spill] sm:$0xff] }
0x2720   :  { %7354 = vrot.lane.b32.xlu1 %v13570_v7, %s10484_s28  ;;  %v15118_v7 = vld [vmem:[#allocation21_spill] sm:$0xff] }
0x2721   :  { %7352 = vrot.lane.b32.xlu0 %v13560_v24, %s10484_s28  ;;  %v15117_v24 = vld [vmem:[#allocation17_spill] sm:$0xff] }
0x2724   :  { %7358 = vrot.lane.b32.xlu1 %v13585_v48, %s10484_s28  ;;  %v15120_v48 = vld [vmem:[#allocation13_spill] sm:$0xff] }
0x2725   :  { %7356 = vrot.lane.b32.xlu0 %v13575_v49, %s10484_s28  ;;  %v15119_v49 = vld [vmem:[#allocation16_spill] sm:$0xff] }
0x2728   :  { %7362 = vrot.lane.b32.xlu1 %v13600_v30, %s10484_s28 }
0x2729   :  { %7360 = vrot.lane.b32.xlu0 %v13590_v40, %s10484_s28  ;;  %v15121_v40 = vld [vmem:[#allocation15_spill] sm:$0xff] }
0x272c   :  { %7366 = vrot.lane.b32.xlu1 %v13617_v56, %s10484_s28 }
0x272d   :  { %7364 = vrot.lane.b32.xlu0 %v13605_v19, %s10484_s28 }
0x2730   :  { %7370 = vrot.lane.b32.xlu1 %v13633_v35, %s10484_s28  ;;  %v15112_v35 = vld [vmem:[#allocation24_spill] sm:$0xff] }
0x2731   :  { %7368 = vrot.lane.b32.xlu0 %v13622_v14, %s10484_s28  ;;  %v15113_v14 = vld [vmem:[#allocation23_spill] sm:$0xff] }
0x2734   :  { %7374 = vrot.lane.b32.xlu1 %v13648_v27, %s10484_s28  ;;  %v15114_v27 = vld [vmem:[#allocation27_spill] sm:$0xff] }
0x2735   :  { %7372 = vrot.lane.b32.xlu0 %v13638_v13, %s10484_s28  ;;  %v15115_v13 = vld [vmem:[#allocation22_spill] sm:$0xff] }
0x2738   :  { %7378 = vrot.lane.b32.xlu1 %v15109_v50, %s10484_s28 }
0x2739   :  { %7376 = vrot.lane.b32.xlu0 %v15110_v8, %s10484_s28 }
0x273c   :  { %7382 = vrot.lane.b32.xlu1 %v15111_v46, %s10484_s28 }
0x273d   :  { %7380 = vrot.lane.b32.xlu0 %v15112_v35, %s10484_s28 }
0x2740   :  { %7386 = vrot.lane.b32.xlu1 %v15113_v14, %s10484_s28 }
0x2741   :  { %7384 = vrot.lane.b32.xlu0 %v15114_v27, %s10484_s28 }
0x2744   :  { %7390 = vrot.lane.b32.xlu1 %v15115_v13, %s10484_s28 }
0x2745   :  { %7388 = vrot.lane.b32.xlu0 %v15116_v25, %s10484_s28 }
0x2748   :  { %7394 = vrot.lane.b32.xlu1 %v15117_v24, %s10484_s28 }
0x2749   :  { %7392 = vrot.lane.b32.xlu0 %v15118_v7, %s10484_s28 }
0x274c   :  { %7398 = vrot.lane.b32.xlu1 %v15119_v49, %s10484_s28 }
0x274d   :  { %7396 = vrot.lane.b32.xlu0 %v15120_v48, %s10484_s28 }
0x2750   :  { %7402 = vrot.lane.b32.xlu1 %v13734_v47, %s10484_s28  ;;  %v10368_v47 = vld [vmem:[%s14874_s5 + $0xf] ss:$0 sm:$0xff] }
0x2751   :  { %7400 = vrot.lane.b32.xlu0 %v15121_v40, %s10484_s28 }
0x2754   :  { %7406 = vrot.lane.b32.xlu1 %v13910_v11, %s10484_s28 }
0x2755   :  { %7404 = vrot.lane.b32.xlu0 %v13737_v31, %s10484_s28  ;;  %v10369_v31 = vld [vmem:[%s14874_s5 + $0x10] ss:$0 sm:$0xff] }
0x278c   :  { %v7251_v30 = vpop.xlane.xlu1 %7250 }
0x278d   :  { %v7255_v19 = vmul.f32 0.03125, %v7251_v30 }
0x278f   :  { %v7257_v56 = vadd.f32 1e-05, %v7255_v19 }
0x2790   :  { %v7254_v26 = vpop.xlane.xlu0 %7253  ;;  %v7345_v30 = vpop.permute.xlu1 %7344 }
0x2791   :  { %10188 = vrsqrt.f32 %v7257_v56  ;;  %v7256_v61 = vmul.f32 0.03125, %v7254_v26 }
0x2793   :  { %v7258_v20 = vadd.f32 1e-05, %v7256_v61 }
0x2795   :  { %10190 = vrsqrt.f32 %v7258_v20 }
0x279e   :  { %v10189_v0 = vpop.eup %10188 }
0x279f   :  { %v7261_v58 = vmul.f32 %v10189_v0, %v7245_v57 }
0x27a1   :  { %v7263_v3 = vmul.f32 %v10368_v47, %v7261_v58 }
0x27a2   :  { %v10191_v42 = vpop.eup %10190 }
0x27a3   :  { %v7262_v11 = vmul.f32 %v10191_v42, %v7246_v10  ;;  %v7265_v1 = vadd.f32 %v10369_v31, %v7263_v3 }
0x27a5   :  { %v7264_v2 = vmul.f32 %v10368_v47, %v7262_v11  ;;  %8752 = vst.msk [vmem:[#allocation8] sm:$0xff] %vm221_vm1, %v7265_v1  ;;  %v7349_v47 = vpop.permute.xlu1 %7348 }
0x27a7   :  { %v7266_v36 = vadd.f32 %v10369_v31, %v7264_v2 }
0x27a9   :  { %v7267_v39 = vpack.c.bf16 %v7266_v36, %v7265_v1  ;;  %8753 = vst.msk [vmem:[#allocation8 + $0x8] sm:$0xff] %vm221_vm1, %v7266_v36  ;;  %v7347_v1 = vpop.permute.xlu0 %7346  ;;  %v7351_v36 = vpop.permute.xlu1 %7350 }
0x27ab   :  { %8997 = vmatmul.mubr.msk.bf16.vlgmr.msra.gmra.mxu0 %vm221_vm1, %v7267_v39 }
0x27ac   :  { %9782 = vmatpush3.bf16.msra.mxu0 %v13941_v16  ;;  %9785 = vmatprep.mubr.msk.bf16.mxu0 %vm221_vm1, %v15122_v29  ;;  %v10372_v16 = vld [vmem:[%s14871_s2 + $0x1c] ss:$36 sps:$4 sm:$0xff]  }
0x27ad   :  { %9783 = vmatprep.subr.bf16.mxu0 %v10370_v34  ;;  %v7353_v29 = vpop.permute.xlu0 %7352 }
0x27b0   :  { %9784 = vmatpush3.bf16.msra.mxu0 %v10370_v34  ;;  %v7355_v34 = vpop.permute.xlu1 %7354 }
0x27b1   :  { %9825 = vmatprep.subr.bf16.mxu0 %v10371_v18 }
0x27b3   :  { %9786 = vmatmul.mubr.msk.bf16.vlgmr.msra.gmra.mxu0 %vm221_vm1, %v15123_v37 }
0x27b4   :  { %9789 = vmatprep.mubr.msk.bf16.mxu0 %vm221_vm1, %v15124_v22  ;;  %9826 = vmatpush3.bf16.msra.mxu0 %v10371_v18  ;;  %v7357_v18 = vpop.permute.xlu0 %7356  ;;  %v7359_v37 = vpop.permute.xlu1 %7358 }
0x27b5   :  { %9827 = vmatprep.subr.bf16.mxu0 %v10372_v16 }
0x27b8   :  { %9828 = vmatpush3.bf16.msra.mxu0 %v10372_v16  ;;  %v7361_v22 = vpop.permute.xlu0 %7360  ;;  %v7363_v16 = vpop.permute.xlu1 %7362 }
0x27bb   :  { %9790 = vmatmul.mubr.msk.bf16.gmra.mxu0 %vm221_vm1, %v15125_v21 }
0x27bc   :  { %9793 = vmatprep.mubr.msk.bf16.mxu0 %vm221_vm1, %v15126_v55  ;;  %v7365_v21 = vpop.permute.xlu0 %7364  ;;  %v7367_v55 = vpop.permute.xlu1 %7366 }
0x27c3   :  { %9794 = vmatmul.mubr.msk.bf16.gmra.mxu0 %vm221_vm1, %v15127_v43  ;;  %v7369_v43 = vpop.permute.xlu0 %7368 }
0x27c4   :  { %9797 = vmatprep.mubr.msk.bf16.mxu0 %vm221_vm1, %v15128_v52  ;;  %v7371_v52 = vpop.permute.xlu1 %7370 }
0x27cb   :  { %9798 = vmatmul.mubr.msk.bf16.gmra.mxu0 %vm221_vm1, %v15129_v53  ;;  %v7373_v53 = vpop.permute.xlu0 %7372 }
0x286b   :  { %v14058_v44 = vpop.f32.mrf.mxu0 }
0x286c   :  { %v7602_v45 = vrot.slane %v14058_v44, %v15130_v38  ;;  %v7595_v5 = vcombine.high %v14058_v44, %v14058_v44 }
0x286d   :  { %v7307_v62 = vpop.f32.mrf.mxu0 }
0x286e   :  { %v7618_v28 = vrot.slane %v7602_v45, %v15130_v38  ;;  %v7610_v60 = vcombine.high %v7602_v45, %v7602_v45  ;;  %v7609_v4 = vrot.slane %v7595_v5, %v15130_v38  ;;  %v14112_v45 = vpop.permute.xlu0 %7376 }
0x286f   :  { %v14066_v32 = vpop.f32.mrf.mxu0 }
0x2870   :  { %v7696_v15 = vrot.slane %v7618_v28, %v10670_v23  ;;  %v7632_v12 = vrot.slane %v7610_v60, %v15130_v38  ;;  %v7640_v41 = vcombine.high %v7618_v28, %v7618_v28  ;;  %v7611_v17 = vcombine.high %v7609_v4, %v7609_v4 }
0x2871   :  { %v7310_v51 = vpop.f32.mrf.mxu0  ;;  %v7625_v10 = vrot.slane %v7609_v4, %v15130_v38  ;;  %v7651_v63 = vrot.slane %v14066_v32, %v15130_v38  ;;  %v7644_v27 = vcombine.high %v14066_v32, %v14066_v32 }
0x2872   :  { %7757 = vrot.lane.b32.xlu0 %v7696_v15, %s10477_s17  ;;  %v7700_v57 = vrot.slane %v7632_v12, %v10670_v23  ;;  %v7642_v59 = vcombine.high %v7632_v12, %v7632_v12  ;;  %v7704_v9 = vrot.slane %v7640_v41, %v10670_v23  ;;  %v7639_v54 = vrot.slane %v7611_v17, %v15130_v38  ;;  %v14116_v28 = vpop.permute.xlu0 %7380 }
0x2873   :  { %v7712_v50 = vrot.slane %v7625_v10, %v10670_v23  ;;  %v7641_v8 = vcombine.high %v7625_v10, %v7625_v10  ;;  %v7659_v14 = vcombine.high %v7651_v63, %v7651_v63  ;;  %v7667_v25 = vrot.slane %v7651_v63, %v15130_v38  ;;  %v9787_v5 = vpop.f32.mrf.mxu0 }
0x2874   :  { %7759 = vrot.lane.b32.xlu1 %v7700_v57, %s10477_s17  ;;  %v7708_v6 = vrot.slane %v7642_v59, %v10670_v23  ;;  %v7716_v46 = vrot.slane %v7639_v54, %v10670_v23  ;;  %v7643_v35 = vcombine.high %v7639_v54, %v7639_v54  ;;  %v7658_v49 = vrot.slane %v7644_v27, %v15130_v38 }
0x2875   :  { %v7720_v13 = vrot.slane %v7641_v8, %v10670_v23  ;;  %v7681_v7 = vrot.slane %v7659_v14, %v15130_v38  ;;  %v7728_v48 = vrot.slane %v7667_v25, %v10670_v23  ;;  %v7689_v40 = vcombine.high %v7667_v25, %v7667_v25 }
0x2876   :  { %7761 = vrot.lane.b32.xlu0 %v7704_v9, %s10477_s17  ;;  %v7724_v24 = vrot.slane %v7643_v35, %v10670_v23  ;;  %v7660_v26 = vcombine.high %v7658_v49, %v7658_v49  ;;  %v7674_v20 = vrot.slane %v7658_v49, %v15130_v38  ;;  %v14118_v15 = vpop.permute.xlu0 %7384  ;;  %v7408_v35 = vsel %vm221_vm1, %v7345_v30, %v7347_v1 }
0x2877   :  { %v7732_v19 = vrot.slane %v7681_v7, %v10670_v23  ;;  %v7691_v56 = vcombine.high %v7681_v7, %v7681_v7  ;;  %v7736_v61 = vrot.slane %v7689_v40, %v10670_v23  ;;  %v7409_v25 = vsel %vm221_vm1, %v7349_v47, %v7351_v36  ;;  %v14144_v40 = vld [vmem:[%s14874_s5 + $0x9] ss:$0 sm:$0xff] }
0x2878   :  { %7763 = vrot.lane.b32.xlu1 %v7708_v6, %s10477_s17  ;;  %v7688_v58 = vrot.slane %v7660_v26, %v15130_v38  ;;  %v7744_v3 = vrot.slane %v7674_v20, %v10670_v23  ;;  %v7690_v42 = vcombine.high %v7674_v20, %v7674_v20  ;;  %v7375_v38 = vpop.permute.xlu1 %7374  ;;  %v7410_v7 = vsel %vm221_vm1, %v7353_v29, %v7355_v34 }
0x2879   :  { %v7740_v0 = vrot.slane %v7691_v56, %v10670_v23  ;;  %v7411_v30 = vsel %vm221_vm1, %v7357_v18, %v7359_v37 }
0x287a   :  { %7765 = vrot.lane.b32.xlu0 %v7712_v50, %s10477_s17  ;;  %v7748_v11 = vrot.slane %v7688_v58, %v10670_v23  ;;  %v7692_v31 = vcombine.high %v7688_v58, %v7688_v58  ;;  %v7752_v2 = vrot.slane %v7690_v42, %v10670_v23  ;;  %v14122_v57 = vpop.permute.xlu0 %7388 }
0x287c   :  { %7767 = vrot.lane.b32.xlu1 %v7716_v46, %s10477_s17  ;;  %v7756_v39 = vrot.slane %v7692_v31, %v10670_v23  ;;  %v14114_v62 = vpop.permute.xlu1 %7378  ;;  %v7498_v23 = vpop.f32.mrf.mxu0  ;;  %v7413_v31 = vsel %vm221_vm1, %v7365_v21, %v7367_v55 }
0x287d   :  { %v7499_v27 = vadd.f32 %v7498_v23, %v7408_v35 }
0x287e   :  { %7769 = vrot.lane.b32.xlu0 %v7720_v13, %s10477_s17  ;;  %v9788_v4 = vpop.f32.mrf.mxu0  ;;  %v14126_v9 = vpop.permute.xlu0 %7392 }
0x287f   :  { %v7510_v26 = vadd.f32 %v9788_v4, %v7411_v30 }
0x2880   :  { %7771 = vrot.lane.b32.xlu1 %v7724_v24, %s10477_s17  ;;  %v7383_v60 = vpop.permute.xlu1 %7382  ;;  %v7501_v12 = vpop.f32.mrf.mxu0 }
0x2881   :  { %v7502_v24 = vadd.f32 %v7501_v12, %v7409_v25 }
0x2882   :  { %7773 = vrot.lane.b32.xlu0 %v7728_v48, %s10477_s17  ;;  %v9791_v51 = vpop.f32.mrf.mxu0  ;;  %v14130_v63 = vpop.permute.xlu0 %7396  ;;  %v7507_v48 = vadd.f32 %v9787_v5, %v7410_v7 }
0x2884   :  { %7775 = vrot.lane.b32.xlu1 %v7732_v19, %s10477_s17  ;;  %v14120_v41 = vpop.permute.xlu1 %7386  ;;  %v7514_v17 = vpop.f32.mrf.mxu0  ;;  %v7561_v19 = vadd.f32 %v14144_v40, %v7499_v27  ;;  %v7563_v47 = vadd.f32 %v14144_v40, %v7507_v48 }
0x2885   :  { %v7418_v48 = vsel %vm221_vm1, %v14118_v15, %v14120_v41 }
0x2886   :  { %7777 = vrot.lane.b32.xlu0 %v7736_v61, %s10477_s17  ;;  %v9792_v10 = vpop.f32.mrf.mxu0  ;;  %v14134_v46 = vpop.permute.xlu0 %7400  ;;  %v7562_v61 = vadd.f32 %v14144_v40, %v7502_v24  ;;  %v7577_v42 = vadd.f32 %v7561_v19, %v14058_v44  ;;  %v7579_v23 = vadd.f32 %v7563_v47, %v14058_v44 }
0x2888   :  { %7779 = vrot.lane.b32.xlu1 %v7740_v0, %s10477_s17  ;;  %v14124_v59 = vpop.permute.xlu1 %7390  ;;  %v7517_v54 = vpop.f32.mrf.mxu0  ;;  %v7412_v0 = vsel %vm221_vm1, %v7361_v22, %v7363_v16  ;;  %v7578_v29 = vadd.f32 %v7562_v61, %v14058_v44  ;;  %v7415_v16 = vsel %vm221_vm1, %v7373_v53, %v7375_v38  ;;  %v7417_v53 = vsel %vm221_vm1, %v14116_v28, %v7383_v60 }
0x2889   :  { %v7518_v36 = vadd.f32 %v7517_v54, %v7413_v31  ;;  %v7526_v4 = vadd.f32 %v9792_v10, %v7415_v16  ;;  %v7416_v54 = vsel %vm221_vm1, %v14112_v45, %v14114_v62 }
0x288a   :  { %7781 = vrot.lane.b32.xlu0 %v7744_v3, %s10477_s17  ;;  %v9795_v8 = vpop.f32.mrf.mxu0  ;;  %v14148_v56 = vpop.permute.xlu0 %7404  ;;  %v7515_v3 = vadd.f32 %v7514_v17, %v7412_v0 }
0x288b   :  { %v7568_v7 = vadd.f32 %v14144_v40, %v7526_v4  ;;  %v7539_v60 = vadd.f32 %v9795_v8, %v7418_v48 }
0x288c   :  { %7783 = vrot.lane.b32.xlu1 %v7748_v11, %s10477_s17  ;;  %v14128_v6 = vpop.permute.xlu1 %7394  ;;  %v7530_v14 = vpop.f32.mrf.mxu0  ;;  %v7564_v11 = vadd.f32 %v14144_v40, %v7510_v26  ;;  %v7565_v22 = vadd.f32 %v14144_v40, %v7515_v3 }
0x288d   :  { %v7531_v10 = vadd.f32 %v7530_v14, %v7416_v54  ;;  %v7419_v14 = vsel %vm221_vm1, %v14122_v57, %v14124_v59  ;;  %v7584_v8 = vadd.f32 %v7568_v7, %v14058_v44  ;;  %v7571_v57 = vadd.f32 %v14144_v40, %v7539_v60 }
0x288e   :  { %7785 = vrot.lane.b32.xlu0 %v7752_v2, %s10477_s17  ;;  %v9796_v49 = vpop.f32.mrf.mxu0  ;;  %v7414_v2 = vsel %vm221_vm1, %v7369_v43, %v7371_v52  ;;  %v7580_v55 = vadd.f32 %v7564_v11, %v14058_v44  ;;  %v7566_v43 = vadd.f32 %v14144_v40, %v7518_v36  ;;  %v7581_v24 = vadd.f32 %v7565_v22, %v14058_v44  ;;  %v10374_v22 = vld [vmem:[#allocation5 + $0x38] ss:$12 sps:$4 sm:$0xff]  }
0x288f   :  { %v7523_v34 = vadd.f32 %v9791_v51, %v7414_v2  ;;  %v7569_v47 = vadd.f32 %v14144_v40, %v7531_v10  ;;  %v7420_v59 = vsel %vm221_vm1, %v14126_v9, %v14128_v6 }
0x2890   :  { %7787 = vrot.lane.b32.xlu1 %v7756_v39, %s10477_s17  ;;  %v14132_v50 = vpop.permute.xlu1 %7398  ;;  %v7533_v58 = vpop.f32.mrf.mxu0  ;;  %v7582_v28 = vadd.f32 %v7566_v43, %v14058_v44 }
0x2891   :  { %v7567_v51 = vadd.f32 %v14144_v40, %v7523_v34  ;;  %v7534_v19 = vadd.f32 %v7533_v58, %v7417_v53  ;;  %v7542_v58 = vadd.f32 %v9796_v49, %v7419_v14 }
0x2892   :  { %v14160_v18 = vpop.f32.mrf.mxu0 }
0x2893   :  { %v7583_v41 = vadd.f32 %v7567_v51, %v14058_v44  ;;  %v7572_v16 = vadd.f32 %v14144_v40, %v7542_v58  ;;  %v7421_v44 = vsel %vm221_vm1, %v14130_v63, %v14132_v50  ;;  %v7587_v63 = vadd.f32 %v7571_v57, %v14066_v32  ;;  %v10375_v51 = vld [vmem:[#allocation5 + $0x20] ss:$12 sps:$4 sm:$0xff]  }
0x2894   :  { %v14137_v13 = vpop.permute.xlu1 %7402  ;;  %v7546_v38 = vpop.f32.mrf.mxu0 }
0x2895   :  { %v7547_v49 = vadd.f32 %v7546_v38, %v7420_v59 }
0x2896   :  { %v9800_v61 = vpop.f32.mrf.mxu0 }
0x2898   :  { %v14151_v20 = vpop.permute.xlu1 %7406  ;;  %v7549_v36 = vpop.f32.mrf.mxu0 }
0x2899   :  { %v7550_v6 = vadd.f32 %v7549_v36, %v7421_v44  ;;  %v15131_v36 = vld [vmem:[#allocation36_spill] sm:$0xff] }
0x28e4   :  { %v7758_v1 = vpop.permute.xlu0 %7757 }
0x28e5   :  { %v7805_v39 = vadd.f32 %v7758_v1, %v7577_v42  ;;  %v7570_v42 = vadd.f32 %v14144_v40, %v7534_v19 }
0x28e6   :  { %v7760_v37 = vpop.permute.xlu1 %7759 }
0x28e7   :  { %v7806_v5 = vadd.f32 %v7760_v37, %v7578_v29  ;;  %v7821_v52 = vmax.f32 %v7805_v39, 0.0  ;;  %v7585_v37 = vadd.f32 %v7569_v47, %v14066_v32  ;;  %v7586_v9 = vadd.f32 %v7570_v42, %v14066_v32 }
0x28e8   :  { %v7762_v21 = vpop.permute.xlu0 %7761 }
0x28e9   :  { %v7822_v12 = vmax.f32 %v7806_v5, 0.0  ;;  %v7807_v17 = vadd.f32 %v7762_v21, %v7579_v23  ;;  %v7422_v21 = vsel %vm221_vm1, %v14134_v46, %v14137_v13  ;;  %v7588_v46 = vadd.f32 %v7572_v16, %v14066_v32 }
0x28ea   :  { %v7764_v35 = vpop.permute.xlu1 %7763  ;;  %v7555_v50 = vadd.f32 %v14160_v18, %v7422_v21  ;;  %v7574_v13 = vadd.f32 %v14144_v40, %v7550_v6 }
0x28eb   :  { %v7837_v27 = vpack.c.bf16 %v7822_v12, %v7821_v52  ;;  %v7808_v25 = vadd.f32 %v7764_v35, %v7580_v55  ;;  %v7823_v26 = vmax.f32 %v7807_v17, 0.0  ;;  %v7423_v55 = vsel %vm221_vm1, %v14148_v56, %v14151_v20 }
0x28ec   :  { %v7766_v30 = vpop.permute.xlu0 %7765  ;;  %v7573_v52 = vadd.f32 %v14144_v40, %v7547_v49  ;;  %v7558_v54 = vadd.f32 %v9800_v61, %v7423_v55  ;;  %v7575_v18 = vadd.f32 %v14144_v40, %v7555_v50  ;;  %v15135_v50 = vld [vmem:[#allocation32_spill] sm:$0xff] }
0x28ed   :  { %v7824_v45 = vmax.f32 %v7808_v25, 0.0  ;;  %v7809_v62 = vadd.f32 %v7766_v30, %v7581_v24  ;;  %9809 = vmatprep.mubr.msk.bf16.mxu1 %vm1582_vm4, %v7837_v27  ;;  %v10376_v24 = vld [vmem:[#allocation5 + $0x8] ss:$12 sps:$4 sm:$0xff]  }
0x28ee   :  { %v7768_v0 = vpop.permute.xlu1 %7767  ;;  %v7589_v25 = vadd.f32 %v7573_v52, %v14066_v32  ;;  %v7576_v7 = vadd.f32 %v14144_v40, %v7558_v54  ;;  %v7591_v14 = vadd.f32 %v7575_v18, %v14066_v32 }
0x28ef   :  { %v7838_v3 = vpack.c.bf16 %v7824_v45, %v7823_v26  ;;  %v7810_v15 = vadd.f32 %v7768_v0, %v7582_v28  ;;  %v7825_v31 = vmax.f32 %v7809_v62, 0.0  ;;  %v7590_v45 = vadd.f32 %v7574_v13, %v14066_v32 }
0x28f0   :  { %v7770_v11 = vpop.permute.xlu0 %7769  ;;  %v7592_v40 = vadd.f32 %v7576_v7, %v14066_v32 }
0x28f1   :  { %v7826_v1 = vmax.f32 %v7810_v15, 0.0  ;;  %v7811_v2 = vadd.f32 %v7770_v11, %v7583_v41  ;;  %9810 = vmatmul.mubr.msk.bf16.vlgmr.msra.gmra.mxu1 %vm1582_vm4, %v7838_v3 }
0x28f2   :  { %v7772_v39 = vpop.permute.xlu1 %7771  ;;  %9846 = vmatpush3.bf16.msra.mxu1 %v13949_v33 }
0x28f3   :  { %v7839_v29 = vpack.c.bf16 %v7826_v1, %v7825_v31  ;;  %v7812_v34 = vadd.f32 %v7772_v39, %v7584_v8  ;;  %9847 = vmatprep.subr.bf16.mxu1 %v10374_v22  ;;  %v7827_v23 = vmax.f32 %v7811_v2, 0.0  ;;  %v14225_v8 = vld [vmem:[%s14874_s5 + $0xa] ss:$0 sm:$0xff] }
0x28f4   :  { %v7774_v5 = vpop.permute.xlu0 %7773 }
0x28f5   :  { %v7828_v4 = vmax.f32 %v7812_v34, 0.0  ;;  %v7813_v33 = vadd.f32 %v7774_v5, %v7585_v37  ;;  %9813 = vmatprep.mubr.msk.bf16.mxu1 %vm1582_vm4, %v7839_v29  ;;  %v15132_v29 = vld [vmem:[#allocation20_spill] sm:$0xff]  ;;  %v15133_v5 = vld [vmem:[#allocation33_spill] sm:$0xff] }
0x28f6   :  { %v7776_v43 = vpop.permute.xlu1 %7775  ;;  %9848 = vmatpush3.bf16.msra.mxu1 %v10374_v22 }
0x28f7   :  { %v7840_v12 = vpack.c.bf16 %v7828_v4, %v7827_v23  ;;  %v7814_v17 = vadd.f32 %v7776_v43, %v7586_v9  ;;  %9849 = vmatprep.subr.bf16.mxu1 %v10375_v51  ;;  %v7829_v38 = vmax.f32 %v7813_v33, 0.0  ;;  %v15134_v4 = vld [vmem:[#allocation19_spill] sm:$0xff] }
0x28f8   :  { %v7778_v53 = vpop.permute.xlu0 %7777 }
0x28f9   :  { %v7830_v56 = vmax.f32 %v7814_v17, 0.0  ;;  %v7815_v20 = vadd.f32 %v7778_v53, %v7587_v63  ;;  %9814 = vmatmul.mubr.msk.bf16.gmra.mxu1 %vm1582_vm4, %v7840_v12  ;;  %v15136_v12 = vld [vmem:[#allocation50_spill] sm:$0xff] }
0x28fa   :  { %v7780_v35 = vpop.permute.xlu1 %7779  ;;  %9850 = vmatpush3.bf16.msra.mxu1 %v10375_v51 }
0x28fb   :  { %v7841_v10 = vpack.c.bf16 %v7830_v56, %v7829_v38  ;;  %v7816_v27 = vadd.f32 %v7780_v35, %v7588_v46  ;;  %9851 = vmatprep.subr.bf16.mxu1 %v10376_v24  ;;  %v7831_v19 = vmax.f32 %v7815_v20, 0.0  ;;  %v15137_v56 = vld [vmem:[#allocation26_spill] sm:$0xff] }
0x28fc   :  { %v7782_v48 = vpop.permute.xlu0 %7781 }
0x28fd   :  { %v7832_v30 = vmax.f32 %v7816_v27, 0.0  ;;  %v7817_v26 = vadd.f32 %v7782_v48, %v7589_v25  ;;  %9817 = vmatprep.mubr.msk.bf16.mxu1 %vm1582_vm4, %v7841_v10  ;;  %v15138_v10 = vld [vmem:[#allocation38_spill] sm:$0xff] }
0x28fe   :  { %v7784_v62 = vpop.permute.xlu1 %7783  ;;  %9852 = vmatpush3.bf16.msra.mxu1 %v10376_v24 }
0x28ff   :  { %v7842_v28 = vpack.c.bf16 %v7832_v30, %v7831_v19  ;;  %v7818_v60 = vadd.f32 %v7784_v62, %v7590_v45  ;;  %v7833_v0 = vmax.f32 %v7817_v26, 0.0  ;;  %v15139_v19 = vld [vmem:[#allocation46_spill] sm:$0xff]  ;;  %v15140_v62 = vld [vmem:[#allocation45_spill] sm:$0xff] }
0x2900   :  { %v7786_v61 = vpop.permute.xlu0 %7785 }
0x2901   :  { %v7834_v47 = vmax.f32 %v7818_v60, 0.0  ;;  %v7819_v3 = vadd.f32 %v7786_v61, %v7591_v14  ;;  %9818 = vmatmul.mubr.msk.bf16.gmra.mxu1 %vm1582_vm4, %v7842_v28 }
0x2902   :  { %v7788_v15 = vpop.permute.xlu1 %7787 }
0x2903   :  { %v7843_v41 = vpack.c.bf16 %v7834_v47, %v7833_v0  ;;  %v7820_v58 = vadd.f32 %v7788_v15, %v7592_v40  ;;  %v7835_v42 = vmax.f32 %v7819_v3, 0.0  ;;  %v15141_v47 = vld [vmem:[#allocation49_spill] sm:$0xff]  ;;  %v15142_v40 = vld [vmem:[#allocation44_spill] sm:$0xff] }
0x2905   :  { %v7836_v11 = vmax.f32 %v7820_v58, 0.0  ;;  %9821 = vmatprep.mubr.msk.bf16.mxu1 %vm1582_vm4, %v7843_v41 }
0x2907   :  { %v7844_v31 = vpack.c.bf16 %v7836_v11, %v7835_v42 }
0x2909   :  { %9822 = vmatmul.mubr.msk.bf16.gmra.mxu1 %vm1582_vm4, %v7844_v31 }
0x29b1   :  { %v9811_v1 = vpop.f32.mrf.mxu1 }
0x29b2   :  { %v7912_v57 = vadd.f32 %v14225_v8, %v9811_v1 }
0x29b3   :  { %v7903_v2 = vpop.f32.mrf.mxu1 }
0x29b4   :  { %v7904_v32 = vadd.f32 %v14225_v8, %v7903_v2  ;;  %v14233_v34 = vadd.f32 %v7912_v57, %v15132_v29  ;;  %v15143_v2 = vld [vmem:[#allocation40_spill] sm:$0xff] }
0x29b5   :  { %v9812_v59 = vpop.f32.mrf.mxu1 }
0x29b6   :  { %v14230_v39 = vadd.f32 %v7904_v32, %v15131_v36  ;;  %v7915_v37 = vadd.f32 %v14225_v8, %v9812_v59  ;;  %v7988_v43 = vsel %vm221_vm1, %v14233_v34, 0.0  ;;  %v15144_v36 = vld [vmem:[#allocation30_spill] sm:$0xff] }
0x29b7   :  { %v7906_v49 = vpop.f32.mrf.mxu1 }
0x29b8   :  { %v7907_v22 = vadd.f32 %v14225_v8, %v7906_v49  ;;  %v7982_v16 = vsel %vm221_vm1, %v14230_v39, 0.0  ;;  %v14244_v33 = vadd.f32 %v7915_v37, %v15134_v4 }
0x29b9   :  { %v9815_v44 = vpop.f32.mrf.mxu1  ;;  %7983 = vadd.xlane.f32.xlu0 %v7982_v16  ;;  %v15145_v16 = vld [vmem:[#allocation43_spill] sm:$0xff] }
0x29ba   :  { %v14240_v9 = vadd.f32 %v7907_v22, %v15133_v5  ;;  %v7928_v6 = vadd.f32 %v14225_v8, %v9815_v44  ;;  %v7991_v13 = vsel %vm221_vm1, %v14244_v33, 0.0  ;;  %v15146_v5 = vld [vmem:[#allocation39_spill] sm:$0xff] }
0x29bb   :  { %v7919_v23 = vpop.f32.mrf.mxu1 }
0x29bc   :  { %v7920_v21 = vadd.f32 %v14225_v8, %v7919_v23  ;;  %v7985_v55 = vsel %vm221_vm1, %v14240_v9, 0.0  ;;  %v14255_v17 = vadd.f32 %v7928_v6, %v15136_v12 }
0x29bd   :  { %v9816_v63 = vpop.f32.mrf.mxu1  ;;  %7986 = vadd.xlane.f32.xlu1 %v7985_v55  ;;  %7989 = vadd.xlane.f32.xlu0 %v7988_v43 }
0x29be   :  { %v14252_v52 = vadd.f32 %v7920_v21, %v15135_v50  ;;  %v7931_v54 = vadd.f32 %v14225_v8, %v9816_v63  ;;  %v8000_v18 = vsel %vm221_vm1, %v14255_v17, 0.0 }
0x29bf   :  { %v7922_v51 = vpop.f32.mrf.mxu1 }
0x29c0   :  { %v7923_v53 = vadd.f32 %v14225_v8, %v7922_v51  ;;  %v7994_v46 = vsel %vm221_vm1, %v14252_v52, 0.0  ;;  %v14269_v27 = vadd.f32 %v7931_v54, %v15138_v10 }
0x29c1   :  { %v9819_v38 = vpop.f32.mrf.mxu1  ;;  %7995 = vadd.xlane.f32.xlu1 %v7994_v46  ;;  %7992 = vadd.xlane.f32.xlu0 %v7991_v13 }
0x29c2   :  { %v14264_v20 = vadd.f32 %v7923_v53, %v15137_v56  ;;  %v7944_v25 = vadd.f32 %v14225_v8, %v9819_v38  ;;  %v8003_v61 = vsel %vm221_vm1, %v14269_v27, 0.0 }
0x29c3   :  { %v7935_v35 = vpop.f32.mrf.mxu1 }
0x29c4   :  { %v7936_v24 = vadd.f32 %v14225_v8, %v7935_v35  ;;  %v7997_v7 = vsel %vm221_vm1, %v14264_v20, 0.0  ;;  %v14280_v28 = vadd.f32 %v7944_v25, %v15140_v62 }
0x29c5   :  { %v9820_v48 = vpop.f32.mrf.mxu1  ;;  %8001 = vadd.xlane.f32.xlu1 %v8000_v18  ;;  %7998 = vadd.xlane.f32.xlu0 %v7997_v7 }
0x29c6   :  { %v14276_v30 = vadd.f32 %v7936_v24, %v15139_v19  ;;  %v7947_v26 = vadd.f32 %v14225_v8, %v9820_v48  ;;  %v8012_v11 = vsel %vm221_vm1, %v14280_v28, 0.0 }
0x29c7   :  { %v7938_v45 = vpop.f32.mrf.mxu1 }
0x29c8   :  { %v7939_v60 = vadd.f32 %v14225_v8, %v7938_v45  ;;  %v8006_v14 = vsel %vm221_vm1, %v14276_v30, 0.0  ;;  %v14291_v15 = vadd.f32 %v7947_v26, %v15142_v40 }
0x29c9   :  { %v9823_v0 = vpop.f32.mrf.mxu1  ;;  %8007 = vadd.xlane.f32.xlu1 %v8006_v14  ;;  %8004 = vadd.xlane.f32.xlu0 %v8003_v61 }
0x29ca   :  { %v14288_v3 = vadd.f32 %v7939_v60, %v15141_v47  ;;  %v7960_v58 = vadd.f32 %v14225_v8, %v9823_v0  ;;  %v8015_v59 = vsel %vm221_vm1, %v14291_v15, 0.0 }
0x29cb   :  { %v7951_v41 = vpop.f32.mrf.mxu1 }
0x29cc   :  { %v7952_v42 = vadd.f32 %v14225_v8, %v7951_v41  ;;  %v8009_v31 = vsel %vm221_vm1, %v14288_v3, 0.0  ;;  %v14305_v49 = vadd.f32 %v7960_v58, %v15144_v36 }
0x29cd   :  { %v9824_v1 = vpop.f32.mrf.mxu1  ;;  %8013 = vadd.xlane.f32.xlu1 %v8012_v11  ;;  %8010 = vadd.xlane.f32.xlu0 %v8009_v31 }
0x29ce   :  { %v14300_v57 = vadd.f32 %v7952_v42, %v15143_v2  ;;  %v7963_v29 = vadd.f32 %v14225_v8, %v9824_v1  ;;  %v8024_v23 = vsel %vm221_vm1, %v14305_v49, 0.0 }
0x29cf   :  { %v7954_v32 = vpop.f32.mrf.mxu1 }
0x29d0   :  { %v7955_v37 = vadd.f32 %v14225_v8, %v7954_v32  ;;  %v8018_v22 = vsel %vm221_vm1, %v14300_v57, 0.0  ;;  %v14315_v6 = vadd.f32 %v7963_v29, %v15146_v5 }
0x29d1   :  { %8019 = vadd.xlane.f32.xlu1 %v8018_v22  ;;  %8016 = vadd.xlane.f32.xlu0 %v8015_v59 }
0x29d2   :  { %v14312_v44 = vadd.f32 %v7955_v37, %v15145_v16  ;;  %v8027_v8 = vsel %vm221_vm1, %v14315_v6, 0.0 }
0x29d4   :  { %v8021_v4 = vsel %vm221_vm1, %v14312_v44, 0.0 }
0x29d5   :  { %8025 = vadd.xlane.f32.xlu1 %v8024_v23  ;;  %8022 = vadd.xlane.f32.xlu0 %v8021_v4 }
0x29d9   :  { %8028 = vadd.xlane.f32.xlu0 %v8027_v8 }
0x2a42   :  { %v7984_v21 = vpop.xlane.xlu0 %7983 }
0x2a43   :  { %v8030_v55 = vmul.f32 0.03125, %v7984_v21 }
0x2a45   :  { %v14324_v43 = vsub.f32 %v14230_v39, %v8030_v55 }
0x2a46   :  { %v7987_v63 = vpop.xlane.xlu1 %7986  ;;  %v7990_v50 = vpop.xlane.xlu0 %7989 }
0x2a47   :  { %v8031_v12 = vmul.f32 0.03125, %v7987_v63  ;;  %v8032_v51 = vmul.f32 0.03125, %v7990_v50  ;;  %v8062_v54 = vmul.f32 %v14324_v43, %v14324_v43 }
0x2a49   :  { %v14329_v53 = vsub.f32 %v14240_v9, %v8031_v12  ;;  %v14332_v46 = vsub.f32 %v14233_v34, %v8032_v51  ;;  %v8078_v13 = vsel %vm221_vm1, %v8062_v54, 0.0 }
0x2a4a   :  { %v7996_v38 = vpop.xlane.xlu1 %7995  ;;  %8079 = vadd.xlane.f32.xlu1 %v8078_v13  ;;  %v7993_v56 = vpop.xlane.xlu0 %7992 }
0x2a4b   :  { %v8034_v39 = vmul.f32 0.03125, %v7996_v38  ;;  %v8033_v35 = vmul.f32 0.03125, %v7993_v56  ;;  %v8063_v18 = vmul.f32 %v14329_v53, %v14329_v53  ;;  %v8064_v10 = vmul.f32 %v14332_v46, %v14332_v46 }
0x2a4d   :  { %v14340_v25 = vsub.f32 %v14252_v52, %v8034_v39  ;;  %v14343_v9 = vsub.f32 %v14244_v33, %v8033_v35  ;;  %v8081_v34 = vsel %vm221_vm1, %v8063_v18, 0.0  ;;  %v8084_v24 = vsel %vm221_vm1, %v8064_v10, 0.0 }
0x2a4e   :  { %v8002_v7 = vpop.xlane.xlu1 %8001  ;;  %8082 = vadd.xlane.f32.xlu0 %v8081_v34  ;;  %8085 = vadd.xlane.f32.xlu1 %v8084_v24  ;;  %v7999_v48 = vpop.xlane.xlu0 %7998 }
0x2a4f   :  { %v8036_v19 = vmul.f32 0.03125, %v8002_v7  ;;  %v8035_v26 = vmul.f32 0.03125, %v7999_v48  ;;  %v8066_v45 = vmul.f32 %v14340_v25, %v14340_v25  ;;  %v8065_v52 = vmul.f32 %v14343_v9, %v14343_v9 }
0x2a51   :  { %v14352_v62 = vsub.f32 %v14255_v17, %v8036_v19  ;;  %v14355_v33 = vsub.f32 %v14264_v20, %v8035_v26  ;;  %v8090_v60 = vsel %vm221_vm1, %v8066_v45, 0.0  ;;  %v8087_v14 = vsel %vm221_vm1, %v8065_v52, 0.0 }
0x2a52   :  { %v8008_v61 = vpop.xlane.xlu1 %8007  ;;  %8091 = vadd.xlane.f32.xlu1 %v8090_v60  ;;  %8088 = vadd.xlane.f32.xlu0 %v8087_v14  ;;  %v8005_v0 = vpop.xlane.xlu0 %8004 }
0x2a53   :  { %v8038_v47 = vmul.f32 0.03125, %v8008_v61  ;;  %v8037_v40 = vmul.f32 0.03125, %v8005_v0  ;;  %v8068_v41 = vmul.f32 %v14352_v62, %v14352_v62  ;;  %v8067_v17 = vmul.f32 %v14355_v33, %v14355_v33 }
0x2a55   :  { %v14364_v58 = vsub.f32 %v14276_v30, %v8038_v47  ;;  %v14367_v20 = vsub.f32 %v14269_v27, %v8037_v40  ;;  %v8096_v42 = vsel %vm221_vm1, %v8068_v41, 0.0  ;;  %v8093_v11 = vsel %vm221_vm1, %v8067_v17, 0.0 }
0x2a56   :  { %v8014_v31 = vpop.xlane.xlu1 %8013  ;;  %8097 = vadd.xlane.f32.xlu1 %v8096_v42  ;;  %8094 = vadd.xlane.f32.xlu0 %v8093_v11  ;;  %v8011_v1 = vpop.xlane.xlu0 %8010 }
0x2a57   :  { %v8040_v2 = vmul.f32 0.03125, %v8014_v31  ;;  %v8039_v32 = vmul.f32 0.03125, %v8011_v1  ;;  %v8070_v59 = vmul.f32 %v14364_v58, %v14364_v58  ;;  %v8069_v30 = vmul.f32 %v14367_v20, %v14367_v20 }
0x2a59   :  { %v14376_v36 = vsub.f32 %v14280_v28, %v8040_v2  ;;  %v14379_v27 = vsub.f32 %v14288_v3, %v8039_v32  ;;  %v8102_v29 = vsel %vm221_vm1, %v8070_v59, 0.0  ;;  %v8099_v37 = vsel %vm221_vm1, %v8069_v30, 0.0 }
0x2a5a   :  { %v8020_v22 = vpop.xlane.xlu1 %8019  ;;  %8103 = vadd.xlane.f32.xlu1 %v8102_v29  ;;  %8100 = vadd.xlane.f32.xlu0 %v8099_v37  ;;  %v8017_v16 = vpop.xlane.xlu0 %8016 }
0x2a5b   :  { %v8042_v5 = vmul.f32 0.03125, %v8020_v22  ;;  %v8041_v23 = vmul.f32 0.03125, %v8017_v16  ;;  %v8072_v4 = vmul.f32 %v14376_v36, %v14376_v36  ;;  %v8071_v28 = vmul.f32 %v14379_v27, %v14379_v27 }
0x2a5d   :  { %v14388_v8 = vsub.f32 %v14300_v57, %v8042_v5  ;;  %v14391_v3 = vsub.f32 %v14291_v15, %v8041_v23  ;;  %v8108_v21 = vsel %vm221_vm1, %v8072_v4, 0.0  ;;  %v8105_v55 = vsel %vm221_vm1, %v8071_v28, 0.0 }
0x2a5e   :  { %v8026_v63 = vpop.xlane.xlu1 %8025  ;;  %8109 = vadd.xlane.f32.xlu1 %v8108_v21  ;;  %8106 = vadd.xlane.f32.xlu0 %v8105_v55  ;;  %v8023_v50 = vpop.xlane.xlu0 %8022 }
0x2a5f   :  { %v8044_v12 = vmul.f32 0.03125, %v8026_v63  ;;  %v8043_v51 = vmul.f32 0.03125, %v8023_v50  ;;  %v8074_v54 = vmul.f32 %v14388_v8, %v14388_v8  ;;  %v8073_v57 = vmul.f32 %v14391_v3, %v14391_v3 }
0x2a61   :  { %v14400_v13 = vsub.f32 %v14305_v49, %v8044_v12  ;;  %v14403_v15 = vsub.f32 %v14312_v44, %v8043_v51  ;;  %v8114_v38 = vsel %vm221_vm1, %v8074_v54, 0.0  ;;  %v8111_v56 = vsel %vm221_vm1, %v8073_v57, 0.0 }
0x2a62   :  { %8115 = vadd.xlane.f32.xlu1 %v8114_v38  ;;  %8112 = vadd.xlane.f32.xlu0 %v8111_v56  ;;  %v8029_v39 = vpop.xlane.xlu0 %8028 }
0x2a63   :  { %v8045_v35 = vmul.f32 0.03125, %v8029_v39  ;;  %v8076_v18 = vmul.f32 %v14400_v13, %v14400_v13  ;;  %v8075_v10 = vmul.f32 %v14403_v15, %v14403_v15 }
0x2a65   :  { %v14412_v49 = vsub.f32 %v14315_v6, %v8045_v35  ;;  %v8120_v44 = vsel %vm221_vm1, %v8076_v18, 0.0  ;;  %v8117_v34 = vsel %vm221_vm1, %v8075_v10, 0.0  ;;  %v14425_v35 = vld [vmem:[%s14874_s5 + $0x11] ss:$0 sm:$0xff] }
0x2a66   :  { %8121 = vadd.xlane.f32.xlu1 %v8120_v44  ;;  %8118 = vadd.xlane.f32.xlu0 %v8117_v34 }
0x2a67   :  { %v8077_v24 = vmul.f32 %v14412_v49, %v14412_v49 }
0x2a69   :  { %v8123_v7 = vsel %vm221_vm1, %v8077_v24, 0.0 }
0x2a6a   :  { %8124 = vadd.xlane.f32.xlu0 %v8123_v7 }
0x2ad3   :  { %v8080_v48 = vpop.xlane.xlu1 %8079 }
0x2ad4   :  { %v8126_v19 = vmul.f32 0.03125, %v8080_v48 }
0x2ad6   :  { %v8142_v26 = vadd.f32 1e-05, %v8126_v19 }
0x2ad7   :  { %v8086_v45 = vpop.xlane.xlu1 %8085  ;;  %v8083_v52 = vpop.xlane.xlu0 %8082 }
0x2ad8   :  { %10192 = vrsqrt.f32 %v8142_v26  ;;  %v8128_v6 = vmul.f32 0.03125, %v8086_v45  ;;  %v8127_v60 = vmul.f32 0.03125, %v8083_v52  ;;  %v14434_v45 = vld [vmem:[%s14874_s5 + $0x12] ss:$0 sm:$0xff] }
0x2ada   :  { %v8144_v14 = vadd.f32 1e-05, %v8128_v6  ;;  %v8143_v61 = vadd.f32 1e-05, %v8127_v60 }
0x2adb   :  { %v8092_v0 = vpop.xlane.xlu1 %8091  ;;  %v8089_v47 = vpop.xlane.xlu0 %8088 }
0x2adc   :  { %10194 = vrsqrt.f32 %v8144_v14  ;;  %v8130_v40 = vmul.f32 0.03125, %v8092_v0  ;;  %v8129_v41 = vmul.f32 0.03125, %v8089_v47 }
0x2add   :  { %10196 = vrsqrt.f32 %v8143_v61 }
0x2ade   :  { %v8146_v17 = vadd.f32 1e-05, %v8130_v40  ;;  %v8145_v42 = vadd.f32 1e-05, %v8129_v41 }
0x2adf   :  { %v8098_v11 = vpop.xlane.xlu1 %8097  ;;  %v8095_v31 = vpop.xlane.xlu0 %8094 }
0x2ae0   :  { %10198 = vrsqrt.f32 %v8146_v17  ;;  %v8132_v1 = vmul.f32 0.03125, %v8098_v11  ;;  %v8131_v2 = vmul.f32 0.03125, %v8095_v31 }
0x2ae1   :  { %10200 = vrsqrt.f32 %v8145_v42 }
0x2ae2   :  { %v8148_v32 = vadd.f32 1e-05, %v8132_v1  ;;  %v8147_v59 = vadd.f32 1e-05, %v8131_v2 }
0x2ae3   :  { %v8104_v30 = vpop.xlane.xlu1 %8103  ;;  %v8101_v29 = vpop.xlane.xlu0 %8100 }
0x2ae4   :  { %10202 = vrsqrt.f32 %v8148_v32  ;;  %v8134_v37 = vmul.f32 0.03125, %v8104_v30  ;;  %v8133_v22 = vmul.f32 0.03125, %v8101_v29 }
0x2ae5   :  { %v10193_v16 = vpop.eup %10192  ;;  %10204 = vrsqrt.f32 %v8147_v59 }
0x2ae6   :  { %v8150_v5 = vadd.f32 1e-05, %v8134_v37  ;;  %v8149_v23 = vadd.f32 1e-05, %v8133_v22  ;;  %v8174_v21 = vmul.f32 %v10193_v16, %v14324_v43 }
0x2ae7   :  { %v8110_v4 = vpop.xlane.xlu1 %8109  ;;  %v8107_v28 = vpop.xlane.xlu0 %8106 }
0x2ae8   :  { %10206 = vrsqrt.f32 %v8150_v5  ;;  %v8136_v55 = vmul.f32 0.03125, %v8110_v4  ;;  %v8135_v63 = vmul.f32 0.03125, %v8107_v28  ;;  %v8190_v43 = vmul.f32 %v14425_v35, %v8174_v21 }
0x2ae9   :  { %v10195_v50 = vpop.eup %10194  ;;  %10208 = vrsqrt.f32 %v8149_v23 }
0x2aea   :  { %v10197_v12 = vpop.eup %10196  ;;  %v8176_v51 = vmul.f32 %v10195_v50, %v14332_v46  ;;  %v8152_v54 = vadd.f32 1e-05, %v8136_v55  ;;  %v8151_v57 = vadd.f32 1e-05, %v8135_v63  ;;  %v14437_v52 = vadd.f32 %v14434_v45, %v8190_v43 }
0x2aeb   :  { %v8116_v38 = vpop.xlane.xlu1 %8115  ;;  %v8113_v56 = vpop.xlane.xlu0 %8112  ;;  %v8175_v39 = vmul.f32 %v10197_v12, %v14329_v53 }
0x2aec   :  { %10210 = vrsqrt.f32 %v8152_v54  ;;  %v8138_v18 = vmul.f32 0.03125, %v8116_v38  ;;  %v8137_v10 = vmul.f32 0.03125, %v8113_v56  ;;  %v8192_v24 = vmul.f32 %v14425_v35, %v8176_v51 }
0x2aed   :  { %v10199_v44 = vpop.eup %10198  ;;  %10212 = vrsqrt.f32 %v8151_v57  ;;  %v8191_v46 = vmul.f32 %v14425_v35, %v8175_v39 }
0x2aee   :  { %v10201_v34 = vpop.eup %10200  ;;  %v8154_v7 = vadd.f32 1e-05, %v8138_v18  ;;  %v8153_v48 = vadd.f32 1e-05, %v8137_v10  ;;  %v8178_v60 = vmul.f32 %v10199_v44, %v14340_v25  ;;  %v14447_v41 = vadd.f32 %v14434_v45, %v8192_v24 }
0x2aef   :  { %v8177_v53 = vmul.f32 %v10201_v34, %v14343_v9  ;;  %v8122_v19 = vpop.xlane.xlu1 %8121  ;;  %v8119_v26 = vpop.xlane.xlu0 %8118  ;;  %v14440_v6 = vadd.f32 %v14434_v45, %v8191_v46 }
0x2af0   :  { %10214 = vrsqrt.f32 %v8154_v7  ;;  %v8140_v14 = vmul.f32 0.03125, %v8122_v19  ;;  %v8139_v61 = vmul.f32 0.03125, %v8119_v26  ;;  %v8194_v2 = vmul.f32 %v14425_v35, %v8178_v60 }
0x2af1   :  { %v10203_v0 = vpop.eup %10202  ;;  %v8193_v9 = vmul.f32 %v14425_v35, %v8177_v53  ;;  %10216 = vrsqrt.f32 %v8153_v48  ;;  %v8222_v47 = vpack.c.bf16 %v14440_v6, %v14437_v52 }
0x2af2   :  { %v10205_v40 = vpop.eup %10204  ;;  %v8156_v17 = vadd.f32 1e-05, %v8140_v14  ;;  %v8155_v42 = vadd.f32 1e-05, %v8139_v61  ;;  %v8180_v25 = vmul.f32 %v10203_v0, %v14352_v62 }
0x2af3   :  { %v14450_v11 = vadd.f32 %v14434_v45, %v8193_v9  ;;  %9829 = vmatprep.mubr.msk.bf16.mxu0 %vm221_vm1, %v8222_v47  ;;  %v8125_v31 = vpop.xlane.xlu0 %8124  ;;  %v8179_v1 = vmul.f32 %v10205_v40, %v14355_v33  ;;  %v14463_v33 = vadd.f32 %v14434_v45, %v8194_v2 }
0x2af4   :  { %10218 = vrsqrt.f32 %v8156_v17  ;;  %v8141_v32 = vmul.f32 0.03125, %v8125_v31  ;;  %v8196_v23 = vmul.f32 %v14425_v35, %v8180_v25 }
0x2af5   :  { %v10207_v59 = vpop.eup %10206  ;;  %v8223_v30 = vpack.c.bf16 %v14450_v11, %v14447_v41  ;;  %10220 = vrsqrt.f32 %v8155_v42  ;;  %v8195_v29 = vmul.f32 %v14425_v35, %v8179_v1 }
0x2af6   :  { %v10209_v37 = vpop.eup %10208  ;;  %v8157_v22 = vadd.f32 1e-05, %v8141_v32  ;;  %v8182_v62 = vmul.f32 %v10207_v59, %v14364_v58  ;;  %v14476_v63 = vadd.f32 %v14434_v45, %v8196_v23 }
0x2af7   :  { %v8181_v16 = vmul.f32 %v10209_v37, %v14367_v20  ;;  %9830 = vmatmul.mubr.msk.bf16.vlgmr.msra.gmra.mxu0 %vm221_vm1, %v8223_v30  ;;  %v14466_v5 = vadd.f32 %v14434_v45, %v8195_v29 }
0x2af8   :  { %10222 = vrsqrt.f32 %v8157_v22  ;;  %v8198_v20 = vmul.f32 %v14425_v35, %v8182_v62 }
0x2af9   :  { %v10211_v4 = vpop.eup %10210  ;;  %v8224_v28 = vpack.c.bf16 %v14466_v5, %v14463_v33  ;;  %v8197_v21 = vmul.f32 %v14425_v35, %v8181_v16 }
0x2afa   :  { %v10213_v58 = vpop.eup %10212  ;;  %v8184_v55 = vmul.f32 %v10211_v4, %v14376_v36  ;;  %v14486_v56 = vadd.f32 %v14434_v45, %v8198_v20 }
0x2afb   :  { %9833 = vmatprep.mubr.msk.bf16.mxu0 %vm221_vm1, %v8224_v28  ;;  %v14479_v50 = vadd.f32 %v14434_v45, %v8197_v21  ;;  %v8183_v12 = vmul.f32 %v10213_v58, %v14379_v27 }
0x2afc   :  { %v8200_v43 = vmul.f32 %v14425_v35, %v8184_v55 }
0x2afd   :  { %v10215_v51 = vpop.eup %10214  ;;  %v8225_v54 = vpack.c.bf16 %v14479_v50, %v14476_v63  ;;  %v8199_v57 = vmul.f32 %v14425_v35, %v8183_v12 }
0x2afe   :  { %v10217_v38 = vpop.eup %10216  ;;  %v8186_v27 = vmul.f32 %v10215_v51, %v14388_v8 }
0x2aff   :  { %v8185_v36 = vmul.f32 %v10217_v38, %v14391_v3  ;;  %9834 = vmatmul.mubr.msk.bf16.gmra.mxu0 %vm221_vm1, %v8225_v54  ;;  %v14491_v39 = vadd.f32 %v14434_v45, %v8199_v57  ;;  %v14501_v3 = vadd.f32 %v14434_v45, %v8200_v43 }
0x2b00   :  { %v8202_v8 = vmul.f32 %v14425_v35, %v8186_v27 }
0x2b01   :  { %v10219_v18 = vpop.eup %10218  ;;  %v8226_v10 = vpack.c.bf16 %v14491_v39, %v14486_v56  ;;  %v8201_v44 = vmul.f32 %v14425_v35, %v8185_v36 }
0x2b02   :  { %v10221_v46 = vpop.eup %10220  ;;  %v8188_v34 = vmul.f32 %v10219_v18, %v14400_v13  ;;  %v14515_v60 = vadd.f32 %v14434_v45, %v8202_v8 }
0x2b03   :  { %9837 = vmatprep.mubr.msk.bf16.mxu0 %vm221_vm1, %v8226_v10  ;;  %v14504_v24 = vadd.f32 %v14434_v45, %v8201_v44  ;;  %v8187_v7 = vmul.f32 %v10221_v46, %v14403_v15 }
0x2b04   :  { %v8204_v26 = vmul.f32 %v14425_v35, %v8188_v34 }
0x2b05   :  { %v10223_v48 = vpop.eup %10222  ;;  %v8227_v53 = vpack.c.bf16 %v14504_v24, %v14501_v3  ;;  %v8203_v19 = vmul.f32 %v14425_v35, %v8187_v7 }
0x2b06   :  { %v8189_v13 = vmul.f32 %v10223_v48, %v14412_v49  ;;  %v14524_v0 = vadd.f32 %v14434_v45, %v8204_v26 }
0x2b07   :  { %9838 = vmatmul.mubr.msk.bf16.gmra.mxu0 %vm221_vm1, %v8227_v53  ;;  %v14518_v14 = vadd.f32 %v14434_v45, %v8203_v19 }
0x2b08   :  { %v8205_v15 = vmul.f32 %v14425_v35, %v8189_v13  ;;  %v10380_v35 = vld [vmem:[%s14874_s5 + $0xb] ss:$0 sm:$0xff] }
0x2b09   :  { %v8228_v61 = vpack.c.bf16 %v14518_v14, %v14515_v60 }
0x2b0a   :  { %v14527_v49 = vadd.f32 %v14434_v45, %v8205_v15 }
0x2b0b   :  { %9841 = vmatprep.mubr.msk.bf16.mxu0 %vm221_vm1, %v8228_v61 }
0x2b0c   :  { %v8229_v9 = vpack.c.bf16 %v14527_v49, %v14524_v0 }
0x2b0f   :  { %9842 = vmatmul.mubr.msk.bf16.gmra.mxu0 %vm221_vm1, %v8229_v9 }
0x2bb7   :  { %v9831_v47 = vpop.f32.mrf.mxu0 }
0x2bb8   :  { %v8297_v31 = vadd.f32 %v10380_v35, %v9831_v47 }
0x2bb9   :  { %v8288_v40 = vpop.f32.mrf.mxu0 }
0x2bba   :  { %v8289_v42 = vadd.f32 %v10380_v35, %v8288_v40  ;;  %v8353_v29 = vmax.f32 %v8297_v31, 0.0 }
0x2bbb   :  { %v9832_v17 = vpop.f32.mrf.mxu0 }
0x2bbc   :  { %v8300_v25 = vadd.f32 %v10380_v35, %v9832_v17  ;;  %v8351_v59 = vmax.f32 %v8289_v42, 0.0 }
0x2bbd   :  { %v8291_v1 = vpop.f32.mrf.mxu0 }
0x2bbe   :  { %v8292_v45 = vadd.f32 %v10380_v35, %v8291_v1  ;;  %v8354_v2 = vmax.f32 %v8300_v25, 0.0 }
0x2bbf   :  { %v9835_v32 = vpop.f32.mrf.mxu0 }
0x2bc0   :  { %v8352_v30 = vmax.f32 %v8292_v45, 0.0  ;;  %v8368_v62 = vpack.c.bf16 %v8354_v2, %v8353_v29  ;;  %v8313_v28 = vadd.f32 %v10380_v35, %v9835_v32 }
0x2bc1   :  { %v8304_v37 = vpop.f32.mrf.mxu0 }
0x2bc2   :  { %v8367_v22 = vpack.c.bf16 %v8352_v30, %v8351_v59  ;;  %v8305_v23 = vadd.f32 %v10380_v35, %v8304_v37  ;;  %v8357_v54 = vmax.f32 %v8313_v28, 0.0  ;;  %v14547_v59 = vld [vmem:[%s14874_s5 + $0xc] ss:$0 sm:$0xff] }
0x2bc3   :  { %v9836_v16 = vpop.f32.mrf.mxu0 }
0x2bc4   :  { %v8316_v4 = vadd.f32 %v10380_v35, %v9836_v16  ;;  %9853 = vmatprep.mubr.msk.bf16.mxu1 %vm1582_vm4, %v8367_v22  ;;  %v8355_v12 = vmax.f32 %v8305_v23, 0.0 }
0x2bc5   :  { %v8307_v21 = vpop.f32.mrf.mxu0  ;;  %9854 = vmatmul.mubr.msk.bf16.vlgmr.msra.gmra.mxu1 %vm1582_vm4, %v8368_v62 }
0x2bc6   :  { %v8308_v58 = vadd.f32 %v10380_v35, %v8307_v21  ;;  %v8358_v20 = vmax.f32 %v8316_v4, 0.0 }
0x2bc7   :  { %v9839_v55 = vpop.f32.mrf.mxu0 }
0x2bc8   :  { %v8356_v51 = vmax.f32 %v8308_v58, 0.0  ;;  %v8370_v36 = vpack.c.bf16 %v8358_v20, %v8357_v54  ;;  %v8329_v10 = vadd.f32 %v10380_v35, %v9839_v55 }
0x2bc9   :  { %v8320_v57 = vpop.f32.mrf.mxu0 }
0x2bca   :  { %v8369_v38 = vpack.c.bf16 %v8356_v51, %v8355_v12  ;;  %v8321_v27 = vadd.f32 %v10380_v35, %v8320_v57  ;;  %v8361_v53 = vmax.f32 %v8329_v10, 0.0 }
0x2bcb   :  { %v9840_v43 = vpop.f32.mrf.mxu0 }
0x2bcc   :  { %v8332_v18 = vadd.f32 %v10380_v35, %v9840_v43  ;;  %9857 = vmatprep.mubr.msk.bf16.mxu1 %vm1582_vm4, %v8369_v38  ;;  %v8359_v8 = vmax.f32 %v8321_v27, 0.0 }
0x2bcd   :  { %v8323_v44 = vpop.f32.mrf.mxu0  ;;  %9858 = vmatmul.mubr.msk.bf16.gmra.mxu1 %vm1582_vm4, %v8370_v36 }
0x2bce   :  { %v8324_v46 = vadd.f32 %v10380_v35, %v8323_v44  ;;  %v8362_v34 = vmax.f32 %v8332_v18, 0.0 }
0x2bcf   :  { %v9843_v7 = vpop.f32.mrf.mxu0 }
0x2bd0   :  { %v8360_v48 = vmax.f32 %v8324_v46, 0.0  ;;  %v8372_v26 = vpack.c.bf16 %v8362_v34, %v8361_v53  ;;  %v8345_v47 = vadd.f32 %v10380_v35, %v9843_v7 }
0x2bd1   :  { %v8336_v19 = vpop.f32.mrf.mxu0 }
0x2bd2   :  { %v8371_v13 = vpack.c.bf16 %v8360_v48, %v8359_v8  ;;  %v8337_v61 = vadd.f32 %v10380_v35, %v8336_v19  ;;  %v8365_v1 = vmax.f32 %v8345_v47, 0.0 }
0x2bd3   :  { %v9844_v15 = vpop.f32.mrf.mxu0 }
0x2bd4   :  { %v8348_v9 = vadd.f32 %v10380_v35, %v9844_v15  ;;  %9861 = vmatprep.mubr.msk.bf16.mxu1 %vm1582_vm4, %v8371_v13  ;;  %v8363_v25 = vmax.f32 %v8337_v61, 0.0 }
0x2bd5   :  { %v8339_v40 = vpop.f32.mrf.mxu0  ;;  %9862 = vmatmul.mubr.msk.bf16.gmra.mxu1 %vm1582_vm4, %v8372_v26 }
0x2bd6   :  { %v8340_v17 = vadd.f32 %v10380_v35, %v8339_v40  ;;  %v8366_v42 = vmax.f32 %v8348_v9, 0.0 }
0x2bd8   :  { %v8364_v31 = vmax.f32 %v8340_v17, 0.0  ;;  %v8374_v2 = vpack.c.bf16 %v8366_v42, %v8365_v1 }
0x2bda   :  { %v8373_v45 = vpack.c.bf16 %v8364_v31, %v8363_v25 }
0x2bdc   :  { %9865 = vmatprep.mubr.msk.bf16.mxu1 %vm1582_vm4, %v8373_v45 }
0x2bdd   :  { %9866 = vmatmul.mubr.msk.bf16.gmra.mxu1 %vm1582_vm4, %v8374_v2 }
0x2c85   :  { %v9855_v32 = vpop.f32.mrf.mxu1 }
0x2c86   :  { %v8442_v30 = vadd.f32 %v14547_v59, %v9855_v32 }
0x2c87   :  { %v8433_v29 = vpop.f32.mrf.mxu1 }
0x2c88   :  { %v14551_v35 = vadd.f32 %v8442_v30, %v14447_v41  ;;  %v8434_v37 = vadd.f32 %v14547_v59, %v8433_v29 }
0x2c89   :  { %v9856_v22 = vpop.f32.mrf.mxu1 }
0x2c8a   :  { %v14555_v62 = vadd.f32 %v8434_v37, %v14437_v52  ;;  %v8445_v16 = vadd.f32 %v14547_v59, %v9856_v22  ;;  %v8518_v23 = vsel %vm221_vm1, %v14551_v35, 0.0 }
0x2c8b   :  { %8519 = vadd.xlane.f32.xlu1 %v8518_v23  ;;  %v8436_v4 = vpop.f32.mrf.mxu1 }
0x2c8c   :  { %v14561_v28 = vadd.f32 %v8445_v16, %v14450_v11  ;;  %v8437_v21 = vadd.f32 %v14547_v59, %v8436_v4  ;;  %v8512_v55 = vsel %vm221_vm1, %v14555_v62, 0.0 }
0x2c8d   :  { %v9859_v41 = vpop.f32.mrf.mxu1 }
0x2c8e   :  { %v14565_v58 = vadd.f32 %v8437_v21, %v14440_v6  ;;  %v8458_v20 = vadd.f32 %v14547_v59, %v9859_v41  ;;  %v8521_v52 = vsel %vm221_vm1, %v14561_v28, 0.0 }
0x2c8f   :  { %8522 = vadd.xlane.f32.xlu0 %v8521_v52  ;;  %8513 = vadd.xlane.f32.xlu1 %v8512_v55  ;;  %v8449_v12 = vpop.f32.mrf.mxu1 }
0x2c90   :  { %v14573_v11 = vadd.f32 %v8458_v20, %v14476_v63  ;;  %v8450_v51 = vadd.f32 %v14547_v59, %v8449_v12  ;;  %v8515_v38 = vsel %vm221_vm1, %v14565_v58, 0.0 }
0x2c91   :  { %v9860_v54 = vpop.f32.mrf.mxu1 }
0x2c92   :  { %v14577_v6 = vadd.f32 %v8450_v51, %v14463_v33  ;;  %v8461_v57 = vadd.f32 %v14547_v59, %v9860_v54  ;;  %v8530_v36 = vsel %vm221_vm1, %v14573_v11, 0.0 }
0x2c93   :  { %8516 = vadd.xlane.f32.xlu0 %v8515_v38  ;;  %8531 = vadd.xlane.f32.xlu1 %v8530_v36  ;;  %v8452_v43 = vpop.f32.mrf.mxu1 }
0x2c94   :  { %v14585_v63 = vadd.f32 %v8461_v57, %v14479_v50  ;;  %v8453_v27 = vadd.f32 %v14547_v59, %v8452_v43  ;;  %v8524_v46 = vsel %vm221_vm1, %v14577_v6, 0.0 }
0x2c95   :  { %v9863_v18 = vpop.f32.mrf.mxu1 }
0x2c96   :  { %v14589_v33 = vadd.f32 %v8453_v27, %v14466_v5  ;;  %v8474_v10 = vadd.f32 %v14547_v59, %v9863_v18  ;;  %v8533_v44 = vsel %vm221_vm1, %v14585_v63, 0.0 }
0x2c97   :  { %8534 = vadd.xlane.f32.xlu0 %v8533_v44  ;;  %8525 = vadd.xlane.f32.xlu1 %v8524_v46  ;;  %v8465_v34 = vpop.f32.mrf.mxu1 }
0x2c98   :  { %v14597_v50 = vadd.f32 %v8474_v10, %v14501_v3  ;;  %v8466_v7 = vadd.f32 %v14547_v59, %v8465_v34  ;;  %v8527_v53 = vsel %vm221_vm1, %v14589_v33, 0.0 }
0x2c99   :  { %v9864_v8 = vpop.f32.mrf.mxu1 }
0x2c9a   :  { %v14601_v5 = vadd.f32 %v8466_v7, %v14486_v56  ;;  %v8477_v48 = vadd.f32 %v14547_v59, %v9864_v8  ;;  %v8542_v19 = vsel %vm221_vm1, %v14597_v50, 0.0 }
0x2c9b   :  { %8528 = vadd.xlane.f32.xlu0 %v8527_v53  ;;  %8543 = vadd.xlane.f32.xlu1 %v8542_v19  ;;  %v8468_v13 = vpop.f32.mrf.mxu1 }
0x2c9c   :  { %v14609_v3 = vadd.f32 %v8477_v48, %v14504_v24  ;;  %v8469_v26 = vadd.f32 %v14547_v59, %v8468_v13  ;;  %v8536_v9 = vsel %vm221_vm1, %v14601_v5, 0.0 }
0x2c9d   :  { %v9867_v15 = vpop.f32.mrf.mxu1 }
0x2c9e   :  { %v14613_v56 = vadd.f32 %v8469_v26, %v14491_v39  ;;  %v8545_v61 = vsel %vm221_vm1, %v14609_v3, 0.0  ;;  %v8490_v40 = vadd.f32 %v14547_v59, %v9867_v15 }
0x2c9f   :  { %8546 = vadd.xlane.f32.xlu0 %v8545_v61  ;;  %8537 = vadd.xlane.f32.xlu1 %v8536_v9  ;;  %v8481_v47 = vpop.f32.mrf.mxu1 }
0x2ca0   :  { %v8482_v24 = vadd.f32 %v14547_v59, %v8481_v47  ;;  %v8539_v39 = vsel %vm221_vm1, %v14613_v56, 0.0  ;;  %v14627_v31 = vadd.f32 %v8490_v40, %v14524_v0 }
0x2ca1   :  { %v9868_v17 = vpop.f32.mrf.mxu1 }
0x2ca2   :  { %v14622_v42 = vadd.f32 %v8482_v24, %v14515_v60  ;;  %v8493_v1 = vadd.f32 %v14547_v59, %v9868_v17  ;;  %v8554_v0 = vsel %vm221_vm1, %v14627_v31, 0.0 }
0x2ca3   :  { %8540 = vadd.xlane.f32.xlu0 %v8539_v39  ;;  %v8484_v25 = vpop.f32.mrf.mxu1 }
0x2ca4   :  { %v8485_v45 = vadd.f32 %v14547_v59, %v8484_v25  ;;  %v8548_v2 = vsel %vm221_vm1, %v14622_v42, 0.0  ;;  %v14637_v60 = vadd.f32 %v8493_v1, %v14527_v49 }
0x2ca5   :  { %8549 = vadd.xlane.f32.xlu1 %v8548_v2 }
0x2ca6   :  { %v14634_v32 = vadd.f32 %v8485_v45, %v14518_v14  ;;  %v8557_v59 = vsel %vm221_vm1, %v14637_v60, 0.0 }
0x2ca8   :  { %v8551_v30 = vsel %vm221_vm1, %v14634_v32, 0.0 }
0x2ca9   :  { %8552 = vadd.xlane.f32.xlu0 %v8551_v30  ;;  %8555 = vadd.xlane.f32.xlu1 %v8554_v0 }
0x2cad   :  { %8558 = vadd.xlane.f32.xlu0 %v8557_v59 }
0x2d14   :  { %v8520_v29 = vpop.xlane.xlu1 %8519 }
0x2d15   :  { %v8562_v37 = vmul.f32 0.03125, %v8520_v29 }
0x2d17   :  { %v14646_v14 = vsub.f32 %v14551_v35, %v8562_v37 }
0x2d18   :  { %v8514_v22 = vpop.xlane.xlu1 %8513  ;;  %v8523_v49 = vpop.xlane.xlu0 %8522 }
0x2d19   :  { %v8560_v16 = vmul.f32 0.03125, %v8514_v22  ;;  %v8563_v23 = vmul.f32 0.03125, %v8523_v49  ;;  %v8594_v4 = vmul.f32 %v14646_v14, %v14646_v14 }
0x2d1b   :  { %v14651_v21 = vsub.f32 %v14555_v62, %v8560_v16  ;;  %v14654_v41 = vsub.f32 %v14561_v28, %v8563_v23  ;;  %v8614_v20 = vsel %vm221_vm1, %v8594_v4, 0.0 }
0x2d1c   :  { %v8532_v52 = vpop.xlane.xlu1 %8531  ;;  %8615 = vadd.xlane.f32.xlu1 %v8614_v20  ;;  %v8517_v55 = vpop.xlane.xlu0 %8516 }
0x2d1d   :  { %v8566_v35 = vmul.f32 0.03125, %v8532_v52  ;;  %v8561_v12 = vmul.f32 0.03125, %v8517_v55  ;;  %v8592_v51 = vmul.f32 %v14651_v21, %v14651_v21  ;;  %v8595_v54 = vmul.f32 %v14654_v41, %v14654_v41 }
0x2d1f   :  { %v14662_v57 = vsub.f32 %v14573_v11, %v8566_v35  ;;  %v14665_v62 = vsub.f32 %v14565_v58, %v8561_v12  ;;  %v8608_v28 = vsel %vm221_vm1, %v8592_v51, 0.0  ;;  %v8617_v38 = vsel %vm221_vm1, %v8595_v54, 0.0 }
0x2d20   :  { %v8526_v36 = vpop.xlane.xlu1 %8525  ;;  %8609 = vadd.xlane.f32.xlu1 %v8608_v28  ;;  %8618 = vadd.xlane.f32.xlu0 %v8617_v38  ;;  %v8535_v43 = vpop.xlane.xlu0 %8534 }
0x2d21   :  { %v8564_v27 = vmul.f32 0.03125, %v8526_v36  ;;  %v8567_v18 = vmul.f32 0.03125, %v8535_v43  ;;  %v8598_v10 = vmul.f32 %v14662_v57, %v14662_v57  ;;  %v8593_v11 = vmul.f32 %v14665_v62, %v14665_v62 }
0x2d23   :  { %v14674_v44 = vsub.f32 %v14577_v6, %v8564_v27  ;;  %v14677_v58 = vsub.f32 %v14585_v63, %v8567_v18  ;;  %v8626_v46 = vsel %vm221_vm1, %v8598_v10, 0.0  ;;  %v8611_v34 = vsel %vm221_vm1, %v8593_v11, 0.0 }
0x2d24   :  { %v8544_v7 = vpop.xlane.xlu1 %8543  ;;  %8627 = vadd.xlane.f32.xlu1 %v8626_v46  ;;  %8612 = vadd.xlane.f32.xlu0 %v8611_v34  ;;  %v8529_v8 = vpop.xlane.xlu0 %8528 }
0x2d25   :  { %v8570_v48 = vmul.f32 0.03125, %v8544_v7  ;;  %v8565_v53 = vmul.f32 0.03125, %v8529_v8  ;;  %v8596_v19 = vmul.f32 %v14674_v44, %v14674_v44  ;;  %v8599_v6 = vmul.f32 %v14677_v58, %v14677_v58 }
0x2d27   :  { %v14686_v13 = vsub.f32 %v14597_v50, %v8570_v48  ;;  %v14689_v63 = vsub.f32 %v14589_v33, %v8565_v53  ;;  %v8620_v26 = vsel %vm221_vm1, %v8596_v19, 0.0  ;;  %v8629_v15 = vsel %vm221_vm1, %v8599_v6, 0.0 }
0x2d28   :  { %v8538_v61 = vpop.xlane.xlu1 %8537  ;;  %8621 = vadd.xlane.f32.xlu1 %v8620_v26  ;;  %8630 = vadd.xlane.f32.xlu0 %v8629_v15  ;;  %v8547_v9 = vpop.xlane.xlu0 %8546 }
0x2d29   :  { %v8568_v47 = vmul.f32 0.03125, %v8538_v61  ;;  %v8571_v40 = vmul.f32 0.03125, %v8547_v9  ;;  %v8602_v24 = vmul.f32 %v14686_v13, %v14686_v13  ;;  %v8597_v50 = vmul.f32 %v14689_v63, %v14689_v63 }
0x2d2b   :  { %v14698_v17 = vsub.f32 %v14601_v5, %v8568_v47  ;;  %v14701_v33 = vsub.f32 %v14609_v3, %v8571_v40  ;;  %v8638_v39 = vsel %vm221_vm1, %v8602_v24, 0.0  ;;  %v8623_v25 = vsel %vm221_vm1, %v8597_v50, 0.0 }
0x2d2c   :  { %8639 = vadd.xlane.f32.xlu1 %v8638_v39  ;;  %8624 = vadd.xlane.f32.xlu0 %v8623_v25  ;;  %v8541_v1 = vpop.xlane.xlu0 %8540 }
0x2d2d   :  { %v8569_v45 = vmul.f32 0.03125, %v8541_v1  ;;  %v8600_v2 = vmul.f32 %v14698_v17, %v14698_v17  ;;  %v8603_v30 = vmul.f32 %v14701_v33, %v14701_v33 }
0x2d2e   :  { %v8550_v0 = vpop.xlane.xlu1 %8549 }
0x2d2f   :  { %v14710_v5 = vsub.f32 %v14613_v56, %v8569_v45  ;;  %v8572_v3 = vmul.f32 0.03125, %v8550_v0  ;;  %v8632_v59 = vsel %vm221_vm1, %v8600_v2, 0.0  ;;  %v8641_v29 = vsel %vm221_vm1, %v8603_v30, 0.0 }
0x2d30   :  { %8633 = vadd.xlane.f32.xlu1 %v8632_v59  ;;  %8642 = vadd.xlane.f32.xlu0 %v8641_v29 }
0x2d31   :  { %v14715_v37 = vsub.f32 %v14622_v42, %v8572_v3  ;;  %v8601_v22 = vmul.f32 %v14710_v5, %v14710_v5 }
0x2d32   :  { %v8556_v49 = vpop.xlane.xlu1 %8555  ;;  %v8553_v16 = vpop.xlane.xlu0 %8552 }
0x2d33   :  { %v8574_v23 = vmul.f32 0.03125, %v8556_v49  ;;  %v8573_v4 = vmul.f32 0.03125, %v8553_v16  ;;  %v8635_v56 = vsel %vm221_vm1, %v8601_v22, 0.0  ;;  %v8604_v20 = vmul.f32 %v14715_v37, %v14715_v37 }
0x2d34   :  { %8636 = vadd.xlane.f32.xlu0 %v8635_v56 }
0x2d35   :  { %v14723_v52 = vsub.f32 %v14627_v31, %v8574_v23  ;;  %v14726_v55 = vsub.f32 %v14634_v32, %v8573_v4  ;;  %v8644_v42 = vsel %vm221_vm1, %v8604_v20, 0.0 }
0x2d36   :  { %8645 = vadd.xlane.f32.xlu1 %v8644_v42  ;;  %v8559_v35 = vpop.xlane.xlu0 %8558 }
0x2d37   :  { %v8575_v12 = vmul.f32 0.03125, %v8559_v35  ;;  %v8606_v51 = vmul.f32 %v14723_v52, %v14723_v52  ;;  %v8605_v54 = vmul.f32 %v14726_v55, %v14726_v55 }
0x2d39   :  { %v14734_v28 = vsub.f32 %v14637_v60, %v8575_v12  ;;  %v8650_v31 = vsel %vm221_vm1, %v8606_v51, 0.0  ;;  %v8647_v38 = vsel %vm221_vm1, %v8605_v54, 0.0 }
0x2d3a   :  { %8651 = vadd.xlane.f32.xlu1 %v8650_v31  ;;  %8648 = vadd.xlane.f32.xlu0 %v8647_v38 }
0x2d3b   :  { %v8607_v32 = vmul.f32 %v14734_v28, %v14734_v28 }
0x2d3d   :  { %v8653_v36 = vsel %vm221_vm1, %v8607_v32, 0.0 }
0x2d3e   :  { %8654 = vadd.xlane.f32.xlu0 %v8653_v36 }
0x2d3f   :  { %10455 = shalt.err (!%p10452_p5)
}
0x2d40   :  { %8781 = dma.vmem_to_hbm [thread:$0]  %s8776_s29, 256, %s14875_s6, [#allocation4], %s10474_s11, %s10474_s11, %s10475_s12  }
0x2d41   :  { %v14751_v29 = vld [vmem:[%s14874_s5 + $0x13] ss:$0 sm:$0xff] }
0x2da5   :  { %v8616_v60 = vpop.xlane.xlu1 %8615 }
0x2da6   :  { %v8658_v43 = vmul.f32 0.03125, %v8616_v60 }
0x2da8   :  { %v8674_v27 = vadd.f32 1e-05, %v8658_v43 }
0x2da9   :  { %v8610_v18 = vpop.xlane.xlu1 %8609  ;;  %v8619_v10 = vpop.xlane.xlu0 %8618 }
0x2daa   :  { %10224 = vrsqrt.f32 %v8674_v27  ;;  %v8656_v11 = vmul.f32 0.03125, %v8610_v18  ;;  %v8659_v46 = vmul.f32 0.03125, %v8619_v10 }
0x2dac   :  { %v8672_v34 = vadd.f32 1e-05, %v8656_v11  ;;  %v8675_v7 = vadd.f32 1e-05, %v8659_v46 }
0x2dad   :  { %v8628_v8 = vpop.xlane.xlu1 %8627  ;;  %v8613_v48 = vpop.xlane.xlu0 %8612 }
0x2dae   :  { %10226 = vrsqrt.f32 %v8672_v34  ;;  %v8662_v53 = vmul.f32 0.03125, %v8628_v8  ;;  %v8657_v19 = vmul.f32 0.03125, %v8613_v48 }
0x2daf   :  { %10228 = vrsqrt.f32 %v8675_v7 }
0x2db0   :  { %v8678_v6 = vadd.f32 1e-05, %v8662_v53  ;;  %v8673_v26 = vadd.f32 1e-05, %v8657_v19 }
0x2db1   :  { %v8622_v15 = vpop.xlane.xlu1 %8621  ;;  %v8631_v61 = vpop.xlane.xlu0 %8630 }
0x2db2   :  { %10230 = vrsqrt.f32 %v8678_v6  ;;  %v8660_v9 = vmul.f32 0.03125, %v8622_v15  ;;  %v8663_v47 = vmul.f32 0.03125, %v8631_v61 }
0x2db3   :  { %10232 = vrsqrt.f32 %v8673_v26 }
0x2db4   :  { %v8676_v40 = vadd.f32 1e-05, %v8660_v9  ;;  %v8679_v24 = vadd.f32 1e-05, %v8663_v47 }
0x2db5   :  { %v8640_v50 = vpop.xlane.xlu1 %8639  ;;  %v8625_v39 = vpop.xlane.xlu0 %8624 }
0x2db6   :  { %10234 = vrsqrt.f32 %v8676_v40  ;;  %v8666_v25 = vmul.f32 0.03125, %v8640_v50  ;;  %v8661_v1 = vmul.f32 0.03125, %v8625_v39 }
0x2db7   :  { %v10225_v45 = vpop.eup %10224  ;;  %10236 = vrsqrt.f32 %v8679_v24 }
0x2db8   :  { %v8706_v2 = vmul.f32 %v10225_v45, %v14646_v14  ;;  %v8682_v30 = vadd.f32 1e-05, %v8666_v25  ;;  %v8677_v0 = vadd.f32 1e-05, %v8661_v1  ;;  %v14757_v14 = vld [vmem:[%s14874_s5 + $0x14] ss:$0 sm:$0xff] }
0x2db9   :  { %v8634_v3 = vpop.xlane.xlu1 %8633  ;;  %v8643_v59 = vpop.xlane.xlu0 %8642 }
0x2dba   :  { %v8722_v22 = vmul.f32 %v14751_v29, %v8706_v2  ;;  %10238 = vrsqrt.f32 %v8682_v30  ;;  %v8664_v49 = vmul.f32 0.03125, %v8634_v3  ;;  %v8667_v16 = vmul.f32 0.03125, %v8643_v59 }
0x2dbb   :  { %v10227_v23 = vpop.eup %10226  ;;  %10240 = vrsqrt.f32 %v8677_v0 }
0x2dbc   :  { %v10229_v4 = vpop.eup %10228  ;;  %v8738_v56 = vadd.f32 %v14757_v14, %v8722_v22  ;;  %v8704_v20 = vmul.f32 %v10227_v23, %v14651_v21  ;;  %v8680_v42 = vadd.f32 1e-05, %v8664_v49  ;;  %v8683_v35 = vadd.f32 1e-05, %v8667_v16 }
0x2dbd   :  { %v8707_v12 = vmul.f32 %v10229_v4, %v14654_v41  ;;  %v8637_v51 = vpop.xlane.xlu0 %8636 }
0x2dbe   :  { %8756 = vst.msk [vmem:[%s14876_s7 + $0x10] sm:$0xff] %vm221_vm1, %v8738_v56  ;;  %v8720_v54 = vmul.f32 %v14751_v29, %v8704_v20  ;;  %10242 = vrsqrt.f32 %v8680_v42  ;;  %v8665_v31 = vmul.f32 0.03125, %v8637_v51 }
0x2dbf   :  { %v10231_v38 = vpop.eup %10230  ;;  %v8723_v32 = vmul.f32 %v14751_v29, %v8707_v12  ;;  %10244 = vrsqrt.f32 %v8683_v35  ;;  %v8646_v36 = vpop.xlane.xlu1 %8645 }
0x2dc0   :  { %v10233_v21 = vpop.eup %10232  ;;  %v8736_v60 = vadd.f32 %v14757_v14, %v8720_v54  ;;  %v8710_v41 = vmul.f32 %v10231_v38, %v14662_v57  ;;  %v8681_v43 = vadd.f32 1e-05, %v8665_v31  ;;  %v8668_v27 = vmul.f32 0.03125, %v8646_v36 }
0x2dc1   :  { %v8739_v18 = vadd.f32 %v14757_v14, %v8723_v32  ;;  %v8705_v10 = vmul.f32 %v10233_v21, %v14665_v62 }
0x2dc2   :  { %8754 = vst.msk [vmem:[%s14876_s7] sm:$0xff] %vm221_vm1, %v8736_v60  ;;  %v8726_v11 = vmul.f32 %v14751_v29, %v8710_v41  ;;  %10246 = vrsqrt.f32 %v8681_v43  ;;  %v8684_v46 = vadd.f32 1e-05, %v8668_v27 }
0x2dc3   :  { %v10235_v34 = vpop.eup %10234  ;;  %8757 = vst.msk [vmem:[%s14876_s7 + $0x18] sm:$0xff] %vm221_vm1, %v8739_v18  ;;  %v8721_v57 = vmul.f32 %v14751_v29, %v8705_v10  ;;  %v8652_v7 = vpop.xlane.xlu1 %8651 }
0x2dc4   :  { %v8649_v8 = vpop.xlane.xlu0 %8648  ;;  %v10237_v62 = vpop.eup %10236  ;;  %v8742_v48 = vadd.f32 %v14757_v14, %v8726_v11  ;;  %v8708_v53 = vmul.f32 %v10235_v34, %v14674_v44  ;;  %10248 = vrsqrt.f32 %v8684_v46  ;;  %v8670_v19 = vmul.f32 0.03125, %v8652_v7 }
0x2dc5   :  { %v8737_v6 = vadd.f32 %v14757_v14, %v8721_v57  ;;  %v8711_v26 = vmul.f32 %v10237_v62, %v14677_v58  ;;  %v8669_v15 = vmul.f32 0.03125, %v8649_v8 }
0x2dc6   :  { %8760 = vst.msk [vmem:[%s14876_s7 + $0x30] sm:$0xff] %vm221_vm1, %v8742_v48  ;;  %v8724_v61 = vmul.f32 %v14751_v29, %v8708_v53  ;;  %v8686_v9 = vadd.f32 1e-05, %v8670_v19 }
0x2dc7   :  { %v10239_v47 = vpop.eup %10238  ;;  %8755 = vst.msk [vmem:[%s14876_s7 + $0x8] sm:$0xff] %vm221_vm1, %v8737_v6  ;;  %v8727_v44 = vmul.f32 %v14751_v29, %v8711_v26  ;;  %v8685_v40 = vadd.f32 1e-05, %v8669_v15 }
0x2dc8   :  { %v8655_v24 = vpop.xlane.xlu0 %8654  ;;  %v10241_v58 = vpop.eup %10240  ;;  %v8740_v50 = vadd.f32 %v14757_v14, %v8724_v61  ;;  %v8714_v39 = vmul.f32 %v10239_v47, %v14686_v13  ;;  %10250 = vrsqrt.f32 %v8686_v9 }
0x2dc9   :  { %v8671_v25 = vmul.f32 0.03125, %v8655_v24  ;;  %v8743_v1 = vadd.f32 %v14757_v14, %v8727_v44  ;;  %v8709_v45 = vmul.f32 %v10241_v58, %v14689_v63  ;;  %10252 = vrsqrt.f32 %v8685_v40 }
0x2dca   :  { %8758 = vst.msk [vmem:[%s14876_s7 + $0x20] sm:$0xff] %vm221_vm1, %v8740_v50  ;;  %v8730_v2 = vmul.f32 %v14751_v29, %v8714_v39 }
0x2dcb   :  { %v8687_v30 = vadd.f32 1e-05, %v8671_v25  ;;  %v10243_v0 = vpop.eup %10242  ;;  %8761 = vst.msk [vmem:[%s14876_s7 + $0x38] sm:$0xff] %vm221_vm1, %v8743_v1  ;;  %v8725_v13 = vmul.f32 %v14751_v29, %v8709_v45 }
0x2dcc   :  { %v10245_v3 = vpop.eup %10244  ;;  %v8746_v63 = vadd.f32 %v14757_v14, %v8730_v2  ;;  %v8712_v59 = vmul.f32 %v10243_v0, %v14698_v17 }
0x2dcd   :  { %10254 = vrsqrt.f32 %v8687_v30  ;;  %v8741_v22 = vadd.f32 %v14757_v14, %v8725_v13  ;;  %v8715_v49 = vmul.f32 %v10245_v3, %v14701_v33 }
0x2dce   :  { %8764 = vst.msk [vmem:[%s14876_s7 + $0x50] sm:$0xff] %vm221_vm1, %v8746_v63  ;;  %v8728_v16 = vmul.f32 %v14751_v29, %v8712_v59 }
0x2dcf   :  { %v10247_v23 = vpop.eup %10246  ;;  %8759 = vst.msk [vmem:[%s14876_s7 + $0x28] sm:$0xff] %vm221_vm1, %v8741_v22  ;;  %v8731_v17 = vmul.f32 %v14751_v29, %v8715_v49 }
0x2dd0   :  { %v8744_v4 = vadd.f32 %v14757_v14, %v8728_v16  ;;  %v8713_v56 = vmul.f32 %v10247_v23, %v14710_v5 }
0x2dd1   :  { %v10249_v33 = vpop.eup %10248  ;;  %v8747_v20 = vadd.f32 %v14757_v14, %v8731_v17 }
0x2dd2   :  { %8762 = vst.msk [vmem:[%s14876_s7 + $0x40] sm:$0xff] %vm221_vm1, %v8744_v4  ;;  %v8729_v42 = vmul.f32 %v14751_v29, %v8713_v56  ;;  %v8716_v35 = vmul.f32 %v10249_v33, %v14715_v37 }
0x2dd3   :  { %8765 = vst.msk [vmem:[%s14876_s7 + $0x58] sm:$0xff] %vm221_vm1, %v8747_v20 }
0x2dd4   :  { %v8745_v12 = vadd.f32 %v14757_v14, %v8729_v42  ;;  %v8732_v5 = vmul.f32 %v14751_v29, %v8716_v35 }
0x2dd5   :  { %v10251_v51 = vpop.eup %10250 }
0x2dd6   :  { %v10253_v54 = vpop.eup %10252  ;;  %8763 = vst.msk [vmem:[%s14876_s7 + $0x48] sm:$0xff] %vm221_vm1, %v8745_v12  ;;  %v8748_v31 = vadd.f32 %v14757_v14, %v8732_v5  ;;  %v8718_v37 = vmul.f32 %v10251_v51, %v14723_v52 }
0x2dd7   :  { %v8717_v38 = vmul.f32 %v10253_v54, %v14726_v55 }
0x2dd8   :  { %8766 = vst.msk [vmem:[%s14876_s7 + $0x60] sm:$0xff] %vm221_vm1, %v8748_v31  ;;  %v8734_v32 = vmul.f32 %v14751_v29, %v8718_v37 }
0x2dd9   :  { %v8733_v21 = vmul.f32 %v14751_v29, %v8717_v38 }
0x2dda   :  { %v10255_v36 = vpop.eup %10254  ;;  %v8750_v60 = vadd.f32 %v14757_v14, %v8734_v32 }
0x2ddb   :  { %v8719_v41 = vmul.f32 %v10255_v36, %v14734_v28  ;;  %v8749_v43 = vadd.f32 %v14757_v14, %v8733_v21 }
0x2ddc   :  { %8768 = vst.msk [vmem:[%s14876_s7 + $0x70] sm:$0xff] %vm221_vm1, %v8750_v60 }
0x2ddd   :  { %v8735_v52 = vmul.f32 %v14751_v29, %v8719_v41  ;;  %8767 = vst.msk [vmem:[%s14876_s7 + $0x68] sm:$0xff] %vm221_vm1, %v8749_v43 }
0x2ddf   :  { %v8751_v55 = vadd.f32 %v14757_v14, %v8735_v52 }
0x2de1   :  { %8769 = vst.msk [vmem:[%s14876_s7 + $0x78] sm:$0xff] %vm221_vm1, %v8751_v55 }
0x2de2   :  { %10468 = dma.done.wait [#allocation4], 256  }
0x2de3   :  { %10469 = vsyncadd [#allocation4], 4294967040 }
0x2de4   :  { %8789 = vsyncpa [#allocation3], 1 }
0x2de5   :  { %8790 = vsyncpa [#allocation6], 1 }
0x2de6   :  { %8791 = vsyncpa [#allocation4], 1 }

</bundles_post_ra>
